<compile_context>
chip_gen: v7x
topology: tpu7x:2x2x1
jax: 0.10.0
libtpu: 0.0.40
codegen_flags: <defaults>
</compile_context>

<pallas_src>
import functools
import math

import jax
import jax.numpy as jnp
from jax.experimental import pallas as pl
from jax.experimental.pallas import tpu as pltpu


def _marginal_loss_kernel(x_ref, labels_ref, seg_ref, out_ref):
    # x_ref:      (R, 128*D) VMEM  lane-dense capsule data (128 capsules / row)
    # labels_ref: (R, 128)   VMEM  one-hot labels, capsule-aligned with x rows
    # seg_ref:    (128*D, 128) VMEM  constant 0/1 segment matrix (resident)
    # out_ref:    (1, 1)     VMEM  resident accumulator across grid axis 1
    i = pl.program_id(1)

    @pl.when(i == 0)
    def _():
        out_ref[...] = jnp.zeros_like(out_ref)

    x = x_ref[...].astype(jnp.float32)            # (R, 128*D), fully packed vregs
    xsq = x * x                                   # VPU

    # Segmented per-capsule sum of squares on the MXU -> capsule-dense (R, 128).
    ssq = jnp.dot(xsq, seg_ref[...],
                  preferred_element_type=jnp.float32,
                  precision=jax.lax.Precision.HIGHEST)
    v_c = jnp.sqrt(ssq)                           # EUP

    labels = labels_ref[...].astype(jnp.float32)  # (R, 128), aligned with v_c
    left = jnp.maximum(0.9 - v_c, 0.0)
    right = jnp.maximum(v_c - 0.1, 0.0)
    half_right = 0.5 * right
    margin = half_right + labels * (left - half_right)

    # Fused full reduction for this tile -> (1, 1), accumulated in place.
    out_ref[...] += jnp.sum(margin, keepdims=True)


def _round_up(n: int, m: int) -> int:
    return ((n + m - 1) // m) * m


@functools.partial(jax.jit, static_argnames=("tile_b", "num_partials"))
def marginal_loss(x: jax.Array, labels: jax.Array, *, tile_b: int = 8192,
                  num_partials: int = 1) -> jax.Array:
    """Pallas-backed marginal loss. x: (B, C, D), labels: (B, C) one-hot."""
    B, C, D = x.shape
    assert labels.shape == (B, C)
    assert 128 % D == 0, "capsule dim must divide 128 for the lane-dense fold"

    lanes = 128 * D                       # one folded x row holds 128 capsules

    # Per-tile capsule count must be a multiple of 128*8 so the folded blocks
    # (rows, 128*D) / (rows, 128) keep (8, 128)-aligned shapes.
    tb_align = (128 * 8) // math.gcd(C, 128 * 8)
    tb = min(tile_b, _round_up(B, tb_align))
    tb = max(tb_align, (tb // tb_align) * tb_align)

    n_tiles = pl.cdiv(B, tb)
    parts = max(1, min(num_partials, n_tiles))   # >1 only pays off on v7x (2 TCs)
    n_tiles = _round_up(n_tiles, parts)
    tiles_per_partial = n_tiles // parts
    b_padded = n_tiles * tb

    if b_padded != B:
        # Zero rows contribute exactly 0 margin (labels=0, relu(0-0.1)=0).
        x = jnp.pad(x, ((0, b_padded - B), (0, 0), (0, 0)))
        labels = jnp.pad(labels, ((0, b_padded - B), (0, 0)))

    caps = b_padded * C                   # total capsules, multiple of 128
    x2 = x.reshape(caps // 128, lanes)    # free row-major reshape, lane-dense
    l2 = labels.reshape(caps // 128, 128)  # free row-major reshape, lane-dense

    # Constant 0/1 segment matrix: seg[l, j] = 1 iff lane l belongs to capsule j.
    seg = (jnp.arange(lanes, dtype=jnp.int32)[:, None] // D
           == jnp.arange(128, dtype=jnp.int32)[None, :]).astype(jnp.float32)

    rows_per_tile = (tb * C) // 128       # multiple of 8 by construction

    partials = pl.pallas_call(
        _marginal_loss_kernel,
        out_shape=jax.ShapeDtypeStruct((parts, 1), jnp.float32),
        grid=(parts, tiles_per_partial),
        in_specs=[
            pl.BlockSpec((rows_per_tile, lanes),
                         lambda p, i: (p * tiles_per_partial + i, 0)),
            pl.BlockSpec((rows_per_tile, 128),
                         lambda p, i: (p * tiles_per_partial + i, 0)),
            # Constant block index -> fetched once, stays resident in VMEM.
            pl.BlockSpec((lanes, 128), lambda p, i: (0, 0)),
        ],
        out_specs=pl.BlockSpec((1, 1), lambda p, i: (p, 0)),
        compiler_params=pltpu.CompilerParams(
            dimension_semantics=("parallel", "arbitrary"),
            vmem_limit_bytes=32 * 1024 * 1024),
    )(x2, l2, seg)

    # Combine per-partial sums and take the mean over the ORIGINAL batch size.
    return jnp.sum(partials) / jnp.float32(B)


def _marginal_loss_ref(x, labels):
    # Pure-JAX reference mirroring the PyTorch forward exactly.
    B = x.shape[0]
    v_c = jnp.sqrt(jnp.sum(x.astype(jnp.float32) ** 2, axis=2, keepdims=True))
    left = jax.nn.relu(0.9 - v_c).reshape(B, -1)
    right = jax.nn.relu(v_c - 0.1).reshape(B, -1)
    ml = labels * left + 0.5 * (1.0 - labels) * right
    return jnp.mean(jnp.sum(ml, axis=1))


if __name__ == "__main__":
    key = jax.random.PRNGKey(0)
    num_caps, caps_dim = 10, 16  # (num_digit_capsules, digit_capsule_dim)

    # --- small case matching the module's demo shapes -----------------------
    B = 2
    kx, kl = jax.random.split(key)
    x = jax.random.normal(kx, (B, num_caps, caps_dim), dtype=jnp.float32) * 0.5
    label_idx = jax.random.randint(kl, (B,), 0, num_caps)
    labels = jax.nn.one_hot(label_idx, num_caps, dtype=jnp.float32)

    loss = marginal_loss(x, labels)
    jax.block_until_ready(loss)
    ref = _marginal_loss_ref(x, labels)
    assert jnp.allclose(loss, ref, atol=1e-5, rtol=5e-5), (loss, ref)

    # --- larger case exercising multi-tile / padding / 2-partial paths ------
    B2 = 1000
    kx2, kl2 = jax.random.split(jax.random.PRNGKey(1))
    x2 = jax.random.normal(kx2, (B2, num_caps, caps_dim), dtype=jnp.float32) * 0.5
    labels2 = jax.nn.one_hot(
        jax.random.randint(kl2, (B2,), 0, num_caps), num_caps, dtype=jnp.float32)

    loss2 = marginal_loss(x2, labels2, tile_b=512, num_partials=2)
    jax.block_until_ready(loss2)
    ref2 = _marginal_loss_ref(x2, labels2)
    assert jnp.allclose(loss2, ref2, atol=1e-5, rtol=5e-5), (loss2, ref2)

    print("KERNEL_OK")
</pallas_src>

<mosaic_0001>
module attributes {stable_mosaic.version = 11 : i64} {
  func.func @_marginal_loss_kernel(%arg0: i32, %arg1: i32, %arg2: memref<40x2048xf32, #tpu.memory_space<vmem>>, %arg3: memref<40x128xf32, #tpu.memory_space<vmem>>, %arg4: memref<2048x128xf32, #tpu.memory_space<vmem>>, %arg5: memref<1x1xf32, #tpu.memory_space<vmem>>) attributes {dimension_semantics = [#tpu.dimension_semantics<parallel>, #tpu.dimension_semantics<arbitrary>], iteration_bounds = array<i64: 1, 1>, scalar_prefetch = 0 : i64, scratch_operands = 0 : i64, tpu.core_type = #tpu.core_type<tc>, window_params = [{transform_indices = @transform_0, window_bounds = array<i64: 40, 2048>}, {transform_indices = @transform_1, window_bounds = array<i64: 40, 128>}, {pipeline_mode = #tpu.pipeline_mode<synchronous>, transform_indices = @transform_2, window_bounds = array<i64: 2048, 128>}, {transform_indices = @transform_3, window_bounds = array<i64: 1, 1>}]} {
    %c0_i32 = arith.constant 0 : i32
    %0 = arith.cmpi eq, %arg1, %c0_i32 : i32
    %1 = arith.extui %0 : i1 to i32
    %c0_i32_0 = arith.constant 0 : i32
    %2 = arith.cmpi ne, %1, %c0_i32_0 : i32
    scf.if %2 {
      %cst_16 = arith.constant 0.000000e+00 : f32
      %30 = vector.broadcast %cst_16 : f32 to vector<1x1xf32>
      %c0_17 = arith.constant 0 : index
      %c0_18 = arith.constant 0 : index
      %31 = vector.load %arg5[%c0_17, %c0_18] : memref<1x1xf32, #tpu.memory_space<vmem>>, vector<1x1xf32>
      tpu.vector_store %arg5[%c0_17, %c0_18], %30 {strides = array<i32>} : memref<1x1xf32, #tpu.memory_space<vmem>>, vector<1x1xf32>,
    } else {
    }
    %c0 = arith.constant 0 : index
    %c0_1 = arith.constant 0 : index
    %3 = vector.load %arg2[%c0, %c0_1] : memref<40x2048xf32, #tpu.memory_space<vmem>>, vector<40x2048xf32>
    %4 = arith.mulf %3, %3 : vector<40x2048xf32>
    %c0_2 = arith.constant 0 : index
    %c0_3 = arith.constant 0 : index
    %5 = vector.load %arg4[%c0_2, %c0_3] : memref<2048x128xf32, #tpu.memory_space<vmem>>, vector<2048x128xf32>
    %cst = arith.constant dense<0.000000e+00> : vector<40x128xf32>
    %6 = tpu.matmul %4, %5, %cst {dimension_numbers = #tpu.dot_dimension_numbers<[1], [0], [0], [1], [0, 0, 1, 1], [], []>, precision = #tpu.contract_precision<fp32>} : vector<40x2048xf32>, vector<2048x128xf32>, vector<40x128xf32> -> vector<40x128xf32>
    %7 = math.sqrt %6 : vector<40x128xf32>
    %c0_4 = arith.constant 0 : index
    %c0_5 = arith.constant 0 : index
    %8 = vector.load %arg3[%c0_4, %c0_5] : memref<40x128xf32, #tpu.memory_space<vmem>>, vector<40x128xf32>
    %cst_6 = arith.constant 0.899999976 : f32
    %9 = vector.broadcast %cst_6 : f32 to vector<40x128xf32>
    %10 = arith.subf %9, %7 : vector<40x128xf32>
    %cst_7 = arith.constant 0.000000e+00 : f32
    %11 = vector.broadcast %cst_7 : f32 to vector<40x128xf32>
    %12 = arith.maximumf %10, %11 : vector<40x128xf32>
    %cst_8 = arith.constant 1.000000e-01 : f32
    %13 = vector.broadcast %cst_8 : f32 to vector<40x128xf32>
    %14 = arith.subf %7, %13 : vector<40x128xf32>
    %cst_9 = arith.constant 0.000000e+00 : f32
    %15 = vector.broadcast %cst_9 : f32 to vector<40x128xf32>
    %16 = arith.maximumf %14, %15 : vector<40x128xf32>
    %cst_10 = arith.constant 5.000000e-01 : f32
    %17 = vector.broadcast %cst_10 : f32 to vector<40x128xf32>
    %18 = arith.mulf %17, %16 : vector<40x128xf32>
    %19 = arith.subf %12, %18 : vector<40x128xf32>
    %20 = arith.mulf %8, %19 : vector<40x128xf32>
    %21 = arith.addf %18, %20 : vector<40x128xf32>
    %c0_11 = arith.constant 0 : index
    %c0_12 = arith.constant 0 : index
    %22 = vector.load %arg5[%c0_11, %c0_12] : memref<1x1xf32, #tpu.memory_space<vmem>>, vector<1x1xf32>
    %23 = vector.shape_cast %21 : vector<40x128xf32> to vector<1x40x128xf32>
    %cst_13 = arith.constant dense<0.000000e+00> : vector<1xf32>
    %24 = vector.multi_reduction <add>, %23, %cst_13 [1, 2] : vector<1x40x128xf32> to vector<1xf32>
    %25 = vector.shape_cast %24 : vector<1xf32> to vector<1x1x1xf32>
    %26 = vector.extract %25[0, 0, 0] : f32 from vector<1x1x1xf32>
    %27 = vector.broadcast %26 : f32 to vector<1x1xf32>
    %28 = arith.addf %22, %27 : vector<1x1xf32>
    %c0_14 = arith.constant 0 : index
    %c0_15 = arith.constant 0 : index
    %29 = vector.load %arg5[%c0_14, %c0_15] : memref<1x1xf32, #tpu.memory_space<vmem>>, vector<1x1xf32>
    tpu.vector_store %arg5[%c0_14, %c0_15], %28 {strides = array<i32>} : memref<1x1xf32, #tpu.memory_space<vmem>>, vector<1x1xf32>,
    return
  }
  func.func @transform_0(%arg0: i32, %arg1: i32) -> (i32, i32) {
    %c1_i32 = arith.constant 1 : i32
    %0 = arith.muli %arg0, %c1_i32 : i32
    %1 = arith.addi %0, %arg1 : i32
    %c0_i32 = arith.constant 0 : i32
    %c0_i32_0 = arith.constant 0 : i32
    return %1, %c0_i32 : i32, i32
  }
  func.func @transform_1(%arg0: i32, %arg1: i32) -> (i32, i32) {
    %c1_i32 = arith.constant 1 : i32
    %0 = arith.muli %arg0, %c1_i32 : i32
    %1 = arith.addi %0, %arg1 : i32
    %c0_i32 = arith.constant 0 : i32
    %c0_i32_0 = arith.constant 0 : i32
    return %1, %c0_i32 : i32, i32
  }
  func.func @transform_2(%arg0: i32, %arg1: i32) -> (i32, i32) {
    %c0_i32 = arith.constant 0 : i32
    %c0_i32_0 = arith.constant 0 : i32
    %c0_i32_1 = arith.constant 0 : i32
    return %c0_i32, %c0_i32_0 : i32, i32
  }
  func.func @transform_3(%arg0: i32, %arg1: i32) -> (i32, i32) {
    %c0_i32 = arith.constant 0 : i32
    %c0_i32_0 = arith.constant 0 : i32
    return %arg0, %c0_i32 : i32, i32
  }
}

</mosaic_0001>

<bundles_post_ra>
// kernel: marginal_loss.1
= control target key start
LH: loop header
LB: loop body
LE: loop exit
PB: predicated region body
PF: predicated region fallthrough
CT: control target
= control target key end

     0   :  { %s19379_s0 = inlined_call_operand.vmem [shape: f32[40,2048], index: 0, kind: input, shape index: {}]   ;;  %s19380_s1 = inlined_call_operand.vmem [shape: f32[40,128], index: 1, kind: input, shape index: {}]   ;;  %s19381_s2 = inlined_call_operand.vmem [shape: f32[2048,128], index: 2, kind: input, shape index: {}]   ;;  %s19382_s3 = inlined_call_operand.hbm [shape: f32[1,1], index: 3, kind: output, shape index: {}]  }
   0x1   :  { %v244_v0 = vld [vmem:[%s19381_s2 + $0x80] sm:$0xff]  ;;  %v245_v1 = vld [vmem:[%s19381_s2 + $0x88] sm:$0xff]  ;;  %v246_v7 = vld [vmem:[%s19381_s2 + $0x90] sm:$0xff] }
   0x2   :  { %v228_v2 = vld [vmem:[%s19381_s2] sm:$0xff]  ;;  %v533_v3 = vand.u32 4294901760, %v244_v0  ;;  %v536_v4 = vand.u32 4294901760, %v245_v1  ;;  %v229_v5 = vld [vmem:[%s19381_s2 + $0x8] sm:$0xff]  ;;  %v247_v8 = vld [vmem:[%s19381_s2 + $0x98] sm:$0xff]  ;;  %v539_v10 = vand.u32 4294901760, %v246_v7 }
   0x3   :  { %v485_v6 = vand.u32 4294901760, %v228_v2  ;;  %v488_v9 = vand.u32 4294901760, %v229_v5  ;;  %v542_v11 = vand.u32 4294901760, %v247_v8  ;;  %v230_v12 = vld [vmem:[%s19381_s2 + $0x10] sm:$0xff]  ;;  %v231_v13 = vld [vmem:[%s19381_s2 + $0x18] sm:$0xff]  ;;  %v248_v18 = vld [vmem:[%s19381_s2 + $0xa0] sm:$0xff] }
   0x4   :  { %v13177_v14 = vpack.c.bf16 %v536_v4, %v533_v3  ;;  %v491_v16 = vand.u32 4294901760, %v230_v12  ;;  %v494_v17 = vand.u32 4294901760, %v231_v13  ;;  %v249_v19 = vld [vmem:[%s19381_s2 + $0xa8] sm:$0xff]  ;;  %v232_v23 = vld [vmem:[%s19381_s2 + $0x20] sm:$0xff]  ;;  %v13200_v25 = vsub.f32 %v246_v7, %v539_v10  ;;  %v250_v37 = vld [vmem:[%s19381_s2 + $0xb0] sm:$0xff] }
   0x5   :  { %v13179_v15 = vsub.f32 %v228_v2, %v485_v6  ;;  %v13187_v20 = vpack.c.bf16 %v488_v9, %v485_v6  ;;  %v13189_v21 = vsub.f32 %v229_v5, %v488_v9  ;;  %v13191_v22 = vpack.c.bf16 %v542_v11, %v539_v10  ;;  %v233_v24 = vld [vmem:[%s19381_s2 + $0x28] sm:$0xff]  ;;  %v251_v42 = vld [vmem:[%s19381_s2 + $0xb8] sm:$0xff]  ;;  %v234_v55 = vld [vmem:[%s19381_s2 + $0x30] sm:$0xff] }
   0x6   :  { %20233 = vst [vmem:[#allocation5_spill] sm:$0xff] %v13177_v14  ;;  %11558 = vmatprep.subr.bf16.mxu0 %v13177_v14  ;;  %v13202_v26 = vsub.f32 %v247_v8, %v542_v11  ;;  %v13204_v27 = vpack.c.bf16 %v494_v17, %v491_v16  ;;  %v13206_v28 = vsub.f32 %v230_v12, %v491_v16  ;;  %v545_v29 = vand.u32 4294901760, %v248_v18  ;;  %v235_v56 = vld [vmem:[%s19381_s2 + $0x38] sm:$0xff]  ;;  %v252_v5 = vld [vmem:[%s19381_s2 + $0xc0] sm:$0xff]  ;;  %v253_v6 = vld [vmem:[%s19381_s2 + $0xc8] sm:$0xff] }
   0x7   :  { %20234 = vst [vmem:[#allocation6_spill] sm:$0xff] %v13187_v20  ;;  %20235 = vst [vmem:[#allocation7_spill] sm:$0xff] %v13191_v22  ;;  %11560 = vmatpush3.bf16.msra.mxu0 %v13187_v20  ;;  %v548_v30 = vand.u32 4294901760, %v249_v19  ;;  %v13209_v31 = vsub.f32 %v244_v0, %v533_v3  ;;  %v13211_v32 = vsub.f32 %v245_v1, %v536_v4  ;;  %v497_v33 = vand.u32 4294901760, %v232_v23  ;;  %v236_v11 = vld [vmem:[%s19381_s2 + $0x40] sm:$0xff] }
   0x8   :  { %11562 = vmatprep.subr.bf16.mxu0 %v13191_v22  ;;  %v500_v34 = vand.u32 4294901760, %v233_v24  ;;  %v19399_v35 = vand.u32 4294901760, %v13179_v15  ;;  %v19398_v36 = vand.u32 4294901760, %v13189_v21  ;;  %v13219_v38 = vsub.f32 %v231_v13, %v494_v17 }
   0x9   :  { %v13221_v39 = vpack.c.bf16 %v548_v30, %v545_v29  ;;  %v13223_v40 = vsub.f32 %v248_v18, %v545_v29  ;;  %v19404_v41 = vand.u32 4294901760, %v13209_v31  ;;  %v13229_v43 = vsub.f32 %v249_v19, %v548_v30  ;;  %v237_v29 = vld [vmem:[%s19381_s2 + $0x48] sm:$0xff] }
   0xa   :  { %v19401_v44 = vand.u32 4294901760, %v13211_v32  ;;  %v13232_v45 = vpack.c.bf16 %v500_v34, %v497_v33  ;;  %v13234_v46 = vsub.f32 %v232_v23, %v497_v33  ;;  %v660_v48 = vsub.f32 %v13179_v15, %v19399_v35 }
   0xb   :  { %11564 = vmatpush3.bf16.msra.mxu0 %v13204_v27  ;;  %v772_v47 = vsub.f32 %v13209_v31, %v19404_v41  ;;  %v667_v49 = vsub.f32 %v13189_v21, %v19398_v36  ;;  %v551_v50 = vand.u32 4294901760, %v250_v37  ;;  %v554_v52 = vand.u32 4294901760, %v251_v42 }
   0xc   :  { %11566 = vmatprep.subr.bf16.mxu0 %v13221_v39  ;;  %v779_v51 = vsub.f32 %v13211_v32, %v19401_v44  ;;  %v19396_v53 = vand.u32 4294901760, %v13200_v25  ;;  %v19395_v54 = vand.u32 4294901760, %v13202_v26  ;;  %v13258_v58 = vsub.f32 %v233_v24, %v500_v34 }
   0xd   :  { %v773_v57 = vand.u32 4294901760, %v772_v47  ;;  %v661_v59 = vand.u32 4294901760, %v660_v48  ;;  %v668_v60 = vand.u32 4294901760, %v667_v49  ;;  %v13260_v62 = vpack.c.bf16 %v554_v52, %v551_v50 }
   0xe   :  { %v780_v61 = vand.u32 4294901760, %v779_v51  ;;  %v13262_v63 = vsub.f32 %v250_v37, %v551_v50  ;;  %v786_v0 = vsub.f32 %v13200_v25, %v19396_v53  ;;  %v793_v2 = vsub.f32 %v13202_v26, %v19395_v54 }
   0xf   :  { %11568 = vmatpush3.bf16.msra.mxu0 %v13232_v45  ;;  %v11591_v1 = vpack.c.bf16 %v668_v60, %v661_v59  ;;  %v503_v3 = vand.u32 4294901760, %v234_v55  ;;  %v506_v4 = vand.u32 4294901760, %v235_v56  ;;  %v19394_v9 = vand.u32 4294901760, %v13206_v28 }
  0x10   :  { %v11589_v7 = vpack.c.bf16 %v780_v61, %v773_v57  ;;  %11570 = vmatprep.subr.bf16.mxu0 %v13260_v62  ;;  %v787_v8 = vand.u32 4294901760, %v786_v0  ;;  %v19391_v10 = vand.u32 4294901760, %v13219_v38  ;;  %v13283_v12 = vsub.f32 %v251_v42, %v554_v52  ;;  %v255_v57 = vld [vmem:[%s19381_s2 + $0xd8] sm:$0xff] }
  0x11   :  { %v794_v13 = vand.u32 4294901760, %v793_v2  ;;  %v13285_v16 = vpack.c.bf16 %v506_v4, %v503_v3  ;;  %v13287_v17 = vsub.f32 %v234_v55, %v503_v3  ;;  %v674_v18 = vsub.f32 %v13206_v28, %v19394_v9 }
  0x12   :  { %11590 = vmatprep.subr.bf16.mxu1 %v11589_v7  ;;  %v681_v19 = vsub.f32 %v13219_v38, %v19391_v10  ;;  %v557_v23 = vand.u32 4294901760, %v252_v5  ;;  %v560_v24 = vand.u32 4294901760, %v253_v6  ;;  %v19389_v33 = vand.u32 4294901760, %v13223_v40 }
  0x13   :  { %11592 = vmatpush3.bf16.msra.mxu1 %v11591_v1  ;;  %v11593_v30 = vpack.c.bf16 %v794_v13, %v787_v8  ;;  %11572 = vmatpush3.bf16.msra.mxu0 %v13285_v16  ;;  %v19388_v34 = vand.u32 4294901760, %v13229_v43  ;;  %v509_v37 = vand.u32 4294901760, %v236_v11  ;;  %v13301_v42 = vsub.f32 %v235_v56, %v506_v4  ;;  %v254_v56 = vld [vmem:[%s19381_s2 + $0xd0] sm:$0xff] }
  0x14   :  { %v675_v47 = vand.u32 4294901760, %v674_v18  ;;  %v682_v48 = vand.u32 4294901760, %v681_v19  ;;  %v13303_v49 = vpack.c.bf16 %v560_v24, %v557_v23  ;;  %v13305_v50 = vsub.f32 %v252_v5, %v557_v23  ;;  %v238_v1 = vld [vmem:[%s19381_s2 + $0x50] sm:$0xff]  ;;  %v239_v18 = vld [vmem:[%s19381_s2 + $0x58] sm:$0xff] }
  0x15   :  { %11594 = vmatprep.subr.bf16.mxu1 %v11593_v30  ;;  %v800_v51 = vsub.f32 %v13223_v40, %v19389_v33  ;;  %v807_v52 = vsub.f32 %v13229_v43, %v19388_v34  ;;  %v512_v55 = vand.u32 4294901760, %v237_v29  ;;  %v13320_v60 = vsub.f32 %v253_v6, %v560_v24 }
  0x16   :  { %v11595_v59 = vpack.c.bf16 %v682_v48, %v675_v47  ;;  %11574 = vmatprep.subr.bf16.mxu0 %v13303_v49  ;;  %v19386_v61 = vand.u32 4294901760, %v13234_v46  ;;  %v19385_v0 = vand.u32 4294901760, %v13258_v58  ;;  %v13329_v5 = vsub.f32 %v236_v11, %v509_v37 }
  0x17   :  { %v801_v2 = vand.u32 4294901760, %v800_v51  ;;  %v808_v3 = vand.u32 4294901760, %v807_v52  ;;  %v13327_v4 = vpack.c.bf16 %v512_v55, %v509_v37  ;;  %v563_v8 = vand.u32 4294901760, %v254_v56 }
  0x18   :  { %11596 = vmatpush3.bf16.msra.mxu1 %v11595_v59  ;;  %v688_v6 = vsub.f32 %v13234_v46, %v19386_v61  ;;  %v695_v7 = vsub.f32 %v13258_v58, %v19385_v0  ;;  %v566_v13 = vand.u32 4294901760, %v255_v57  ;;  %v19384_v11 = vand.u32 4294901760, %v13262_v63 }
  0x19   :  { %20236 = vst [vmem:[#allocation8_spill] sm:$0xff] %v13327_v4  ;;  %v11597_v19 = vpack.c.bf16 %v808_v3, %v801_v2  ;;  %11576 = vmatpush3.bf16.msra.mxu0 %v13327_v4  ;;  %v19383_v23 = vand.u32 4294901760, %v13283_v12  ;;  %v515_v24 = vand.u32 4294901760, %v238_v1  ;;  %v13343_v30 = vsub.f32 %v237_v29, %v512_v55  ;;  %v256_v29 = vld [vmem:[%s19381_s2 + $0xe0] sm:$0xff]  ;;  %v257_v55 = vld [vmem:[%s19381_s2 + $0xe8] sm:$0xff] }
  0x1a   :  { %v689_v37 = vand.u32 4294901760, %v688_v6  ;;  %v696_v47 = vand.u32 4294901760, %v695_v7  ;;  %v13345_v48 = vpack.c.bf16 %v566_v13, %v563_v8  ;;  %v13347_v51 = vsub.f32 %v254_v56, %v563_v8  ;;  %v240_v8 = vld [vmem:[%s19381_s2 + $0x60] sm:$0xff] }
  0x1b   :  { %11598 = vmatprep.subr.bf16.mxu1 %v11597_v19  ;;  %v814_v52 = vsub.f32 %v13262_v63, %v19384_v11  ;;  %v821_v59 = vsub.f32 %v13283_v12, %v19383_v23  ;;  %v518_v2 = vand.u32 4294901760, %v239_v18  ;;  %v13362_v56 = vsub.f32 %v255_v57, %v566_v13 }
  0x1c   :  { %20237 = vst [vmem:[#allocation9_spill] sm:$0xff] %v13345_v48  ;;  %v11599_v3 = vpack.c.bf16 %v696_v47, %v689_v37  ;;  %11578 = vmatprep.subr.bf16.mxu0 %v13345_v48  ;;  %v19387_v6 = vand.u32 4294901760, %v13287_v17  ;;  %v19390_v7 = vand.u32 4294901760, %v13301_v42  ;;  %v13371_v0 = vsub.f32 %v238_v1, %v515_v24 }
  0x1d   :  { %v815_v19 = vand.u32 4294901760, %v814_v52  ;;  %v822_v23 = vand.u32 4294901760, %v821_v59  ;;  %v13369_v11 = vpack.c.bf16 %v518_v2, %v515_v24 }
  0x1f   :  { %20238 = vst [vmem:[#allocation10_spill] sm:$0xff] %v13369_v11 }
  0x20   :  { %8 = vsyncpa [#allocation3], 0  ;;  %11600 = vmatpush3.bf16.msra.mxu1 %v11599_v3  ;;  %v702_v57 = vsub.f32 %v13287_v17, %v19387_v6  ;;  %v709_v13 = vsub.f32 %v13301_v42, %v19390_v7  ;;  %v569_v37 = vand.u32 4294901760, %v256_v29  ;;  %v572_v47 = vand.u32 4294901760, %v257_v55  ;;  %v241_v52 = vld [vmem:[%s19381_s2 + $0x68] sm:$0xff]  ;;  %11580 = vmatpush3.bf16.msra.mxu0 %v13369_v11 }
  0x21   :  { %v11601_v59 = vpack.c.bf16 %v822_v23, %v815_v19  ;;  %v19393_v1 = vand.u32 4294901760, %v13305_v50  ;;  %v19392_v24 = vand.u32 4294901760, %v13320_v60  ;;  %v521_v3 = vand.u32 4294901760, %v240_v8 }
  0x22   :  { %v13385_v61 = vsub.f32 %v239_v18, %v518_v2  ;;  %v703_v6 = vand.u32 4294901760, %v702_v57  ;;  %v710_v34 = vand.u32 4294901760, %v709_v13  ;;  %v13387_v33 = vpack.c.bf16 %v572_v47, %v569_v37  ;;  %v258_v18 = vld [vmem:[%s19381_s2 + $0xf0] sm:$0xff]  ;;  %v259_v2 = vld [vmem:[%s19381_s2 + $0xf8] sm:$0xff] }
  0x23   :  { %11602 = vmatprep.subr.bf16.mxu1 %v11601_v59  ;;  %v13389_v7 = vsub.f32 %v256_v29, %v569_v37  ;;  %v828_v23 = vsub.f32 %v13305_v50, %v19393_v1  ;;  %v835_v19 = vsub.f32 %v13320_v60, %v19392_v24  ;;  %v524_v10 = vand.u32 4294901760, %v241_v52  ;;  %v242_v59 = vld [vmem:[%s19381_s2 + $0x70] sm:$0xff] }
  0x24   :  { %20239 = vst [vmem:[#allocation11_spill] sm:$0xff] %v13387_v33  ;;  %v11603_v57 = vpack.c.bf16 %v710_v34, %v703_v6  ;;  %11582 = vmatprep.subr.bf16.mxu0 %v13387_v33  ;;  %v13404_v29 = vsub.f32 %v257_v55, %v572_v47  ;;  %v19397_v13 = vand.u32 4294901760, %v13329_v5  ;;  %v19400_v37 = vand.u32 4294901760, %v13343_v30 }
  0x25   :  { %v829_v24 = vand.u32 4294901760, %v828_v23  ;;  %v836_v1 = vand.u32 4294901760, %v835_v19  ;;  %v13411_v9 = vpack.c.bf16 %v524_v10, %v521_v3  ;;  %v13413_v54 = vsub.f32 %v240_v8, %v521_v3  ;;  %v243_v23 = vld [vmem:[%s19381_s2 + $0x78] sm:$0xff] }
  0x26   :  { %11604 = vmatpush3.bf16.msra.mxu1 %v11603_v57  ;;  %v716_v34 = vsub.f32 %v13329_v5, %v19397_v13  ;;  %v723_v55 = vsub.f32 %v13343_v30, %v19400_v37  ;;  %v575_v6 = vand.u32 4294901760, %v258_v18  ;;  %v578_v47 = vand.u32 4294901760, %v259_v2 }
  0x27   :  { %20240 = vst [vmem:[#allocation12_spill] sm:$0xff] %v13411_v9  ;;  %v11605_v19 = vpack.c.bf16 %v836_v1, %v829_v24  ;;  %11584 = vmatpush3.bf16.msra.mxu0 %v13411_v9  ;;  %v19403_v8 = vand.u32 4294901760, %v13347_v51  ;;  %v19402_v3 = vand.u32 4294901760, %v13362_v56  ;;  %v527_v57 = vand.u32 4294901760, %v242_v59 }
  0x28   :  { %v13427_v53 = vsub.f32 %v241_v52, %v524_v10  ;;  %v717_v13 = vand.u32 4294901760, %v716_v34  ;;  %v724_v36 = vand.u32 4294901760, %v723_v55  ;;  %v13429_v35 = vpack.c.bf16 %v578_v47, %v575_v6  ;;  %v69_v10 = vld [vmem:[%s19379_s0 + $0x8] sm:$0xff] }
  0x29   :  { %11606 = vmatprep.subr.bf16.mxu1 %v11605_v19  ;;  %v13431_v37 = vsub.f32 %v258_v18, %v575_v6  ;;  %v842_v1 = vsub.f32 %v13347_v51, %v19403_v8  ;;  %v849_v24 = vsub.f32 %v13362_v56, %v19402_v3  ;;  %v530_v44 = vand.u32 4294901760, %v243_v23  ;;  %v68_v6 = vld [vmem:[%s19379_s0] sm:$0xff] }
  0x2a   :  { %20241 = vst [vmem:[#allocation13_spill] sm:$0xff] %v13429_v35  ;;  %v11607_v52 = vpack.c.bf16 %v724_v36, %v717_v13  ;;  %11586 = vmatprep.subr.bf16.mxu0 %v13429_v35  ;;  %v13443_v34 = vsub.f32 %v259_v2, %v578_v47  ;;  %v19410_v18 = vand.u32 4294901760, %v13371_v0  ;;  %v19409_v55 = vand.u32 4294901760, %v13385_v61 }
  0x2b   :  { %v843_v19 = vand.u32 4294901760, %v842_v1  ;;  %v850_v3 = vand.u32 4294901760, %v849_v24  ;;  %v13450_v8 = vpack.c.bf16 %v530_v44, %v527_v57  ;;  %v13452_v41 = vsub.f32 %v242_v59, %v527_v57 }
  0x2c   :  { %20242 = vst [vmem:[#allocation14_spill] sm:$0xff] %v13443_v34  ;;  %11608 = vmatpush3.bf16.msra.mxu1 %v11607_v52  ;;  %v730_v36 = vsub.f32 %v13371_v0, %v19410_v18  ;;  %v737_v2 = vsub.f32 %v13385_v61, %v19409_v55  ;;  %v149_v13 = vmul.f32 %v69_v10, %v69_v10  ;;  %v19413_v47 = vand.u32 4294901760, %v13389_v7 }
  0x2d   :  { %20243 = vst [vmem:[#allocation15_spill] sm:$0xff] %v13450_v8  ;;  %20244 = vst [vmem:[#allocation16_spill] sm:$0xff] %v13452_v41  ;;  %v11609_v35 = vpack.c.bf16 %v850_v3, %v843_v19  ;;  %11588 = vmatpush3.bf16.msra.mxu0 %v13450_v8  ;;  %v19414_v1 = vand.u32 4294901760, %v13404_v29  ;;  %v11621_v59 = vpack.c.bf16 %v13211_v32, %v13209_v31  ;;  %v19416_v19 = vand.u32 4294901760, %v13413_v54 }
  0x2e   :  { %v148_v57 = vmul.f32 %v68_v6, %v68_v6  ;;  %v731_v24 = vand.u32 4294901760, %v730_v36  ;;  %v738_v52 = vand.u32 4294901760, %v737_v2  ;;  %v13465_v9 = vand.u32 4294901760, %v149_v13 }
  0x2f   :  { %v856_v55 = vsub.f32 %v13389_v7, %v19413_v47  ;;  %11610 = vmatprep.subr.bf16.mxu1 %v11609_v35  ;;  %v863_v3 = vsub.f32 %v13404_v29, %v19414_v1  ;;  %11622 = vmatprep.subr.bf16.mxu0 %v11621_v59  ;;  %v19415_v6 = vand.u32 4294901760, %v13427_v53  ;;  %v13477_v36 = vsub.f32 %v243_v23, %v530_v44 }
  0x30   :  { %20245 = vst [vmem:[#allocation17_spill] sm:$0xff] %v13465_v9  ;;  %v13473_v10 = vand.u32 4294901760, %v148_v57  ;;  %v11611_v2 = vpack.c.bf16 %v738_v52, %v731_v24  ;;  %v13480_v18 = vsub.f32 %v149_v13, %v13465_v9  ;;  %881 = vmatprep.mubr.f32.mxu1 %v13465_v9  ;;  %v744_v59 = vsub.f32 %v13413_v54, %v19416_v19 }
  0x31   :  { %20247 = vst [vmem:[#allocation19_spill] sm:$0xff] %v13477_v36  ;;  %v857_v8 = vand.u32 4294901760, %v856_v55  ;;  %v864_v35 = vand.u32 4294901760, %v863_v3  ;;  %v751_v44 = vsub.f32 %v13427_v53, %v19415_v6  ;;  %v19420_v13 = vand.u32 4294901760, %v13431_v37 }
  0x32   :  { %20246 = vst [vmem:[#allocation18_spill] sm:$0xff] %v13473_v10  ;;  %20248 = vst [vmem:[#allocation20_spill] sm:$0xff] %v13480_v18  ;;  %v13484_v47 = vsub.f32 %v148_v57, %v13473_v10  ;;  %11612 = vmatpush3.bf16.msra.mxu1 %v11611_v2  ;;  %v19417_v23 = vand.u32 4294901760, %v13480_v18  ;;  %v19421_v55 = vand.u32 4294901760, %v13443_v34  ;;  %v745_v57 = vand.u32 4294901760, %v744_v59 }
  0x33   :  { %v11613_v24 = vpack.c.bf16 %v864_v35, %v857_v8  ;;  %v752_v3 = vand.u32 4294901760, %v751_v44  ;;  %v870_v6 = vsub.f32 %v13431_v37, %v19420_v13  ;;  %v19423_v19 = vand.u32 4294901760, %v13452_v41 }
  0x34   :  { %20249 = vst [vmem:[#allocation21_spill] sm:$0xff] %v13484_v47  ;;  %v19422_v52 = vand.u32 4294901760, %v13484_v47  ;;  %v583_v1 = vsub.f32 %v13480_v18, %v19417_v23  ;;  %v877_v2 = vsub.f32 %v13443_v34, %v19421_v55  ;;  %v11623_v59 = vpack.c.bf16 %v13189_v21, %v13179_v15 }
  0x35   :  { %11614 = vmatprep.subr.bf16.mxu1 %v11613_v24  ;;  %v11615_v35 = vpack.c.bf16 %v752_v3, %v745_v57  ;;  %v19430_v44 = vand.u32 4294901760, %v13477_v36  ;;  %v871_v9 = vand.u32 4294901760, %v870_v6  ;;  %v758_v55 = vsub.f32 %v13452_v41, %v19423_v19  ;;  %v85_v24 = vld [vmem:[%s19379_s0 + $0x88] sm:$0xff]  ;;  %v84_v57 = vld [vmem:[%s19379_s0 + $0x80] sm:$0xff] }
  0x36   :  { %v589_v8 = vsub.f32 %v13484_v47, %v19422_v52  ;;  %v584_v23 = vand.u32 4294901760, %v583_v1  ;;  %v878_v13 = vand.u32 4294901760, %v877_v2  ;;  %v11625_v52 = vpack.c.bf16 %v13202_v26, %v13200_v25  ;;  %v101_v6 = vld [vmem:[%s19379_s0 + $0x108] sm:$0xff]  ;;  %v100_v2 = vld [vmem:[%s19379_s0 + $0x100] sm:$0xff] }
  0x37   :  { %11616 = vmatpush3.bf16.msra.mxu1 %v11615_v35  ;;  %v765_v1 = vsub.f32 %v13477_v36, %v19430_v44  ;;  %v759_v47 = vand.u32 4294901760, %v758_v55  ;;  %v11627_v35 = vpack.c.bf16 %v13219_v38, %v13206_v28  ;;  %v165_v33 = vmul.f32 %v85_v24, %v85_v24  ;;  %v117_v44 = vld [vmem:[%s19379_s0 + $0x188] sm:$0xff]  ;;  %v132_v41 = vld [vmem:[%s19379_s0 + $0x200] sm:$0xff] }
  0x38   :  { %v590_v3 = vand.u32 4294901760, %v589_v8  ;;  %585 = vmatprep.mubr.f32.mxu0 %v584_v23  ;;  %v11617_v19 = vpack.c.bf16 %v878_v13, %v871_v9  ;;  %v164_v11 = vmul.f32 %v84_v57, %v84_v57  ;;  %v11629_v18 = vpack.c.bf16 %v13229_v43, %v13223_v40  ;;  %v116_v9 = vld [vmem:[%s19379_s0 + $0x180] sm:$0xff] }
  0x39   :  { %v766_v8 = vand.u32 4294901760, %v765_v1  ;;  %v181_v36 = vmul.f32 %v101_v6, %v101_v6  ;;  %v180_v23 = vmul.f32 %v100_v2, %v100_v2  ;;  %v11631_v55 = vpack.c.bf16 %v13258_v58, %v13234_v46 }
  0x3a   :  { %591 = vmatmul.mubr.f32.vlgmr.msra.gmra.mrb[0].mxu0 %v590_v3  ;;  %11618 = vmatprep.subr.bf16.mxu1 %v11617_v19  ;;  %v13544_v24 = vand.u32 4294901760, %v165_v33  ;;  %v13546_v57 = vand.u32 4294901760, %v164_v11  ;;  %v11633_v19 = vpack.c.bf16 %v13283_v12, %v13262_v63  ;;  %v197_v1 = vmul.f32 %v117_v44, %v117_v44 }
  0x3b   :  { %11624 = vmatpush3.bf16.msra.mxu0 %v11623_v59  ;;  %v11619_v13 = vpack.c.bf16 %v766_v8, %v759_v47  ;;  %v13550_v59 = vand.u32 4294901760, %v181_v36  ;;  %v13552_v3 = vand.u32 4294901760, %v180_v23  ;;  %v11635_v47 = vpack.c.bf16 %v13301_v42, %v13287_v17 }
  0x3c   :  { %11626 = vmatprep.subr.bf16.mxu0 %v11625_v52  ;;  %20250 = vst [vmem:[#allocation22_spill] sm:$0xff] %v13544_v24  ;;  %20251 = vst [vmem:[#allocation23_spill] sm:$0xff] %v13546_v57  ;;  %v133_v52 = vld [vmem:[%s19379_s0 + $0x208] sm:$0xff]  ;;  %v13560_v6 = vsub.f32 %v165_v33, %v13544_v24  ;;  %v13563_v2 = vsub.f32 %v164_v11, %v13546_v57  ;;  %v196_v8 = vmul.f32 %v116_v9, %v116_v9  ;;  %vm66_vm10 = vcmask 0  }
  0x3d   :  { %20252 = vst [vmem:[#allocation24_spill] sm:$0xff] %v13550_v59  ;;  %20253 = vst [vmem:[#allocation25_spill] sm:$0xff] %v13552_v3  ;;  %11620 = vmatpush3.bf16.msra.mxu1 %v11619_v13  ;;  %v11637_v44 = vpack.c.bf16 %v13320_v60, %v13305_v50  ;;  %v13572_v13 = vsub.f32 %v181_v36, %v13550_v59  ;;  %v13575_v33 = vsub.f32 %v180_v23, %v13552_v3 }
  0x3e   :  { %20254 = vst [vmem:[#allocation26_spill] sm:$0xff] %v13563_v2  ;;  %11654 = vmatprep.subr.bf16.mxu1 %v13177_v14  ;;  %v13577_v48 = vand.u32 4294901760, %v197_v1  ;;  %v19444_v11 = vand.u32 4294901760, %v13560_v6  ;;  %v19447_v9 = vand.u32 4294901760, %v13563_v2  ;;  %v13581_v4 = vand.u32 4294901760, %v196_v8 }
  0x3f   :  { %11628 = vmatpush3.bf16.msra.mxu0 %v11627_v35  ;;  %v213_v35 = vmul.f32 %v133_v52, %v133_v52  ;;  %v212_v23 = vmul.f32 %v132_v41, %v132_v41  ;;  %v20258_v41 = vand.u32 4294901760, %v13572_v13 }
  0x40   :  { %20255 = vst [vmem:[#allocation27_spill] sm:$0xff] %v13577_v48  ;;  %11630 = vmatprep.subr.bf16.mxu0 %v11629_v18  ;;  %20256 = vst [vmem:[#allocation28_spill] sm:$0xff] %v13581_v4  ;;  %883 = vmatmul.mubr.f32.vlgmr.msra.gmra.mrb[0].mxu1 %v13473_v10  ;;  %v13587_v34 = vsub.f32 %v197_v1, %v13577_v48  ;;  %v598_v18 = vsub.f32 %v13560_v6, %v19444_v11  ;;  %v20259_v11 = vand.u32 4294901760, %v13575_v33 }
  0x41   :  { %11656 = vmatpush3.bf16.msra.mxu1 %v13187_v20  ;;  %v604_v52 = vsub.f32 %v13563_v2, %v19447_v9  ;;  %888 = vmatprep.mubr.f32.mxu1 %v13544_v24  ;;  %v13598_v14 = vsub.f32 %v196_v8, %v13581_v4  ;;  %v13600_v36 = vand.u32 4294901760, %v213_v35  ;;  %v613_v1 = vsub.f32 %v13572_v13, %v20258_v41 }
  0x42   :  { %11658 = vmatprep.subr.bf16.mxu1 %v13191_v22  ;;  %v619_v10 = vsub.f32 %v13575_v33, %v20259_v11  ;;  %v19454_v9 = vand.u32 4294901760, %v13587_v34  ;;  %v13610_v20 = vand.u32 4294901760, %v212_v23  ;;  %v599_v8 = vand.u32 4294901760, %v598_v18 }
  0x43   :  { %20257 = vst [vmem:[#allocation29_spill] sm:$0xff] %v13600_v36  ;;  %11632 = vmatpush3.bf16.msra.mxu0 %v11631_v55  ;;  %v605_v24 = vand.u32 4294901760, %v604_v52  ;;  %v13614_v55 = vsub.f32 %v213_v35, %v13600_v36  ;;  %v614_v22 = vand.u32 4294901760, %v613_v1  ;;  %v11641_v52 = vpack.c.bf16 %v13362_v56, %v13347_v51 }
  0x44   :  { %20260 = vst [vmem:[#allocation30_spill] sm:$0xff] %v13610_v20  ;;  %11634 = vmatprep.subr.bf16.mxu0 %v11633_v19  ;;  %890 = vmatmul.mubr.f32.gmra.mrb[2].mxu1 %v13546_v57  ;;  %v628_v41 = vsub.f32 %v13587_v34, %v19454_v9  ;;  %v13621_v11 = vsub.f32 %v212_v23, %v13610_v20  ;;  %v620_v35 = vand.u32 4294901760, %v619_v10  ;;  %v20261_v1 = vand.u32 4294901760, %v13209_v31 }
  0x45   :  { %11660 = vmatpush3.bf16.msra.mxu1 %v13204_v27  ;;  %600 = vmatprep.mubr.f32.mxu0 %v599_v8  ;;  %v11639_v19 = vpack.c.bf16 %v13343_v30, %v13329_v5  ;;  %v20262_v23 = vand.u32 4294901760, %v13211_v32  ;;  %v20263_v8 = vand.u32 4294901760, %v13179_v15  ;;  %v20264_v2 = vand.u32 4294901760, %v13189_v21 }
  0x46   :  { %11662 = vmatprep.subr.bf16.mxu1 %v13221_v39  ;;  %606 = vmatmul.mubr.f32.gmra.mrb[2].mxu0 %v605_v24  ;;  %v19457_v18 = vand.u32 4294901760, %v13621_v11  ;;  %v20266_v31 = vand.u32 4294901760, %v13200_v25  ;;  %v20267_v32 = vand.u32 4294901760, %v13202_v26  ;;  %v20268_v15 = vand.u32 4294901760, %v13206_v28 }
  0x47   :  { %11636 = vmatpush3.bf16.msra.mxu0 %v11635_v47  ;;  %v13634_v9 = vpack.c.bf16 %v20262_v23, %v20261_v1  ;;  %v13640_v57 = vpack.c.bf16 %v20264_v2, %v20263_v8  ;;  %v20265_v47 = vand.u32 4294901760, %v13598_v14  ;;  %v20269_v21 = vand.u32 4294901760, %v13219_v38  ;;  %615 = vmatprep.mubr.f32.mxu0 %v614_v22 }
  0x48   :  { %11638 = vmatprep.subr.bf16.mxu0 %v11637_v44  ;;  %v13650_v1 = vpack.c.bf16 %v20267_v32, %v20266_v31  ;;  %v629_v24 = vand.u32 4294901760, %v628_v41  ;;  %895 = vmatprep.mubr.f32.mxu1 %v13550_v59  ;;  %v20270_v44 = vand.u32 4294901760, %v13614_v55  ;;  %v20271_v25 = vand.u32 4294901760, %v13223_v40 }
  0x49   :  { %v634_v10 = vsub.f32 %v13598_v14, %v20265_v47  ;;  %v13656_v2 = vpack.c.bf16 %v20269_v21, %v20268_v15  ;;  %v20272_v26 = vand.u32 4294901760, %v13229_v43  ;;  %v20273_v28 = vand.u32 4294901760, %v13234_v46  ;;  %11664 = vmatpush3.bf16.msra.mxu1 %v13232_v45 }
  0x4a   :  { %v643_v23 = vsub.f32 %v13614_v55, %v20270_v44  ;;  %v20274_v38 = vand.u32 4294901760, %v13258_v58  ;;  %v11643_v22 = vpack.c.bf16 %v13385_v61, %v13371_v0  ;;  %v20275_v41 = vand.u32 4294901760, %v13262_v63  ;;  %11666 = vmatprep.subr.bf16.mxu1 %v13260_v62  ;;  %621 = vmatmul.mubr.f32.gmra.mrb[4].mxu0 %v620_v35 }
  0x4b   :  { %v13666_v8 = vpack.c.bf16 %v20272_v26, %v20271_v25  ;;  %v20276_v31 = vand.u32 4294901760, %v13283_v12  ;;  %v20277_v43 = vand.u32 4294901760, %v13287_v17  ;;  %v20278_v32 = vand.u32 4294901760, %v13301_v42  ;;  %11640 = vmatpush3.bf16.msra.mxu0 %v11639_v19  ;;  %630 = vmatprep.mubr.f32.mxu0 %v629_v24  ;;  %v20290_v24 = vld [vmem:[#allocation8_spill] sm:$0xff] }
  0x4c   :  { %v13672_v47 = vpack.c.bf16 %v20274_v38, %v20273_v28  ;;  %v20279_v58 = vand.u32 4294901760, %v13305_v50  ;;  %v20280_v15 = vand.u32 4294901760, %v13320_v60  ;;  %v20281_v63 = vand.u32 4294901760, %v13329_v5  ;;  %11642 = vmatprep.subr.bf16.mxu0 %v11641_v52  ;;  %897 = vmatmul.mubr.f32.gmra.mrb[4].mxu1 %v13552_v3  ;;  %v20289_v52 = vld [vmem:[#allocation14_spill] sm:$0xff]  ;;  %v20292_v38 = vld [vmem:[#allocation16_spill] sm:$0xff] }
  0x4d   :  { %v13681_v40 = vpack.c.bf16 %v20276_v31, %v20275_v41  ;;  %v13687_v46 = vpack.c.bf16 %v20278_v32, %v20277_v43  ;;  %v20282_v12 = vand.u32 4294901760, %v13343_v30  ;;  %v20283_v17 = vand.u32 4294901760, %v13347_v51  ;;  %11668 = vmatpush3.bf16.msra.mxu1 %v13285_v16  ;;  %902 = vmatprep.mubr.f32.mxu1 %v13577_v48  ;;  %v260_v31 = vld [vmem:[%s19381_s2 + $0x100] sm:$0xff]  ;;  %v261_v43 = vld [vmem:[%s19381_s2 + $0x108] sm:$0xff] }
  0x4e   :  { %v13693_v21 = vpack.c.bf16 %v20280_v15, %v20279_v58  ;;  %v20284_v42 = vand.u32 4294901760, %v13362_v56  ;;  %v20285_v50 = vand.u32 4294901760, %v13371_v0  ;;  %v20286_v60 = vand.u32 4294901760, %v13385_v61  ;;  %11670 = vmatprep.subr.bf16.mxu1 %v13303_v49  ;;  %v20294_v32 = vld [vmem:[#allocation20_spill] sm:$0xff]  ;;  %v20295_v58 = vld [vmem:[#allocation10_spill] sm:$0xff] }
  0x4f   :  { %v13700_v44 = vpack.c.bf16 %v20282_v12, %v20281_v63  ;;  %v635_v19 = vand.u32 4294901760, %v634_v10  ;;  %v11645_v5 = vpack.c.bf16 %v13404_v29, %v13389_v7  ;;  %v649_v30 = vsub.f32 %v13621_v11, %v19457_v18  ;;  %11644 = vmatpush3.bf16.msra.mxu0 %v11643_v22  ;;  %v20293_v22 = vld [vmem:[#allocation19_spill] sm:$0xff]  ;;  %v281_v48 = vld [vmem:[%s19381_s2 + $0x1a8] sm:$0xff] }
  0x50   :  { %v13706_v25 = vpack.c.bf16 %v20284_v42, %v20283_v17  ;;  %v13712_v26 = vpack.c.bf16 %v20286_v60, %v20285_v50  ;;  %v20287_v51 = vand.u32 4294901760, %v13413_v54  ;;  %v20288_v56 = vand.u32 4294901760, %v13427_v53  ;;  %904 = vmatmul.mubr.f32.gmra.mrb[6].mxu1 %v13581_v4  ;;  %v20297_v17 = vld [vmem:[#allocation11_spill] sm:$0xff] }
  0x51   :  { %v644_v61 = vand.u32 4294901760, %v643_v23  ;;  %v11647_v0 = vpack.c.bf16 %v13427_v53, %v13413_v54  ;;  %636 = vmatmul.mubr.f32.gmra.mrb[6].mxu0 %v635_v19  ;;  %11646 = vmatprep.subr.bf16.mxu0 %v11645_v5  ;;  %v650_v35 = vand.u32 4294901760, %v649_v30  ;;  %v11649_v10 = vpack.c.bf16 %v20289_v52, %v13431_v37  ;;  %v20291_v23 = vld [vmem:[#allocation9_spill] sm:$0xff]  ;;  %v278_v60 = vld [vmem:[%s19381_s2 + $0x190] sm:$0xff]  ;;  %v279_v19 = vld [vmem:[%s19381_s2 + $0x198] sm:$0xff] }
  0x52   :  { %v13723_v28 = vpack.c.bf16 %v20288_v56, %v20287_v51  ;;  %11672 = vmatpush3.bf16.msra.mxu1 %v20290_v24  ;;  %909 = vmatprep.mubr.f32.mxu1 %v13600_v36  ;;  %v11651_v41 = vpack.c.bf16 %v20293_v22, %v20292_v38  ;;  %v276_v53 = vld [vmem:[%s19381_s2 + $0x180] sm:$0xff]  ;;  %v277_v54 = vld [vmem:[%s19381_s2 + $0x188] sm:$0xff]  ;;  %v20296_v15 = vand.u32 4294901760, %v20294_v32  ;;  %v1571_v42 = vand.u32 4294901760, %v260_v31  ;;  %v262_v5 = vld [vmem:[%s19381_s2 + $0x110] sm:$0xff] }
  0x53   :  { %645 = vmatprep.mubr.f32.mxu0 %v644_v61  ;;  %11648 = vmatpush3.bf16.msra.mxu0 %v11647_v0  ;;  %v1619_v63 = vand.u32 4294901760, %v276_v53  ;;  %v1622_v12 = vand.u32 4294901760, %v277_v54  ;;  %v1574_v50 = vand.u32 4294901760, %v261_v43  ;;  %v263_v30 = vld [vmem:[%s19381_s2 + $0x118] sm:$0xff]  ;;  %v20298_v51 = vld [vmem:[#allocation21_spill] sm:$0xff]  ;;  %v20308_v36 = vand.u32 4294901760, %v13431_v37 }
  0x54   :  { %11674 = vmatprep.subr.bf16.mxu1 %v20291_v23  ;;  %11650 = vmatprep.subr.bf16.mxu0 %v11649_v10  ;;  %v20299_v56 = vld [vmem:[#allocation12_spill] sm:$0xff]  ;;  %v13778_v0 = vsub.f32 %v260_v31, %v1571_v42  ;;  %v1625_v10 = vand.u32 4294901760, %v278_v60  ;;  %v1580_v18 = vand.u32 4294901760, %v263_v30  ;;  %v20306_v31 = vand.u32 4294901760, %v13389_v7 }
  0x55   :  { %651 = vmatmul.mubr.f32.gmra.mrb[8].mxu0 %v650_v35  ;;  %911 = vmatmul.mubr.f32.gmra.mrb[8].mxu1 %v13610_v20  ;;  %v13774_v61 = vsub.f32 %v277_v54, %v1622_v12  ;;  %v13780_v35 = vsub.f32 %v261_v43, %v1574_v50  ;;  %v20304_v54 = vld [vmem:[#allocation26_spill] sm:$0xff]  ;;  %v20307_v43 = vand.u32 4294901760, %v13404_v29  ;;  %v264_v7 = vld [vmem:[%s19381_s2 + $0x120] sm:$0xff] }
  0x56   :  { %1046 = vmatprep.mubr.f32.mxu0 %v20294_v32  ;;  %11676 = vmatpush3.bf16.msra.mxu1 %v20295_v58  ;;  %20301 = vst [vmem:[#allocation8_spill] sm:$0xff] %v13778_v0  ;;  %v20303_v32 = vld [vmem:[#allocation13_spill] sm:$0xff]  ;;  %v13811_v29 = vsub.f32 %v278_v60, %v1625_v10  ;;  %v20312_v60 = vand.u32 4294901760, %v20293_v22  ;;  %v13832_v59 = vsub.f32 %v263_v30, %v1580_v18 }
  0x57   :  { %1189 = vmatprep.mubr.f32.mxu1 %v20296_v15  ;;  %11652 = vmatpush3.bf16.msra.mxu0 %v11651_v41  ;;  %20300 = vst [vmem:[#allocation14_spill] sm:$0xff] %v13774_v61  ;;  %20302 = vst [vmem:[#allocation9_spill] sm:$0xff] %v13780_v35  ;;  %v1628_v41 = vand.u32 4294901760, %v279_v19  ;;  %v1577_v15 = vand.u32 4294901760, %v262_v5  ;;  %v13793_v20 = vpack.c.bf16 %v20307_v43, %v20306_v31  ;;  %v20310_v43 = vld [vmem:[#allocation5_spill] sm:$0xff] }
  0x58   :  { %11678 = vmatprep.subr.bf16.mxu1 %v20297_v17  ;;  %11686 = vmatprep.subr.bf16.mxu0 %v13634_v9  ;;  %v13772_v9 = vsub.f32 %v276_v53, %v1619_v63  ;;  %v280_v53 = vld [vmem:[%s19381_s2 + $0x1a0] sm:$0xff]  ;;  %v13838_v31 = vpack.c.bf16 %v1574_v50, %v1571_v42  ;;  %v20319_v42 = vand.u32 4294901760, %v13778_v0 }
  0x59   :  { %v13813_v37 = vsub.f32 %v279_v19, %v1628_v41  ;;  %v13830_v19 = vsub.f32 %v262_v5, %v1577_v15  ;;  %v1631_v3 = vand.u32 4294901760, %v280_v53  ;;  %v13842_v22 = vpack.c.bf16 %v1628_v41, %v1625_v10 }
  0x5a   :  { %1049 = vmatmul.mubr.f32.vlgmr.msra.gmra.mrb[10].mxu0 %v20298_v51  ;;  %11680 = vmatpush3.bf16.msra.mxu1 %v20299_v56  ;;  %20314 = vst [vmem:[#allocation16_spill] sm:$0xff] %v13838_v31  ;;  %v20317_v5 = vand.u32 4294901760, %v13772_v9  ;;  %v1746_v50 = vsub.f32 %v13778_v0, %v20319_v42  ;;  %v20320_v10 = vand.u32 4294901760, %v13780_v35  ;;  %v20324_v0 = vld [vmem:[#allocation7_spill] sm:$0xff] }
  0x5b   :  { %11688 = vmatpush3.bf16.msra.mxu0 %v13640_v57  ;;  %1055 = vmatprep.mubr.f32.mxu0 %v13560_v6  ;;  %v20305_v57 = vld [vmem:[#allocation15_spill] sm:$0xff]  ;;  %20316 = vst [vmem:[#allocation19_spill] sm:$0xff] %v13842_v22  ;;  %v19474_v42 = vand.u32 4294901760, %v13830_v19 }
  0x5c   :  { %11682 = vmatprep.subr.bf16.mxu1 %v20303_v32  ;;  %11690 = vmatprep.subr.bf16.mxu0 %v13650_v1  ;;  %v20309_v1 = vand.u32 4294901760, %v20289_v52  ;;  %v13836_v52 = vpack.c.bf16 %v1622_v12, %v1619_v63  ;;  %v1858_v30 = vsub.f32 %v13772_v9, %v20317_v5  ;;  %v282_v12 = vld [vmem:[%s19381_s2 + $0x1b0] sm:$0xff]  ;;  %v1753_v41 = vsub.f32 %v13780_v35, %v20320_v10 }
  0x5d   :  { %v13870_v5 = vpack.c.bf16 %v1580_v18, %v1577_v15  ;;  %v20323_v35 = vand.u32 4294901760, %v20304_v54  ;;  %v266_v18 = vld [vmem:[%s19381_s2 + $0x130] sm:$0xff]  ;;  %v267_v15 = vld [vmem:[%s19381_s2 + $0x138] sm:$0xff] }
  0x5e   :  { %1058 = vmatmul.mubr.f32.gmra.mrb[12].mxu0 %v20304_v54  ;;  %11684 = vmatpush3.bf16.msra.mxu1 %v20305_v57  ;;  %v13799_v4 = vpack.c.bf16 %v20309_v1, %v20308_v36  ;;  %v13818_v36 = vld [vmem:[%s19381_s2 + $0x128] sm:$0xff]  ;;  %v20313_v57 = vand.u32 4294901760, %v20298_v51  ;;  %v1754_v54 = vand.u32 4294901760, %v1753_v41  ;;  %v284_v41 = vld [vmem:[%s19381_s2 + $0x1c0] sm:$0xff] }
  0x5f   :  { %11692 = vmatpush3.bf16.msra.mxu0 %v13656_v2  ;;  %1064 = vmatprep.mubr.f32.mxu0 %v13572_v13  ;;  %v20311_v2 = vand.u32 4294901760, %v20292_v38  ;;  %v20315_v38 = vld [vmem:[#allocation6_spill] sm:$0xff]  ;;  %v1586_v63 = vand.u32 4294901760, %v13818_v36  ;;  %20322 = vst [vmem:[#allocation20_spill] sm:$0xff] %v13870_v5 }
  0x60   :  { %11694 = vmatprep.subr.bf16.mxu0 %v13666_v8  ;;  %11718 = vmatprep.subr.bf16.mxu1 %v20310_v43  ;;  %v1634_v8 = vand.u32 4294901760, %v281_v48  ;;  %v1583_v43 = vand.u32 4294901760, %v264_v7 }
  0x61   :  { %v13828_v1 = vpack.c.bf16 %v20312_v60, %v20311_v2  ;;  %1193 = vmatmul.mubr.f32.vlgmr.msra.gmra.mrb[10].mxu1 %v20313_v57  ;;  %v20318_v2 = vand.u32 4294901760, %v13774_v61  ;;  %v283_v57 = vld [vmem:[%s19381_s2 + $0x1b8] sm:$0xff] }
  0x62   :  { %1067 = vmatmul.mubr.f32.gmra.mrb[14].mxu0 %v13575_v33  ;;  %11720 = vmatpush3.bf16.msra.mxu1 %v20315_v38  ;;  %v13879_v60 = vpack.c.bf16 %v1634_v8, %v1631_v3  ;;  %v13881_v38 = vsub.f32 %v281_v48, %v1634_v8  ;;  %v1640_v48 = vand.u32 4294901760, %v283_v57 }
  0x63   :  { %v1865_v51 = vsub.f32 %v13774_v61, %v20318_v2  ;;  %11696 = vmatpush3.bf16.msra.mxu0 %v13672_v47  ;;  %1073 = vmatprep.mubr.f32.mxu0 %v13587_v34  ;;  %v20321_v47 = vand.u32 4294901760, %v13560_v6  ;;  %v13872_v2 = vsub.f32 %v280_v53, %v1631_v3  ;;  %v13883_v6 = vsub.f32 %v264_v7, %v1583_v43 }
  0x64   :  { %11698 = vmatprep.subr.bf16.mxu0 %v13681_v40  ;;  %11722 = vmatprep.subr.bf16.mxu1 %v20324_v0  ;;  %20325 = vst [vmem:[#allocation10_spill] sm:$0xff] %v13879_v60  ;;  %v1637_v40 = vand.u32 4294901760, %v282_v12  ;;  %v1859_v0 = vand.u32 4294901760, %v1858_v30  ;;  %v1747_v53 = vand.u32 4294901760, %v1746_v50  ;;  %v20327_v7 = vand.u32 4294901760, %v13811_v29 }
  0x65   :  { %1200 = vmatprep.mubr.f32.mxu1 %v20321_v47  ;;  %v1866_v3 = vand.u32 4294901760, %v1865_v51  ;;  %v20328_v47 = vand.u32 4294901760, %v13813_v37  ;;  %v1592_v30 = vand.u32 4294901760, %v267_v15  ;;  %v20330_v51 = vand.u32 4294901760, %v13832_v59 }
  0x66   :  { %1204 = vmatmul.mubr.f32.gmra.mrb[12].mxu1 %v20323_v35  ;;  %1076 = vmatmul.mubr.f32.gmra.mrb[16].mxu0 %v13598_v14  ;;  %v13893_v35 = vpack.c.bf16 %v1586_v63, %v1583_v43  ;;  %v1872_v8 = vsub.f32 %v13811_v29, %v20327_v7  ;;  %v1589_v43 = vand.u32 4294901760, %v266_v18  ;;  %v20331_v7 = vand.u32 4294901760, %v13575_v33 }
  0x67   :  { %11724 = vmatpush3.bf16.msra.mxu1 %v13204_v27  ;;  %11700 = vmatpush3.bf16.msra.mxu0 %v13687_v46  ;;  %v1879_v10 = vsub.f32 %v13813_v37, %v20328_v47  ;;  %v20329_v27 = vand.u32 4294901760, %v13572_v13  ;;  %v1760_v46 = vsub.f32 %v13830_v19, %v19474_v42  ;;  %v1767_v50 = vsub.f32 %v13832_v59, %v20330_v51  ;;  %v285_v47 = vld [vmem:[%s19381_s2 + $0x1c8] sm:$0xff] }
  0x68   :  { %20326 = vst [vmem:[#allocation11_spill] sm:$0xff] %v13893_v35  ;;  %1082 = vmatprep.mubr.f32.mxu0 %v13614_v55  ;;  %11702 = vmatprep.subr.bf16.mxu0 %v13693_v21  ;;  %v13919_v13 = vsub.f32 %v13818_v36, %v1586_v63  ;;  %v13921_v21 = vsub.f32 %v282_v12, %v1637_v40  ;;  %v20333_v63 = vand.u32 4294901760, %v13587_v34  ;;  %v1643_v51 = vand.u32 4294901760, %v284_v41 }
  0x69   :  { %1211 = vmatprep.mubr.f32.mxu1 %v20329_v27  ;;  %11726 = vmatprep.subr.bf16.mxu1 %v13221_v39  ;;  %v19483_v27 = vand.u32 4294901760, %v13872_v2  ;;  %v13930_v33 = vpack.c.bf16 %v1866_v3, %v1859_v0  ;;  %v13932_v39 = vpack.c.bf16 %v1640_v48, %v1637_v40  ;;  %v13934_v36 = vsub.f32 %v283_v57, %v1640_v48  ;;  %v269_v40 = vld [vmem:[%s19381_s2 + $0x148] sm:$0xff] }
  0x6a   :  { %1215 = vmatmul.mubr.f32.gmra.mrb[14].mxu1 %v20331_v7  ;;  %1085 = vmatmul.mubr.f32.gmra.mrb[18].mxu0 %v13621_v11  ;;  %v13939_v12 = vpack.c.bf16 %v1754_v54, %v1747_v53  ;;  %v1873_v7 = vand.u32 4294901760, %v1872_v8  ;;  %v1880_v42 = vand.u32 4294901760, %v1879_v10  ;;  %v1761_v34 = vand.u32 4294901760, %v1760_v46  ;;  %v20336_v3 = vld [vmem:[#allocation17_spill] sm:$0xff] }
  0x6b   :  { %11728 = vmatpush3.bf16.msra.mxu1 %v13232_v45  ;;  %20332 = vst [vmem:[#allocation21_spill] sm:$0xff] %v13932_v39  ;;  %11704 = vmatpush3.bf16.msra.mxu0 %v13700_v44  ;;  %v268_v45 = vld [vmem:[%s19381_s2 + $0x140] sm:$0xff]  ;;  %v13949_v44 = vpack.c.bf16 %v1592_v30, %v1589_v43  ;;  %v1768_v57 = vand.u32 4294901760, %v1767_v50  ;;  %v1646_v0 = vand.u32 4294901760, %v285_v47  ;;  %v20335_v10 = vand.u32 4294901760, %v13598_v14 }
  0x6c   :  { %1222 = vmatprep.mubr.f32.mxu1 %v20333_v63  ;;  %11706 = vmatprep.subr.bf16.mxu0 %v13706_v25  ;;  %v13954_v48 = vsub.f32 %v266_v18, %v1589_v43  ;;  %v1886_v53 = vsub.f32 %v13872_v2, %v19483_v27  ;;  %v20338_v25 = vand.u32 4294901760, %v13881_v38  ;;  %v20339_v54 = vand.u32 4294901760, %v13614_v55  ;;  %v286_v43 = vld [vmem:[%s19381_s2 + $0x1d0] sm:$0xff] }
  0x6d   :  { %11730 = vmatprep.subr.bf16.mxu1 %v13260_v62  ;;  %20334 = vst [vmem:[#allocation12_spill] sm:$0xff] %v13949_v44  ;;  %1403 = vmatprep.mubr.f32.mxu0 %v20336_v3  ;;  %v1595_v8 = vand.u32 4294901760, %v268_v45  ;;  %v1598_v14 = vand.u32 4294901760, %v269_v40  ;;  %v19476_v46 = vand.u32 4294901760, %v13883_v6  ;;  %v19475_v18 = vand.u32 4294901760, %v13919_v13 }
  0x6e   :  { %1226 = vmatmul.mubr.f32.gmra.mrb[16].mxu1 %v20335_v10  ;;  %20337 = vst [vmem:[#allocation13_spill] sm:$0xff] %v13954_v48  ;;  %v1893_v62 = vsub.f32 %v13881_v38, %v20338_v25  ;;  %v13972_v50 = vpack.c.bf16 %v1880_v42, %v1873_v7  ;;  %v13976_v55 = vsub.f32 %v284_v41, %v1643_v51  ;;  %v20344_v42 = vand.u32 4294901760, %v13621_v11  ;;  %v71_v7 = vld [vmem:[%s19379_s0 + $0x18] sm:$0xff] }
  0x6f   :  { %11732 = vmatpush3.bf16.msra.mxu1 %v13285_v16  ;;  %1233 = vmatprep.mubr.f32.mxu1 %v20339_v54  ;;  %v13974_v16 = vsub.f32 %v267_v15, %v1592_v30  ;;  %v13979_v63 = vpack.c.bf16 %v1768_v57, %v1761_v34  ;;  %v13981_v10 = vpack.c.bf16 %v1646_v0, %v1643_v51  ;;  %v1887_v15 = vand.u32 4294901760, %v1886_v53  ;;  %v270_v57 = vld [vmem:[%s19381_s2 + $0x150] sm:$0xff] }
  0x70   :  { %11708 = vmatpush3.bf16.msra.mxu0 %v13712_v26  ;;  %11734 = vmatprep.subr.bf16.mxu1 %v13303_v49  ;;  %20341 = vst [vmem:[#allocation5_spill] sm:$0xff] %v13976_v55  ;;  %v13983_v25 = vsub.f32 %v285_v47, %v1646_v0  ;;  %v287_v26 = vld [vmem:[%s19381_s2 + $0x1d8] sm:$0xff]  ;;  %v19477_v49 = vand.u32 4294901760, %v13921_v21  ;;  %v1894_v30 = vand.u32 4294901760, %v1893_v62  ;;  %v1649_v41 = vand.u32 4294901760, %v286_v43 }
  0x71   :  { %20340 = vst [vmem:[#allocation26_spill] sm:$0xff] %v13974_v16  ;;  %11710 = vmatprep.subr.bf16.mxu0 %v13793_v20  ;;  %20342 = vst [vmem:[#allocation6_spill] sm:$0xff] %v13981_v10  ;;  %v19482_v20 = vand.u32 4294901760, %v13934_v36  ;;  %v13994_v47 = vpack.c.bf16 %v1598_v14, %v1595_v8  ;;  %v1774_v51 = vsub.f32 %v13883_v6, %v19476_v46  ;;  %v1652_v34 = vand.u32 4294901760, %v287_v26  ;;  %v271_v0 = vld [vmem:[%s19381_s2 + $0x158] sm:$0xff] }
  0x72   :  { %20343 = vst [vmem:[#allocation7_spill] sm:$0xff] %v13983_v25  ;;  %1237 = vmatmul.mubr.f32.gmra.mrb[18].mxu1 %v20344_v42  ;;  %v1781_v11 = vsub.f32 %v13919_v13, %v19475_v18  ;;  %v19478_v53 = vand.u32 4294901760, %v13974_v16  ;;  %v19480_v62 = vand.u32 4294901760, %v13983_v25  ;;  %v14025_v54 = vpack.c.bf16 %v1894_v30, %v1887_v15 }
  0x73   :  { %11736 = vmatpush3.bf16.msra.mxu1 %v20290_v24  ;;  %1535 = vmatprep.mubr.f32.mxu1 %v20336_v3  ;;  %20345 = vst [vmem:[#allocation17_spill] sm:$0xff] %v13994_v47  ;;  %v14007_v24 = vsub.f32 %v268_v45, %v1595_v8  ;;  %v19481_v3 = vand.u32 4294901760, %v13954_v48  ;;  %v19479_v45 = vand.u32 4294901760, %v13976_v55  ;;  %v14027_v8 = vsub.f32 %v286_v43, %v1649_v41 }
  0x74   :  { %11712 = vmatpush3.bf16.msra.mxu0 %v13723_v28  ;;  %11738 = vmatprep.subr.bf16.mxu1 %v20291_v23  ;;  %v14018_v28 = vsub.f32 %v269_v40, %v1598_v14  ;;  %v1900_v23 = vsub.f32 %v13921_v21, %v19477_v49  ;;  %v1907_v42 = vsub.f32 %v13934_v36, %v19482_v20  ;;  %v1782_v40 = vand.u32 4294901760, %v1781_v11  ;;  %v272_v11 = vld [vmem:[%s19381_s2 + $0x160] sm:$0xff] }
  0x75   :  { %20346 = vst [vmem:[#allocation31_spill] sm:$0xff] %v14007_v24  ;;  %11714 = vmatprep.subr.bf16.mxu0 %v13799_v4  ;;  %v151_v18 = vmul.f32 %v71_v7, %v71_v7  ;;  %v1775_v4 = vand.u32 4294901760, %v1774_v51  ;;  %v1601_v14 = vand.u32 4294901760, %v270_v57  ;;  %v1604_v46 = vand.u32 4294901760, %v271_v0  ;;  %v273_v7 = vld [vmem:[%s19381_s2 + $0x168] sm:$0xff] }
  0x76   :  { %20347 = vst [vmem:[#allocation32_spill] sm:$0xff] %v14018_v28  ;;  %v14035_v49 = vpack.c.bf16 %v1652_v34, %v1649_v41  ;;  %v1788_v43 = vsub.f32 %v13954_v48, %v19481_v3  ;;  %v1795_v15 = vsub.f32 %v13974_v16, %v19478_v53  ;;  %v1901_v30 = vand.u32 4294901760, %v1900_v23  ;;  %v290_v48 = vld [vmem:[%s19381_s2 + $0x1f0] sm:$0xff] }
  0x77   :  { %11740 = vmatpush3.bf16.msra.mxu1 %v20295_v58  ;;  %v288_v58 = vld [vmem:[%s19381_s2 + $0x1e0] sm:$0xff]  ;;  %v1914_v41 = vsub.f32 %v13976_v55, %v19479_v45  ;;  %v1921_v51 = vsub.f32 %v13983_v25, %v19480_v62  ;;  %v1908_v53 = vand.u32 4294901760, %v1907_v42  ;;  %v14066_v23 = vand.u32 4294901760, %v151_v18  ;;  %v20351_v45 = vld [vmem:[#allocation18_spill] sm:$0xff] }
  0x78   :  { %11716 = vmatpush3.bf16.msra.mxu0 %v13828_v1  ;;  %11742 = vmatprep.subr.bf16.mxu1 %v20297_v17  ;;  %20348 = vst [vmem:[#allocation33_spill] sm:$0xff] %v14035_v49  ;;  %v289_v1 = vld [vmem:[%s19381_s2 + $0x1e8] sm:$0xff]  ;;  %v14050_v17 = vsub.f32 %v287_v26, %v1652_v34  ;;  %v14070_v62 = vpack.c.bf16 %v1782_v40, %v1775_v4  ;;  %v1655_v20 = vand.u32 4294901760, %v288_v58  ;;  %v1789_v42 = vand.u32 4294901760, %v1788_v43 }
  0x79   :  { %11750 = vmatprep.subr.bf16.mxu0 %v13836_v52  ;;  %20350 = vst [vmem:[#allocation35_spill] sm:$0xff] %v14066_v23  ;;  %v14072_v3 = vpack.c.bf16 %v1604_v46, %v1601_v14  ;;  %v1658_v27 = vand.u32 4294901760, %v289_v1  ;;  %v20353_v25 = vld [vmem:[#allocation22_spill] sm:$0xff]  ;;  %v1796_v26 = vand.u32 4294901760, %v1795_v15  ;;  %v1607_v55 = vand.u32 4294901760, %v272_v11 }
  0x7a   :  { %20349 = vst [vmem:[#allocation34_spill] sm:$0xff] %v14050_v17  ;;  %v1610_v34 = vand.u32 4294901760, %v273_v7  ;;  %v14078_v16 = vsub.f32 %v270_v57, %v1601_v14  ;;  %v1915_v4 = vand.u32 4294901760, %v1914_v41  ;;  %v1922_v40 = vand.u32 4294901760, %v1921_v51  ;;  %v20359_v14 = vld [vmem:[#allocation15_spill] sm:$0xff] }
  0x7b   :  { %1405 = vmatmul.mubr.f32.vlgmr.msra.gmra.mrb[20].mxu0 %v20351_v45  ;;  %11744 = vmatpush3.bf16.msra.mxu1 %v20299_v56  ;;  %20352 = vst [vmem:[#allocation18_spill] sm:$0xff] %v14072_v3  ;;  %v14080_v56 = vsub.f32 %v271_v0, %v1604_v46  ;;  %v20355_v43 = vand.u32 4294901760, %v14007_v24  ;;  %v291_v46 = vld [vmem:[%s19381_s2 + $0x1f8] sm:$0xff]  ;;  %v14097_v57 = vsub.f32 %v151_v18, %v14066_v23 }
  0x7c   :  { %11752 = vmatpush3.bf16.msra.mxu0 %v13838_v31  ;;  %1410 = vmatprep.mubr.f32.mxu0 %v20353_v25  ;;  %v14085_v31 = vpack.c.bf16 %v1908_v53, %v1901_v30  ;;  %v20358_v0 = vld [vmem:[#allocation23_spill] sm:$0xff]  ;;  %v14101_v53 = vpack.c.bf16 %v1658_v27, %v1655_v20  ;;  %v14103_v30 = vsub.f32 %v288_v58, %v1655_v20  ;;  %v20361_v18 = vld [vmem:[#allocation24_spill] sm:$0xff]  ;;  %v1661_v20 = vand.u32 4294901760, %v290_v48 }
  0x7d   :  { %11746 = vmatprep.subr.bf16.mxu1 %v20303_v32  ;;  %11754 = vmatprep.subr.bf16.mxu0 %v13842_v22  ;;  %20354 = vst [vmem:[#allocation22_spill] sm:$0xff] %v14080_v56  ;;  %v1802_v15 = vsub.f32 %v14007_v24, %v20355_v43  ;;  %v20356_v32 = vand.u32 4294901760, %v14018_v28  ;;  %20357 = vst [vmem:[#allocation36_spill] sm:$0xff] %v14097_v57  ;;  %v70_v43 = vld [vmem:[%s19379_s0 + $0x10] sm:$0xff]  ;;  %v14120_v58 = vpack.c.bf16 %v1922_v40, %v1915_v4 }
  0x7e   :  { %20360 = vst [vmem:[#allocation23_spill] sm:$0xff] %v14101_v53  ;;  %v14122_v51 = vsub.f32 %v272_v11, %v1607_v55  ;;  %v14124_v41 = vsub.f32 %v273_v7, %v1610_v34  ;;  %v1664_v24 = vand.u32 4294901760, %v291_v46  ;;  %v150_v7 = vmul.f32 %v70_v43, %v70_v43 }
  0x7f   :  { %v1809_v22 = vsub.f32 %v14018_v28, %v20356_v32  ;;  %1412 = vmatmul.mubr.f32.gmra.mrb[22].mxu0 %v20358_v0  ;;  %11748 = vmatpush3.bf16.msra.mxu1 %v20359_v14  ;;  %v14112_v32 = vpack.c.bf16 %v1796_v26, %v1789_v42  ;;  %v14114_v28 = vsub.f32 %v289_v1, %v1658_v27  ;;  %v274_v26 = vld [vmem:[%s19381_s2 + $0x170] sm:$0xff]  ;;  %v275_v27 = vld [vmem:[%s19381_s2 + $0x178] sm:$0xff]  ;;  %v20365_v42 = vand.u32 4294901760, %v14027_v8 }
  0x80   :  { %11756 = vmatpush3.bf16.msra.mxu0 %v13870_v5  ;;  %1417 = vmatprep.mubr.f32.mxu0 %v20361_v18  ;;  %v14116_v14 = vpack.c.bf16 %v1610_v34, %v1607_v55  ;;  %v87_v1 = vld [vmem:[%s19379_s0 + $0x98] sm:$0xff]  ;;  %v20364_v34 = vld [vmem:[#allocation25_spill] sm:$0xff]  ;;  %v20366_v40 = vand.u32 4294901760, %v14050_v17  ;;  %v1616_v43 = vand.u32 4294901760, %v275_v27  ;;  %v14159_v5 = vsub.f32 %v291_v46, %v1664_v24 }
  0x81   :  { %20362 = vst [vmem:[#allocation15_spill] sm:$0xff] %v14114_v28  ;;  %11758 = vmatprep.subr.bf16.mxu0 %v13879_v60  ;;  %11782 = vmatprep.subr.bf16.mxu1 %v13930_v33  ;;  %v1803_v33 = vand.u32 4294901760, %v1802_v15  ;;  %v1810_v55 = vand.u32 4294901760, %v1809_v22  ;;  %v1928_v4 = vsub.f32 %v14027_v8, %v20365_v42  ;;  %v86_v22 = vld [vmem:[%s19379_s0 + $0x90] sm:$0xff]  ;;  %v167_v11 = vmul.f32 %v87_v1, %v87_v1  ;;  %v20371_v46 = vld [vmem:[#allocation28_spill] sm:$0xff] }
  0x82   :  { %20363 = vst [vmem:[#allocation24_spill] sm:$0xff] %v14116_v14  ;;  %1537 = vmatmul.mubr.f32.vlgmr.msra.gmra.mrb[20].mxu1 %v20351_v45  ;;  %v1935_v60 = vsub.f32 %v14050_v17, %v20366_v40  ;;  %v20367_v15 = vld [vmem:[#allocation27_spill] sm:$0xff]  ;;  %v14155_v40 = vpack.c.bf16 %v1664_v24, %v1661_v20  ;;  %v14157_v45 = vsub.f32 %v290_v48, %v1661_v20  ;;  %v14172_v48 = vand.u32 4294901760, %v150_v7 }
  0x83   :  { %1419 = vmatmul.mubr.f32.gmra.mrb[24].mxu0 %v20364_v34  ;;  %11784 = vmatpush3.bf16.msra.mxu1 %v13939_v12  ;;  %v1613_v12 = vand.u32 4294901760, %v274_v26  ;;  %v14167_v1 = vpack.c.bf16 %v1810_v55, %v1803_v33  ;;  %v166_v24 = vmul.f32 %v86_v22, %v86_v22  ;;  %v1929_v20 = vand.u32 4294901760, %v1928_v4  ;;  %v20374_v55 = vld [vmem:[#allocation29_spill] sm:$0xff] }
  0x84   :  { %11760 = vmatpush3.bf16.msra.mxu0 %v13893_v35  ;;  %1424 = vmatprep.mubr.f32.mxu0 %v20367_v15  ;;  %20368 = vst [vmem:[#allocation25_spill] sm:$0xff] %v14155_v40  ;;  %v103_v35 = vld [vmem:[%s19379_s0 + $0x118] sm:$0xff]  ;;  %20370 = vst [vmem:[#allocation27_spill] sm:$0xff] %v14172_v48  ;;  %v1936_v17 = vand.u32 4294901760, %v1935_v60  ;;  %v20375_v22 = vand.u32 4294901760, %v14103_v30  ;;  %v14189_v4 = vand.u32 4294901760, %v167_v11 }
  0x85   :  { %1542 = vmatprep.mubr.f32.mxu1 %v20353_v25  ;;  %11762 = vmatprep.subr.bf16.mxu0 %v13932_v39  ;;  %v20369_v25 = vand.u32 4294901760, %v14097_v57  ;;  %v20372_v39 = vand.u32 4294901760, %v14078_v16  ;;  %v183_v60 = vmul.f32 %v103_v35, %v103_v35  ;;  %v119_v35 = vld [vmem:[%s19379_s0 + $0x198] sm:$0xff] }
  0x86   :  { %1544 = vmatmul.mubr.f32.gmra.mrb[22].mxu1 %v20358_v0  ;;  %11786 = vmatprep.subr.bf16.mxu1 %v13972_v50  ;;  %v20373_v50 = vand.u32 4294901760, %v14080_v56  ;;  %20376 = vst [vmem:[#allocation28_spill] sm:$0xff] %v14189_v4 }
  0x87   :  { %v1669_v42 = vsub.f32 %v14097_v57, %v20369_v25  ;;  %1426 = vmatmul.mubr.f32.gmra.mrb[26].mxu0 %v20371_v46  ;;  %11788 = vmatpush3.bf16.msra.mxu1 %v13979_v63  ;;  %v1816_v0 = vsub.f32 %v14078_v16, %v20372_v39  ;;  %v14184_v25 = vpack.c.bf16 %v1616_v43, %v1613_v12  ;;  %v102_v39 = vld [vmem:[%s19379_s0 + $0x110] sm:$0xff]  ;;  %v20377_v57 = vand.u32 4294901760, %v14114_v28 }
  0x88   :  { %v1823_v33 = vsub.f32 %v14080_v56, %v20373_v50  ;;  %11764 = vmatpush3.bf16.msra.mxu0 %v13949_v44  ;;  %1431 = vmatprep.mubr.f32.mxu0 %v20374_v55  ;;  %v1942_v63 = vsub.f32 %v14103_v30, %v20375_v22  ;;  %v14196_v50 = vsub.f32 %v274_v26, %v1613_v12  ;;  %v14213_v12 = vand.u32 4294901760, %v166_v24 }
  0x89   :  { %1549 = vmatprep.mubr.f32.mxu1 %v20361_v18  ;;  %11766 = vmatprep.subr.bf16.mxu0 %v13981_v10  ;;  %v14198_v44 = vsub.f32 %v275_v27, %v1616_v43  ;;  %v1949_v56 = vsub.f32 %v14114_v28, %v20377_v57  ;;  %v1670_v18 = vand.u32 4294901760, %v1669_v42  ;;  %v14210_v26 = vsub.f32 %v150_v7, %v14172_v48  ;;  %v20380_v43 = vld [vmem:[#allocation30_spill] sm:$0xff] }
  0x8a   :  { %1551 = vmatmul.mubr.f32.gmra.mrb[24].mxu1 %v20364_v34  ;;  %11790 = vmatprep.subr.bf16.mxu1 %v14025_v54  ;;  %20379 = vst [vmem:[#allocation37_spill] sm:$0xff] %v14213_v12  ;;  %v11801_v57 = vpack.c.bf16 %v1936_v17, %v1929_v20  ;;  %v1817_v22 = vand.u32 4294901760, %v1816_v0  ;;  %v1824_v10 = vand.u32 4294901760, %v1823_v33  ;;  %v182_v28 = vmul.f32 %v102_v39, %v102_v39  ;;  %v118_v27 = vld [vmem:[%s19379_s0 + $0x190] sm:$0xff]  ;;  %v135_v0 = vld [vmem:[%s19379_s0 + $0x218] sm:$0xff] }
  0x8b   :  { %20378 = vst [vmem:[#allocation29_spill] sm:$0xff] %v14210_v26  ;;  %1433 = vmatmul.mubr.f32.gmra.mrb[28].mxu0 %v20380_v43  ;;  %11792 = vmatpush3.bf16.msra.mxu1 %v14070_v62  ;;  %v1943_v54 = vand.u32 4294901760, %v1942_v63  ;;  %v14220_v7 = vsub.f32 %v167_v11, %v14189_v4  ;;  %v14222_v34 = vand.u32 4294901760, %v183_v60  ;;  %v199_v42 = vmul.f32 %v119_v35, %v119_v35 }
  0x8c   :  { %11768 = vmatpush3.bf16.msra.mxu0 %v13994_v47  ;;  %1556 = vmatprep.mubr.f32.mxu1 %v20367_v15  ;;  %v1950_v62 = vand.u32 4294901760, %v1949_v56  ;;  %v20383_v17 = vand.u32 4294901760, %v14122_v51  ;;  %v19522_v20 = vand.u32 4294901760, %v14157_v45  ;;  %v19520_v11 = vand.u32 4294901760, %v14159_v5 }
  0x8d   :  { %20381 = vst [vmem:[#allocation30_spill] sm:$0xff] %v14220_v7  ;;  %20382 = vst [vmem:[#allocation38_spill] sm:$0xff] %v14222_v34  ;;  %11770 = vmatprep.subr.bf16.mxu0 %v14035_v49  ;;  %11794 = vmatprep.subr.bf16.mxu1 %v14085_v31  ;;  %v19521_v33 = vand.u32 4294901760, %v14210_v26  ;;  %v20384_v31 = vand.u32 4294901760, %v14124_v41  ;;  %v14243_v63 = vsub.f32 %v166_v24, %v14213_v12  ;;  %v14257_v39 = vand.u32 4294901760, %v199_v42 }
  0x8e   :  { %v1830_v15 = vsub.f32 %v14122_v51, %v20383_v17  ;;  %1558 = vmatmul.mubr.f32.gmra.mrb[26].mxu1 %v20371_v46  ;;  %1671 = vmatprep.mubr.f32.mxu0 %v1670_v18  ;;  %v11803_v35 = vpack.c.bf16 %v1824_v10, %v1817_v22  ;;  %v19523_v17 = vand.u32 4294901760, %v14198_v44  ;;  %v14249_v46 = vand.u32 4294901760, %v182_v28  ;;  %v134_v10 = vld [vmem:[%s19379_s0 + $0x210] sm:$0xff] }
  0x8f   :  { %v1837_v56 = vsub.f32 %v14124_v41, %v20384_v31  ;;  %11796 = vmatpush3.bf16.msra.mxu1 %v14112_v32  ;;  %1563 = vmatprep.mubr.f32.mxu1 %v20374_v55  ;;  %v198_v18 = vmul.f32 %v118_v27, %v118_v27  ;;  %v14255_v24 = vsub.f32 %v183_v60, %v14222_v34  ;;  %v20392_v31 = vld [vmem:[#allocation9_spill] sm:$0xff] }
  0x90   :  { %20385 = vst [vmem:[#allocation39_spill] sm:$0xff] %v14249_v46  ;;  %11772 = vmatpush3.bf16.msra.mxu0 %v14072_v3  ;;  %11798 = vmatprep.subr.bf16.mxu1 %v14120_v58  ;;  %20386 = vst [vmem:[#allocation40_spill] sm:$0xff] %v14257_v39  ;;  %v215_v32 = vmul.f32 %v135_v0, %v135_v0  ;;  %v11805_v55 = vpack.c.bf16 %v1950_v62, %v1943_v54  ;;  %v1831_v22 = vand.u32 4294901760, %v1830_v15 }
  0x91   :  { %11774 = vmatprep.subr.bf16.mxu0 %v14101_v53  ;;  %v1956_v58 = vsub.f32 %v14157_v45, %v19522_v20  ;;  %v1963_v60 = vsub.f32 %v14159_v5, %v19520_v11  ;;  %v1675_v27 = vsub.f32 %v14210_v26, %v19521_v33  ;;  %v1838_v0 = vand.u32 4294901760, %v1837_v56 }
  0x92   :  { %1565 = vmatmul.mubr.f32.gmra.mrb[28].mxu1 %v20380_v43  ;;  %v20387_v54 = vand.u32 4294901760, %v14196_v50  ;;  %v1851_v15 = vsub.f32 %v14198_v44, %v19523_v17  ;;  %v14283_v43 = vsub.f32 %v182_v28, %v14249_v46  ;;  %v14285_v11 = vand.u32 4294901760, %v198_v18 }
  0x93   :  { %11800 = vmatpush3.bf16.msra.mxu1 %v14167_v1  ;;  %1967 = vmatprep.mubr.f32.mxu1 %v14066_v23  ;;  %v214_v56 = vmul.f32 %v134_v10, %v134_v10  ;;  %v20389_v33 = vand.u32 4294901760, %v14220_v7  ;;  %v14293_v20 = vsub.f32 %v199_v42, %v14257_v39  ;;  %v14295_v17 = vand.u32 4294901760, %v215_v32  ;;  %v20391_v10 = vld [vmem:[#allocation8_spill] sm:$0xff] }
  0x94   :  { %v1844_v62 = vsub.f32 %v14196_v50, %v20387_v54  ;;  %20388 = vst [vmem:[#allocation41_spill] sm:$0xff] %v14285_v11  ;;  %11776 = vmatpush3.bf16.msra.mxu0 %v14116_v14  ;;  %11802 = vmatprep.subr.bf16.mxu1 %v11801_v57  ;;  %v11813_v28 = vpack.c.bf16 %v13774_v61, %v13772_v9  ;;  %v1957_v57 = vand.u32 4294901760, %v1956_v58  ;;  %v1964_v14 = vand.u32 4294901760, %v1963_v60 }
  0x95   :  { %v1684_v54 = vsub.f32 %v14220_v7, %v20389_v33  ;;  %20390 = vst [vmem:[#allocation42_spill] sm:$0xff] %v14295_v17  ;;  %11778 = vmatprep.subr.bf16.mxu0 %v14155_v40  ;;  %v11815_v23 = vpack.c.bf16 %v20392_v31, %v20391_v10  ;;  %v1676_v26 = vand.u32 4294901760, %v1675_v27  ;;  %v11807_v53 = vpack.c.bf16 %v1838_v0, %v1831_v22 }
  0x96   :  { %v20393_v33 = vand.u32 4294901760, %v14243_v63  ;;  %v1845_v42 = vand.u32 4294901760, %v1844_v62  ;;  %v1852_v7 = vand.u32 4294901760, %v1851_v15  ;;  %v19543_v3 = vand.u32 4294901760, %v14283_v43 }
  0x97   :  { %11804 = vmatpush3.bf16.msra.mxu1 %v11803_v35  ;;  %v14307_v40 = vsub.f32 %v198_v18, %v14285_v11  ;;  %v14309_v61 = vand.u32 4294901760, %v214_v56  ;;  %v1685_v58 = vand.u32 4294901760, %v1684_v54  ;;  %v20395_v22 = vand.u32 4294901760, %v14255_v24 }
  0x98   :  { %v1690_v1 = vsub.f32 %v14243_v63, %v20393_v33  ;;  %11780 = vmatpush3.bf16.msra.mxu0 %v14184_v25  ;;  %11806 = vmatprep.subr.bf16.mxu1 %v11805_v55  ;;  %v19542_v27 = vand.u32 4294901760, %v14293_v20  ;;  %v14317_v35 = vsub.f32 %v215_v32, %v14295_v17  ;;  %v11809_v0 = vpack.c.bf16 %v1964_v14, %v1957_v57 }
  0x99   :  { %20394 = vst [vmem:[#allocation8_spill] sm:$0xff] %v14309_v61  ;;  %v1699_v60 = vsub.f32 %v14255_v24, %v20395_v22  ;;  %11814 = vmatprep.subr.bf16.mxu0 %v11813_v28  ;;  %v11817_v18 = vpack.c.bf16 %v13813_v37, %v13811_v29  ;;  %v11811_v15 = vpack.c.bf16 %v1852_v7, %v1845_v42  ;;  %v19541_v54 = vand.u32 4294901760, %v14307_v40  ;;  %v20396_v22 = vld [vmem:[#allocation16_spill] sm:$0xff] }
  0x9a   :  { %v1691_v62 = vand.u32 4294901760, %v1690_v1  ;;  %v1705_v55 = vsub.f32 %v14283_v43, %v19543_v3  ;;  %v14326_v33 = vsub.f32 %v214_v56, %v14309_v61  ;;  %v11819_v14 = vpack.c.bf16 %v13832_v59, %v13830_v19  ;;  %v20412_v3 = vld [vmem:[#allocation12_spill] sm:$0xff] }
  0x9b   :  { %1677 = vmatmul.mubr.f32.vlgmr.msra.gmra.mrb[30].mxu0 %v1676_v26  ;;  %11808 = vmatpush3.bf16.msra.mxu1 %v11807_v53  ;;  %v1700_v32 = vand.u32 4294901760, %v1699_v60  ;;  %v1714_v53 = vsub.f32 %v14293_v20, %v19542_v27  ;;  %v19540_v26 = vand.u32 4294901760, %v14317_v35  ;;  %v11821_v7 = vpack.c.bf16 %v13881_v38, %v13872_v2  ;;  %v20411_v27 = vld [vmem:[#allocation36_spill] sm:$0xff] }
  0x9c   :  { %11816 = vmatpush3.bf16.msra.mxu0 %v11815_v23  ;;  %1686 = vmatprep.mubr.f32.mxu0 %v1685_v58  ;;  %v1706_v56 = vand.u32 4294901760, %v1705_v55  ;;  %v1720_v23 = vsub.f32 %v14307_v40, %v19541_v54  ;;  %v19539_v1 = vand.u32 4294901760, %v14326_v33  ;;  %v11823_v28 = vpack.c.bf16 %v13919_v13, %v13883_v6 }
  0x9d   :  { %11810 = vmatprep.subr.bf16.mxu1 %v11809_v0  ;;  %11818 = vmatprep.subr.bf16.mxu0 %v11817_v18  ;;  %v1715_v57 = vand.u32 4294901760, %v1714_v53  ;;  %v1729_v42 = vsub.f32 %v14317_v35, %v19540_v26  ;;  %v11825_v58 = vpack.c.bf16 %v13934_v36, %v13921_v21  ;;  %v20397_v18 = vld [vmem:[#allocation13_spill] sm:$0xff]  ;;  %v20406_v26 = vld [vmem:[#allocation10_spill] sm:$0xff] }
  0x9e   :  { %v1721_v60 = vand.u32 4294901760, %v1720_v23  ;;  %v1735_v0 = vsub.f32 %v14326_v33, %v19539_v1 }
  0x9f   :  { %1692 = vmatmul.mubr.f32.gmra.mrb[32].mxu0 %v1691_v62  ;;  %11812 = vmatpush3.bf16.msra.mxu1 %v11811_v15  ;;  %v20398_v62 = vld [vmem:[#allocation26_spill] sm:$0xff]  ;;  %v1730_v55 = vand.u32 4294901760, %v1729_v42 }
  0xa0   :  { %11820 = vmatpush3.bf16.msra.mxu0 %v11819_v14  ;;  %1701 = vmatprep.mubr.f32.mxu0 %v1700_v32  ;;  %v11827_v15 = vpack.c.bf16 %v20398_v62, %v20397_v18  ;;  %v20399_v14 = vld [vmem:[#allocation5_spill] sm:$0xff]  ;;  %v20400_v32 = vld [vmem:[#allocation7_spill] sm:$0xff]  ;;  %v1736_v23 = vand.u32 4294901760, %v1735_v0  ;;  %v20405_v42 = vld [vmem:[#allocation34_spill] sm:$0xff] }
  0xa1   :  { %11822 = vmatprep.subr.bf16.mxu0 %v11821_v7  ;;  %11846 = vmatprep.subr.bf16.mxu1 %v13836_v52  ;;  %v11829_v53 = vpack.c.bf16 %v20400_v32, %v20399_v14  ;;  %v20401_v7 = vld [vmem:[#allocation19_spill] sm:$0xff]  ;;  %v20408_v0 = vld [vmem:[#allocation22_spill] sm:$0xff] }
  0xa2   :  { %1969 = vmatmul.mubr.f32.vlgmr.msra.gmra.mrb[30].mxu1 %v14172_v48 }
  0xa3   :  { %1707 = vmatmul.mubr.f32.gmra.mrb[34].mxu0 %v1706_v56  ;;  %11848 = vmatpush3.bf16.msra.mxu1 %v20396_v22  ;;  %v20402_v56 = vld [vmem:[#allocation20_spill] sm:$0xff] }
  0xa4   :  { %11824 = vmatpush3.bf16.msra.mxu0 %v11823_v28  ;;  %1716 = vmatprep.mubr.f32.mxu0 %v1715_v57  ;;  %v20403_v28 = vld [vmem:[#allocation31_spill] sm:$0xff]  ;;  %v20404_v57 = vld [vmem:[#allocation32_spill] sm:$0xff] }
  0xa5   :  { %1974 = vmatprep.mubr.f32.mxu1 %v14189_v4  ;;  %11826 = vmatprep.subr.bf16.mxu0 %v11825_v58  ;;  %v11831_v1 = vpack.c.bf16 %v20404_v57, %v20403_v28  ;;  %v11833_v58 = vpack.c.bf16 %v20405_v42, %v14027_v8 }
  0xa6   :  { %1976 = vmatmul.mubr.f32.gmra.mrb[32].mxu1 %v14213_v12  ;;  %11850 = vmatprep.subr.bf16.mxu1 %v20401_v7 }
  0xa7   :  { %1722 = vmatmul.mubr.f32.gmra.mrb[36].mxu0 %v1721_v60  ;;  %11852 = vmatpush3.bf16.msra.mxu1 %v20402_v56  ;;  %v20407_v60 = vld [vmem:[#allocation11_spill] sm:$0xff] }
  0xa8   :  { %11828 = vmatpush3.bf16.msra.mxu0 %v11827_v15  ;;  %1731 = vmatprep.mubr.f32.mxu0 %v1730_v55  ;;  %v11835_v15 = vpack.c.bf16 %v20408_v0, %v14078_v16  ;;  %v20409_v55 = vld [vmem:[#allocation21_spill] sm:$0xff] }
  0xa9   :  { %1981 = vmatprep.mubr.f32.mxu1 %v14222_v34  ;;  %11830 = vmatprep.subr.bf16.mxu0 %v11829_v53  ;;  %v20410_v53 = vld [vmem:[#allocation15_spill] sm:$0xff]  ;;  %v20418_v34 = vld [vmem:[#allocation18_spill] sm:$0xff] }
  0xaa   :  { %1983 = vmatmul.mubr.f32.gmra.mrb[34].mxu1 %v14249_v46  ;;  %11854 = vmatprep.subr.bf16.mxu1 %v20406_v26  ;;  %v11837_v54 = vpack.c.bf16 %v20410_v53, %v14103_v30  ;;  %v293_v46 = vld [vmem:[%s19381_s2 + $0x208] sm:$0xff] }
  0xab   :  { %1737 = vmatmul.mubr.f32.gmra.mrb[38].mxu0 %v1736_v23  ;;  %11856 = vmatpush3.bf16.msra.mxu1 %v20407_v60  ;;  %v11839_v23 = vpack.c.bf16 %v14124_v41, %v14122_v51  ;;  %v2660_v48 = vand.u32 4294901760, %v293_v46 }
  0xac   :  { %11832 = vmatpush3.bf16.msra.mxu0 %v11831_v1  ;;  %1988 = vmatprep.mubr.f32.mxu1 %v14257_v39  ;;  %v20413_v1 = vld [vmem:[#allocation6_spill] sm:$0xff] }
  0xad   :  { %11834 = vmatprep.subr.bf16.mxu0 %v11833_v58  ;;  %11858 = vmatprep.subr.bf16.mxu1 %v20409_v55  ;;  %v11841_v58 = vpack.c.bf16 %v14159_v5, %v14157_v45  ;;  %v20416_v39 = vld [vmem:[#allocation14_spill] sm:$0xff] }
  0xae   :  { %1990 = vmatmul.mubr.f32.gmra.mrb[36].mxu1 %v14285_v11  ;;  %2132 = vmatprep.mubr.f32.mxu0 %v20411_v27  ;;  %v20414_v11 = vand.u32 4294901760, %v20411_v27  ;;  %v20417_v27 = vand.u32 4294901760, %v20416_v39 }
  0xaf   :  { %11860 = vmatpush3.bf16.msra.mxu1 %v20412_v3  ;;  %1995 = vmatprep.mubr.f32.mxu1 %v14295_v17  ;;  %v309_v17 = vld [vmem:[%s19381_s2 + $0x288] sm:$0xff] }
  0xb0   :  { %11836 = vmatpush3.bf16.msra.mxu0 %v11835_v15  ;;  %11862 = vmatprep.subr.bf16.mxu1 %v20413_v1  ;;  %v11843_v15 = vpack.c.bf16 %v14198_v44, %v14196_v50  ;;  %v2708_v4 = vand.u32 4294901760, %v309_v17 }
  0xb1   :  { %11838 = vmatprep.subr.bf16.mxu0 %v11837_v54  ;;  %v308_v54 = vld [vmem:[%s19381_s2 + $0x280] sm:$0xff] }
  0xb2   :  { %1997 = vmatmul.mubr.f32.gmra.mrb[38].mxu1 %v14309_v61  ;;  %v20415_v61 = vand.u32 4294901760, %v13772_v9  ;;  %v2705_v12 = vand.u32 4294901760, %v308_v54  ;;  %v20420_v9 = vand.u32 4294901760, %v20391_v10  ;;  %v20427_v10 = vand.u32 4294901760, %v13881_v38  ;;  %v14447_v38 = vld [vmem:[%s19381_s2 + $0x210] sm:$0xff] }
  0xb3   :  { %11864 = vmatpush3.bf16.msra.mxu1 %v13994_v47  ;;  %2275 = vmatprep.mubr.f32.mxu1 %v20414_v11  ;;  %v20423_v47 = vand.u32 4294901760, %v13813_v37  ;;  %v20431_v37 = vand.u32 4294901760, %v13934_v36 }
  0xb4   :  { %11840 = vmatpush3.bf16.msra.mxu0 %v11839_v23  ;;  %11866 = vmatprep.subr.bf16.mxu1 %v14035_v49  ;;  %v11877_v11 = vpack.c.bf16 %v20417_v27, %v20415_v61  ;;  %v14404_v23 = vld [vmem:[%s19381_s2 + $0x200] sm:$0xff]  ;;  %v20421_v61 = vand.u32 4294901760, %v20392_v31  ;;  %v20422_v49 = vand.u32 4294901760, %v13811_v29  ;;  %v20430_v29 = vand.u32 4294901760, %v13921_v21 }
  0xb5   :  { %11842 = vmatprep.subr.bf16.mxu0 %v11841_v58  ;;  %v20419_v58 = vld [vmem:[#allocation23_spill] sm:$0xff]  ;;  %v2657_v27 = vand.u32 4294901760, %v14404_v23  ;;  %v20435_v21 = vand.u32 4294901760, %v20398_v62 }
  0xb6   :  { %v11879_v39 = vpack.c.bf16 %v20421_v61, %v20420_v9  ;;  %v11881_v1 = vpack.c.bf16 %v20423_v47, %v20422_v49  ;;  %v20428_v9 = vand.u32 4294901760, %v13883_v6  ;;  %v20429_v61 = vand.u32 4294901760, %v13919_v13  ;;  %v20433_v6 = vld [vmem:[#allocation24_spill] sm:$0xff] }
  0xb7   :  { %11868 = vmatpush3.bf16.msra.mxu1 %v20418_v34  ;;  %v20424_v34 = vand.u32 4294901760, %v13830_v19  ;;  %v14436_v49 = vpack.c.bf16 %v20431_v37, %v20430_v29  ;;  %v311_v19 = vld [vmem:[%s19381_s2 + $0x298] sm:$0xff]  ;;  %v20434_v13 = vand.u32 4294901760, %v20397_v18  ;;  %v14457_v47 = vsub.f32 %v308_v54, %v2705_v12 }
  0xb8   :  { %11844 = vmatpush3.bf16.msra.mxu0 %v11843_v15  ;;  %11870 = vmatprep.subr.bf16.mxu1 %v20419_v58  ;;  %v20425_v15 = vand.u32 4294901760, %v13832_v59  ;;  %v20426_v58 = vand.u32 4294901760, %v13872_v2  ;;  %v310_v59 = vld [vmem:[%s19381_s2 + $0x290] sm:$0xff]  ;;  %v20432_v2 = vld [vmem:[#allocation29_spill] sm:$0xff]  ;;  %v14472_v62 = vsub.f32 %v14404_v23, %v2657_v27  ;;  %v14474_v54 = vsub.f32 %v293_v46, %v2660_v48 }
  0xb9   :  { %11878 = vmatprep.subr.bf16.mxu0 %v11877_v11  ;;  %v11887_v11 = vpack.c.bf16 %v20429_v61, %v20428_v9  ;;  %v14455_v36 = vpack.c.bf16 %v20435_v21, %v20434_v13  ;;  %v20438_v9 = vand.u32 4294901760, %v20400_v32  ;;  %v20440_v61 = vand.u32 4294901760, %v20403_v28 }
  0xba   :  { %v11883_v3 = vpack.c.bf16 %v20425_v15, %v20424_v34  ;;  %v11885_v31 = vpack.c.bf16 %v20427_v10, %v20426_v58  ;;  %v14459_v34 = vsub.f32 %v309_v17, %v2708_v4  ;;  %v295_v58 = vld [vmem:[%s19381_s2 + $0x218] sm:$0xff]  ;;  %v20436_v15 = vld [vmem:[#allocation30_spill] sm:$0xff]  ;;  %v20437_v10 = vand.u32 4294901760, %v20399_v14  ;;  %v20439_v17 = vld [vmem:[#allocation25_spill] sm:$0xff] }
  0xbb   :  { %2135 = vmatmul.mubr.f32.vlgmr.msra.gmra.mrb[40].mxu0 %v20432_v2  ;;  %11872 = vmatpush3.bf16.msra.mxu1 %v20433_v6  ;;  %v2711_v37 = vand.u32 4294901760, %v310_v59  ;;  %v2714_v14 = vand.u32 4294901760, %v311_v19  ;;  %v2663_v32 = vand.u32 4294901760, %v14447_v38  ;;  %v20442_v13 = vand.u32 4294901760, %v14027_v8 }
  0xbc   :  { %11880 = vmatpush3.bf16.msra.mxu0 %v11879_v39  ;;  %2141 = vmatprep.mubr.f32.mxu0 %v20436_v15  ;;  %v14469_v18 = vpack.c.bf16 %v20438_v9, %v20437_v10  ;;  %v20441_v39 = vand.u32 4294901760, %v20404_v57  ;;  %v20443_v23 = vand.u32 4294901760, %v20405_v42  ;;  %v20444_v46 = vand.u32 4294901760, %v14078_v16 }
  0xbd   :  { %11874 = vmatprep.subr.bf16.mxu1 %v20439_v17  ;;  %11882 = vmatprep.subr.bf16.mxu0 %v11881_v1  ;;  %v20445_v1 = vand.u32 4294901760, %v20408_v0  ;;  %v20446_v28 = vand.u32 4294901760, %v14103_v30  ;;  %v20447_v57 = vand.u32 4294901760, %v20410_v53  ;;  %v20448_v8 = vand.u32 4294901760, %v14122_v51  ;;  %v312_v53 = vld [vmem:[%s19381_s2 + $0x2a0] sm:$0xff] }
  0xbe   :  { %v14481_v29 = vpack.c.bf16 %v20441_v39, %v20440_v61  ;;  %v14488_v21 = vpack.c.bf16 %v20443_v23, %v20442_v13  ;;  %v2666_v61 = vand.u32 4294901760, %v295_v58  ;;  %v20449_v42 = vand.u32 4294901760, %v14124_v41  ;;  %v313_v13 = vld [vmem:[%s19381_s2 + $0x2a8] sm:$0xff] }
  0xbf   :  { %v14494_v10 = vpack.c.bf16 %v20445_v1, %v20444_v46  ;;  %v14500_v9 = vpack.c.bf16 %v20447_v57, %v20446_v28  ;;  %2144 = vmatmul.mubr.f32.gmra.mrb[42].mxu0 %v14243_v63  ;;  %11876 = vmatpush3.bf16.msra.mxu1 %v14184_v25  ;;  %v20450_v0 = vand.u32 4294901760, %v14157_v45  ;;  %v20451_v39 = vand.u32 4294901760, %v14159_v5 }
  0xc0   :  { %v14508_v16 = vpack.c.bf16 %v20449_v42, %v20448_v8  ;;  %v19576_v51 = vand.u32 4294901760, %v14457_v47  ;;  %v19572_v41 = vand.u32 4294901760, %v14459_v34  ;;  %11884 = vmatpush3.bf16.msra.mxu0 %v11883_v3  ;;  %2150 = vmatprep.mubr.f32.mxu0 %v14255_v24  ;;  %v20452_v45 = vand.u32 4294901760, %v14196_v50 }
  0xc1   :  { %v14514_v30 = vpack.c.bf16 %v20451_v39, %v20450_v0  ;;  %v20453_v5 = vand.u32 4294901760, %v14198_v44  ;;  %v14531_v46 = vpack.c.bf16 %v2708_v4, %v2705_v12  ;;  %v19565_v1 = vand.u32 4294901760, %v14472_v62  ;;  %11886 = vmatprep.subr.bf16.mxu0 %v11885_v31  ;;  %11910 = vmatprep.subr.bf16.mxu1 %v13836_v52  ;;  %v296_v44 = vld [vmem:[%s19381_s2 + $0x220] sm:$0xff]  ;;  %v297_v4 = vld [vmem:[%s19381_s2 + $0x228] sm:$0xff] }
  0xc2   :  { %v19564_v28 = vand.u32 4294901760, %v14474_v54  ;;  %v14536_v57 = vsub.f32 %v310_v59, %v2711_v37  ;;  %v14538_v3 = vsub.f32 %v311_v19, %v2714_v14  ;;  %v14541_v8 = vsub.f32 %v14447_v38, %v2663_v32 }
  0xc3   :  { %v14529_v23 = vpack.c.bf16 %v20453_v5, %v20452_v45  ;;  %20454 = vst [vmem:[#allocation9_spill] sm:$0xff] %v14531_v46  ;;  %v20455_v50 = vand.u32 4294901760, %v20432_v2  ;;  %v14551_v12 = vpack.c.bf16 %v2660_v48, %v2657_v27  ;;  %v14553_v52 = vsub.f32 %v295_v58, %v2666_v61  ;;  %2153 = vmatmul.mubr.f32.gmra.mrb[44].mxu0 %v14283_v43 }
  0xc4   :  { %v2717_v31 = vand.u32 4294901760, %v312_v53  ;;  %v2720_v59 = vand.u32 4294901760, %v313_v13  ;;  %v14557_v19 = vpack.c.bf16 %v2714_v14, %v2711_v37  ;;  %v2944_v38 = vsub.f32 %v14457_v47, %v19576_v51  ;;  %11888 = vmatpush3.bf16.msra.mxu0 %v11887_v11  ;;  %2159 = vmatprep.mubr.f32.mxu0 %v14293_v20  ;;  %v314_v37 = vld [vmem:[%s19381_s2 + $0x2b0] sm:$0xff]  ;;  %v315_v11 = vld [vmem:[%s19381_s2 + $0x2b8] sm:$0xff] }
  0xc5   :  { %2279 = vmatmul.mubr.f32.vlgmr.msra.gmra.mrb[40].mxu1 %v20455_v50  ;;  %20456 = vst [vmem:[#allocation16_spill] sm:$0xff] %v14551_v12  ;;  %v2951_v2 = vsub.f32 %v14459_v34, %v19572_v41  ;;  %v2669_v48 = vand.u32 4294901760, %v296_v44  ;;  %v2672_v27 = vand.u32 4294901760, %v297_v4  ;;  %v2832_v58 = vsub.f32 %v14472_v62, %v19565_v1  ;;  %11890 = vmatprep.subr.bf16.mxu0 %v14436_v49 }
  0xc6   :  { %11912 = vmatpush3.bf16.msra.mxu1 %v20396_v22  ;;  %20457 = vst [vmem:[#allocation13_spill] sm:$0xff] %v14557_v19  ;;  %v2839_v22 = vsub.f32 %v14474_v54, %v19564_v28  ;;  %v20458_v14 = vand.u32 4294901760, %v20436_v15  ;;  %v14581_v42 = vpack.c.bf16 %v2666_v61, %v2663_v32  ;;  %v19571_v0 = vand.u32 4294901760, %v14536_v57 }
  0xc7   :  { %v19568_v39 = vand.u32 4294901760, %v14538_v3  ;;  %v19567_v45 = vand.u32 4294901760, %v14541_v8  ;;  %v20460_v5 = vand.u32 4294901760, %v14243_v63  ;;  %11914 = vmatprep.subr.bf16.mxu1 %v20401_v7  ;;  %v14589_v50 = vpack.c.bf16 %v2720_v59, %v2717_v31  ;;  %2162 = vmatmul.mubr.f32.gmra.mrb[46].mxu0 %v14307_v40 }
  0xc8   :  { %2286 = vmatprep.mubr.f32.mxu1 %v20458_v14  ;;  %20459 = vst [vmem:[#allocation26_spill] sm:$0xff] %v14581_v42  ;;  %v14591_v28 = vsub.f32 %v312_v53, %v2717_v31  ;;  %v14593_v15 = vsub.f32 %v313_v13, %v2720_v59  ;;  %v19566_v49 = vand.u32 4294901760, %v14553_v52  ;;  %v2945_v32 = vand.u32 4294901760, %v2944_v38  ;;  %11892 = vmatpush3.bf16.msra.mxu0 %v14455_v36  ;;  %v298_v31 = vld [vmem:[%s19381_s2 + $0x230] sm:$0xff] }
  0xc9   :  { %2290 = vmatmul.mubr.f32.gmra.mrb[42].mxu1 %v20460_v5  ;;  %20461 = vst [vmem:[#allocation5_spill] sm:$0xff] %v14589_v50  ;;  %v2952_v61 = vand.u32 4294901760, %v2951_v2  ;;  %v2723_v14 = vand.u32 4294901760, %v314_v37  ;;  %v2726_v1 = vand.u32 4294901760, %v315_v11  ;;  %2168 = vmatprep.mubr.f32.mxu0 %v14317_v35  ;;  %v14600_v63 = vpack.c.bf16 %v2672_v27, %v2669_v48  ;;  %v316_v2 = vld [vmem:[%s19381_s2 + $0x2c0] sm:$0xff] }
  0xca   :  { %11916 = vmatpush3.bf16.msra.mxu1 %v20402_v56  ;;  %v14602_v7 = vsub.f32 %v296_v44, %v2669_v48  ;;  %v2833_v53 = vand.u32 4294901760, %v2832_v58  ;;  %v2840_v13 = vand.u32 4294901760, %v2839_v22  ;;  %v299_v56 = vld [vmem:[%s19381_s2 + $0x238] sm:$0xff]  ;;  %v20463_v59 = vand.u32 4294901760, %v14255_v24  ;;  %11894 = vmatprep.subr.bf16.mxu0 %v14469_v18  ;;  %v317_v58 = vld [vmem:[%s19381_s2 + $0x2c8] sm:$0xff] }
  0xcb   :  { %20462 = vst [vmem:[#allocation7_spill] sm:$0xff] %v14600_v63  ;;  %v2958_v36 = vsub.f32 %v14536_v57, %v19571_v0  ;;  %v2965_v44 = vsub.f32 %v14538_v3, %v19568_v39  ;;  %v2846_v38 = vsub.f32 %v14541_v8, %v19567_v45  ;;  %v20464_v24 = vand.u32 4294901760, %v14283_v43  ;;  %11918 = vmatprep.subr.bf16.mxu1 %v20406_v26 }
  0xcc   :  { %2297 = vmatprep.mubr.f32.mxu1 %v20463_v59  ;;  %v14628_v18 = vsub.f32 %v297_v4, %v2672_v27  ;;  %v2853_v48 = vsub.f32 %v14553_v52, %v19566_v49  ;;  %v19570_v22 = vand.u32 4294901760, %v14591_v28  ;;  %v19569_v5 = vand.u32 4294901760, %v14593_v15  ;;  %2171 = vmatmul.mubr.f32.gmra.mrb[48].mxu0 %v14326_v33 }
  0xcd   :  { %2301 = vmatmul.mubr.f32.gmra.mrb[44].mxu1 %v20464_v24  ;;  %v14640_v43 = vpack.c.bf16 %v2952_v61, %v2945_v32  ;;  %v14642_v26 = vpack.c.bf16 %v2726_v1, %v2723_v14  ;;  %v2675_v4 = vand.u32 4294901760, %v298_v31  ;;  %v2678_v27 = vand.u32 4294901760, %v299_v56  ;;  %11896 = vmatpush3.bf16.msra.mxu0 %v14481_v29 }
  0xce   :  { %11920 = vmatpush3.bf16.msra.mxu1 %v20407_v60  ;;  %v20466_v59 = vand.u32 4294901760, %v14293_v20  ;;  %v14647_v24 = vpack.c.bf16 %v2840_v13, %v2833_v53  ;;  %v14649_v49 = vsub.f32 %v314_v37, %v2723_v14  ;;  %v14651_v45 = vsub.f32 %v315_v11, %v2726_v1  ;;  %v300_v60 = vld [vmem:[%s19381_s2 + $0x240] sm:$0xff]  ;;  %11898 = vmatprep.subr.bf16.mxu0 %v14488_v21  ;;  %v301_v37 = vld [vmem:[%s19381_s2 + $0x248] sm:$0xff]  ;;  %v20470_v11 = vld [vmem:[#allocation35_spill] sm:$0xff] }
  0xcf   :  { %20465 = vst [vmem:[#allocation19_spill] sm:$0xff] %v14642_v26  ;;  %v2729_v39 = vand.u32 4294901760, %v316_v2  ;;  %11922 = vmatprep.subr.bf16.mxu1 %v20409_v55  ;;  %v2959_v32 = vand.u32 4294901760, %v2958_v36  ;;  %v2966_v29 = vand.u32 4294901760, %v2965_v44  ;;  %v2847_v61 = vand.u32 4294901760, %v2846_v38  ;;  %2489 = vmatprep.mubr.f32.mxu0 %v20470_v11  ;;  %v20471_v13 = vld [vmem:[#allocation12_spill] sm:$0xff] }
  0xd0   :  { %2308 = vmatprep.mubr.f32.mxu1 %v20466_v59  ;;  %20467 = vst [vmem:[#allocation20_spill] sm:$0xff] %v14649_v49  ;;  %20468 = vst [vmem:[#allocation31_spill] sm:$0xff] %v14651_v45  ;;  %v2732_v20 = vand.u32 4294901760, %v317_v58  ;;  %v20469_v1 = vand.u32 4294901760, %v14307_v40  ;;  %v2854_v14 = vand.u32 4294901760, %v2853_v48  ;;  %v2972_v21 = vsub.f32 %v14591_v28, %v19570_v22  ;;  %v20475_v59 = vld [vmem:[#allocation6_spill] sm:$0xff] }
  0xd1   :  { %v2979_v55 = vsub.f32 %v14593_v15, %v19569_v5  ;;  %v19575_v53 = vand.u32 4294901760, %v14602_v7  ;;  %v20472_v36 = vand.u32 4294901760, %v14317_v35  ;;  %v14674_v40 = vpack.c.bf16 %v2678_v27, %v2675_v4  ;;  %11900 = vmatpush3.bf16.msra.mxu0 %v14494_v10  ;;  %v318_v35 = vld [vmem:[%s19381_s2 + $0x2d0] sm:$0xff] }
  0xd2   :  { %2312 = vmatmul.mubr.f32.gmra.mrb[46].mxu1 %v20469_v1  ;;  %v14676_v44 = vsub.f32 %v298_v31, %v2675_v4  ;;  %v2681_v38 = vand.u32 4294901760, %v300_v60  ;;  %v19574_v48 = vand.u32 4294901760, %v14628_v18  ;;  %v14681_v1 = vsub.f32 %v299_v56, %v2678_v27  ;;  %v319_v31 = vld [vmem:[%s19381_s2 + $0x2d8] sm:$0xff]  ;;  %11902 = vmatprep.subr.bf16.mxu0 %v14500_v9  ;;  %v20481_v9 = vld [vmem:[#allocation17_spill] sm:$0xff] }
  0xd3   :  { %11924 = vmatpush3.bf16.msra.mxu1 %v20471_v13  ;;  %2319 = vmatprep.mubr.f32.mxu1 %v20472_v36  ;;  %20473 = vst [vmem:[#allocation32_spill] sm:$0xff] %v14674_v40  ;;  %v14683_v5 = vsub.f32 %v316_v2, %v2729_v39  ;;  %v2684_v22 = vand.u32 4294901760, %v301_v37  ;;  %v19573_v4 = vand.u32 4294901760, %v14649_v49  ;;  %v14693_v10 = vpack.c.bf16 %v2966_v29, %v2959_v32  ;;  %v302_v29 = vld [vmem:[%s19381_s2 + $0x250] sm:$0xff] }
  0xd4   :  { %20474 = vst [vmem:[#allocation34_spill] sm:$0xff] %v14676_v44  ;;  %11926 = vmatprep.subr.bf16.mxu1 %v20475_v59  ;;  %20476 = vst [vmem:[#allocation10_spill] sm:$0xff] %v14681_v1  ;;  %v14695_v13 = vpack.c.bf16 %v2732_v20, %v2729_v39  ;;  %v14697_v56 = vsub.f32 %v317_v58, %v2732_v20  ;;  %v19577_v2 = vand.u32 4294901760, %v14651_v45  ;;  %v20480_v27 = vand.u32 4294901760, %v14326_v33  ;;  %v20482_v20 = vld [vmem:[#allocation33_spill] sm:$0xff] }
  0xd5   :  { %20477 = vst [vmem:[#allocation11_spill] sm:$0xff] %v14683_v5  ;;  %v14702_v36 = vpack.c.bf16 %v2854_v14, %v2847_v61  ;;  %v2973_v59 = vand.u32 4294901760, %v2972_v21  ;;  %v2980_v0 = vand.u32 4294901760, %v2979_v55  ;;  %v2860_v41 = vsub.f32 %v14602_v7, %v19575_v53  ;;  %v73_v61 = vld [vmem:[%s19379_s0 + $0x28] sm:$0xff]  ;;  %11904 = vmatpush3.bf16.msra.mxu0 %v14508_v16  ;;  %v303_v14 = vld [vmem:[%s19381_s2 + $0x258] sm:$0xff]  ;;  %v320_v53 = vld [vmem:[%s19381_s2 + $0x2e0] sm:$0xff] }
  0xd6   :  { %20478 = vst [vmem:[#allocation22_spill] sm:$0xff] %v14695_v13  ;;  %20479 = vst [vmem:[#allocation21_spill] sm:$0xff] %v14697_v56  ;;  %2323 = vmatmul.mubr.f32.gmra.mrb[48].mxu1 %v20480_v27  ;;  %v14709_v39 = vsub.f32 %v300_v60, %v2681_v38  ;;  %v2867_v58 = vsub.f32 %v14628_v18, %v19574_v48  ;;  %v2735_v33 = vand.u32 4294901760, %v318_v35  ;;  %v2738_v32 = vand.u32 4294901760, %v319_v31 }
  0xd7   :  { %11928 = vmatpush3.bf16.msra.mxu1 %v20481_v9  ;;  %2621 = vmatprep.mubr.f32.mxu1 %v20470_v11  ;;  %v14722_v60 = vpack.c.bf16 %v2684_v22, %v2681_v38  ;;  %v2986_v11 = vsub.f32 %v14649_v49, %v19573_v4  ;;  %v19578_v21 = vand.u32 4294901760, %v14676_v44  ;;  %v14733_v27 = vsub.f32 %v301_v37, %v2684_v22 }
  0xd8   :  { %11930 = vmatprep.subr.bf16.mxu1 %v20482_v20  ;;  %11906 = vmatprep.subr.bf16.mxu0 %v14514_v30  ;;  %v2993_v16 = vsub.f32 %v14651_v45, %v19577_v2  ;;  %v19581_v38 = vand.u32 4294901760, %v14683_v5  ;;  %v14740_v20 = vpack.c.bf16 %v2980_v0, %v2973_v59  ;;  %v2861_v4 = vand.u32 4294901760, %v2860_v41  ;;  %v20484_v30 = vld [vmem:[#allocation18_spill] sm:$0xff]  ;;  %v20486_v41 = vld [vmem:[#allocation23_spill] sm:$0xff] }
  0xd9   :  { %20483 = vst [vmem:[#allocation15_spill] sm:$0xff] %v14733_v27  ;;  %v2687_v48 = vand.u32 4294901760, %v302_v29  ;;  %v153_v51 = vmul.f32 %v73_v61, %v73_v61  ;;  %v2868_v22 = vand.u32 4294901760, %v2867_v58  ;;  %v14746_v37 = vpack.c.bf16 %v2738_v32, %v2735_v33  ;;  %v321_v0 = vld [vmem:[%s19381_s2 + $0x2e8] sm:$0xff]  ;;  %11908 = vmatpush3.bf16.msra.mxu0 %v14529_v23 }
  0xda   :  { %v14748_v55 = vsub.f32 %v318_v35, %v2735_v33  ;;  %v2690_v2 = vand.u32 4294901760, %v303_v14  ;;  %v14755_v59 = vsub.f32 %v319_v31, %v2738_v32  ;;  %v2987_v9 = vand.u32 4294901760, %v2986_v11  ;;  %11942 = vmatprep.subr.bf16.mxu0 %v14531_v46  ;;  %v304_v11 = vld [vmem:[%s19381_s2 + $0x260] sm:$0xff] }
  0xdb   :  { %11932 = vmatpush3.bf16.msra.mxu1 %v20484_v30  ;;  %v2874_v58 = vsub.f32 %v14676_v44, %v19578_v21  ;;  %v20488_v61 = vand.u32 4294901760, %v14681_v1  ;;  %v2994_v33 = vand.u32 4294901760, %v2993_v16  ;;  %v2741_v30 = vand.u32 4294901760, %v320_v53  ;;  %v20492_v44 = vld [vmem:[#allocation28_spill] sm:$0xff] }
  0xdc   :  { %20485 = vst [vmem:[#allocation36_spill] sm:$0xff] %v14748_v55  ;;  %11934 = vmatprep.subr.bf16.mxu1 %v20486_v41  ;;  %20487 = vst [vmem:[#allocation14_spill] sm:$0xff] %v14755_v59  ;;  %v3000_v23 = vsub.f32 %v14683_v5, %v19581_v38  ;;  %v20489_v31 = vand.u32 4294901760, %v14697_v56  ;;  %v2744_v41 = vand.u32 4294901760, %v321_v0  ;;  %v20491_v38 = vld [vmem:[#allocation27_spill] sm:$0xff]  ;;  %v14786_v5 = vsub.f32 %v302_v29, %v2687_v48 }
  0xdd   :  { %v2881_v35 = vsub.f32 %v14681_v1, %v20488_v61  ;;  %v305_v61 = vld [vmem:[%s19381_s2 + $0x268] sm:$0xff]  ;;  %v14778_v1 = vand.u32 4294901760, %v153_v51  ;;  %2491 = vmatmul.mubr.f32.vlgmr.msra.gmra.mrb[50].mxu0 %v20491_v38  ;;  %v14790_v45 = vsub.f32 %v303_v14, %v2690_v2  ;;  %v2875_v16 = vand.u32 4294901760, %v2874_v58 }
  0xde   :  { %v3007_v32 = vsub.f32 %v14697_v56, %v20489_v31  ;;  %v14782_v31 = vpack.c.bf16 %v2868_v22, %v2861_v4  ;;  %v14784_v56 = vpack.c.bf16 %v2690_v2, %v2687_v48  ;;  %11944 = vmatpush3.bf16.msra.mxu0 %v14551_v12  ;;  %2496 = vmatprep.mubr.f32.mxu0 %v20492_v44  ;;  %v2693_v49 = vand.u32 4294901760, %v304_v11  ;;  %v322_v48 = vld [vmem:[%s19381_s2 + $0x2f0] sm:$0xff]  ;;  %v323_v2 = vld [vmem:[%s19381_s2 + $0x2f8] sm:$0xff] }
  0xdf   :  { %20490 = vst [vmem:[#allocation29_spill] sm:$0xff] %v14778_v1  ;;  %11936 = vmatpush3.bf16.msra.mxu1 %v20433_v6  ;;  %v2882_v21 = vand.u32 4294901760, %v2881_v35  ;;  %11946 = vmatprep.subr.bf16.mxu0 %v14557_v19  ;;  %v14794_v6 = vpack.c.bf16 %v2994_v33, %v2987_v9  ;;  %v3001_v4 = vand.u32 4294901760, %v3000_v23  ;;  %v2696_v46 = vand.u32 4294901760, %v305_v61  ;;  %v20497_v33 = vld [vmem:[#allocation37_spill] sm:$0xff]  ;;  %v306_v12 = vld [vmem:[%s19381_s2 + $0x270] sm:$0xff] }
  0xe0   :  { %11938 = vmatprep.subr.bf16.mxu1 %v20439_v17  ;;  %v3008_v22 = vand.u32 4294901760, %v3007_v32  ;;  %v14802_v29 = vpack.c.bf16 %v2744_v41, %v2741_v30  ;;  %v20494_v14 = vand.u32 4294901760, %v14709_v39  ;;  %v20495_v9 = vand.u32 4294901760, %v14733_v27 }
  0xe1   :  { %v14811_v35 = vsub.f32 %v153_v51, %v14778_v1  ;;  %2498 = vmatmul.mubr.f32.gmra.mrb[52].mxu0 %v20497_v33  ;;  %v14815_v23 = vsub.f32 %v320_v53, %v2741_v30  ;;  %v14817_v32 = vsub.f32 %v321_v0, %v2744_v41  ;;  %v19602_v19 = vand.u32 4294901760, %v14748_v55  ;;  %v20500_v51 = vld [vmem:[#allocation38_spill] sm:$0xff] }
  0xe2   :  { %20493 = vst [vmem:[#allocation24_spill] sm:$0xff] %v14802_v29  ;;  %v2888_v17 = vsub.f32 %v14709_v39, %v20494_v14  ;;  %v2895_v58 = vsub.f32 %v14733_v27, %v20495_v9  ;;  %v72_v14 = vld [vmem:[%s19379_s0 + $0x20] sm:$0xff]  ;;  %11948 = vmatpush3.bf16.msra.mxu0 %v14581_v42  ;;  %2503 = vmatprep.mubr.f32.mxu0 %v20500_v51  ;;  %v2750_v53 = vand.u32 4294901760, %v323_v2 }
  0xe3   :  { %20496 = vst [vmem:[#allocation30_spill] sm:$0xff] %v14811_v35  ;;  %11940 = vmatpush3.bf16.msra.mxu1 %v14184_v25  ;;  %20498 = vst [vmem:[#allocation25_spill] sm:$0xff] %v14815_v23  ;;  %v14826_v9 = vpack.c.bf16 %v2882_v21, %v2875_v16  ;;  %v14828_v27 = vsub.f32 %v304_v11, %v2693_v49  ;;  %v2747_v25 = vand.u32 4294901760, %v322_v48  ;;  %11950 = vmatprep.subr.bf16.mxu0 %v14589_v50  ;;  %v89_v21 = vld [vmem:[%s19379_s0 + $0xa8] sm:$0xff] }
  0xe4   :  { %20499 = vst [vmem:[#allocation35_spill] sm:$0xff] %v14817_v32  ;;  %11974 = vmatprep.subr.bf16.mxu1 %v14640_v43  ;;  %v14832_v0 = vpack.c.bf16 %v3008_v22, %v3001_v4  ;;  %v14834_v30 = vpack.c.bf16 %v2696_v46, %v2693_v49  ;;  %v14836_v41 = vsub.f32 %v305_v61, %v2696_v46  ;;  %v2889_v11 = vand.u32 4294901760, %v2888_v17  ;;  %v307_v43 = vld [vmem:[%s19381_s2 + $0x278] sm:$0xff] }
  0xe5   :  { %v2896_v16 = vand.u32 4294901760, %v2895_v58  ;;  %v152_v46 = vmul.f32 %v72_v14, %v72_v14  ;;  %v20502_v61 = vld [vmem:[#allocation39_spill] sm:$0xff]  ;;  %v3014_v4 = vsub.f32 %v14748_v55, %v19602_v19  ;;  %v20503_v22 = vand.u32 4294901760, %v14755_v59  ;;  %v88_v14 = vld [vmem:[%s19379_s0 + $0xa0] sm:$0xff] }
  0xe6   :  { %20501 = vst [vmem:[#allocation12_spill] sm:$0xff] %v14834_v30  ;;  %2623 = vmatmul.mubr.f32.vlgmr.msra.gmra.mrb[50].mxu1 %v20491_v38  ;;  %2505 = vmatmul.mubr.f32.gmra.mrb[54].mxu0 %v20502_v61  ;;  %v20504_v49 = vld [vmem:[#allocation40_spill] sm:$0xff]  ;;  %v2699_v50 = vand.u32 4294901760, %v306_v12  ;;  %v169_v55 = vmul.f32 %v89_v21, %v89_v21  ;;  %v14871_v58 = vsub.f32 %v323_v2, %v2750_v53  ;;  %v2702_v17 = vand.u32 4294901760, %v307_v43 }
  0xe7   :  { %11976 = vmatpush3.bf16.msra.mxu1 %v14647_v24  ;;  %v3021_v38 = vsub.f32 %v14755_v59, %v20503_v22  ;;  %11952 = vmatpush3.bf16.msra.mxu0 %v14600_v63  ;;  %v14864_v24 = vpack.c.bf16 %v2750_v53, %v2747_v25  ;;  %v14869_v22 = vsub.f32 %v322_v48, %v2747_v25  ;;  %v105_v63 = vld [vmem:[%s19379_s0 + $0x128] sm:$0xff]  ;;  %v14884_v25 = vand.u32 4294901760, %v152_v46 }
  0xe8   :  { %2510 = vmatprep.mubr.f32.mxu0 %v20504_v49  ;;  %2628 = vmatprep.mubr.f32.mxu1 %v20492_v44  ;;  %v14879_v21 = vpack.c.bf16 %v2896_v16, %v2889_v11  ;;  %v20506_v44 = vand.u32 4294901760, %v14811_v35  ;;  %v168_v2 = vmul.f32 %v88_v14, %v88_v14  ;;  %v20508_v53 = vld [vmem:[#allocation41_spill] sm:$0xff]  ;;  %v3015_v59 = vand.u32 4294901760, %v3014_v4  ;;  %v20511_v16 = vld [vmem:[#allocation42_spill] sm:$0xff] }
  0xe9   :  { %20505 = vst [vmem:[#allocation6_spill] sm:$0xff] %v14864_v24  ;;  %11954 = vmatprep.subr.bf16.mxu0 %v14642_v26  ;;  %11978 = vmatprep.subr.bf16.mxu1 %v14693_v10  ;;  %20507 = vst [vmem:[#allocation17_spill] sm:$0xff] %v14884_v25  ;;  %v3022_v19 = vand.u32 4294901760, %v3021_v38  ;;  %v20509_v26 = vand.u32 4294901760, %v14786_v5  ;;  %v20510_v10 = vand.u32 4294901760, %v14790_v45  ;;  %v20512_v14 = vand.u32 4294901760, %v14815_v23 }
  0xea   :  { %2630 = vmatmul.mubr.f32.gmra.mrb[52].mxu1 %v20497_v33  ;;  %v2755_v48 = vsub.f32 %v14811_v35, %v20506_v44  ;;  %2512 = vmatmul.mubr.f32.gmra.mrb[56].mxu0 %v20508_v53  ;;  %v14896_v44 = vsub.f32 %v306_v12, %v2699_v50  ;;  %v14901_v4 = vand.u32 4294901760, %v169_v55  ;;  %v185_v38 = vmul.f32 %v105_v63, %v105_v63  ;;  %v121_v63 = vld [vmem:[%s19379_s0 + $0x1a8] sm:$0xff] }
  0xeb   :  { %11980 = vmatpush3.bf16.msra.mxu1 %v14702_v36  ;;  %v2902_v33 = vsub.f32 %v14786_v5, %v20509_v26  ;;  %v2909_v11 = vsub.f32 %v14790_v45, %v20510_v10  ;;  %11956 = vmatpush3.bf16.msra.mxu0 %v14674_v40  ;;  %v3028_v36 = vsub.f32 %v14815_v23, %v20512_v14  ;;  %v104_v26 = vld [vmem:[%s19379_s0 + $0x120] sm:$0xff]  ;;  %v20514_v12 = vand.u32 4294901760, %v14817_v32 }
  0xec   :  { %2517 = vmatprep.mubr.f32.mxu0 %v20511_v16  ;;  %20513 = vst [vmem:[#allocation33_spill] sm:$0xff] %v14901_v4  ;;  %2635 = vmatprep.mubr.f32.mxu1 %v20500_v51  ;;  %v14908_v10 = vpack.c.bf16 %v2702_v17, %v2699_v50  ;;  %v14910_v40 = vsub.f32 %v307_v43, %v2702_v17  ;;  %v2756_v51 = vand.u32 4294901760, %v2755_v48  ;;  %v14925_v17 = vand.u32 4294901760, %v168_v2  ;;  %v120_v43 = vld [vmem:[%s19379_s0 + $0x1a0] sm:$0xff] }
  0xed   :  { %11958 = vmatprep.subr.bf16.mxu0 %v14695_v13  ;;  %v3035_v35 = vsub.f32 %v14817_v32, %v20514_v12  ;;  %11982 = vmatprep.subr.bf16.mxu1 %v14740_v20  ;;  %v14922_v50 = vsub.f32 %v152_v46, %v14884_v25  ;;  %v20517_v13 = vld [vmem:[#allocation8_spill] sm:$0xff]  ;;  %v11993_v12 = vpack.c.bf16 %v3022_v19, %v3015_v59  ;;  %v2903_v14 = vand.u32 4294901760, %v2902_v33  ;;  %v137_v33 = vld [vmem:[%s19379_s0 + $0x228] sm:$0xff] }
  0xee   :  { %2637 = vmatmul.mubr.f32.gmra.mrb[54].mxu1 %v20502_v61  ;;  %20516 = vst [vmem:[#allocation23_spill] sm:$0xff] %v14925_v17  ;;  %2519 = vmatmul.mubr.f32.gmra.mrb[58].mxu0 %v20517_v13  ;;  %v2910_v32 = vand.u32 4294901760, %v2909_v11  ;;  %v184_v23 = vmul.f32 %v104_v26, %v104_v26  ;;  %v3029_v20 = vand.u32 4294901760, %v3028_v36  ;;  %v14932_v46 = vsub.f32 %v169_v55, %v14901_v4 }
  0xef   :  { %20515 = vst [vmem:[#allocation18_spill] sm:$0xff] %v14922_v50  ;;  %11984 = vmatpush3.bf16.msra.mxu1 %v14782_v31  ;;  %11960 = vmatpush3.bf16.msra.mxu0 %v14722_v60  ;;  %v14934_v61 = vand.u32 4294901760, %v185_v38  ;;  %v201_v48 = vmul.f32 %v121_v63, %v121_v63  ;;  %v3036_v19 = vand.u32 4294901760, %v3035_v35  ;;  %v20520_v59 = vand.u32 4294901760, %v14828_v27 }
  0xf0   :  { %2642 = vmatprep.mubr.f32.mxu1 %v20504_v49  ;;  %20518 = vst [vmem:[#allocation27_spill] sm:$0xff] %v14932_v46  ;;  %11962 = vmatprep.subr.bf16.mxu0 %v14746_v37  ;;  %v19623_v49 = vand.u32 4294901760, %v14869_v22  ;;  %v19621_v55 = vand.u32 4294901760, %v14871_v58  ;;  %v19622_v11 = vand.u32 4294901760, %v14922_v50  ;;  %v14955_v36 = vsub.f32 %v168_v2, %v14925_v17 }
  0xf1   :  { %20519 = vst [vmem:[#allocation28_spill] sm:$0xff] %v14934_v61  ;;  %11986 = vmatprep.subr.bf16.mxu1 %v14794_v6  ;;  %v2916_v31 = vsub.f32 %v14828_v27, %v20520_v59  ;;  %2757 = vmatprep.mubr.f32.mxu0 %v2756_v51  ;;  %v20521_v6 = vand.u32 4294901760, %v14836_v41  ;;  %v11995_v63 = vpack.c.bf16 %v2910_v32, %v2903_v14  ;;  %v19624_v59 = vand.u32 4294901760, %v14910_v40  ;;  %v136_v32 = vld [vmem:[%s19379_s0 + $0x220] sm:$0xff] }
  0xf2   :  { %2644 = vmatmul.mubr.f32.gmra.mrb[56].mxu1 %v20508_v53  ;;  %v14961_v53 = vand.u32 4294901760, %v184_v23  ;;  %v200_v51 = vmul.f32 %v120_v43, %v120_v43  ;;  %v14967_v2 = vsub.f32 %v185_v38, %v14934_v61  ;;  %v14969_v26 = vand.u32 4294901760, %v201_v48 }
  0xf3   :  { %v2923_v35 = vsub.f32 %v14836_v41, %v20521_v6  ;;  %11988 = vmatpush3.bf16.msra.mxu1 %v14826_v9  ;;  %2649 = vmatprep.mubr.f32.mxu1 %v20511_v16  ;;  %v217_v9 = vmul.f32 %v137_v33, %v137_v33  ;;  %v11997_v16 = vpack.c.bf16 %v3036_v19, %v3029_v20  ;;  %v2917_v14 = vand.u32 4294901760, %v2916_v31 }
  0xf4   :  { %20522 = vst [vmem:[#allocation37_spill] sm:$0xff] %v14961_v53  ;;  %11964 = vmatpush3.bf16.msra.mxu0 %v14784_v56  ;;  %11990 = vmatprep.subr.bf16.mxu1 %v14832_v0  ;;  %20523 = vst [vmem:[#allocation38_spill] sm:$0xff] %v14969_v26  ;;  %v3042_v0 = vsub.f32 %v14869_v22, %v19623_v49  ;;  %v3049_v38 = vsub.f32 %v14871_v58, %v19621_v55  ;;  %v20524_v20 = vand.u32 4294901760, %v14896_v44 }
  0xf5   :  { %11966 = vmatprep.subr.bf16.mxu0 %v14802_v29  ;;  %v2761_v43 = vsub.f32 %v14922_v50, %v19622_v11  ;;  %v2924_v33 = vand.u32 4294901760, %v2923_v35  ;;  %v2937_v31 = vsub.f32 %v14910_v40, %v19624_v59  ;;  %v14997_v55 = vand.u32 4294901760, %v200_v51 }
  0xf6   :  { %2651 = vmatmul.mubr.f32.gmra.mrb[58].mxu1 %v20517_v13  ;;  %v2930_v19 = vsub.f32 %v14896_v44, %v20524_v20  ;;  %v14995_v13 = vsub.f32 %v184_v23, %v14961_v53  ;;  %v216_v35 = vmul.f32 %v136_v32, %v136_v32  ;;  %v20526_v11 = vand.u32 4294901760, %v14932_v46 }
  0xf7   :  { %11992 = vmatpush3.bf16.msra.mxu1 %v14879_v21  ;;  %3053 = vmatprep.mubr.f32.mxu1 %v14778_v1  ;;  %20525 = vst [vmem:[#allocation39_spill] sm:$0xff] %v14997_v55  ;;  %v15005_v49 = vsub.f32 %v201_v48, %v14969_v26  ;;  %v15007_v59 = vand.u32 4294901760, %v217_v9  ;;  %v12005_v23 = vpack.c.bf16 %v14459_v34, %v14457_v47  ;;  %v3050_v6 = vand.u32 4294901760, %v3049_v38 }
  0xf8   :  { %11968 = vmatpush3.bf16.msra.mxu0 %v14834_v30  ;;  %11994 = vmatprep.subr.bf16.mxu1 %v11993_v12  ;;  %v2770_v20 = vsub.f32 %v14932_v46, %v20526_v11  ;;  %v12007_v32 = vpack.c.bf16 %v14474_v54, %v14472_v62  ;;  %v3043_v12 = vand.u32 4294901760, %v3042_v0  ;;  %v2762_v1 = vand.u32 4294901760, %v2761_v43 }
  0xf9   :  { %20527 = vst [vmem:[#allocation40_spill] sm:$0xff] %v15005_v49  ;;  %20528 = vst [vmem:[#allocation41_spill] sm:$0xff] %v15007_v59  ;;  %11970 = vmatprep.subr.bf16.mxu0 %v14864_v24  ;;  %v11999_v30 = vpack.c.bf16 %v2924_v33, %v2917_v14  ;;  %v20529_v11 = vand.u32 4294901760, %v14955_v36  ;;  %v2931_v48 = vand.u32 4294901760, %v2930_v19  ;;  %v2938_v46 = vand.u32 4294901760, %v2937_v31 }
  0xfa   :  { %v19641_v50 = vand.u32 4294901760, %v14995_v13  ;;  %v15019_v24 = vsub.f32 %v200_v51, %v14997_v55  ;;  %v15021_v29 = vand.u32 4294901760, %v216_v35  ;;  %v2771_v0 = vand.u32 4294901760, %v2770_v20 }
  0xfb   :  { %v2776_v21 = vsub.f32 %v14955_v36, %v20529_v11  ;;  %11996 = vmatpush3.bf16.msra.mxu1 %v11995_v63  ;;  %v20532_v14 = vand.u32 4294901760, %v14967_v2  ;;  %v19640_v43 = vand.u32 4294901760, %v15005_v49  ;;  %v15029_v63 = vsub.f32 %v217_v9, %v15007_v59 }
  0xfc   :  { %20530 = vst [vmem:[#allocation42_spill] sm:$0xff] %v15019_v24  ;;  %20531 = vst [vmem:[#allocation8_spill] sm:$0xff] %v15021_v29  ;;  %11972 = vmatpush3.bf16.msra.mxu0 %v14908_v10  ;;  %11998 = vmatprep.subr.bf16.mxu1 %v11997_v16  ;;  %v12001_v33 = vpack.c.bf16 %v3050_v6, %v3043_v12  ;;  %v12009_v51 = vpack.c.bf16 %v14538_v3, %v14536_v57  ;;  %v19638_v20 = vand.u32 4294901760, %v15019_v24 }
  0xfd   :  { %v2785_v38 = vsub.f32 %v14967_v2, %v20532_v14  ;;  %20533 = vst [vmem:[#allocation43_spill] sm:$0xff] %v15029_v63  ;;  %12006 = vmatprep.subr.bf16.mxu0 %v12005_v23  ;;  %v2777_v19 = vand.u32 4294901760, %v2776_v21  ;;  %v12003_v31 = vpack.c.bf16 %v2938_v46, %v2931_v48  ;;  %v2791_v16 = vsub.f32 %v14995_v13, %v19641_v50  ;;  %v20536_v14 = vld [vmem:[#allocation20_spill] sm:$0xff]  ;;  %v20550_v50 = vld [vmem:[#allocation35_spill] sm:$0xff] }
  0xfe   :  { %v15038_v11 = vsub.f32 %v216_v35, %v15021_v29  ;;  %v12011_v6 = vpack.c.bf16 %v14553_v52, %v14541_v8  ;;  %v12013_v46 = vpack.c.bf16 %v14593_v15, %v14591_v28  ;;  %v2806_v21 = vsub.f32 %v15019_v24, %v19638_v20 }
  0xff   :  { %2763 = vmatmul.mubr.f32.vlgmr.msra.gmra.mrb[60].mxu0 %v2762_v1  ;;  %12000 = vmatpush3.bf16.msra.mxu1 %v11999_v30  ;;  %v2786_v9 = vand.u32 4294901760, %v2785_v38  ;;  %v2800_v1 = vsub.f32 %v15005_v49, %v19640_v43  ;;  %v19637_v30 = vand.u32 4294901760, %v15029_v63  ;;  %v2792_v35 = vand.u32 4294901760, %v2791_v16  ;;  %v20537_v38 = vld [vmem:[#allocation31_spill] sm:$0xff]  ;;  %v20539_v16 = vld [vmem:[#allocation34_spill] sm:$0xff]  ;;  %v15081_v43 = vld [vmem:[%s19381_s2 + $0x380] sm:$0xff] }
 0x100   :  { %20534 = vst [vmem:[#allocation44_spill] sm:$0xff] %v15038_v11  ;;  %12008 = vmatpush3.bf16.msra.mxu0 %v12007_v32  ;;  %2772 = vmatprep.mubr.f32.mxu0 %v2771_v0  ;;  %v19639_v23 = vand.u32 4294901760, %v15038_v11  ;;  %v12015_v32 = vpack.c.bf16 %v14628_v18, %v14602_v7  ;;  %v20535_v0 = vld [vmem:[#allocation9_spill] sm:$0xff]  ;;  %v20556_v24 = vand.u32 4294901760, %v14474_v54  ;;  %v20558_v49 = vand.u32 4294901760, %v14538_v3 }
 0x101   :  { %12002 = vmatprep.subr.bf16.mxu1 %v12001_v33  ;;  %12010 = vmatprep.subr.bf16.mxu0 %v12009_v51  ;;  %v2801_v12 = vand.u32 4294901760, %v2800_v1  ;;  %v2815_v48 = vsub.f32 %v15029_v63, %v19637_v30  ;;  %v12017_v33 = vpack.c.bf16 %v20537_v38, %v20536_v14  ;;  %v20538_v51 = vld [vmem:[#allocation16_spill] sm:$0xff]  ;;  %v20542_v30 = vld [vmem:[#allocation21_spill] sm:$0xff]  ;;  %v20560_v54 = vand.u32 4294901760, %v14541_v8 }
 0x102   :  { %v20566_v8 = vand.u32 4294901760, %v14628_v18  ;;  %v20571_v18 = vand.u32 4294901760, %v20539_v16 }
 0x103   :  { %2778 = vmatmul.mubr.f32.gmra.mrb[62].mxu0 %v2777_v19  ;;  %12004 = vmatpush3.bf16.msra.mxu1 %v12003_v31  ;;  %v2807_v19 = vand.u32 4294901760, %v2806_v21  ;;  %v2821_v31 = vsub.f32 %v15038_v11, %v19639_v23  ;;  %v2816_v1 = vand.u32 4294901760, %v2815_v48  ;;  %v20545_v48 = vld [vmem:[#allocation36_spill] sm:$0xff] }
 0x104   :  { %12012 = vmatpush3.bf16.msra.mxu0 %v12011_v6  ;;  %2787 = vmatprep.mubr.f32.mxu0 %v2786_v9  ;;  %v20540_v6 = vld [vmem:[#allocation10_spill] sm:$0xff] }
 0x105   :  { %12014 = vmatprep.subr.bf16.mxu0 %v12013_v46  ;;  %12038 = vmatprep.subr.bf16.mxu1 %v20535_v0  ;;  %v12019_v9 = vpack.c.bf16 %v20540_v6, %v20539_v16  ;;  %v20541_v46 = vld [vmem:[#allocation11_spill] sm:$0xff]  ;;  %v2822_v21 = vand.u32 4294901760, %v2821_v31  ;;  %v15088_v31 = vld [vmem:[%s19381_s2 + $0x388] sm:$0xff] }
 0x106   :  { %3055 = vmatmul.mubr.f32.vlgmr.msra.gmra.mrb[60].mxu1 %v14884_v25  ;;  %v12021_v20 = vpack.c.bf16 %v20542_v30, %v20541_v46  ;;  %v20557_v25 = vand.u32 4294901760, %v14536_v57  ;;  %v20561_v57 = vand.u32 4294901760, %v14553_v52 }
 0x107   :  { %2793 = vmatmul.mubr.f32.gmra.mrb[64].mxu0 %v2792_v35  ;;  %12040 = vmatpush3.bf16.msra.mxu1 %v20538_v51  ;;  %v20543_v35 = vld [vmem:[#allocation13_spill] sm:$0xff]  ;;  %v20565_v51 = vand.u32 4294901760, %v14602_v7  ;;  %v326_v7 = vld [vmem:[%s19381_s2 + $0x310] sm:$0xff] }
 0x108   :  { %12016 = vmatpush3.bf16.msra.mxu0 %v12015_v32  ;;  %2802 = vmatprep.mubr.f32.mxu0 %v2801_v12  ;;  %v20544_v32 = vld [vmem:[#allocation15_spill] sm:$0xff]  ;;  %v15145_v3 = vpack.c.bf16 %v20561_v57, %v20560_v54 }
 0x109   :  { %3060 = vmatprep.mubr.f32.mxu1 %v14901_v4  ;;  %12018 = vmatprep.subr.bf16.mxu0 %v12017_v33  ;;  %v12023_v12 = vpack.c.bf16 %v20544_v32, %v14709_v39  ;;  %v20546_v33 = vld [vmem:[#allocation14_spill] sm:$0xff]  ;;  %v12033_v4 = vpack.c.bf16 %v14871_v58, %v14869_v22  ;;  %v15159_v52 = vpack.c.bf16 %v20566_v8, %v20565_v51  ;;  %v20577_v8 = vand.u32 4294901760, %v20545_v48 }
 0x10a   :  { %3062 = vmatmul.mubr.f32.gmra.mrb[62].mxu1 %v14925_v17  ;;  %12042 = vmatprep.subr.bf16.mxu1 %v20543_v35  ;;  %v12025_v23 = vpack.c.bf16 %v20546_v33, %v20545_v48  ;;  %v15100_v17 = vld [vmem:[%s19381_s2 + $0x300] sm:$0xff]  ;;  %v20578_v16 = vand.u32 4294901760, %v20546_v33  ;;  %v327_v48 = vld [vmem:[%s19381_s2 + $0x318] sm:$0xff] }
 0x10b   :  { %2808 = vmatmul.mubr.f32.gmra.mrb[66].mxu0 %v2807_v19  ;;  %12044 = vmatpush3.bf16.msra.mxu1 %v14581_v42  ;;  %v20547_v19 = vld [vmem:[#allocation5_spill] sm:$0xff]  ;;  %v20555_v42 = vand.u32 4294901760, %v14472_v62 }
 0x10c   :  { %12020 = vmatpush3.bf16.msra.mxu0 %v12019_v9  ;;  %2817 = vmatprep.mubr.f32.mxu0 %v2816_v1  ;;  %v20548_v9 = vld [vmem:[#allocation7_spill] sm:$0xff]  ;;  %v20549_v1 = vld [vmem:[#allocation25_spill] sm:$0xff] }
 0x10d   :  { %3067 = vmatprep.mubr.f32.mxu1 %v14934_v61  ;;  %12022 = vmatprep.subr.bf16.mxu0 %v12021_v20  ;;  %v12027_v20 = vpack.c.bf16 %v14790_v45, %v14786_v5  ;;  %v12029_v61 = vpack.c.bf16 %v20550_v50, %v20549_v1  ;;  %v9333_v11 = vpop.f32.mrb[0].mxu0  ;;  %v15125_v35 = vpack.c.bf16 %v20556_v24, %v20555_v42  ;;  %v20562_v42 = vand.u32 4294901760, %v14591_v28 }
 0x10e   :  { %3069 = vmatmul.mubr.f32.gmra.mrb[64].mxu1 %v14961_v53  ;;  %12046 = vmatprep.subr.bf16.mxu1 %v20547_v19  ;;  %v3791_v53 = vand.u32 4294901760, %v15081_v43  ;;  %v20552_v19 = vld [vmem:[#allocation30_spill] sm:$0xff]  ;;  %v9334_v62 = vpop.f32.mrb[1].mxu0  ;;  %v20563_v24 = vand.u32 4294901760, %v14593_v15  ;;  %v20568_v28 = vand.u32 4294901760, %v20536_v14  ;;  %v20569_v15 = vand.u32 4294901760, %v20537_v38 }
 0x10f   :  { %2823 = vmatmul.mubr.f32.gmra.mrb[68].mxu0 %v2822_v21  ;;  %12048 = vmatpush3.bf16.msra.mxu1 %v20548_v9  ;;  %v325_v21 = vld [vmem:[%s19381_s2 + $0x308] sm:$0xff]  ;;  %v3794_v9 = vand.u32 4294901760, %v15088_v31  ;;  %v20573_v14 = vand.u32 4294901760, %v20541_v46  ;;  %v20574_v38 = vand.u32 4294901760, %v20542_v30  ;;  %v20580_v30 = vand.u32 4294901760, %v14786_v5 }
 0x110   :  { %12024 = vmatpush3.bf16.msra.mxu0 %v12023_v12  ;;  %3074 = vmatprep.mubr.f32.mxu1 %v14969_v26  ;;  %v20551_v12 = vld [vmem:[#allocation19_spill] sm:$0xff]  ;;  %v12031_v26 = vpack.c.bf16 %v14836_v41, %v14828_v27  ;;  %v15162_v54 = vsub.f32 %v15081_v43, %v3791_v53  ;;  %v15168_v57 = vpack.c.bf16 %v20569_v15, %v20568_v28  ;;  %v20581_v46 = vand.u32 4294901760, %v14790_v45 }
 0x111   :  { %12026 = vmatprep.subr.bf16.mxu0 %v12025_v23  ;;  %12050 = vmatprep.subr.bf16.mxu1 %v20551_v12  ;;  %v20553_v23 = vand.u32 4294901760, %v14457_v47  ;;  %v20554_v12 = vand.u32 4294901760, %v14459_v34  ;;  %v342_v47 = vld [vmem:[%s19381_s2 + $0x390] sm:$0xff]  ;;  %v343_v34 = vld [vmem:[%s19381_s2 + $0x398] sm:$0xff]  ;;  %v15187_v51 = vpack.c.bf16 %v20574_v38, %v20573_v14  ;;  %v15199_v28 = vpack.c.bf16 %v20578_v16, %v20577_v8 }
 0x112   :  { %3076 = vmatmul.mubr.f32.gmra.mrb[66].mxu1 %v14997_v55  ;;  %3218 = vmatprep.mubr.f32.mxu0 %v20552_v19  ;;  %v15131_v55 = vpack.c.bf16 %v20558_v49, %v20557_v25  ;;  %v15151_v25 = vpack.c.bf16 %v20563_v24, %v20562_v42  ;;  %v3743_v49 = vand.u32 4294901760, %v15100_v17  ;;  %20567 = vst [vmem:[#allocation9_spill] sm:$0xff] %v15162_v54  ;;  %v20576_v42 = vand.u32 4294901760, %v20544_v32 }
 0x113   :  { %v15119_v63 = vpack.c.bf16 %v20554_v12, %v20553_v23  ;;  %v20559_v12 = vld [vmem:[#allocation32_spill] sm:$0xff]  ;;  %3081 = vmatprep.mubr.f32.mxu1 %v15007_v59  ;;  %v3746_v23 = vand.u32 4294901760, %v325_v21  ;;  %v9335_v59 = vadd.f32 %v9334_v62, %v9333_v11  ;;  %v3797_v11 = vand.u32 4294901760, %v342_v47  ;;  %v9380_v14 = vpop.f32.mrb[0].mxu1 }
 0x114   :  { %12052 = vmatpush3.bf16.msra.mxu1 %v20559_v12  ;;  %12028 = vmatpush3.bf16.msra.mxu0 %v12027_v20  ;;  %v20564_v12 = vld [vmem:[#allocation22_spill] sm:$0xff]  ;;  %v15171_v20 = vsub.f32 %v15088_v31, %v3794_v9  ;;  %v3800_v62 = vand.u32 4294901760, %v343_v34  ;;  %v20575_v31 = vand.u32 4294901760, %v14709_v39  ;;  %v15208_v39 = vpack.c.bf16 %v20581_v46, %v20580_v30  ;;  %v328_v46 = vld [vmem:[%s19381_s2 + $0x320] sm:$0xff] }
 0x115   :  { %12054 = vmatprep.subr.bf16.mxu1 %v20564_v12  ;;  %12030 = vmatprep.subr.bf16.mxu0 %v12029_v61  ;;  %v20572_v61 = vand.u32 4294901760, %v20540_v6  ;;  %v20579_v6 = vand.u32 4294901760, %v20552_v19  ;;  %v15211_v32 = vsub.f32 %v15100_v17, %v3743_v49  ;;  %v15213_v15 = vsub.f32 %v325_v21, %v3746_v23 }
 0x116   :  { %20570 = vst [vmem:[#allocation20_spill] sm:$0xff] %v15171_v20  ;;  %3083 = vmatmul.mubr.f32.gmra.mrb[68].mxu1 %v15021_v29  ;;  %v15193_v24 = vpack.c.bf16 %v20576_v42, %v20575_v31  ;;  %v20584_v33 = vand.u32 4294901760, %v20549_v1  ;;  %v20585_v5 = vand.u32 4294901760, %v20550_v50  ;;  %v20586_v45 = vand.u32 4294901760, %v14828_v27  ;;  %v344_v27 = vld [vmem:[%s19381_s2 + $0x3a0] sm:$0xff]  ;;  %v9381_v42 = vpop.f32.mrb[1].mxu1 }
 0x117   :  { %v15181_v43 = vpack.c.bf16 %v20572_v61, %v20571_v18  ;;  %3361 = vmatprep.mubr.f32.mxu1 %v20579_v6  ;;  %20582 = vst [vmem:[#allocation31_spill] sm:$0xff] %v15211_v32  ;;  %20583 = vst [vmem:[#allocation34_spill] sm:$0xff] %v15213_v15  ;;  %v20587_v17 = vand.u32 4294901760, %v14836_v41  ;;  %v3749_v21 = vand.u32 4294901760, %v326_v7  ;;  %v19668_v61 = vand.u32 4294901760, %v15162_v54  ;;  %v345_v41 = vld [vmem:[%s19381_s2 + $0x3a8] sm:$0xff] }
 0x118   :  { %12056 = vmatpush3.bf16.msra.mxu1 %v14722_v60  ;;  %12032 = vmatpush3.bf16.msra.mxu0 %v12031_v26  ;;  %v15223_v19 = vpack.c.bf16 %v20585_v5, %v20584_v33  ;;  %v20588_v26 = vand.u32 4294901760, %v14869_v22  ;;  %v20589_v38 = vand.u32 4294901760, %v14871_v58  ;;  %v15238_v50 = vsub.f32 %v342_v47, %v3797_v11  ;;  %v329_v33 = vld [vmem:[%s19381_s2 + $0x328] sm:$0xff] }
 0x119   :  { %12058 = vmatprep.subr.bf16.mxu1 %v14746_v37  ;;  %v15229_v18 = vpack.c.bf16 %v20587_v17, %v20586_v45  ;;  %12034 = vmatprep.subr.bf16.mxu0 %v12033_v4  ;;  %v15240_v31 = vsub.f32 %v343_v34, %v3800_v62  ;;  %v19667_v4 = vand.u32 4294901760, %v15171_v20  ;;  %v20592_v22 = vand.u32 4294901760, %v14896_v44  ;;  %v346_v17 = vld [vmem:[%s19381_s2 + $0x3b0] sm:$0xff] }
 0x11a   :  { %v15236_v1 = vpack.c.bf16 %v20589_v38, %v20588_v26  ;;  %20590 = vst [vmem:[#allocation10_spill] sm:$0xff] %v15238_v50  ;;  %v20593_v58 = vand.u32 4294901760, %v14910_v40  ;;  %v15255_v47 = vpack.c.bf16 %v3794_v9, %v3791_v53  ;;  %v15257_v34 = vpack.c.bf16 %v3746_v23, %v3743_v49  ;;  %v20596_v49 = vld [vmem:[#allocation24_spill] sm:$0xff]  ;;  %v9336_v26 = vpop.f32.mrb[2].mxu0 }
 0x11b   :  { %20591 = vst [vmem:[#allocation11_spill] sm:$0xff] %v15240_v31  ;;  %v3752_v16 = vand.u32 4294901760, %v327_v48  ;;  %v9382_v6 = vadd.f32 %v9381_v42, %v9380_v14  ;;  %v15260_v30 = vpack.c.bf16 %v3800_v62, %v3797_v11  ;;  %v19673_v5 = vand.u32 4294901760, %v15211_v32 }
 0x11c   :  { %v15253_v8 = vpack.c.bf16 %v20593_v58, %v20592_v22  ;;  %12060 = vmatpush3.bf16.msra.mxu1 %v14784_v56  ;;  %v19674_v53 = vand.u32 4294901760, %v15213_v15  ;;  %v20595_v9 = vpack.c.bf16 %v14910_v40, %v14896_v44  ;;  %v15274_v23 = vsub.f32 %v326_v7, %v3749_v21  ;;  %v9383_v40 = vpop.f32.mrb[2].mxu1 }
 0x11d   :  { %20594 = vst [vmem:[#allocation21_spill] sm:$0xff] %v15260_v30  ;;  %12062 = vmatprep.subr.bf16.mxu1 %v20596_v49  ;;  %v3803_v11 = vand.u32 4294901760, %v344_v27  ;;  %v3806_v62 = vand.u32 4294901760, %v345_v41  ;;  %v4030_v45 = vsub.f32 %v15162_v54, %v19668_v61  ;;  %v15282_v14 = vadd.f32 %v9382_v6, %v9335_v59  ;;  %v9384_v38 = vpop.f32.mrb[3].mxu1  ;;  %v347_v59 = vld [vmem:[%s19381_s2 + $0x3b8] sm:$0xff] }
 0x11e   :  { %12036 = vmatpush3.bf16.msra.mxu0 %v20595_v9  ;;  %20597 = vst [vmem:[#allocation15_spill] sm:$0xff] %v15274_v23  ;;  %v4037_v44 = vsub.f32 %v15171_v20, %v19667_v4  ;;  %v15290_v42 = vpack.c.bf16 %v3752_v16, %v3749_v21  ;;  %v15292_v22 = vsub.f32 %v327_v48, %v3752_v16  ;;  %v3755_v58 = vand.u32 4294901760, %v328_v46  ;;  %v20601_v6 = vld [vmem:[#allocation12_spill] sm:$0xff]  ;;  %v20602_v16 = vld [vmem:[#allocation27_spill] sm:$0xff] }
 0x11f   :  { %12070 = vmatprep.subr.bf16.mxu0 %v15119_v63  ;;  %v3758_v9 = vand.u32 4294901760, %v329_v33  ;;  %v20600_v63 = vld [vmem:[#allocation18_spill] sm:$0xff]  ;;  %v9385_v4 = vadd.f32 %v9384_v38, %v9383_v40  ;;  %v3918_v61 = vsub.f32 %v15211_v32, %v19673_v5  ;;  %v3925_v48 = vsub.f32 %v15213_v15, %v19674_v53  ;;  %v9337_v53 = vpop.f32.mrb[3].mxu0 }
 0x120   :  { %20598 = vst [vmem:[#allocation36_spill] sm:$0xff] %v15290_v42  ;;  %20599 = vst [vmem:[#allocation14_spill] sm:$0xff] %v15292_v22  ;;  %12064 = vmatpush3.bf16.msra.mxu1 %v20601_v6  ;;  %v3809_v21 = vand.u32 4294901760, %v346_v17  ;;  %v15307_v7 = vpack.c.bf16 %v3806_v62, %v3803_v11  ;;  %v15309_v29 = vsub.f32 %v344_v27, %v3803_v11  ;;  %v4031_v40 = vand.u32 4294901760, %v4030_v45  ;;  %v330_v38 = vld [vmem:[%s19381_s2 + $0x330] sm:$0xff]  ;;  %v331_v11 = vld [vmem:[%s19381_s2 + $0x338] sm:$0xff] }
 0x121   :  { %3221 = vmatmul.mubr.f32.vlgmr.msra.gmra.mrb[70].mxu0 %v20600_v63  ;;  %v15311_v20 = vsub.f32 %v345_v41, %v3806_v62  ;;  %v20606_v5 = vld [vmem:[#allocation6_spill] sm:$0xff]  ;;  %v3812_v15 = vand.u32 4294901760, %v347_v59  ;;  %v20607_v32 = vand.u32 4294901760, %v15238_v50  ;;  %v20608_v27 = vand.u32 4294901760, %v15240_v31 }
 0x122   :  { %12072 = vmatpush3.bf16.msra.mxu0 %v15125_v35  ;;  %3227 = vmatprep.mubr.f32.mxu0 %v20602_v16  ;;  %20603 = vst [vmem:[#allocation25_spill] sm:$0xff] %v15307_v7  ;;  %20604 = vst [vmem:[#allocation35_spill] sm:$0xff] %v15309_v29  ;;  %v4038_v35 = vand.u32 4294901760, %v4037_v44  ;;  %v9338_v62 = vadd.f32 %v9337_v53, %v9336_v26  ;;  %v15327_v45 = vpack.c.bf16 %v3758_v9, %v3755_v58  ;;  %v9339_v26 = vpop.f32.mrb[4].mxu0 }
 0x123   :  { %20605 = vst [vmem:[#allocation30_spill] sm:$0xff] %v15311_v20  ;;  %12066 = vmatprep.subr.bf16.mxu1 %v20606_v5  ;;  %12074 = vmatprep.subr.bf16.mxu0 %v15131_v55  ;;  %v4044_v54 = vsub.f32 %v15238_v50, %v20607_v32  ;;  %v4051_v41 = vsub.f32 %v15240_v31, %v20608_v27  ;;  %v3919_v32 = vand.u32 4294901760, %v3918_v61  ;;  %v3926_v44 = vand.u32 4294901760, %v3925_v48  ;;  %v15346_v61 = vld [vmem:[%s19381_s2 + $0x3c0] sm:$0xff] }
 0x124   :  { %20609 = vst [vmem:[#allocation22_spill] sm:$0xff] %v15327_v45  ;;  %v15329_v7 = vsub.f32 %v328_v46, %v3755_v58  ;;  %v15331_v55 = vsub.f32 %v329_v33, %v3758_v9  ;;  %12068 = vmatpush3.bf16.msra.mxu1 %v14908_v10  ;;  %v15335_v50 = vsub.f32 %v346_v17, %v3809_v21  ;;  %v3761_v27 = vand.u32 4294901760, %v330_v38  ;;  %v9340_v17 = vpop.f32.mrb[5].mxu0 }
 0x125   :  { %3230 = vmatmul.mubr.f32.gmra.mrb[72].mxu0 %v14955_v36  ;;  %v15339_v53 = vadd.f32 %v9385_v4, %v9338_v62  ;;  %v3764_v46 = vand.u32 4294901760, %v331_v11  ;;  %12102 = vmatprep.subr.bf16.mxu1 %v20535_v0  ;;  %v15350_v9 = vpack.c.bf16 %v4038_v35, %v4031_v40  ;;  %v15352_v4 = vpack.c.bf16 %v3812_v15, %v3809_v21  ;;  %v20616_v21 = vld [vmem:[#allocation16_spill] sm:$0xff] }
 0x126   :  { %20610 = vst [vmem:[#allocation24_spill] sm:$0xff] %v15329_v7  ;;  %20611 = vst [vmem:[#allocation18_spill] sm:$0xff] %v15331_v55  ;;  %12076 = vmatpush3.bf16.msra.mxu0 %v15145_v3  ;;  %3236 = vmatprep.mubr.f32.mxu0 %v14967_v2  ;;  %v9386_v3 = vpop.f32.mrb[4].mxu1  ;;  %v4045_v48 = vand.u32 4294901760, %v4044_v54  ;;  %v4052_v62 = vand.u32 4294901760, %v4051_v41  ;;  %v20614_v33 = vand.u32 4294901760, %v20600_v63  ;;  %v9341_v58 = vadd.f32 %v9340_v17, %v9339_v26 }
 0x127   :  { %20612 = vst [vmem:[#allocation12_spill] sm:$0xff] %v15335_v50  ;;  %12078 = vmatprep.subr.bf16.mxu0 %v15151_v25  ;;  %20613 = vst [vmem:[#allocation27_spill] sm:$0xff] %v15352_v4  ;;  %v9387_v31 = vpop.f32.mrb[5].mxu1  ;;  %v15356_v45 = vsub.f32 %v347_v59, %v3812_v15  ;;  %v349_v25 = vld [vmem:[%s19381_s2 + $0x3c8] sm:$0xff]  ;;  %v19689_v0 = vand.u32 4294901760, %v15309_v29  ;;  %v15365_v35 = vpack.c.bf16 %v3926_v44, %v3919_v32  ;;  %v3815_v15 = vand.u32 4294901760, %v15346_v61 }
 0x128   :  { %3365 = vmatmul.mubr.f32.vlgmr.msra.gmra.mrb[70].mxu1 %v20614_v33  ;;  %v9388_v54 = vadd.f32 %v9387_v31, %v9386_v3  ;;  %v15367_v63 = vsub.f32 %v330_v38, %v3761_v27  ;;  %v20617_v59 = vld [vmem:[#allocation40_spill] sm:$0xff]  ;;  %v9342_v41 = vpop.f32.mrb[6].mxu0  ;;  %v15372_v26 = vpack.c.bf16 %v3764_v46, %v3761_v27  ;;  %v20619_v33 = vand.u32 4294901760, %v15274_v23  ;;  %v9389_v44 = vpop.f32.mrb[6].mxu1 }
 0x129   :  { %20615 = vst [vmem:[#allocation6_spill] sm:$0xff] %v15356_v45  ;;  %3239 = vmatmul.mubr.f32.gmra.mrb[74].mxu0 %v14995_v13  ;;  %12104 = vmatpush3.bf16.msra.mxu1 %v20616_v21  ;;  %v20620_v21 = vand.u32 4294901760, %v15292_v22  ;;  %v20621_v38 = vand.u32 4294901760, %v20602_v16  ;;  %v15385_v3 = vpack.c.bf16 %v4052_v62, %v4045_v48  ;;  %v15387_v27 = vsub.f32 %v331_v11, %v3764_v46  ;;  %v333_v16 = vld [vmem:[%s19381_s2 + $0x348] sm:$0xff] }
 0x12a   :  { %12080 = vmatpush3.bf16.msra.mxu0 %v15159_v52  ;;  %3245 = vmatprep.mubr.f32.mxu0 %v20617_v59  ;;  %20618 = vst [vmem:[#allocation16_spill] sm:$0xff] %v15372_v26  ;;  %v3932_v17 = vsub.f32 %v15274_v23, %v20619_v33  ;;  %v15383_v32 = vadd.f32 %v9388_v54, %v9341_v58  ;;  %v9343_v52 = vpop.f32.mrb[7].mxu0  ;;  %v3818_v40 = vand.u32 4294901760, %v349_v25  ;;  %v332_v33 = vld [vmem:[%s19381_s2 + $0x340] sm:$0xff]  ;;  %v9390_v54 = vpop.f32.mrb[7].mxu1  ;;  %v20624_v46 = vand.u32 4294901760, %v15311_v20 }
 0x12b   :  { %v3939_v31 = vsub.f32 %v15292_v22, %v20620_v21  ;;  %3372 = vmatprep.mubr.f32.mxu1 %v20621_v38  ;;  %12082 = vmatprep.subr.bf16.mxu0 %v15168_v57  ;;  %v20622_v21 = vand.u32 4294901760, %v14955_v36  ;;  %v20623_v57 = vld [vmem:[#allocation13_spill] sm:$0xff]  ;;  %v9344_v58 = vadd.f32 %v9343_v52, %v9342_v41  ;;  %v4058_v11 = vsub.f32 %v15309_v29, %v19689_v0  ;;  %v20625_v62 = vld [vmem:[#allocation42_spill] sm:$0xff]  ;;  %v20627_v52 = vld [vmem:[#allocation43_spill] sm:$0xff] }
 0x12c   :  { %12106 = vmatprep.subr.bf16.mxu1 %v20623_v57  ;;  %v4065_v48 = vsub.f32 %v15311_v20, %v20624_v46  ;;  %v20626_v38 = vld [vmem:[#allocation26_spill] sm:$0xff]  ;;  %v9391_v22 = vadd.f32 %v9390_v54, %v9389_v44  ;;  %v15407_v36 = vsub.f32 %v15346_v61, %v3815_v15  ;;  %v9345_v57 = vpop.f32.mrb[8].mxu0  ;;  %v3933_v0 = vand.u32 4294901760, %v3932_v17  ;;  %v9392_v54 = vpop.f32.mrb[8].mxu1 }
 0x12d   :  { %3376 = vmatmul.mubr.f32.gmra.mrb[72].mxu1 %v20622_v21  ;;  %3248 = vmatmul.mubr.f32.gmra.mrb[76].mxu0 %v20625_v62  ;;  %v3940_v29 = vand.u32 4294901760, %v3939_v31  ;;  %v3767_v46 = vand.u32 4294901760, %v332_v33  ;;  %v3770_v20 = vand.u32 4294901760, %v333_v16  ;;  %v20628_v23 = vand.u32 4294901760, %v14967_v2  ;;  %v9346_v61 = vpop.f32.mrb[9].mxu0  ;;  %v20631_v31 = vld [vmem:[#allocation5_spill] sm:$0xff] }
 0x12e   :  { %12108 = vmatpush3.bf16.msra.mxu1 %v20626_v38  ;;  %12084 = vmatpush3.bf16.msra.mxu0 %v15181_v43  ;;  %v15416_v44 = vadd.f32 %v9391_v22, %v9344_v58  ;;  %v15418_v38 = vpack.c.bf16 %v3818_v40, %v3815_v15  ;;  %v19697_v43 = vand.u32 4294901760, %v15335_v50  ;;  %v20630_v17 = vand.u32 4294901760, %v14995_v13  ;;  %v9393_v2 = vpop.f32.mrb[9].mxu1  ;;  %v350_v22 = vld [vmem:[%s19381_s2 + $0x3d0] sm:$0xff]  ;;  %v20633_v15 = vld [vmem:[#allocation44_spill] sm:$0xff] }
 0x12f   :  { %3254 = vmatprep.mubr.f32.mxu0 %v20627_v52  ;;  %3383 = vmatprep.mubr.f32.mxu1 %v20628_v23  ;;  %v9347_v21 = vadd.f32 %v9346_v61, %v9345_v57  ;;  %v15425_v23 = vsub.f32 %v349_v25, %v3818_v40  ;;  %v4066_v26 = vand.u32 4294901760, %v4065_v48  ;;  %v20634_v58 = vld [vmem:[#allocation7_spill] sm:$0xff]  ;;  %v9394_v41 = vadd.f32 %v9393_v2, %v9392_v54 }
 0x130   :  { %12086 = vmatprep.subr.bf16.mxu0 %v15187_v51  ;;  %20629 = vst [vmem:[#allocation40_spill] sm:$0xff] %v15418_v38  ;;  %12110 = vmatprep.subr.bf16.mxu1 %v20631_v31  ;;  %v4059_v51 = vand.u32 4294901760, %v4058_v11  ;;  %v20635_v13 = vand.u32 4294901760, %v15329_v7  ;;  %v20636_v57 = vand.u32 4294901760, %v15331_v55  ;;  %v351_v40 = vld [vmem:[%s19381_s2 + $0x3d8] sm:$0xff]  ;;  %v20637_v11 = vand.u32 4294901760, %v20617_v59 }
 0x131   :  { %3387 = vmatmul.mubr.f32.gmra.mrb[74].mxu1 %v20630_v17  ;;  %20632 = vst [vmem:[#allocation13_spill] sm:$0xff] %v15425_v23  ;;  %3257 = vmatmul.mubr.f32.gmra.mrb[78].mxu0 %v20633_v15  ;;  %v15444_v48 = vpack.c.bf16 %v3940_v29, %v3933_v0  ;;  %v15446_v61 = vpack.c.bf16 %v3770_v20, %v3767_v46  ;;  %v334_v54 = vld [vmem:[%s19381_s2 + $0x350] sm:$0xff]  ;;  %v335_v31 = vld [vmem:[%s19381_s2 + $0x358] sm:$0xff]  ;;  %v3821_v0 = vand.u32 4294901760, %v350_v22  ;;  %v3824_v2 = vand.u32 4294901760, %v351_v40 }
 0x132   :  { %12112 = vmatpush3.bf16.msra.mxu1 %v20634_v58  ;;  %v3946_v17 = vsub.f32 %v15329_v7, %v20635_v13  ;;  %v3953_v25 = vsub.f32 %v15331_v55, %v20636_v57  ;;  %12088 = vmatpush3.bf16.msra.mxu0 %v15193_v24  ;;  %v20639_v24 = vld [vmem:[#allocation19_spill] sm:$0xff]  ;;  %v15458_v29 = vadd.f32 %v9394_v41, %v9347_v21  ;;  %v20640_v13 = vand.u32 4294901760, %v15356_v45  ;;  %v9427_v58 = vpop.f32.mrb[10].mxu0  ;;  %v20642_v21 = vld [vmem:[#allocation29_spill] sm:$0xff] }
 0x133   :  { %3394 = vmatprep.mubr.f32.mxu1 %v20637_v11  ;;  %20638 = vst [vmem:[#allocation42_spill] sm:$0xff] %v15446_v61  ;;  %12090 = vmatprep.subr.bf16.mxu0 %v15199_v28  ;;  %v4072_v59 = vsub.f32 %v15335_v50, %v19697_v43  ;;  %v15469_v11 = vld [vmem:[%s19381_s2 + $0x3e0] sm:$0xff]  ;;  %v20641_v28 = vand.u32 4294901760, %v20625_v62  ;;  %v15474_v41 = vpack.c.bf16 %v4066_v26, %v4059_v51  ;;  %v9428_v50 = vpop.f32.mrb[11].mxu0  ;;  %v3773_v61 = vand.u32 4294901760, %v334_v54 }
 0x134   :  { %12114 = vmatprep.subr.bf16.mxu1 %v20639_v24  ;;  %v4079_v57 = vsub.f32 %v15356_v45, %v20640_v13  ;;  %3575 = vmatprep.mubr.f32.mxu0 %v20642_v21  ;;  %v15476_v24 = vsub.f32 %v332_v33, %v3767_v46  ;;  %v15478_v43 = vsub.f32 %v333_v16, %v3770_v20  ;;  %v20645_v13 = vld [vmem:[#allocation32_spill] sm:$0xff]  ;;  %v20646_v45 = vand.u32 4294901760, %v20627_v52 }
 0x135   :  { %3398 = vmatmul.mubr.f32.gmra.mrb[76].mxu1 %v20641_v28  ;;  %v3947_v55 = vand.u32 4294901760, %v3946_v17  ;;  %v3954_v7 = vand.u32 4294901760, %v3953_v25  ;;  %v3776_v62 = vand.u32 4294901760, %v335_v31  ;;  %v9429_v28 = vadd.f32 %v9428_v50, %v9427_v58  ;;  %v9430_v17 = vpop.f32.mrb[12].mxu0 }
 0x136   :  { %20643 = vst [vmem:[#allocation26_spill] sm:$0xff] %v15476_v24  ;;  %20644 = vst [vmem:[#allocation43_spill] sm:$0xff] %v15478_v43  ;;  %12116 = vmatpush3.bf16.msra.mxu1 %v20645_v13  ;;  %3405 = vmatprep.mubr.f32.mxu1 %v20646_v45  ;;  %v20647_v26 = vand.u32 4294901760, %v15367_v63  ;;  %v20648_v33 = vand.u32 4294901760, %v15387_v27  ;;  %v353_v45 = vld [vmem:[%s19381_s2 + $0x3e8] sm:$0xff]  ;;  %v3827_v52 = vand.u32 4294901760, %v15469_v11  ;;  %v15501_v58 = vpack.c.bf16 %v3824_v2, %v3821_v0 }
 0x137   :  { %12092 = vmatpush3.bf16.msra.mxu0 %v15208_v39  ;;  %12118 = vmatprep.subr.bf16.mxu1 %v20564_v12  ;;  %v4073_v50 = vand.u32 4294901760, %v4072_v59  ;;  %v4080_v39 = vand.u32 4294901760, %v4079_v57  ;;  %v19710_v12 = vand.u32 4294901760, %v15407_v36  ;;  %v19707_v46 = vand.u32 4294901760, %v15425_v23 }
 0x138   :  { %v3960_v20 = vsub.f32 %v15367_v63, %v20647_v26  ;;  %v3967_v16 = vsub.f32 %v15387_v27, %v20648_v33  ;;  %12094 = vmatprep.subr.bf16.mxu0 %v15223_v19  ;;  %v1051_v51 = vadd.f32 %v9429_v28, %v15282_v14  ;;  %v20649_v25 = vand.u32 4294901760, %v20633_v15  ;;  %20650 = vst [vmem:[#allocation5_spill] sm:$0xff] %v15501_v58  ;;  %v9431_v33 = vpop.f32.mrb[13].mxu0  ;;  %v75_v15 = vld [vmem:[%s19379_s0 + $0x38] sm:$0xff] }
 0x139   :  { %v15503_v13 = vsub.f32 %v350_v22, %v3821_v0  ;;  %v15505_v26 = vsub.f32 %v351_v40, %v3824_v2  ;;  %v15509_v19 = vpack.c.bf16 %v3954_v7, %v3947_v55  ;;  %v15511_v59 = vpack.c.bf16 %v3776_v62, %v3773_v61  ;;  %v336_v7 = vld [vmem:[%s19381_s2 + $0x360] sm:$0xff]  ;;  %v337_v55 = vld [vmem:[%s19381_s2 + $0x368] sm:$0xff] }
 0x13a   :  { %3409 = vmatmul.mubr.f32.gmra.mrb[78].mxu1 %v20649_v25  ;;  %v15513_v14 = vsub.f32 %v334_v54, %v3773_v61  ;;  %v3830_v57 = vand.u32 4294901760, %v353_v45  ;;  %v9432_v22 = vadd.f32 %v9431_v33, %v9430_v17  ;;  %v15520_v40 = vsub.f32 %v335_v31, %v3776_v62  ;;  %v9474_v61 = vpop.f32.mrb[10].mxu1 }
 0x13b   :  { %20651 = vst [vmem:[#allocation44_spill] sm:$0xff] %v15503_v13  ;;  %20652 = vst [vmem:[#allocation7_spill] sm:$0xff] %v15505_v26  ;;  %12120 = vmatpush3.bf16.msra.mxu1 %v14722_v60  ;;  %3707 = vmatprep.mubr.f32.mxu1 %v20642_v21  ;;  %v3961_v60 = vand.u32 4294901760, %v3960_v20  ;;  %v3968_v2 = vand.u32 4294901760, %v3967_v16  ;;  %v15529_v54 = vpack.c.bf16 %v4080_v39, %v4073_v50  ;;  %v9433_v21 = vpop.f32.mrb[14].mxu0  ;;  %v9475_v62 = vpop.f32.mrb[11].mxu1 }
 0x13c   :  { %20653 = vst [vmem:[#allocation19_spill] sm:$0xff] %v15511_v59  ;;  %12096 = vmatpush3.bf16.msra.mxu0 %v15229_v18  ;;  %12122 = vmatprep.subr.bf16.mxu1 %v14746_v37  ;;  %v15532_v18 = vsub.f32 %v15469_v11, %v3827_v52  ;;  %v4086_v37 = vsub.f32 %v15407_v36, %v19710_v12  ;;  %v19709_v28 = vand.u32 4294901760, %v15476_v24  ;;  %v15546_v11 = vld [vmem:[%s19381_s2 + $0x3f0] sm:$0xff]  ;;  %v9434_v16 = vpop.f32.mrb[15].mxu0  ;;  %v3779_v17 = vand.u32 4294901760, %v336_v7 }
 0x13d   :  { %12098 = vmatprep.subr.bf16.mxu0 %v15236_v1  ;;  %v4093_v31 = vsub.f32 %v15425_v23, %v19707_v46  ;;  %v1060_v0 = vadd.f32 %v9432_v22, %v15339_v53  ;;  %v19708_v1 = vand.u32 4294901760, %v15478_v43  ;;  %v155_v20 = vmul.f32 %v75_v15, %v75_v15  ;;  %v9477_v15 = vpop.f32.mrb[12].mxu1  ;;  %v20667_v23 = vld [vmem:[#allocation37_spill] sm:$0xff] }
 0x13e   :  { %v9476_v50 = vadd.f32 %v9475_v62, %v9474_v61  ;;  %v15549_v39 = vpack.c.bf16 %v3830_v57, %v3827_v52  ;;  %v3782_v53 = vand.u32 4294901760, %v337_v55  ;;  %v9435_v25 = vadd.f32 %v9434_v16, %v9433_v21  ;;  %v9436_v21 = vpop.f32.mrb[16].mxu0  ;;  %v9478_v16 = vpop.f32.mrb[13].mxu1 }
 0x13f   :  { %12124 = vmatpush3.bf16.msra.mxu1 %v14784_v56  ;;  %v15553_v33 = vpack.c.bf16 %v3968_v2, %v3961_v60  ;;  %v15555_v22 = vsub.f32 %v353_v45, %v3830_v57  ;;  %v4087_v61 = vand.u32 4294901760, %v4086_v37  ;;  %v4094_v56 = vand.u32 4294901760, %v4093_v31  ;;  %v355_v45 = vld [vmem:[%s19381_s2 + $0x3f8] sm:$0xff]  ;;  %v9437_v57 = vpop.f32.mrb[17].mxu0 }
 0x140   :  { %20654 = vst [vmem:[#allocation29_spill] sm:$0xff] %v15549_v39  ;;  %12100 = vmatpush3.bf16.msra.mxu0 %v15253_v8  ;;  %12126 = vmatprep.subr.bf16.mxu1 %v20596_v49  ;;  %v15557_v46 = vadd.f32 %v9476_v50, %v1051_v51  ;;  %v3833_v52 = vand.u32 4294901760, %v15546_v11  ;;  %v1069_v62 = vadd.f32 %v9435_v25, %v15383_v32  ;;  %v15573_v51 = vand.u32 4294901760, %v155_v20  ;;  %v20657_v32 = vld [vmem:[#allocation17_spill] sm:$0xff]  ;;  %v20662_v31 = vld [vmem:[#allocation23_spill] sm:$0xff] }
 0x141   :  { %20655 = vst [vmem:[#allocation32_spill] sm:$0xff] %v15555_v22  ;;  %12134 = vmatprep.subr.bf16.mxu0 %v15255_v47  ;;  %v15565_v8 = vsub.f32 %v15476_v24, %v19709_v28  ;;  %v3981_v49 = vsub.f32 %v15478_v43, %v19708_v1  ;;  %v9479_v60 = vadd.f32 %v9478_v16, %v9477_v15  ;;  %v19713_v37 = vand.u32 4294901760, %v15503_v13  ;;  %v20659_v25 = vld [vmem:[#allocation33_spill] sm:$0xff]  ;;  %v338_v15 = vld [vmem:[%s19381_s2 + $0x370] sm:$0xff]  ;;  %v9480_v16 = vpop.f32.mrb[14].mxu1 }
 0x142   :  { %20656 = vst [vmem:[#allocation45_spill] sm:$0xff] %v15573_v51  ;;  %v15577_v2 = vpack.c.bf16 %v3782_v53, %v3779_v17  ;;  %v9438_v50 = vadd.f32 %v9437_v57, %v9436_v21  ;;  %v15583_v1 = vsub.f32 %v336_v7, %v3779_v17  ;;  %v15585_v28 = vsub.f32 %v337_v55, %v3782_v53  ;;  %v15602_v7 = vld [vmem:[%s19381_s2 + $0x378] sm:$0xff]  ;;  %v9481_v17 = vpop.f32.mrb[15].mxu1 }
 0x143   :  { %3577 = vmatmul.mubr.f32.vlgmr.msra.gmra.mrb[80].mxu0 %v20657_v32  ;;  %12128 = vmatpush3.bf16.msra.mxu1 %v20601_v6  ;;  %v15590_v6 = vadd.f32 %v9479_v60, %v1060_v0  ;;  %v15594_v21 = vpack.c.bf16 %v4094_v56, %v4087_v61  ;;  %v3836_v57 = vand.u32 4294901760, %v355_v45  ;;  %v15597_v12 = vsub.f32 %v15546_v11, %v3833_v52  ;;  %v9439_v0 = vpop.f32.mrb[18].mxu0  ;;  %v74_v11 = vld [vmem:[%s19379_s0 + $0x30] sm:$0xff]  ;;  %v9483_v24 = vpop.f32.mrb[16].mxu1 }
 0x144   :  { %20658 = vst [vmem:[#allocation17_spill] sm:$0xff] %v15577_v2  ;;  %12136 = vmatpush3.bf16.msra.mxu0 %v15257_v34  ;;  %3582 = vmatprep.mubr.f32.mxu0 %v20659_v25  ;;  %20660 = vst [vmem:[#allocation33_spill] sm:$0xff] %v15585_v28  ;;  %v1078_v55 = vadd.f32 %v9438_v50, %v15416_v44  ;;  %v3975_v53 = vand.u32 4294901760, %v15565_v8  ;;  %v15607_v60 = vsub.f32 %v155_v20, %v15573_v51  ;;  %v9440_v61 = vpop.f32.mrb[19].mxu0  ;;  %v91_v50 = vld [vmem:[%s19379_s0 + $0xb8] sm:$0xff] }
 0x145   :  { %12130 = vmatprep.subr.bf16.mxu1 %v20606_v5  ;;  %12138 = vmatprep.subr.bf16.mxu0 %v15260_v30  ;;  %v3982_v5 = vand.u32 4294901760, %v3981_v49  ;;  %v9482_v56 = vadd.f32 %v9481_v17, %v9480_v16  ;;  %v4100_v44 = vsub.f32 %v15503_v13, %v19713_v37  ;;  %v20663_v8 = vand.u32 4294901760, %v15505_v26  ;;  %v20664_v16 = vld [vmem:[#allocation28_spill] sm:$0xff]  ;;  %v9484_v30 = vpop.f32.mrb[17].mxu1 }
 0x146   :  { %20661 = vst [vmem:[#allocation46_spill] sm:$0xff] %v15607_v60  ;;  %v3785_v20 = vand.u32 4294901760, %v338_v15  ;;  %v9441_v43 = vadd.f32 %v9440_v61, %v9439_v0  ;;  %v154_v0 = vmul.f32 %v74_v11, %v74_v11  ;;  %v19726_v61 = vand.u32 4294901760, %v15532_v18 }
 0x147   :  { %3584 = vmatmul.mubr.f32.gmra.mrb[82].mxu0 %v20662_v31  ;;  %12132 = vmatpush3.bf16.msra.mxu1 %v14908_v10  ;;  %v4107_v49 = vsub.f32 %v15505_v26, %v20663_v8  ;;  %v3788_v10 = vand.u32 4294901760, %v15602_v7  ;;  %v15628_v13 = vadd.f32 %v9482_v56, %v1069_v62  ;;  %v20665_v8 = vld [vmem:[#allocation25_spill] sm:$0xff]  ;;  %v15632_v26 = vpack.c.bf16 %v3836_v57, %v3833_v52 }
 0x148   :  { %12140 = vmatpush3.bf16.msra.mxu0 %v15290_v42  ;;  %3589 = vmatprep.mubr.f32.mxu0 %v20664_v16  ;;  %v1087_v42 = vadd.f32 %v9441_v43, %v15458_v29  ;;  %v19729_v17 = vand.u32 4294901760, %v15607_v60  ;;  %v171_v56 = vmul.f32 %v91_v50, %v91_v50  ;;  %v9485_v37 = vadd.f32 %v9484_v30, %v9483_v24  ;;  %v90_v43 = vld [vmem:[%s19379_s0 + $0xb0] sm:$0xff] }
 0x149   :  { %12142 = vmatprep.subr.bf16.mxu0 %v20665_v8  ;;  %12166 = vmatprep.subr.bf16.mxu1 %v15350_v9  ;;  %20666 = vst [vmem:[#allocation23_spill] sm:$0xff] %v15632_v26  ;;  %v15641_v9 = vpack.c.bf16 %v3982_v5, %v3975_v53  ;;  %v15643_v52 = vsub.f32 %v355_v45, %v3836_v57  ;;  %v4101_v11 = vand.u32 4294901760, %v4100_v44  ;;  %v20668_v29 = vld [vmem:[#allocation22_spill] sm:$0xff]  ;;  %v4108_v62 = vand.u32 4294901760, %v4107_v49  ;;  %v9486_v53 = vpop.f32.mrb[18].mxu1 }
 0x14a   :  { %3709 = vmatmul.mubr.f32.vlgmr.msra.gmra.mrb[80].mxu1 %v20657_v32  ;;  %v20669_v32 = vld [vmem:[#allocation38_spill] sm:$0xff]  ;;  %v15650_v50 = vpack.c.bf16 %v3788_v10, %v3785_v20  ;;  %v20671_v30 = vand.u32 4294901760, %v15513_v14  ;;  %v20672_v24 = vand.u32 4294901760, %v15520_v40  ;;  %v15658_v57 = vadd.f32 %v9485_v37, %v1078_v55 }
 0x14b   :  { %3591 = vmatmul.mubr.f32.gmra.mrb[84].mxu0 %v20667_v23  ;;  %12168 = vmatpush3.bf16.msra.mxu1 %v15365_v35  ;;  %v15662_v5 = vsub.f32 %v338_v15, %v3785_v20  ;;  %v15664_v44 = vand.u32 4294901760, %v154_v0  ;;  %v4114_v49 = vsub.f32 %v15532_v18, %v19726_v61  ;;  %v3841_v37 = vsub.f32 %v15607_v60, %v19729_v17  ;;  %v20677_v17 = vld [vmem:[#allocation16_spill] sm:$0xff]  ;;  %v20678_v60 = vld [vmem:[#allocation41_spill] sm:$0xff] }
 0x14c   :  { %12144 = vmatpush3.bf16.msra.mxu0 %v20668_v29  ;;  %3596 = vmatprep.mubr.f32.mxu0 %v20669_v32  ;;  %20670 = vst [vmem:[#allocation28_spill] sm:$0xff] %v15650_v50  ;;  %v3988_v35 = vsub.f32 %v15513_v14, %v20671_v30  ;;  %v3995_v45 = vsub.f32 %v15520_v40, %v20672_v24  ;;  %v107_v30 = vld [vmem:[%s19379_s0 + $0x138] sm:$0xff]  ;;  %v9487_v24 = vpop.f32.mrb[19].mxu1  ;;  %v15680_v55 = vand.u32 4294901760, %v171_v56  ;;  %v20680_v29 = vld [vmem:[#allocation9_spill] sm:$0xff] }
 0x14d   :  { %3714 = vmatprep.mubr.f32.mxu1 %v20659_v25  ;;  %12146 = vmatprep.subr.bf16.mxu0 %v15352_v4  ;;  %20673 = vst [vmem:[#allocation37_spill] sm:$0xff] %v15664_v44  ;;  %v20674_v25 = vand.u32 4294901760, %v15555_v22  ;;  %v170_v20 = vmul.f32 %v90_v43, %v90_v43  ;;  %v9488_v61 = vadd.f32 %v9487_v24, %v9486_v53  ;;  %v20676_v4 = vld [vmem:[#allocation39_spill] sm:$0xff] }
 0x14e   :  { %3716 = vmatmul.mubr.f32.gmra.mrb[82].mxu1 %v20662_v31  ;;  %12170 = vmatprep.subr.bf16.mxu1 %v15385_v3  ;;  %20675 = vst [vmem:[#allocation38_spill] sm:$0xff] %v15680_v55  ;;  %v15685_v31 = vsub.f32 %v15602_v7, %v3788_v10  ;;  %v19736_v3 = vand.u32 4294901760, %v15583_v1  ;;  %v3996_v43 = vand.u32 4294901760, %v3995_v45  ;;  %v187_v53 = vmul.f32 %v107_v30, %v107_v30 }
 0x14f   :  { %v4121_v15 = vsub.f32 %v15555_v22, %v20674_v25  ;;  %3598 = vmatmul.mubr.f32.gmra.mrb[86].mxu0 %v20676_v4  ;;  %12172 = vmatpush3.bf16.msra.mxu1 %v15444_v48  ;;  %v15691_v25 = vpack.c.bf16 %v4108_v62, %v4101_v11  ;;  %v3989_v22 = vand.u32 4294901760, %v3988_v35  ;;  %v106_v48 = vld [vmem:[%s19379_s0 + $0x130] sm:$0xff]  ;;  %v15696_v24 = vadd.f32 %v9488_v61, %v1087_v42  ;;  %v20681_v62 = vld [vmem:[#allocation20_spill] sm:$0xff] }
 0x150   :  { %12148 = vmatpush3.bf16.msra.mxu0 %v20677_v17  ;;  %3603 = vmatprep.mubr.f32.mxu0 %v20678_v60  ;;  %v15701_v7 = vsub.f32 %v154_v0, %v15664_v44  ;;  %v4115_v10 = vand.u32 4294901760, %v4114_v49  ;;  %v123_v35 = vld [vmem:[%s19379_s0 + $0x1b8] sm:$0xff]  ;;  %v3842_v42 = vand.u32 4294901760, %v3841_v37  ;;  %v15713_v45 = vand.u32 4294901760, %v170_v20  ;;  %v20686_v37 = vld [vmem:[#allocation42_spill] sm:$0xff] }
 0x151   :  { %3721 = vmatprep.mubr.f32.mxu1 %v20664_v16  ;;  %12150 = vmatprep.subr.bf16.mxu0 %v15418_v38  ;;  %v4122_v61 = vand.u32 4294901760, %v4121_v15  ;;  %v15711_v16 = vsub.f32 %v171_v56, %v15680_v55  ;;  %v20684_v0 = vld [vmem:[#allocation8_spill] sm:$0xff]  ;;  %v4002_v49 = vsub.f32 %v15583_v1, %v19736_v3  ;;  %v20685_v30 = vand.u32 4294901760, %v15585_v28  ;;  %v20687_v15 = vld [vmem:[#allocation31_spill] sm:$0xff]  ;;  %v20688_v11 = vld [vmem:[#allocation34_spill] sm:$0xff] }
 0x152   :  { %20679 = vst [vmem:[#allocation39_spill] sm:$0xff] %v15701_v7  ;;  %3723 = vmatmul.mubr.f32.gmra.mrb[84].mxu1 %v20667_v23  ;;  %12174 = vmatprep.subr.bf16.mxu1 %v15474_v41  ;;  %20683 = vst [vmem:[#allocation9_spill] sm:$0xff] %v15713_v45  ;;  %v186_v41 = vmul.f32 %v106_v48, %v106_v48  ;;  %v15725_v56 = vpack.c.bf16 %v3996_v43, %v3989_v22  ;;  %v15729_v17 = vand.u32 4294901760, %v187_v53  ;;  %v122_v3 = vld [vmem:[%s19379_s0 + $0x1b0] sm:$0xff] }
 0x153   :  { %20682 = vst [vmem:[#allocation41_spill] sm:$0xff] %v15711_v16  ;;  %3605 = vmatmul.mubr.f32.gmra.mrb[88].mxu0 %v20684_v0  ;;  %12176 = vmatpush3.bf16.msra.mxu1 %v15509_v19  ;;  %v4009_v23 = vsub.f32 %v15585_v28, %v20685_v30  ;;  %v203_v19 = vmul.f32 %v123_v35, %v123_v35  ;;  %v139_v35 = vld [vmem:[%s19379_s0 + $0x238] sm:$0xff]  ;;  %v9521_v30 = vpop.f32.mrb[20].mxu0  ;;  %v4003_v43 = vand.u32 4294901760, %v4002_v49 }
 0x154   :  { %12152 = vmatpush3.bf16.msra.mxu0 %v20686_v37  ;;  %3728 = vmatprep.mubr.f32.mxu1 %v20669_v32  ;;  %20689 = vst [vmem:[#allocation20_spill] sm:$0xff] %v15729_v17  ;;  %v12189_v38 = vpack.c.bf16 %v4122_v61, %v4115_v10  ;;  %v9522_v48 = vpop.f32.mrb[21].mxu0  ;;  %v15751_v37 = vand.u32 4294901760, %v186_v41  ;;  %v202_v28 = vmul.f32 %v122_v3, %v122_v3  ;;  %v20695_v61 = vand.u32 4294901760, %v15597_v12 }
 0x155   :  { %12154 = vmatprep.subr.bf16.mxu0 %v15501_v58  ;;  %12178 = vmatprep.subr.bf16.mxu1 %v15529_v54  ;;  %v19745_v58 = vand.u32 4294901760, %v15711_v16  ;;  %v15746_v54 = vsub.f32 %v170_v20, %v15713_v45  ;;  %v4010_v22 = vand.u32 4294901760, %v4009_v23  ;;  %v15756_v20 = vsub.f32 %v187_v53, %v15729_v17 }
 0x156   :  { %3730 = vmatmul.mubr.f32.gmra.mrb[86].mxu1 %v20676_v4  ;;  %3843 = vmatprep.mubr.f32.mxu0 %v3842_v42  ;;  %20691 = vst [vmem:[#allocation31_spill] sm:$0xff] %v15751_v37  ;;  %v9523_v4 = vadd.f32 %v9522_v48, %v9521_v30  ;;  %v15758_v10 = vand.u32 4294901760, %v203_v19  ;;  %v219_v42 = vmul.f32 %v139_v35, %v139_v35  ;;  %v20696_v53 = vand.u32 4294901760, %v15643_v52  ;;  %v9524_v30 = vpop.f32.mrb[22].mxu0 }
 0x157   :  { %20690 = vst [vmem:[#allocation8_spill] sm:$0xff] %v15746_v54  ;;  %12180 = vmatpush3.bf16.msra.mxu1 %v15553_v33  ;;  %3735 = vmatprep.mubr.f32.mxu1 %v20678_v60  ;;  %20692 = vst [vmem:[#allocation34_spill] sm:$0xff] %v15756_v20  ;;  %v138_v33 = vld [vmem:[%s19379_s0 + $0x230] sm:$0xff]  ;;  %v20694_v60 = vand.u32 4294901760, %v15701_v7  ;;  %v20697_v23 = vand.u32 4294901760, %v15662_v5 }
 0x158   :  { %12156 = vmatpush3.bf16.msra.mxu0 %v15511_v59  ;;  %12182 = vmatprep.subr.bf16.mxu1 %v15594_v21  ;;  %20693 = vst [vmem:[#allocation47_spill] sm:$0xff] %v15758_v10  ;;  %v4128_v21 = vsub.f32 %v15597_v12, %v20695_v61  ;;  %v4135_v49 = vsub.f32 %v15643_v52, %v20696_v53  ;;  %v20698_v61 = vand.u32 4294901760, %v15685_v31  ;;  %v9525_v53 = vpop.f32.mrb[23].mxu0 }
 0x159   :  { %12158 = vmatprep.subr.bf16.mxu0 %v15549_v39  ;;  %v3847_v3 = vsub.f32 %v15701_v7, %v20694_v60  ;;  %v4016_v48 = vsub.f32 %v15662_v5, %v20697_v23  ;;  %v1407_v35 = vadd.f32 %v9523_v4, %v15557_v46  ;;  %v3856_v60 = vsub.f32 %v15711_v16, %v19745_v58 }
 0x15a   :  { %3737 = vmatmul.mubr.f32.gmra.mrb[88].mxu1 %v20684_v0  ;;  %v4023_v7 = vsub.f32 %v15685_v31, %v20698_v61  ;;  %v12191_v39 = vpack.c.bf16 %v4010_v22, %v4003_v43  ;;  %v15788_v46 = vsub.f32 %v186_v41, %v15751_v37  ;;  %v15790_v0 = vand.u32 4294901760, %v202_v28  ;;  %v9568_v22 = vpop.f32.mrb[20].mxu1 }
 0x15b   :  { %12184 = vmatpush3.bf16.msra.mxu1 %v15641_v9  ;;  %4139 = vmatprep.mubr.f32.mxu1 %v15573_v51  ;;  %v218_v4 = vmul.f32 %v138_v33, %v138_v33  ;;  %v9526_v23 = vadd.f32 %v9525_v53, %v9524_v30  ;;  %v15796_v61 = vsub.f32 %v203_v19, %v15758_v10  ;;  %v15798_v9 = vand.u32 4294901760, %v219_v42  ;;  %v9527_v30 = vpop.f32.mrb[24].mxu0  ;;  %v9569_v53 = vpop.f32.mrb[21].mxu1 }
 0x15c   :  { %20699 = vst [vmem:[#allocation48_spill] sm:$0xff] %v15790_v0  ;;  %12160 = vmatpush3.bf16.msra.mxu0 %v15577_v2  ;;  %12186 = vmatprep.subr.bf16.mxu1 %v15691_v25  ;;  %v3848_v41 = vand.u32 4294901760, %v3847_v3  ;;  %v4129_v43 = vand.u32 4294901760, %v4128_v21  ;;  %v4136_v32 = vand.u32 4294901760, %v4135_v49  ;;  %v4017_v51 = vand.u32 4294901760, %v4016_v48  ;;  %v9528_v2 = vpop.f32.mrb[25].mxu0 }
 0x15d   :  { %20700 = vst [vmem:[#allocation49_spill] sm:$0xff] %v15796_v61  ;;  %20701 = vst [vmem:[#allocation50_spill] sm:$0xff] %v15798_v9  ;;  %12162 = vmatprep.subr.bf16.mxu0 %v15632_v26  ;;  %v1414_v33 = vadd.f32 %v9526_v23, %v15590_v6  ;;  %v3857_v16 = vand.u32 4294901760, %v3856_v60  ;;  %v20702_v25 = vand.u32 4294901760, %v15746_v54  ;;  %v4024_v19 = vand.u32 4294901760, %v4023_v7  ;;  %v9571_v23 = vpop.f32.mrb[22].mxu1 }
 0x15e   :  { %v9570_v59 = vadd.f32 %v9569_v53, %v9568_v22  ;;  %v15808_v3 = vsub.f32 %v202_v28, %v15790_v0  ;;  %v15810_v21 = vand.u32 4294901760, %v218_v4  ;;  %v9529_v6 = vadd.f32 %v9528_v2, %v9527_v30  ;;  %v20706_v22 = vld [vmem:[#allocation10_spill] sm:$0xff]  ;;  %v20707_v30 = vld [vmem:[#allocation11_spill] sm:$0xff] }
 0x15f   :  { %v3862_v58 = vsub.f32 %v15746_v54, %v20702_v25  ;;  %12188 = vmatpush3.bf16.msra.mxu1 %v15725_v56  ;;  %v20704_v49 = vand.u32 4294901760, %v15756_v20  ;;  %v15818_v60 = vsub.f32 %v219_v42, %v15798_v9  ;;  %v20705_v28 = vpack.c.bf16 %v20681_v62, %v20680_v29  ;;  %v9530_v25 = vpop.f32.mrb[26].mxu0  ;;  %v20709_v42 = vld [vmem:[#allocation14_spill] sm:$0xff] }
 0x160   :  { %20703 = vst [vmem:[#allocation51_spill] sm:$0xff] %v15810_v21  ;;  %12164 = vmatpush3.bf16.msra.mxu0 %v15650_v50  ;;  %12190 = vmatprep.subr.bf16.mxu1 %v12189_v38  ;;  %v15820_v56 = vadd.f32 %v9570_v59, %v1407_v35  ;;  %v12193_v2 = vpack.c.bf16 %v4136_v32, %v4129_v43  ;;  %v9531_v59 = vpop.f32.mrb[27].mxu0  ;;  %v20710_v54 = vand.u32 4294901760, %v15788_v46 }
 0x161   :  { %v3871_v48 = vsub.f32 %v15756_v20, %v20704_v49  ;;  %12198 = vmatprep.subr.bf16.mxu0 %v20705_v28  ;;  %v12201_v38 = vpack.c.bf16 %v20707_v30, %v20706_v22  ;;  %v1421_v53 = vadd.f32 %v9529_v6, %v15628_v13  ;;  %v9572_v49 = vpop.f32.mrb[23].mxu1  ;;  %v3863_v26 = vand.u32 4294901760, %v3862_v58  ;;  %v20708_v20 = vld [vmem:[#allocation15_spill] sm:$0xff] }
 0x162   :  { %v12195_v7 = vpack.c.bf16 %v4024_v19, %v4017_v51  ;;  %v12203_v50 = vpack.c.bf16 %v20709_v42, %v20708_v20  ;;  %v9573_v35 = vadd.f32 %v9572_v49, %v9571_v23  ;;  %v3877_v32 = vsub.f32 %v15788_v46, %v20710_v54  ;;  %v9574_v54 = vpop.f32.mrb[24].mxu1  ;;  %v20715_v23 = vld [vmem:[#allocation30_spill] sm:$0xff] }
 0x163   :  { %3849 = vmatmul.mubr.f32.vlgmr.msra.gmra.mrb[90].mxu0 %v3848_v41  ;;  %12192 = vmatpush3.bf16.msra.mxu1 %v12191_v39  ;;  %v15835_v28 = vsub.f32 %v218_v4, %v15810_v21  ;;  %v9532_v13 = vadd.f32 %v9531_v59, %v9530_v25  ;;  %v20712_v58 = vpack.c.bf16 %v20688_v11, %v20687_v15  ;;  %v3872_v51 = vand.u32 4294901760, %v3871_v48  ;;  %v20714_v4 = vld [vmem:[#allocation35_spill] sm:$0xff]  ;;  %v9533_v59 = vpop.f32.mrb[28].mxu0  ;;  %v20718_v41 = vld [vmem:[#allocation18_spill] sm:$0xff] }
 0x164   :  { %3858 = vmatprep.mubr.f32.mxu0 %v3857_v16  ;;  %v20713_v19 = vand.u32 4294901760, %v15796_v61  ;;  %v15844_v6 = vadd.f32 %v9573_v35, %v1414_v33  ;;  %12194 = vmatprep.subr.bf16.mxu1 %v12193_v2  ;;  %v12205_v25 = vpack.c.bf16 %v20715_v23, %v20714_v4  ;;  %v9534_v16 = vpop.f32.mrb[29].mxu0  ;;  %v3878_v43 = vand.u32 4294901760, %v3877_v32  ;;  %v20720_v32 = vld [vmem:[#allocation12_spill] sm:$0xff] }
 0x165   :  { %20711 = vst [vmem:[#allocation10_spill] sm:$0xff] %v15835_v28  ;;  %12200 = vmatpush3.bf16.msra.mxu0 %v20712_v58  ;;  %v1428_v49 = vadd.f32 %v9532_v13, %v15658_v57  ;;  %v9575_v58 = vpop.f32.mrb[25].mxu1  ;;  %v19764_v35 = vand.u32 4294901760, %v15835_v28  ;;  %v9535_v2 = vadd.f32 %v9534_v16, %v9533_v59  ;;  %v20719_v13 = vand.u32 4294901760, %v15818_v60 }
 0x166   :  { %v3886_v39 = vsub.f32 %v15796_v61, %v20713_v19  ;;  %12202 = vmatprep.subr.bf16.mxu0 %v12201_v38  ;;  %v9576_v48 = vadd.f32 %v9575_v58, %v9574_v54  ;;  %v20716_v19 = vand.u32 4294901760, %v15808_v3  ;;  %v20717_v38 = vld [vmem:[#allocation24_spill] sm:$0xff]  ;;  %v20721_v58 = vld [vmem:[#allocation6_spill] sm:$0xff] }
 0x167   :  { %3864 = vmatmul.mubr.f32.gmra.mrb[92].mxu0 %v3863_v26  ;;  %12196 = vmatpush3.bf16.msra.mxu1 %v12195_v7  ;;  %v12207_v61 = vpack.c.bf16 %v20718_v41, %v20717_v38  ;;  %v3901_v54 = vsub.f32 %v15818_v60, %v20719_v13  ;;  %v9577_v7 = vpop.f32.mrb[26].mxu1  ;;  %v20723_v13 = vld [vmem:[#allocation21_spill] sm:$0xff] }
 0x168   :  { %v3892_v33 = vsub.f32 %v15808_v3, %v20716_v19  ;;  %3873 = vmatprep.mubr.f32.mxu0 %v3872_v51  ;;  %v3887_v57 = vand.u32 4294901760, %v3886_v39  ;;  %v15858_v26 = vadd.f32 %v9576_v48, %v1421_v53  ;;  %12230 = vmatprep.subr.bf16.mxu1 %v15255_v47  ;;  %v12209_v19 = vpack.c.bf16 %v20721_v58, %v20720_v32  ;;  %v9578_v51 = vpop.f32.mrb[27].mxu1 }
 0x169   :  { %12204 = vmatpush3.bf16.msra.mxu0 %v12203_v50  ;;  %v1435_v50 = vadd.f32 %v9535_v2, %v15696_v24  ;;  %v9579_v59 = vadd.f32 %v9578_v51, %v9577_v7  ;;  %v3907_v53 = vsub.f32 %v15835_v28, %v19764_v35  ;;  %v3902_v16 = vand.u32 4294901760, %v3901_v54  ;;  %v9580_v24 = vpop.f32.mrb[28].mxu1  ;;  %v20726_v54 = vld [vmem:[#allocation43_spill] sm:$0xff] }
 0x16a   :  { %12206 = vmatprep.subr.bf16.mxu0 %v12205_v25  ;;  %4141 = vmatmul.mubr.f32.vlgmr.msra.gmra.mrb[90].mxu1 %v15664_v44  ;;  %v3893_v39 = vand.u32 4294901760, %v3892_v33  ;;  %v12211_v25 = vpack.c.bf16 %v15387_v27, %v15367_v63  ;;  %v9581_v33 = vpop.f32.mrb[29].mxu1  ;;  %v20728_v35 = vld [vmem:[#allocation7_spill] sm:$0xff] }
 0x16b   :  { %3879 = vmatmul.mubr.f32.gmra.mrb[94].mxu0 %v3878_v43  ;;  %12232 = vmatpush3.bf16.msra.mxu1 %v15257_v34  ;;  %v15871_v48 = vadd.f32 %v9579_v59, %v1428_v49  ;;  %v20722_v43 = vld [vmem:[#allocation13_spill] sm:$0xff]  ;;  %v3908_v7 = vand.u32 4294901760, %v3907_v53  ;;  %v20725_v49 = vld [vmem:[#allocation26_spill] sm:$0xff]  ;;  %v12219_v53 = vpack.c.bf16 %v15520_v40, %v15513_v14 }
 0x16c   :  { %3888 = vmatprep.mubr.f32.mxu0 %v3887_v57  ;;  %4146 = vmatprep.mubr.f32.mxu1 %v15680_v55  ;;  %v12213_v2 = vpack.c.bf16 %v20722_v43, %v15407_v36  ;;  %v20724_v57 = vld [vmem:[#allocation36_spill] sm:$0xff]  ;;  %v12215_v51 = vpack.c.bf16 %v20726_v54, %v20725_v49  ;;  %v20733_v55 = vand.u32 4294901760, %v20681_v62  ;;  %v20740_v62 = vand.u32 4294901760, %v20709_v42 }
 0x16d   :  { %12208 = vmatpush3.bf16.msra.mxu0 %v12207_v61  ;;  %12234 = vmatprep.subr.bf16.mxu1 %v20723_v13  ;;  %v9582_v61 = vadd.f32 %v9581_v33, %v9580_v24  ;;  %v20730_v24 = vld [vmem:[#allocation22_spill] sm:$0xff] }
 0x16e   :  { %12210 = vmatprep.subr.bf16.mxu0 %v12209_v19  ;;  %4148 = vmatmul.mubr.f32.gmra.mrb[92].mxu1 %v15713_v45  ;;  %v20727_v19 = vld [vmem:[#allocation44_spill] sm:$0xff]  ;;  %v9615_v42 = vpop.f32.mrb[30].mxu0 }
 0x16f   :  { %3894 = vmatmul.mubr.f32.gmra.mrb[96].mxu0 %v3893_v39  ;;  %12236 = vmatpush3.bf16.msra.mxu1 %v20724_v57  ;;  %v15881_v59 = vadd.f32 %v9582_v61, %v1435_v50  ;;  %v12217_v45 = vpack.c.bf16 %v20728_v35, %v20727_v19  ;;  %v15889_v39 = vld [vmem:[%s19381_s2 + $0x480] sm:$0xff]  ;;  %v20736_v61 = vand.u32 4294901760, %v20706_v22 }
 0x170   :  { %3903 = vmatprep.mubr.f32.mxu0 %v3902_v16  ;;  %4153 = vmatprep.mubr.f32.mxu1 %v15729_v17  ;;  %v20729_v50 = vld [vmem:[#allocation32_spill] sm:$0xff]  ;;  %v373_v16 = vld [vmem:[%s19381_s2 + $0x488] sm:$0xff]  ;;  %v20732_v17 = vand.u32 4294901760, %v20680_v29 }
 0x171   :  { %12212 = vmatpush3.bf16.msra.mxu0 %v12211_v25  ;;  %12238 = vmatprep.subr.bf16.mxu1 %v20665_v8  ;;  %v12221_v25 = vpack.c.bf16 %v20729_v50, %v15532_v18  ;;  %v20737_v8 = vand.u32 4294901760, %v20707_v30  ;;  %v356_v29 = vld [vmem:[%s19381_s2 + $0x400] sm:$0xff]  ;;  %v20743_v30 = vand.u32 4294901760, %v20717_v38  ;;  %v20749_v38 = vand.u32 4294901760, %v15387_v27 }
 0x172   :  { %12214 = vmatprep.subr.bf16.mxu0 %v12213_v2  ;;  %4155 = vmatmul.mubr.f32.gmra.mrb[94].mxu1 %v15751_v37  ;;  %v20731_v2 = vld [vmem:[#allocation33_spill] sm:$0xff]  ;;  %v15912_v44 = vpack.c.bf16 %v20733_v55, %v20732_v17  ;;  %v20738_v17 = vld [vmem:[#allocation27_spill] sm:$0xff]  ;;  %v20739_v55 = vand.u32 4294901760, %v20708_v20  ;;  %v20753_v27 = vand.u32 4294901760, %v20725_v49 }
 0x173   :  { %3909 = vmatmul.mubr.f32.gmra.mrb[98].mxu0 %v3908_v7  ;;  %12240 = vmatpush3.bf16.msra.mxu1 %v20730_v24  ;;  %v12223_v33 = vpack.c.bf16 %v20731_v2, %v15583_v1  ;;  %v20734_v7 = vand.u32 4294901760, %v20687_v15  ;;  %v20735_v24 = vand.u32 4294901760, %v20688_v11  ;;  %v15924_v37 = vpack.c.bf16 %v20737_v8, %v20736_v61  ;;  %v357_v20 = vld [vmem:[%s19381_s2 + $0x408] sm:$0xff]  ;;  %v358_v49 = vld [vmem:[%s19381_s2 + $0x410] sm:$0xff] }
 0x174   :  { %4160 = vmatprep.mubr.f32.mxu1 %v15758_v10  ;;  %12242 = vmatprep.subr.bf16.mxu1 %v20738_v17  ;;  %v15935_v11 = vpack.c.bf16 %v20740_v62, %v20739_v55  ;;  %v20741_v15 = vand.u32 4294901760, %v20714_v4  ;;  %v20742_v8 = vand.u32 4294901760, %v20715_v23  ;;  %v20746_v4 = vand.u32 4294901760, %v20720_v32  ;;  %v374_v32 = vld [vmem:[%s19381_s2 + $0x490] sm:$0xff] }
 0x175   :  { %12216 = vmatpush3.bf16.msra.mxu0 %v12215_v51  ;;  %v15918_v28 = vpack.c.bf16 %v20735_v24, %v20734_v7  ;;  %v4877_v51 = vand.u32 4294901760, %v15889_v39  ;;  %v20744_v24 = vand.u32 4294901760, %v20718_v41  ;;  %v20745_v7 = vld [vmem:[#allocation46_spill] sm:$0xff]  ;;  %v20747_v23 = vand.u32 4294901760, %v20721_v58  ;;  %v375_v58 = vld [vmem:[%s19381_s2 + $0x498] sm:$0xff] }
 0x176   :  { %12218 = vmatprep.subr.bf16.mxu0 %v12217_v45  ;;  %v15941_v22 = vpack.c.bf16 %v20742_v8, %v20741_v15  ;;  %v4880_v45 = vand.u32 4294901760, %v373_v16  ;;  %4162 = vmatmul.mubr.f32.gmra.mrb[96].mxu1 %v15790_v0  ;;  %v20748_v41 = vand.u32 4294901760, %v15367_v63  ;;  %v20750_v15 = vand.u32 4294901760, %v15407_v36  ;;  %v20752_v63 = vld [vmem:[#allocation16_spill] sm:$0xff] }
 0x177   :  { %v15947_v61 = vpack.c.bf16 %v20744_v24, %v20743_v30  ;;  %4304 = vmatprep.mubr.f32.mxu0 %v20745_v7  ;;  %v15958_v55 = vpack.c.bf16 %v20747_v23, %v20746_v4  ;;  %v20751_v8 = vand.u32 4294901760, %v20722_v43  ;;  %v9616_v24 = vpop.f32.mrb[31].mxu0  ;;  %12244 = vmatpush3.bf16.msra.mxu1 %v20752_v63  ;;  %v20754_v36 = vand.u32 4294901760, %v20726_v54  ;;  %v359_v54 = vld [vmem:[%s19381_s2 + $0x418] sm:$0xff] }
 0x178   :  { %v15964_v62 = vpack.c.bf16 %v20749_v38, %v20748_v41  ;;  %4167 = vmatprep.mubr.f32.mxu1 %v15798_v9  ;;  %v20755_v4 = vand.u32 4294901760, %v20727_v19  ;;  %v20756_v23 = vand.u32 4294901760, %v20728_v35  ;;  %v20757_v38 = vand.u32 4294901760, %v15513_v14  ;;  %v20759_v35 = vld [vmem:[#allocation40_spill] sm:$0xff] }
 0x179   :  { %v15970_v30 = vpack.c.bf16 %v20751_v8, %v20750_v15  ;;  %v15984_v43 = vpack.c.bf16 %v20754_v36, %v20753_v27  ;;  %v20758_v15 = vand.u32 4294901760, %v15520_v40  ;;  %v4829_v0 = vand.u32 4294901760, %v356_v29  ;;  %12220 = vmatpush3.bf16.msra.mxu0 %v12219_v53  ;;  %12246 = vmatprep.subr.bf16.mxu1 %v20759_v35 }
 0x17a   :  { %v15990_v41 = vpack.c.bf16 %v20756_v23, %v20755_v4  ;;  %v9617_v19 = vadd.f32 %v9616_v24, %v9615_v42  ;;  %v20760_v27 = vand.u32 4294901760, %v15532_v18  ;;  %v20761_v14 = vand.u32 4294901760, %v20729_v50  ;;  %12222 = vmatprep.subr.bf16.mxu0 %v12221_v25  ;;  %v376_v18 = vld [vmem:[%s19381_s2 + $0x4a0] sm:$0xff]  ;;  %4169 = vmatmul.mubr.f32.gmra.mrb[98].mxu1 %v15810_v21 }
 0x17b   :  { %v15996_v8 = vpack.c.bf16 %v20758_v15, %v20757_v38  ;;  %v20762_v36 = vand.u32 4294901760, %v15583_v1  ;;  %v20763_v4 = vand.u32 4294901760, %v20731_v2  ;;  %v4832_v38 = vand.u32 4294901760, %v357_v20  ;;  %v9618_v1 = vpop.f32.mrb[32].mxu0 }
 0x17c   :  { %v16009_v40 = vpack.c.bf16 %v20761_v14, %v20760_v27  ;;  %v16018_v15 = vsub.f32 %v15889_v39, %v4877_v51  ;;  %v16020_v53 = vsub.f32 %v373_v16, %v4880_v45  ;;  %v4883_v42 = vand.u32 4294901760, %v374_v32  ;;  %v9619_v14 = vpop.f32.mrb[33].mxu0 }
 0x17d   :  { %v16015_v23 = vpack.c.bf16 %v20763_v4, %v20762_v36  ;;  %v4886_v24 = vand.u32 4294901760, %v375_v58  ;;  %v1679_v50 = vadd.f32 %v9617_v19, %v15820_v56  ;;  %v20767_v2 = vand.u32 4294901760, %v15597_v12  ;;  %v20770_v36 = vld [vmem:[#allocation42_spill] sm:$0xff]  ;;  %12224 = vmatpush3.bf16.msra.mxu0 %v12223_v33 }
 0x17e   :  { %20765 = vst [vmem:[#allocation15_spill] sm:$0xff] %v16018_v15  ;;  %20766 = vst [vmem:[#allocation14_spill] sm:$0xff] %v16020_v53  ;;  %v20768_v25 = vand.u32 4294901760, %v15643_v52  ;;  %v4835_v39 = vand.u32 4294901760, %v358_v49  ;;  %v4838_v16 = vand.u32 4294901760, %v359_v54  ;;  %12248 = vmatpush3.bf16.msra.mxu1 %v20770_v36  ;;  %v20771_v4 = vand.u32 4294901760, %v20745_v7 }
 0x17f   :  { %20764 = vst [vmem:[#allocation11_spill] sm:$0xff] %v16015_v23  ;;  %v20772_v9 = vand.u32 4294901760, %v15662_v5  ;;  %v20773_v56 = vand.u32 4294901760, %v15685_v31  ;;  %v16042_v21 = vpack.c.bf16 %v4880_v45, %v4877_v51  ;;  %v16044_v10 = vsub.f32 %v356_v29, %v4829_v0  ;;  %v9662_v36 = vpop.f32.mrb[30].mxu1 }
 0x180   :  { %v16031_v27 = vpack.c.bf16 %v20768_v25, %v20767_v2  ;;  %4447 = vmatprep.mubr.f32.mxu1 %v20771_v4  ;;  %v377_v2 = vld [vmem:[%s19381_s2 + $0x4a8] sm:$0xff]  ;;  %v9620_v25 = vadd.f32 %v9619_v14, %v9618_v1  ;;  %v16050_v7 = vpack.c.bf16 %v4832_v38, %v4829_v0  ;;  %v16052_v4 = vsub.f32 %v357_v20, %v4832_v38  ;;  %v360_v0 = vld [vmem:[%s19381_s2 + $0x420] sm:$0xff]  ;;  %v9621_v38 = vpop.f32.mrb[34].mxu0  ;;  %v9663_v1 = vpop.f32.mrb[31].mxu1 }
 0x181   :  { %v16040_v19 = vpack.c.bf16 %v20773_v56, %v20772_v9  ;;  %20774 = vst [vmem:[#allocation30_spill] sm:$0xff] %v16042_v21  ;;  %20775 = vst [vmem:[#allocation24_spill] sm:$0xff] %v16044_v10  ;;  %v4889_v23 = vand.u32 4294901760, %v376_v18  ;;  %v20779_v9 = vpack.c.bf16 %v15643_v52, %v15597_v12  ;;  %v16057_v51 = vpack.c.bf16 %v4886_v24, %v4883_v42 }
 0x182   :  { %20769 = vst [vmem:[#allocation35_spill] sm:$0xff] %v16031_v27  ;;  %v20776_v27 = vld [vmem:[#allocation5_spill] sm:$0xff]  ;;  %20777 = vst [vmem:[#allocation18_spill] sm:$0xff] %v16050_v7  ;;  %v16059_v29 = vsub.f32 %v374_v32, %v4883_v42  ;;  %v1694_v20 = vadd.f32 %v9620_v25, %v15844_v6  ;;  %v16067_v14 = vsub.f32 %v375_v58, %v4886_v24  ;;  %v4892_v52 = vand.u32 4294901760, %v377_v2  ;;  %v9622_v42 = vpop.f32.mrb[35].mxu0  ;;  %v16083_v58 = vld [vmem:[%s19381_s2 + $0x4b0] sm:$0xff] }
 0x183   :  { %12250 = vmatprep.subr.bf16.mxu1 %v20776_v27  ;;  %20778 = vst [vmem:[#allocation12_spill] sm:$0xff] %v16052_v4  ;;  %12226 = vmatprep.subr.bf16.mxu0 %v20779_v9  ;;  %20780 = vst [vmem:[#allocation6_spill] sm:$0xff] %v16057_v51  ;;  %v16069_v12 = vpack.c.bf16 %v4838_v16, %v4835_v39  ;;  %v361_v32 = vld [vmem:[%s19381_s2 + $0x428] sm:$0xff]  ;;  %v9664_v56 = vadd.f32 %v9663_v1, %v9662_v36  ;;  %v20782_v9 = vld [vmem:[#allocation19_spill] sm:$0xff]  ;;  %v20785_v1 = vand.u32 4294901760, %v16018_v15 }
 0x184   :  { %12252 = vmatpush3.bf16.msra.mxu1 %v20782_v9  ;;  %v16075_v33 = vsub.f32 %v358_v49, %v4835_v39  ;;  %v16077_v45 = vsub.f32 %v359_v54, %v4838_v16  ;;  %v9623_v24 = vadd.f32 %v9622_v42, %v9621_v38  ;;  %v20783_v25 = vpack.c.bf16 %v15685_v31, %v15662_v5  ;;  %v9665_v16 = vpop.f32.mrb[32].mxu1  ;;  %v20789_v7 = vld [vmem:[#allocation39_spill] sm:$0xff] }
 0x185   :  { %20781 = vst [vmem:[#allocation13_spill] sm:$0xff] %v16069_v12  ;;  %v20784_v12 = vld [vmem:[#allocation29_spill] sm:$0xff]  ;;  %v16089_v36 = vsub.f32 %v376_v18, %v4889_v23  ;;  %v4841_v49 = vand.u32 4294901760, %v360_v0  ;;  %v16092_v39 = vadd.f32 %v9664_v56, %v1679_v50  ;;  %v5116_v38 = vsub.f32 %v16018_v15, %v20785_v1  ;;  %v9666_v6 = vpop.f32.mrb[33].mxu1 }
 0x186   :  { %12228 = vmatpush3.bf16.msra.mxu0 %v20783_v25  ;;  %12254 = vmatprep.subr.bf16.mxu1 %v20784_v12  ;;  %v20786_v42 = vand.u32 4294901760, %v16020_v53  ;;  %v4844_v31 = vand.u32 4294901760, %v361_v32  ;;  %v1709_v18 = vadd.f32 %v9623_v24, %v15858_v26  ;;  %v9624_v25 = vpop.f32.mrb[36].mxu0  ;;  %v16102_v51 = vpack.c.bf16 %v4892_v52, %v4889_v23  ;;  %v20790_v1 = vld [vmem:[#allocation17_spill] sm:$0xff]  ;;  %v379_v26 = vld [vmem:[%s19381_s2 + $0x4b8] sm:$0xff] }
 0x187   :  { %12262 = vmatprep.subr.bf16.mxu0 %v15912_v44  ;;  %v16104_v50 = vsub.f32 %v377_v2, %v4892_v52  ;;  %v4895_v56 = vand.u32 4294901760, %v16083_v58  ;;  %v9625_v44 = vpop.f32.mrb[37].mxu0  ;;  %v9667_v54 = vadd.f32 %v9666_v6, %v9665_v16  ;;  %v20791_v15 = vand.u32 4294901760, %v16044_v10  ;;  %v20792_v6 = vld [vmem:[#allocation41_spill] sm:$0xff] }
 0x188   :  { %v5123_v5 = vsub.f32 %v16020_v53, %v20786_v42  ;;  %20787 = vst [vmem:[#allocation21_spill] sm:$0xff] %v16102_v51  ;;  %12256 = vmatpush3.bf16.msra.mxu1 %v20790_v1  ;;  %v9626_v52 = vadd.f32 %v9625_v44, %v9624_v25  ;;  %v16119_v24 = vsub.f32 %v360_v0, %v4841_v49  ;;  %v20794_v16 = vand.u32 4294901760, %v16052_v4  ;;  %v20795_v51 = vld [vmem:[#allocation23_spill] sm:$0xff]  ;;  %v9627_v44 = vpop.f32.mrb[38].mxu0 }
 0x189   :  { %20788 = vst [vmem:[#allocation36_spill] sm:$0xff] %v16104_v50  ;;  %4307 = vmatmul.mubr.f32.vlgmr.msra.gmra.mrb[100].mxu0 %v20789_v7  ;;  %v5004_v42 = vsub.f32 %v16044_v10, %v20791_v15  ;;  %v16124_v15 = vadd.f32 %v9667_v54, %v1694_v20  ;;  %v9668_v10 = vpop.f32.mrb[34].mxu1  ;;  %12258 = vmatprep.subr.bf16.mxu1 %v20795_v51  ;;  %v5117_v23 = vand.u32 4294901760, %v5116_v38  ;;  %v4898_v21 = vand.u32 4294901760, %v379_v26  ;;  %v362_v20 = vld [vmem:[%s19381_s2 + $0x430] sm:$0xff]  ;;  %v20799_v38 = vld [vmem:[#allocation8_spill] sm:$0xff] }
 0x18a   :  { %12264 = vmatpush3.bf16.msra.mxu0 %v15918_v28  ;;  %4313 = vmatprep.mubr.f32.mxu0 %v20792_v6  ;;  %20793 = vst [vmem:[#allocation26_spill] sm:$0xff] %v16119_v24  ;;  %v5011_v53 = vsub.f32 %v16052_v4, %v20794_v16  ;;  %v5124_v2 = vand.u32 4294901760, %v5123_v5  ;;  %v16128_v25 = vpack.c.bf16 %v4844_v31, %v4841_v49  ;;  %v9669_v0 = vpop.f32.mrb[35].mxu1  ;;  %v9628_v49 = vpop.f32.mrb[39].mxu0  ;;  %v20801_v5 = vand.u32 4294901760, %v16059_v29 }
 0x18b   :  { %12266 = vmatprep.subr.bf16.mxu0 %v15924_v37  ;;  %v1724_v28 = vadd.f32 %v9626_v52, %v15871_v48  ;;  %v16131_v1 = vsub.f32 %v361_v32, %v4844_v31  ;;  %v16134_v16 = vsub.f32 %v16083_v58, %v4895_v56  ;;  %v363_v37 = vld [vmem:[%s19381_s2 + $0x438] sm:$0xff]  ;;  %v9670_v54 = vadd.f32 %v9669_v0, %v9668_v10 }
 0x18c   :  { %20796 = vst [vmem:[#allocation43_spill] sm:$0xff] %v16128_v25  ;;  %v20800_v48 = vld [vmem:[#allocation28_spill] sm:$0xff]  ;;  %v5005_v32 = vand.u32 4294901760, %v5004_v42  ;;  %v5130_v58 = vsub.f32 %v16059_v29, %v20801_v5  ;;  %v20802_v31 = vand.u32 4294901760, %v16067_v14  ;;  %v9629_v4 = vadd.f32 %v9628_v49, %v9627_v44  ;;  %v20803_v25 = vld [vmem:[#allocation34_spill] sm:$0xff]  ;;  %v9671_v42 = vpop.f32.mrb[36].mxu1 }
 0x18d   :  { %20797 = vst [vmem:[#allocation44_spill] sm:$0xff] %v16131_v1  ;;  %20798 = vst [vmem:[#allocation7_spill] sm:$0xff] %v16134_v16  ;;  %4316 = vmatmul.mubr.f32.gmra.mrb[102].mxu0 %v20799_v38  ;;  %12260 = vmatpush3.bf16.msra.mxu1 %v20800_v48  ;;  %v5012_v51 = vand.u32 4294901760, %v5011_v53  ;;  %v16154_v48 = vadd.f32 %v9670_v54, %v1709_v18  ;;  %v16158_v5 = vpack.c.bf16 %v5124_v2, %v5117_v23  ;;  %v9672_v49 = vpop.f32.mrb[37].mxu1 }
 0x18e   :  { %v5137_v52 = vsub.f32 %v16067_v14, %v20802_v31  ;;  %12268 = vmatpush3.bf16.msra.mxu0 %v15935_v11  ;;  %4322 = vmatprep.mubr.f32.mxu0 %v20803_v25  ;;  %v4847_v31 = vand.u32 4294901760, %v362_v20  ;;  %v4850_v44 = vand.u32 4294901760, %v363_v37  ;;  %v16163_v11 = vld [vmem:[%s19381_s2 + $0x4c0] sm:$0xff]  ;;  %v1739_v53 = vadd.f32 %v9629_v4, %v15881_v59 }
 0x18f   :  { %12270 = vmatprep.subr.bf16.mxu0 %v15941_v22  ;;  %12294 = vmatprep.subr.bf16.mxu1 %v15255_v47  ;;  %v20804_v18 = vand.u32 4294901760, %v20789_v7  ;;  %v16168_v54 = vpack.c.bf16 %v4898_v21, %v4895_v56  ;;  %v19801_v22 = vand.u32 4294901760, %v16089_v36  ;;  %v19800_v47 = vand.u32 4294901760, %v16104_v50  ;;  %v20807_v59 = vld [vmem:[#allocation49_spill] sm:$0xff] }
 0x190   :  { %v9673_v23 = vadd.f32 %v9672_v49, %v9671_v42  ;;  %v16174_v2 = vsub.f32 %v379_v26, %v4898_v21  ;;  %v5131_v0 = vand.u32 4294901760, %v5130_v58  ;;  %v5138_v10 = vand.u32 4294901760, %v5137_v52  ;;  %v364_v52 = vld [vmem:[%s19381_s2 + $0x440] sm:$0xff] }
 0x191   :  { %4451 = vmatmul.mubr.f32.vlgmr.msra.gmra.mrb[100].mxu1 %v20804_v18  ;;  %20805 = vst [vmem:[#allocation32_spill] sm:$0xff] %v16168_v54  ;;  %4325 = vmatmul.mubr.f32.gmra.mrb[104].mxu0 %v15788_v46  ;;  %v16178_v7 = vpack.c.bf16 %v5012_v51, %v5005_v32  ;;  %v20808_v4 = vand.u32 4294901760, %v16075_v33  ;;  %v20809_v42 = vand.u32 4294901760, %v16077_v45  ;;  %v4901_v21 = vand.u32 4294901760, %v16163_v11 }
 0x192   :  { %12296 = vmatpush3.bf16.msra.mxu1 %v15257_v34  ;;  %20806 = vst [vmem:[#allocation33_spill] sm:$0xff] %v16174_v2  ;;  %12272 = vmatpush3.bf16.msra.mxu0 %v15947_v61  ;;  %v381_v34 = vld [vmem:[%s19381_s2 + $0x4c8] sm:$0xff]  ;;  %v16190_v26 = vadd.f32 %v9673_v23, %v1724_v28  ;;  %v9674_v61 = vpop.f32.mrb[38].mxu1  ;;  %v20810_v51 = vand.u32 4294901760, %v20792_v6  ;;  %v16195_v32 = vpack.c.bf16 %v4850_v44, %v4847_v31 }
 0x193   :  { %4331 = vmatprep.mubr.f32.mxu0 %v20807_v59  ;;  %v5018_v56 = vsub.f32 %v16075_v33, %v20808_v4  ;;  %v5025_v49 = vsub.f32 %v16077_v45, %v20809_v42  ;;  %12274 = vmatprep.subr.bf16.mxu0 %v15958_v55  ;;  %v16197_v58 = vsub.f32 %v362_v20, %v4847_v31  ;;  %v9675_v18 = vpop.f32.mrb[39].mxu1  ;;  %v20813_v4 = vand.u32 4294901760, %v20799_v38  ;;  %v365_v28 = vld [vmem:[%s19381_s2 + $0x448] sm:$0xff] }
 0x194   :  { %4458 = vmatprep.mubr.f32.mxu1 %v20810_v51  ;;  %20811 = vst [vmem:[#allocation27_spill] sm:$0xff] %v16195_v32  ;;  %12298 = vmatprep.subr.bf16.mxu1 %v20723_v13  ;;  %v5144_v6 = vsub.f32 %v16089_v36, %v19801_v22  ;;  %v5151_v55 = vsub.f32 %v16104_v50, %v19800_v47  ;;  %v19802_v20 = vand.u32 4294901760, %v16119_v24  ;;  %v19803_v31 = vand.u32 4294901760, %v16131_v1 }
 0x195   :  { %20812 = vst [vmem:[#allocation46_spill] sm:$0xff] %v16197_v58  ;;  %4462 = vmatmul.mubr.f32.gmra.mrb[102].mxu1 %v20813_v4  ;;  %v9676_v38 = vadd.f32 %v9675_v18, %v9674_v61  ;;  %4334 = vmatmul.mubr.f32.gmra.mrb[106].mxu0 %v15808_v3  ;;  %v16218_v13 = vpack.c.bf16 %v5138_v10, %v5131_v0  ;;  %v4904_v42 = vand.u32 4294901760, %v381_v34  ;;  %v5019_v51 = vand.u32 4294901760, %v5018_v56  ;;  %v382_v61 = vld [vmem:[%s19381_s2 + $0x4d0] sm:$0xff]  ;;  %v20818_v56 = vld [vmem:[#allocation25_spill] sm:$0xff] }
 0x196   :  { %12300 = vmatpush3.bf16.msra.mxu1 %v20724_v57  ;;  %v16220_v23 = vsub.f32 %v363_v37, %v4850_v44  ;;  %12276 = vmatpush3.bf16.msra.mxu0 %v15964_v62  ;;  %v5026_v4 = vand.u32 4294901760, %v5025_v49  ;;  %v16225_v47 = vsub.f32 %v16163_v11, %v4901_v21  ;;  %v4853_v22 = vand.u32 4294901760, %v364_v52  ;;  %v383_v57 = vld [vmem:[%s19381_s2 + $0x4d8] sm:$0xff] }
 0x197   :  { %4340 = vmatprep.mubr.f32.mxu0 %v15818_v60  ;;  %v16233_v37 = vadd.f32 %v9676_v38, %v1739_v53  ;;  %v20816_v62 = vand.u32 4294901760, %v20803_v25  ;;  %12278 = vmatprep.subr.bf16.mxu0 %v15970_v30  ;;  %v4856_v10 = vand.u32 4294901760, %v365_v28  ;;  %v19804_v0 = vand.u32 4294901760, %v16134_v16  ;;  %v20819_v25 = vld [vmem:[#allocation10_spill] sm:$0xff] }
 0x198   :  { %20814 = vst [vmem:[#allocation16_spill] sm:$0xff] %v16220_v23  ;;  %20815 = vst [vmem:[#allocation40_spill] sm:$0xff] %v16225_v47  ;;  %v19805_v44 = vand.u32 4294901760, %v16174_v2  ;;  %v20817_v11 = vand.u32 4294901760, %v15788_v46  ;;  %12302 = vmatprep.subr.bf16.mxu1 %v20818_v56  ;;  %v5145_v49 = vand.u32 4294901760, %v5144_v6  ;;  %v5152_v18 = vand.u32 4294901760, %v5151_v55 }
 0x199   :  { %4469 = vmatprep.mubr.f32.mxu1 %v20816_v62  ;;  %v5032_v53 = vsub.f32 %v16119_v24, %v19802_v20  ;;  %v5039_v30 = vsub.f32 %v16131_v1, %v19803_v31  ;;  %4343 = vmatmul.mubr.f32.gmra.mrb[108].mxu0 %v20819_v25  ;;  %v20820_v38 = vld [vmem:[#allocation22_spill] sm:$0xff]  ;;  %v16251_v62 = vpack.c.bf16 %v4904_v42, %v4901_v21  ;;  %v4910_v56 = vand.u32 4294901760, %v383_v57 }
 0x19a   :  { %4473 = vmatmul.mubr.f32.gmra.mrb[104].mxu1 %v20817_v11  ;;  %v16253_v46 = vsub.f32 %v381_v34, %v4904_v42  ;;  %v4907_v11 = vand.u32 4294901760, %v382_v61  ;;  %12280 = vmatpush3.bf16.msra.mxu0 %v15984_v43  ;;  %v20823_v6 = vand.u32 4294901760, %v20807_v59  ;;  %v16258_v55 = vpack.c.bf16 %v5026_v4, %v5019_v51  ;;  %v366_v31 = vld [vmem:[%s19381_s2 + $0x450] sm:$0xff]  ;;  %v367_v34 = vld [vmem:[%s19381_s2 + $0x458] sm:$0xff]  ;;  %v9709_v51 = vpop.f32.mrb[40].mxu0 }
 0x19b   :  { %12304 = vmatpush3.bf16.msra.mxu1 %v20820_v38  ;;  %20821 = vst [vmem:[#allocation5_spill] sm:$0xff] %v16251_v62  ;;  %v16260_v20 = vsub.f32 %v364_v52, %v4853_v22  ;;  %12282 = vmatprep.subr.bf16.mxu0 %v15990_v41  ;;  %v16272_v43 = vpack.c.bf16 %v4856_v10, %v4853_v22  ;;  %v20826_v4 = vand.u32 4294901760, %v15808_v3  ;;  %v20827_v38 = vld [vmem:[#allocation45_spill] sm:$0xff]  ;;  %v5040_v22 = vand.u32 4294901760, %v5039_v30  ;;  %v9710_v42 = vpop.f32.mrb[41].mxu0 }
 0x19c   :  { %20822 = vst [vmem:[#allocation19_spill] sm:$0xff] %v16253_v46  ;;  %4480 = vmatprep.mubr.f32.mxu1 %v20823_v6  ;;  %12306 = vmatprep.subr.bf16.mxu1 %v20738_v17  ;;  %v5158_v59 = vsub.f32 %v16134_v16, %v19804_v0  ;;  %v5165_v52 = vsub.f32 %v16174_v2, %v19805_v44  ;;  %v5033_v17 = vand.u32 4294901760, %v5032_v53  ;;  %v20829_v0 = vand.u32 4294901760, %v15818_v60 }
 0x19d   :  { %20824 = vst [vmem:[#allocation29_spill] sm:$0xff] %v16260_v20  ;;  %20825 = vst [vmem:[#allocation39_spill] sm:$0xff] %v16272_v43  ;;  %4661 = vmatprep.mubr.f32.mxu0 %v20827_v38  ;;  %v16283_v6 = vpack.c.bf16 %v5152_v18, %v5145_v49  ;;  %v16285_v41 = vsub.f32 %v365_v28, %v4856_v10  ;;  %v16290_v21 = vpack.c.bf16 %v4910_v56, %v4907_v11  ;;  %v384_v49 = vld [vmem:[%s19381_s2 + $0x4e0] sm:$0xff]  ;;  %v385_v28 = vld [vmem:[%s19381_s2 + $0x4e8] sm:$0xff] }
 0x19e   :  { %4484 = vmatmul.mubr.f32.gmra.mrb[106].mxu1 %v20826_v4  ;;  %v16292_v44 = vsub.f32 %v382_v61, %v4907_v11  ;;  %v4859_v3 = vand.u32 4294901760, %v366_v31  ;;  %v4862_v4 = vand.u32 4294901760, %v367_v34  ;;  %v9711_v10 = vadd.f32 %v9710_v42, %v9709_v51  ;;  %12284 = vmatpush3.bf16.msra.mxu0 %v15996_v8  ;;  %v9712_v42 = vpop.f32.mrb[42].mxu0 }
 0x19f   :  { %20828 = vst [vmem:[#allocation41_spill] sm:$0xff] %v16285_v41  ;;  %12308 = vmatpush3.bf16.msra.mxu1 %v20752_v63  ;;  %4491 = vmatprep.mubr.f32.mxu1 %v20829_v0  ;;  %20830 = vst [vmem:[#allocation8_spill] sm:$0xff] %v16290_v21  ;;  %v20832_v60 = vand.u32 4294901760, %v16197_v58  ;;  %v20833_v61 = vand.u32 4294901760, %v16220_v23  ;;  %v16309_v18 = vsub.f32 %v383_v57, %v4910_v56  ;;  %v5159_v53 = vand.u32 4294901760, %v5158_v59  ;;  %v369_v57 = vld [vmem:[%s19381_s2 + $0x468] sm:$0xff] }
 0x1a0   :  { %20831 = vst [vmem:[#allocation34_spill] sm:$0xff] %v16292_v44  ;;  %12310 = vmatprep.subr.bf16.mxu1 %v20759_v35  ;;  %12286 = vmatprep.subr.bf16.mxu0 %v16009_v40  ;;  %v5166_v30 = vand.u32 4294901760, %v5165_v52  ;;  %v2137_v8 = vadd.f32 %v9711_v10, %v16092_v39  ;;  %v20835_v35 = vand.u32 4294901760, %v20819_v25  ;;  %v4913_v51 = vand.u32 4294901760, %v384_v49  ;;  %v368_v40 = vld [vmem:[%s19381_s2 + $0x460] sm:$0xff]  ;;  %v9713_v56 = vpop.f32.mrb[43].mxu0 }
 0x1a1   :  { %v5046_v63 = vsub.f32 %v16197_v58, %v20832_v60  ;;  %v5053_v0 = vsub.f32 %v16220_v23, %v20833_v61  ;;  %20834 = vst [vmem:[#allocation49_spill] sm:$0xff] %v16309_v18  ;;  %v4916_v60 = vand.u32 4294901760, %v385_v28  ;;  %v20836_v59 = vld [vmem:[#allocation42_spill] sm:$0xff]  ;;  %v16324_v39 = vpack.c.bf16 %v5040_v22, %v5033_v17  ;;  %v20839_v17 = vld [vmem:[#allocation35_spill] sm:$0xff] }
 0x1a2   :  { %4495 = vmatmul.mubr.f32.gmra.mrb[108].mxu1 %v20835_v35  ;;  %v16326_v25 = vpack.c.bf16 %v4862_v4, %v4859_v3  ;;  %v16328_v52 = vsub.f32 %v366_v31, %v4859_v3  ;;  %v77_v10 = vld [vmem:[%s19379_s0 + $0x48] sm:$0xff]  ;;  %v9714_v61 = vadd.f32 %v9713_v56, %v9712_v42  ;;  %v20838_v35 = vld [vmem:[#allocation11_spill] sm:$0xff]  ;;  %v16335_v58 = vsub.f32 %v367_v34, %v4862_v4  ;;  %v9715_v34 = vpop.f32.mrb[44].mxu0 }
 0x1a3   :  { %12312 = vmatpush3.bf16.msra.mxu1 %v20836_v59  ;;  %4793 = vmatprep.mubr.f32.mxu1 %v20827_v38  ;;  %v5047_v59 = vand.u32 4294901760, %v5046_v63  ;;  %v5054_v11 = vand.u32 4294901760, %v5053_v0  ;;  %v9756_v38 = vpop.f32.mrb[40].mxu1  ;;  %v16338_v22 = vpack.c.bf16 %v5166_v30, %v5159_v53  ;;  %v20840_v31 = vand.u32 4294901760, %v16225_v47  ;;  %v386_v42 = vld [vmem:[%s19381_s2 + $0x4f0] sm:$0xff]  ;;  %v387_v30 = vld [vmem:[%s19381_s2 + $0x4f8] sm:$0xff] }
 0x1a4   :  { %20837 = vst [vmem:[#allocation25_spill] sm:$0xff] %v16326_v25  ;;  %12288 = vmatpush3.bf16.msra.mxu0 %v20838_v35  ;;  %12314 = vmatprep.subr.bf16.mxu1 %v20776_v27  ;;  %v4865_v23 = vand.u32 4294901760, %v368_v40  ;;  %v4868_v2 = vand.u32 4294901760, %v369_v57  ;;  %v2146_v27 = vadd.f32 %v9714_v61, %v16124_v15  ;;  %v9757_v4 = vpop.f32.mrb[41].mxu1  ;;  %v16347_v63 = vpack.c.bf16 %v4916_v60, %v4913_v51  ;;  %v9716_v35 = vpop.f32.mrb[45].mxu0 }
 0x1a5   :  { %12290 = vmatprep.subr.bf16.mxu0 %v20839_v17  ;;  %v5172_v3 = vsub.f32 %v16225_v47, %v20840_v31  ;;  %v20842_v0 = vand.u32 4294901760, %v16253_v46  ;;  %v157_v56 = vmul.f32 %v77_v10, %v77_v10  ;;  %v9758_v17 = vadd.f32 %v9757_v4, %v9756_v38  ;;  %v9759_v38 = vpop.f32.mrb[42].mxu1 }
 0x1a6   :  { %20841 = vst [vmem:[#allocation10_spill] sm:$0xff] %v16347_v63  ;;  %v16356_v31 = vsub.f32 %v384_v49, %v4913_v51  ;;  %v19818_v15 = vand.u32 4294901760, %v16260_v20  ;;  %v9717_v47 = vadd.f32 %v9716_v35, %v9715_v34  ;;  %v4919_v10 = vand.u32 4294901760, %v386_v42  ;;  %v9718_v35 = vpop.f32.mrb[46].mxu0 }
 0x1a7   :  { %v5179_v53 = vsub.f32 %v16253_v46, %v20842_v0  ;;  %12316 = vmatpush3.bf16.msra.mxu1 %v20782_v9  ;;  %v16362_v0 = vpack.c.bf16 %v5054_v11, %v5047_v59  ;;  %v16364_v46 = vsub.f32 %v385_v28, %v4916_v60  ;;  %v16366_v16 = vadd.f32 %v9758_v17, %v2137_v8  ;;  %v20844_v9 = vld [vmem:[#allocation30_spill] sm:$0xff]  ;;  %v9719_v28 = vpop.f32.mrb[47].mxu0  ;;  %v20847_v8 = vld [vmem:[#allocation37_spill] sm:$0xff] }
 0x1a8   :  { %12292 = vmatpush3.bf16.msra.mxu0 %v16040_v19  ;;  %12318 = vmatprep.subr.bf16.mxu1 %v20784_v12  ;;  %v5173_v49 = vand.u32 4294901760, %v5172_v3  ;;  %v16369_v51 = vpack.c.bf16 %v4868_v2, %v4865_v23  ;;  %v4922_v4 = vand.u32 4294901760, %v387_v30  ;;  %v2155_v34 = vadd.f32 %v9717_v47, %v16154_v48  ;;  %v9760_v19 = vpop.f32.mrb[43].mxu1  ;;  %v20848_v59 = vld [vmem:[#allocation17_spill] sm:$0xff] }
 0x1a9   :  { %20843 = vst [vmem:[#allocation22_spill] sm:$0xff] %v16364_v46  ;;  %12326 = vmatprep.subr.bf16.mxu0 %v20844_v9  ;;  %v5180_v61 = vand.u32 4294901760, %v5179_v53  ;;  %v16372_v12 = vsub.f32 %v368_v40, %v4865_v23  ;;  %v16374_v11 = vand.u32 4294901760, %v157_v56  ;;  %v9761_v60 = vadd.f32 %v9760_v19, %v9759_v38  ;;  %v20850_v53 = vld [vmem:[#allocation18_spill] sm:$0xff]  ;;  %v76_v19 = vld [vmem:[%s19379_s0 + $0x40] sm:$0xff] }
 0x1aa   :  { %20845 = vst [vmem:[#allocation45_spill] sm:$0xff] %v16369_v51  ;;  %v5060_v3 = vsub.f32 %v16260_v20, %v19818_v15  ;;  %v20849_v17 = vand.u32 4294901760, %v16285_v41  ;;  %v9720_v47 = vadd.f32 %v9719_v28, %v9718_v35  ;;  %v20851_v23 = vld [vmem:[#allocation38_spill] sm:$0xff]  ;;  %v16386_v40 = vsub.f32 %v369_v57, %v4868_v2  ;;  %v9762_v15 = vpop.f32.mrb[44].mxu1  ;;  %v20852_v20 = vld [vmem:[#allocation23_spill] sm:$0xff]  ;;  %v20857_v2 = vld [vmem:[#allocation28_spill] sm:$0xff] }
 0x1ab   :  { %20846 = vst [vmem:[#allocation42_spill] sm:$0xff] %v16374_v11  ;;  %4663 = vmatmul.mubr.f32.vlgmr.msra.gmra.mrb[110].mxu0 %v20847_v8  ;;  %12320 = vmatpush3.bf16.msra.mxu1 %v20848_v59  ;;  %v16388_v38 = vsub.f32 %v386_v42, %v4919_v10  ;;  %v16393_v59 = vadd.f32 %v9761_v60, %v2146_v27  ;;  %v20853_v9 = vld [vmem:[#allocation6_spill] sm:$0xff]  ;;  %v9721_v27 = vpop.f32.mrb[48].mxu0  ;;  %v9763_v60 = vpop.f32.mrb[45].mxu1 }
 0x1ac   :  { %v5067_v48 = vsub.f32 %v16285_v41, %v20849_v17  ;;  %12328 = vmatpush3.bf16.msra.mxu0 %v20850_v53  ;;  %4668 = vmatprep.mubr.f32.mxu0 %v20851_v23  ;;  %v16397_v35 = vpack.c.bf16 %v4922_v4, %v4919_v10  ;;  %v16404_v57 = vld [vmem:[%s19381_s2 + $0x470] sm:$0xff]  ;;  %v2164_v42 = vadd.f32 %v9720_v47, %v16190_v26  ;;  %v9722_v41 = vpop.f32.mrb[49].mxu0  ;;  %v5061_v53 = vand.u32 4294901760, %v5060_v3  ;;  %v93_v26 = vld [vmem:[%s19379_s0 + $0xc8] sm:$0xff]  ;;  %v9765_v47 = vpop.f32.mrb[46].mxu1 }
 0x1ad   :  { %12322 = vmatprep.subr.bf16.mxu1 %v20852_v20  ;;  %12330 = vmatprep.subr.bf16.mxu0 %v20853_v9  ;;  %v16407_v17 = vpack.c.bf16 %v5180_v61, %v5173_v49  ;;  %v16409_v20 = vsub.f32 %v387_v30, %v4922_v4  ;;  %v16412_v10 = vsub.f32 %v157_v56, %v16374_v11  ;;  %v20856_v9 = vld [vmem:[#allocation9_spill] sm:$0xff]  ;;  %v20859_v30 = vld [vmem:[#allocation20_spill] sm:$0xff]  ;;  %v9766_v3 = vpop.f32.mrb[47].mxu1 }
 0x1ae   :  { %20854 = vst [vmem:[#allocation11_spill] sm:$0xff] %v16397_v35  ;;  %v9764_v28 = vadd.f32 %v9763_v60, %v9762_v15  ;;  %v5068_v1 = vand.u32 4294901760, %v5067_v48  ;;  %v156_v24 = vmul.f32 %v76_v19, %v76_v19  ;;  %v9723_v61 = vadd.f32 %v9722_v41, %v9721_v27  ;;  %v20858_v49 = vld [vmem:[#allocation13_spill] sm:$0xff]  ;;  %v371_v56 = vld [vmem:[%s19381_s2 + $0x478] sm:$0xff] }
 0x1af   :  { %20855 = vst [vmem:[#allocation35_spill] sm:$0xff] %v16412_v10  ;;  %4670 = vmatmul.mubr.f32.gmra.mrb[112].mxu0 %v20856_v9  ;;  %12324 = vmatpush3.bf16.msra.mxu1 %v20857_v2  ;;  %v4871_v15 = vand.u32 4294901760, %v16404_v57  ;;  %v20860_v19 = vld [vmem:[#allocation21_spill] sm:$0xff]  ;;  %v20861_v41 = vand.u32 4294901760, %v16292_v44  ;;  %v20862_v27 = vand.u32 4294901760, %v16309_v18 }
 0x1b0   :  { %12332 = vmatpush3.bf16.msra.mxu0 %v20858_v49  ;;  %4675 = vmatprep.mubr.f32.mxu0 %v20859_v30  ;;  %v16427_v48 = vadd.f32 %v9764_v28, %v2155_v34  ;;  %v2173_v4 = vadd.f32 %v9723_v61, %v16233_v37  ;;  %v4874_v37 = vand.u32 4294901760, %v371_v56  ;;  %v16449_v61 = vand.u32 4294901760, %v156_v24  ;;  %v20866_v49 = vld [vmem:[#allocation47_spill] sm:$0xff] }
 0x1b1   :  { %12334 = vmatprep.subr.bf16.mxu0 %v20860_v19  ;;  %12358 = vmatprep.subr.bf16.mxu1 %v16158_v5  ;;  %v5186_v2 = vsub.f32 %v16292_v44, %v20861_v41  ;;  %v5193_v60 = vsub.f32 %v16309_v18, %v20862_v27  ;;  %v173_v5 = vmul.f32 %v93_v26, %v93_v26  ;;  %v92_v41 = vld [vmem:[%s19379_s0 + $0xc0] sm:$0xff]  ;;  %v20863_v44 = vld [vmem:[#allocation31_spill] sm:$0xff]  ;;  %v20867_v28 = vand.u32 4294901760, %v16328_v52 }
 0x1b2   :  { %4795 = vmatmul.mubr.f32.vlgmr.msra.gmra.mrb[110].mxu1 %v20847_v8  ;;  %v9767_v19 = vadd.f32 %v9766_v3, %v9765_v47  ;;  %v16447_v27 = vpack.c.bf16 %v5068_v1, %v5061_v53  ;;  %20864 = vst [vmem:[#allocation37_spill] sm:$0xff] %v16449_v61  ;;  %v20865_v8 = vld [vmem:[#allocation43_spill] sm:$0xff]  ;;  %v16454_v26 = vsub.f32 %v16404_v57, %v4871_v15  ;;  %v20868_v47 = vand.u32 4294901760, %v16335_v58  ;;  %v9768_v53 = vpop.f32.mrb[48].mxu1  ;;  %v109_v57 = vld [vmem:[%s19379_s0 + $0x148] sm:$0xff] }
 0x1b3   :  { %4677 = vmatmul.mubr.f32.gmra.mrb[114].mxu0 %v20863_v44  ;;  %12360 = vmatpush3.bf16.msra.mxu1 %v16178_v7  ;;  %v5074_v3 = vsub.f32 %v16328_v52, %v20867_v28  ;;  %v5187_v34 = vand.u32 4294901760, %v5186_v2  ;;  %v172_v18 = vmul.f32 %v92_v41, %v92_v41  ;;  %v9769_v50 = vpop.f32.mrb[49].mxu1  ;;  %v20871_v2 = vand.u32 4294901760, %v16364_v46 }
 0x1b4   :  { %12336 = vmatpush3.bf16.msra.mxu0 %v20865_v8  ;;  %4682 = vmatprep.mubr.f32.mxu0 %v20866_v49  ;;  %v5081_v7 = vsub.f32 %v16335_v58, %v20868_v47  ;;  %v16462_v1 = vadd.f32 %v9767_v19, %v2164_v42  ;;  %v5194_v8 = vand.u32 4294901760, %v5193_v60  ;;  %v20869_v42 = vand.u32 4294901760, %v16412_v10 }
 0x1b5   :  { %4800 = vmatprep.mubr.f32.mxu1 %v20851_v23  ;;  %12338 = vmatprep.subr.bf16.mxu0 %v16168_v54  ;;  %v20870_v23 = vand.u32 4294901760, %v16356_v31  ;;  %v5207_v60 = vsub.f32 %v16364_v46, %v20871_v2  ;;  %v16480_v41 = vand.u32 4294901760, %v173_v5  ;;  %v9770_v47 = vadd.f32 %v9769_v50, %v9768_v53  ;;  %v20873_v54 = vld [vmem:[#allocation48_spill] sm:$0xff] }
 0x1b6   :  { %4802 = vmatmul.mubr.f32.gmra.mrb[112].mxu1 %v20856_v9  ;;  %12362 = vmatprep.subr.bf16.mxu1 %v16218_v13  ;;  %v4927_v19 = vsub.f32 %v16412_v10, %v20869_v42  ;;  %v16484_v13 = vpack.c.bf16 %v4874_v37, %v4871_v15  ;;  %v16487_v9 = vsub.f32 %v156_v24, %v16449_v61  ;;  %v5075_v2 = vand.u32 4294901760, %v5074_v3 }
 0x1b7   :  { %v5200_v28 = vsub.f32 %v16356_v31, %v20870_v23  ;;  %20872 = vst [vmem:[#allocation17_spill] sm:$0xff] %v16480_v41  ;;  %4684 = vmatmul.mubr.f32.gmra.mrb[116].mxu0 %v20873_v54  ;;  %12364 = vmatpush3.bf16.msra.mxu1 %v16258_v55  ;;  %v20875_v23 = vld [vmem:[#allocation50_spill] sm:$0xff]  ;;  %v16492_v10 = vsub.f32 %v371_v56, %v4874_v37  ;;  %v5082_v46 = vand.u32 4294901760, %v5081_v7  ;;  %v108_v55 = vld [vmem:[%s19379_s0 + $0x140] sm:$0xff]  ;;  %v16504_v42 = vand.u32 4294901760, %v172_v18  ;;  %v20880_v7 = vld [vmem:[#allocation15_spill] sm:$0xff] }
 0x1b8   :  { %20874 = vst [vmem:[#allocation38_spill] sm:$0xff] %v16487_v9  ;;  %12340 = vmatpush3.bf16.msra.mxu0 %v16195_v32  ;;  %4689 = vmatprep.mubr.f32.mxu0 %v20875_v23  ;;  %v189_v50 = vmul.f32 %v109_v57, %v109_v57  ;;  %v16497_v15 = vadd.f32 %v9770_v47, %v2173_v4  ;;  %v125_v56 = vld [vmem:[%s19379_s0 + $0x1c8] sm:$0xff]  ;;  %v4928_v4 = vand.u32 4294901760, %v4927_v19  ;;  %v5208_v3 = vand.u32 4294901760, %v5207_v60  ;;  %v20883_v19 = vld [vmem:[#allocation24_spill] sm:$0xff] }
 0x1b9   :  { %20876 = vst [vmem:[#allocation23_spill] sm:$0xff] %v16492_v10  ;;  %4807 = vmatprep.mubr.f32.mxu1 %v20859_v30  ;;  %12342 = vmatprep.subr.bf16.mxu0 %v16251_v62  ;;  %v16501_v24 = vpack.c.bf16 %v5194_v8, %v5187_v34  ;;  %20877 = vst [vmem:[#allocation9_spill] sm:$0xff] %v16504_v42  ;;  %v5201_v37 = vand.u32 4294901760, %v5200_v28  ;;  %v16512_v30 = vsub.f32 %v173_v5, %v16480_v41  ;;  %v20879_v34 = vld [vmem:[#allocation51_spill] sm:$0xff]  ;;  %v20881_v57 = vld [vmem:[#allocation14_spill] sm:$0xff] }
 0x1ba   :  { %4809 = vmatmul.mubr.f32.gmra.mrb[114].mxu1 %v20863_v44  ;;  %12366 = vmatprep.subr.bf16.mxu1 %v16283_v6  ;;  %v20882_v53 = vand.u32 4294901760, %v16372_v12  ;;  %v188_v6 = vmul.f32 %v108_v55, %v108_v55  ;;  %v16526_v5 = vpack.c.bf16 %v5082_v46, %v5075_v2  ;;  %v20884_v28 = vld [vmem:[#allocation12_spill] sm:$0xff]  ;;  %v16530_v60 = vand.u32 4294901760, %v189_v50 }
 0x1bb   :  { %20878 = vst [vmem:[#allocation28_spill] sm:$0xff] %v16512_v30  ;;  %4691 = vmatmul.mubr.f32.gmra.mrb[118].mxu0 %v20879_v34  ;;  %12368 = vmatpush3.bf16.msra.mxu1 %v16324_v39  ;;  %v205_v8 = vmul.f32 %v125_v56, %v125_v56  ;;  %v124_v47 = vld [vmem:[%s19379_s0 + $0x1c0] sm:$0xff]  ;;  %v20886_v55 = vand.u32 4294901760, %v16386_v40  ;;  %v16541_v46 = vsub.f32 %v172_v18, %v16504_v42  ;;  %v141_v56 = vld [vmem:[%s19379_s0 + $0x248] sm:$0xff]  ;;  %v9803_v39 = vpop.f32.mrb[50].mxu0 }
 0x1bc   :  { %v16522_v44 = vsub.f32 %v16372_v12, %v20882_v53  ;;  %12344 = vmatpush3.bf16.msra.mxu0 %v16272_v43  ;;  %4814 = vmatprep.mubr.f32.mxu1 %v20866_v49  ;;  %20885 = vst [vmem:[#allocation20_spill] sm:$0xff] %v16530_v60  ;;  %v9804_v43 = vpop.f32.mrb[51].mxu0  ;;  %v20887_v53 = vand.u32 4294901760, %v16487_v9  ;;  %v16565_v18 = vsub.f32 %v189_v50, %v16530_v60 }
 0x1bd   :  { %12346 = vmatprep.subr.bf16.mxu0 %v16290_v21  ;;  %12370 = vmatprep.subr.bf16.mxu1 %v16338_v22  ;;  %v5095_v49 = vsub.f32 %v16386_v40, %v20886_v55  ;;  %v12381_v22 = vpack.c.bf16 %v5208_v3, %v5201_v37  ;;  %v19849_v21 = vand.u32 4294901760, %v16512_v30  ;;  %v204_v37 = vmul.f32 %v124_v47, %v124_v47 }
 0x1be   :  { %4816 = vmatmul.mubr.f32.gmra.mrb[116].mxu1 %v20873_v54  ;;  %4929 = vmatprep.mubr.f32.mxu0 %v4928_v4  ;;  %v16557_v2 = vsub.f32 %v16487_v9, %v20887_v53  ;;  %v5089_v54 = vand.u32 4294901760, %v16522_v44  ;;  %v16560_v4 = vand.u32 4294901760, %v188_v6  ;;  %v9805_v3 = vadd.f32 %v9804_v43, %v9803_v39  ;;  %v140_v53 = vld [vmem:[%s19379_s0 + $0x240] sm:$0xff] }
 0x1bf   :  { %12372 = vmatpush3.bf16.msra.mxu1 %v16362_v0  ;;  %4821 = vmatprep.mubr.f32.mxu1 %v20875_v23  ;;  %v16567_v0 = vand.u32 4294901760, %v205_v8  ;;  %v221_v23 = vmul.f32 %v141_v56, %v141_v56  ;;  %v5096_v44 = vand.u32 4294901760, %v5095_v49  ;;  %v20890_v43 = vand.u32 4294901760, %v16388_v38  ;;  %v9806_v56 = vpop.f32.mrb[52].mxu0 }
 0x1c0   :  { %20888 = vst [vmem:[#allocation31_spill] sm:$0xff] %v16560_v4  ;;  %12348 = vmatpush3.bf16.msra.mxu0 %v16326_v25  ;;  %12374 = vmatprep.subr.bf16.mxu1 %v16407_v17  ;;  %v20891_v17 = vand.u32 4294901760, %v16409_v20  ;;  %v2493_v55 = vadd.f32 %v9805_v3, %v16366_v16  ;;  %v4942_v9 = vsub.f32 %v16512_v30, %v19849_v21  ;;  %v20892_v49 = vand.u32 4294901760, %v16454_v26  ;;  %v9807_v25 = vpop.f32.mrb[53].mxu0 }
 0x1c1   :  { %20889 = vst [vmem:[#allocation47_spill] sm:$0xff] %v16567_v0  ;;  %12350 = vmatprep.subr.bf16.mxu0 %v16347_v63  ;;  %v5214_v39 = vsub.f32 %v16388_v38, %v20890_v43  ;;  %v20893_v63 = vand.u32 4294901760, %v16492_v10  ;;  %v4934_v16 = vand.u32 4294901760, %v16557_v2  ;;  %v16597_v3 = vand.u32 4294901760, %v204_v37  ;;  %v9850_v2 = vpop.f32.mrb[50].mxu1 }
 0x1c2   :  { %v5221_v50 = vsub.f32 %v16409_v20, %v20891_v17  ;;  %4823 = vmatmul.mubr.f32.gmra.mrb[118].mxu1 %v20879_v34  ;;  %v5102_v47 = vsub.f32 %v16454_v26, %v20892_v49  ;;  %v16595_v34 = vsub.f32 %v188_v6, %v16560_v4  ;;  %v220_v17 = vmul.f32 %v140_v53, %v140_v53 }
 0x1c3   :  { %v5109_v43 = vsub.f32 %v16492_v10, %v20893_v63  ;;  %12376 = vmatpush3.bf16.msra.mxu1 %v16447_v27  ;;  %5225 = vmatprep.mubr.f32.mxu1 %v16374_v11  ;;  %20894 = vst [vmem:[#allocation48_spill] sm:$0xff] %v16597_v3  ;;  %v9808_v21 = vadd.f32 %v9807_v25, %v9806_v56  ;;  %v16605_v27 = vand.u32 4294901760, %v221_v23  ;;  %v20896_v11 = vand.u32 4294901760, %v16541_v46 }
 0x1c4   :  { %12352 = vmatpush3.bf16.msra.mxu0 %v16369_v51  ;;  %12378 = vmatprep.subr.bf16.mxu1 %v16501_v24  ;;  %v16603_v49 = vsub.f32 %v205_v8, %v16567_v0  ;;  %v12383_v6 = vpack.c.bf16 %v5096_v44, %v5089_v54  ;;  %v5215_v25 = vand.u32 4294901760, %v5214_v39  ;;  %v5222_v56 = vand.u32 4294901760, %v5221_v50  ;;  %v9809_v24 = vpop.f32.mrb[54].mxu0  ;;  %v9851_v51 = vpop.f32.mrb[51].mxu1 }
 0x1c5   :  { %20895 = vst [vmem:[#allocation50_spill] sm:$0xff] %v16605_v27  ;;  %12354 = vmatprep.subr.bf16.mxu0 %v16397_v35  ;;  %v4948_v53 = vsub.f32 %v16541_v46, %v20896_v11  ;;  %v2500_v30 = vadd.f32 %v9808_v21, %v16393_v59  ;;  %v4943_v63 = vand.u32 4294901760, %v4942_v9  ;;  %v5103_v62 = vand.u32 4294901760, %v5102_v47  ;;  %v9810_v32 = vpop.f32.mrb[55].mxu0  ;;  %v9853_v47 = vpop.f32.mrb[52].mxu1 }
 0x1c6   :  { %v5110_v8 = vand.u32 4294901760, %v5109_v43  ;;  %v9852_v10 = vadd.f32 %v9851_v51, %v9850_v2  ;;  %v19867_v35 = vand.u32 4294901760, %v16595_v34  ;;  %v16615_v54 = vsub.f32 %v204_v37, %v16597_v3  ;;  %v9812_v50 = vpop.f32.mrb[56].mxu0  ;;  %v9854_v43 = vpop.f32.mrb[53].mxu1 }
 0x1c7   :  { %12380 = vmatpush3.bf16.msra.mxu1 %v16526_v5  ;;  %v16617_v44 = vand.u32 4294901760, %v220_v17  ;;  %v9811_v11 = vadd.f32 %v9810_v32, %v9809_v24  ;;  %v20899_v21 = vand.u32 4294901760, %v16565_v18  ;;  %v19864_v9 = vand.u32 4294901760, %v16603_v49 }
 0x1c8   :  { %20897 = vst [vmem:[#allocation51_spill] sm:$0xff] %v16615_v54  ;;  %12356 = vmatpush3.bf16.msra.mxu0 %v16484_v13  ;;  %12382 = vmatprep.subr.bf16.mxu1 %v12381_v22  ;;  %v16625_v51 = vsub.f32 %v221_v23, %v16605_v27  ;;  %v16627_v5 = vadd.f32 %v9852_v10, %v2493_v55  ;;  %v4949_v2 = vand.u32 4294901760, %v4948_v53  ;;  %v9813_v10 = vpop.f32.mrb[57].mxu0 }
 0x1c9   :  { %20898 = vst [vmem:[#allocation15_spill] sm:$0xff] %v16617_v44  ;;  %v4957_v59 = vsub.f32 %v16565_v18, %v20899_v21  ;;  %v20901_v37 = vpack.c.bf16 %v20881_v57, %v20880_v7  ;;  %v12385_v32 = vpack.c.bf16 %v5222_v56, %v5215_v25  ;;  %v12393_v22 = vpack.c.bf16 %v16067_v14, %v16059_v29 }
 0x1ca   :  { %20900 = vst [vmem:[#allocation14_spill] sm:$0xff] %v16625_v51  ;;  %v2507_v39 = vadd.f32 %v9811_v11, %v16427_v48  ;;  %v12387_v24 = vpack.c.bf16 %v5110_v8, %v5103_v62  ;;  %v12395_v23 = vpack.c.bf16 %v16077_v45, %v16075_v33  ;;  %v9855_v55 = vadd.f32 %v9854_v43, %v9853_v47  ;;  %v9856_v11 = vpop.f32.mrb[54].mxu1 }
 0x1cb   :  { %12390 = vmatprep.subr.bf16.mxu0 %v20901_v37  ;;  %4935 = vmatmul.mubr.f32.vlgmr.msra.gmra.mrb[120].mxu0 %v4934_v16  ;;  %v4963_v25 = vsub.f32 %v16595_v34, %v19867_v35  ;;  %v19865_v56 = vand.u32 4294901760, %v16615_v54  ;;  %v16642_v21 = vsub.f32 %v220_v17, %v16617_v44  ;;  %v9814_v48 = vadd.f32 %v9813_v10, %v9812_v50  ;;  %v20904_v17 = vld [vmem:[#allocation36_spill] sm:$0xff]  ;;  %v9815_v50 = vpop.f32.mrb[58].mxu0  ;;  %v9857_v43 = vpop.f32.mrb[55].mxu1 }
 0x1cc   :  { %12384 = vmatpush3.bf16.msra.mxu1 %v12383_v6  ;;  %v20903_v62 = vpack.c.bf16 %v20884_v28, %v20883_v19  ;;  %4944 = vmatprep.mubr.f32.mxu0 %v4943_v63  ;;  %v4958_v53 = vand.u32 4294901760, %v4957_v59  ;;  %v4972_v16 = vsub.f32 %v16603_v49, %v19864_v9  ;;  %v19866_v6 = vand.u32 4294901760, %v16625_v51  ;;  %v9816_v63 = vpop.f32.mrb[59].mxu0 }
 0x1cd   :  { %20902 = vst [vmem:[#allocation24_spill] sm:$0xff] %v16642_v21  ;;  %v16651_v8 = vadd.f32 %v9855_v55, %v2500_v30  ;;  %12386 = vmatprep.subr.bf16.mxu1 %v12385_v32  ;;  %v12397_v47 = vpack.c.bf16 %v20904_v17, %v16089_v36  ;;  %v2514_v37 = vadd.f32 %v9814_v48, %v16462_v1  ;;  %v4964_v10 = vand.u32 4294901760, %v4963_v25  ;;  %v20907_v25 = vld [vmem:[#allocation30_spill] sm:$0xff] }
 0x1ce   :  { %12392 = vmatpush3.bf16.msra.mxu0 %v20903_v62  ;;  %v9858_v59 = vadd.f32 %v9857_v43, %v9856_v11  ;;  %v4978_v30 = vsub.f32 %v16615_v54, %v19865_v56  ;;  %v19870_v55 = vand.u32 4294901760, %v16642_v21  ;;  %v9817_v32 = vadd.f32 %v9816_v63, %v9815_v50  ;;  %v20906_v62 = vld [vmem:[#allocation44_spill] sm:$0xff]  ;;  %v20908_v11 = vld [vmem:[#allocation7_spill] sm:$0xff]  ;;  %v20909_v43 = vld [vmem:[#allocation33_spill] sm:$0xff] }
 0x1cf   :  { %12394 = vmatprep.subr.bf16.mxu0 %v12393_v22  ;;  %4950 = vmatmul.mubr.f32.gmra.mrb[122].mxu0 %v4949_v2  ;;  %v20905_v22 = vld [vmem:[#allocation26_spill] sm:$0xff]  ;;  %v4973_v1 = vand.u32 4294901760, %v4972_v16  ;;  %v4987_v48 = vsub.f32 %v16625_v51, %v19866_v6  ;;  %v12401_v56 = vpack.c.bf16 %v20909_v43, %v20908_v11 }
 0x1d0   :  { %12388 = vmatpush3.bf16.msra.mxu1 %v12387_v24  ;;  %4959 = vmatprep.mubr.f32.mxu0 %v4958_v53  ;;  %v12399_v9 = vpack.c.bf16 %v20906_v62, %v20905_v22  ;;  %v16665_v2 = vadd.f32 %v9858_v59, %v2507_v39  ;;  %v9859_v24 = vpop.f32.mrb[56].mxu1  ;;  %v20910_v16 = vld [vmem:[#allocation18_spill] sm:$0xff]  ;;  %v4979_v63 = vand.u32 4294901760, %v4978_v30  ;;  %v4993_v39 = vsub.f32 %v16642_v21, %v19870_v55  ;;  %v20912_v59 = vld [vmem:[#allocation16_spill] sm:$0xff] }
 0x1d1   :  { %12422 = vmatprep.subr.bf16.mxu1 %v20907_v25  ;;  %v9860_v53 = vpop.f32.mrb[57].mxu1  ;;  %v4988_v35 = vand.u32 4294901760, %v4987_v48  ;;  %v20918_v48 = vld [vmem:[#allocation41_spill] sm:$0xff]  ;;  %v20928_v21 = vand.u32 4294901760, %v20883_v19 }
 0x1d2   :  { %12396 = vmatpush3.bf16.msra.mxu0 %v12395_v23  ;;  %v2521_v23 = vadd.f32 %v9817_v32, %v16497_v15  ;;  %v9861_v50 = vadd.f32 %v9860_v53, %v9859_v24  ;;  %v9862_v15 = vpop.f32.mrb[58].mxu1  ;;  %v20914_v32 = vld [vmem:[#allocation19_spill] sm:$0xff]  ;;  %v20915_v53 = vld [vmem:[#allocation6_spill] sm:$0xff]  ;;  %v4994_v55 = vand.u32 4294901760, %v4993_v39 }
 0x1d3   :  { %12398 = vmatprep.subr.bf16.mxu0 %v12397_v47  ;;  %5227 = vmatmul.mubr.f32.vlgmr.msra.gmra.mrb[120].mxu1 %v16449_v61  ;;  %v20911_v47 = vld [vmem:[#allocation46_spill] sm:$0xff]  ;;  %v9863_v30 = vpop.f32.mrb[59].mxu1  ;;  %v20920_v61 = vld [vmem:[#allocation49_spill] sm:$0xff] }
 0x1d4   :  { %4965 = vmatmul.mubr.f32.gmra.mrb[124].mxu0 %v4964_v10  ;;  %12424 = vmatpush3.bf16.msra.mxu1 %v20910_v16  ;;  %v12403_v6 = vpack.c.bf16 %v20912_v59, %v20911_v47  ;;  %v16678_v51 = vadd.f32 %v9861_v50, %v2514_v37  ;;  %v20913_v10 = vld [vmem:[#allocation40_spill] sm:$0xff]  ;;  %v20917_v37 = vld [vmem:[#allocation29_spill] sm:$0xff] }
 0x1d5   :  { %4974 = vmatprep.mubr.f32.mxu0 %v4973_v1  ;;  %5232 = vmatprep.mubr.f32.mxu1 %v16480_v41  ;;  %v12405_v24 = vpack.c.bf16 %v20914_v32, %v20913_v10  ;;  %v20916_v1 = vld [vmem:[#allocation13_spill] sm:$0xff]  ;;  %v12407_v50 = vpack.c.bf16 %v20918_v48, %v20917_v37 }
 0x1d6   :  { %12400 = vmatpush3.bf16.msra.mxu0 %v12399_v9  ;;  %12426 = vmatprep.subr.bf16.mxu1 %v20915_v53  ;;  %v9864_v9 = vadd.f32 %v9863_v30, %v9862_v15  ;;  %v20921_v15 = vld [vmem:[#allocation21_spill] sm:$0xff]  ;;  %v12417_v30 = vpack.c.bf16 %v16409_v20, %v16388_v38 }
 0x1d7   :  { %12402 = vmatprep.subr.bf16.mxu0 %v12401_v56  ;;  %5234 = vmatmul.mubr.f32.gmra.mrb[122].mxu1 %v16504_v42  ;;  %v20919_v56 = vld [vmem:[#allocation34_spill] sm:$0xff] }
 0x1d8   :  { %4980 = vmatmul.mubr.f32.gmra.mrb[126].mxu0 %v4979_v63  ;;  %12428 = vmatpush3.bf16.msra.mxu1 %v20916_v1  ;;  %v16688_v41 = vadd.f32 %v9864_v9, %v2521_v23  ;;  %v12409_v42 = vpack.c.bf16 %v20920_v61, %v20919_v56  ;;  %v12411_v23 = vpack.c.bf16 %v16335_v58, %v16328_v52  ;;  %v20923_v63 = vld [vmem:[#allocation22_spill] sm:$0xff]  ;;  %v20924_v9 = vld [vmem:[#allocation32_spill] sm:$0xff] }
 0x1d9   :  { %4989 = vmatprep.mubr.f32.mxu0 %v4988_v35  ;;  %5239 = vmatprep.mubr.f32.mxu1 %v16530_v60  ;;  %v20922_v35 = vld [vmem:[#allocation43_spill] sm:$0xff]  ;;  %v12413_v39 = vpack.c.bf16 %v20923_v63, %v16356_v31  ;;  %v20927_v60 = vand.u32 4294901760, %v20881_v57  ;;  %v20931_v57 = vand.u32 4294901760, %v16059_v29  ;;  %v389_v29 = vld [vmem:[%s19381_s2 + $0x508] sm:$0xff] }
 0x1da   :  { %12404 = vmatpush3.bf16.msra.mxu0 %v12403_v6  ;;  %12430 = vmatprep.subr.bf16.mxu1 %v20921_v15  ;;  %v16698_v6 = vld [vmem:[%s19381_s2 + $0x580] sm:$0xff]  ;;  %v20929_v15 = vand.u32 4294901760, %v20884_v28  ;;  %v20933_v28 = vand.u32 4294901760, %v16075_v33  ;;  %v20938_v33 = vand.u32 4294901760, %v20905_v22  ;;  %v406_v22 = vld [vmem:[%s19381_s2 + $0x590] sm:$0xff] }
 0x1db   :  { %12406 = vmatprep.subr.bf16.mxu0 %v12405_v24  ;;  %5241 = vmatmul.mubr.f32.gmra.mrb[124].mxu1 %v16560_v4  ;;  %v12415_v24 = vpack.c.bf16 %v16386_v40, %v16372_v12  ;;  %v5963_v54 = vand.u32 4294901760, %v16698_v6  ;;  %v20936_v4 = vand.u32 4294901760, %v20904_v17 }
 0x1dc   :  { %4995 = vmatmul.mubr.f32.gmra.mrb[128].mxu0 %v4994_v55  ;;  %12432 = vmatpush3.bf16.msra.mxu1 %v20922_v35  ;;  %v405_v55 = vld [vmem:[%s19381_s2 + $0x588] sm:$0xff]  ;;  %v16726_v1 = vpack.c.bf16 %v20929_v15, %v20928_v21  ;;  %v20935_v15 = vand.u32 4294901760, %v16089_v36  ;;  %v20940_v36 = vand.u32 4294901760, %v20908_v11  ;;  %v20945_v11 = vand.u32 4294901760, %v20913_v10 }
 0x1dd   :  { %5246 = vmatprep.mubr.f32.mxu1 %v16567_v0  ;;  %12434 = vmatprep.subr.bf16.mxu1 %v20924_v9  ;;  %v20926_v0 = vand.u32 4294901760, %v20880_v7  ;;  %v9897_v9 = vpop.f32.mrb[60].mxu0  ;;  %v20930_v7 = vld [vmem:[#allocation35_spill] sm:$0xff]  ;;  %v20950_v10 = vand.u32 4294901760, %v20920_v61 }
 0x1de   :  { %12408 = vmatpush3.bf16.msra.mxu0 %v12407_v50  ;;  %v20925_v50 = vld [vmem:[#allocation23_spill] sm:$0xff]  ;;  %5390 = vmatprep.mubr.f32.mxu0 %v20930_v7  ;;  %v16750_v53 = vpack.c.bf16 %v20936_v4, %v20935_v15  ;;  %v20941_v4 = vand.u32 4294901760, %v20909_v43  ;;  %v5966_v15 = vand.u32 4294901760, %v405_v55  ;;  %v20946_v43 = vand.u32 4294901760, %v20914_v32 }
 0x1df   :  { %12410 = vmatprep.subr.bf16.mxu0 %v12409_v42  ;;  %v16720_v35 = vpack.c.bf16 %v20927_v60, %v20926_v0  ;;  %v388_v42 = vld [vmem:[%s19381_s2 + $0x500] sm:$0xff]  ;;  %5248 = vmatmul.mubr.f32.gmra.mrb[126].mxu1 %v16597_v3  ;;  %v20932_v60 = vand.u32 4294901760, %v16067_v14  ;;  %v20934_v0 = vand.u32 4294901760, %v16077_v45  ;;  %v9898_v3 = vpop.f32.mrb[61].mxu0  ;;  %v20937_v14 = vld [vmem:[#allocation27_spill] sm:$0xff]  ;;  %v20939_v45 = vand.u32 4294901760, %v20906_v62 }
 0x1e0   :  { %12436 = vmatpush3.bf16.msra.mxu1 %v20937_v14  ;;  %5253 = vmatprep.mubr.f32.mxu1 %v16605_v27  ;;  %v16767_v17 = vpack.c.bf16 %v20941_v4, %v20940_v36  ;;  %v9899_v62 = vadd.f32 %v9898_v3, %v9897_v9  ;;  %v5915_v4 = vand.u32 4294901760, %v388_v42  ;;  %v407_v3 = vld [vmem:[%s19381_s2 + $0x598] sm:$0xff]  ;;  %v20951_v32 = vand.u32 4294901760, %v16328_v52 }
 0x1e1   :  { %v16738_v19 = vpack.c.bf16 %v20932_v60, %v20931_v57  ;;  %v16744_v21 = vpack.c.bf16 %v20934_v0, %v20933_v28  ;;  %v16761_v57 = vpack.c.bf16 %v20939_v45, %v20938_v33  ;;  %v20942_v60 = vand.u32 4294901760, %v20911_v47  ;;  %v20944_v33 = vld [vmem:[#allocation5_spill] sm:$0xff]  ;;  %v391_v61 = vld [vmem:[%s19381_s2 + $0x518] sm:$0xff] }
 0x1e2   :  { %v20943_v28 = vand.u32 4294901760, %v20912_v59  ;;  %12412 = vmatpush3.bf16.msra.mxu0 %v12411_v23  ;;  %12438 = vmatprep.subr.bf16.mxu1 %v20944_v33  ;;  %v16783_v45 = vpack.c.bf16 %v20946_v43, %v20945_v11  ;;  %v20947_v47 = vand.u32 4294901760, %v20917_v37  ;;  %v20948_v59 = vand.u32 4294901760, %v20918_v48  ;;  %v9900_v11 = vpop.f32.mrb[62].mxu0 }
 0x1e3   :  { %12414 = vmatprep.subr.bf16.mxu0 %v12413_v39  ;;  %v20949_v23 = vand.u32 4294901760, %v20919_v56  ;;  %v20952_v37 = vand.u32 4294901760, %v16335_v58  ;;  %v16807_v48 = vsub.f32 %v16698_v6, %v5963_v54  ;;  %v390_v39 = vld [vmem:[%s19381_s2 + $0x510] sm:$0xff]  ;;  %v2765_v56 = vadd.f32 %v9899_v62, %v16627_v5  ;;  %5255 = vmatmul.mubr.f32.gmra.mrb[128].mxu1 %v16617_v44 }
 0x1e4   :  { %v16773_v0 = vpack.c.bf16 %v20943_v28, %v20942_v60  ;;  %v16789_v36 = vpack.c.bf16 %v20948_v59, %v20947_v47  ;;  %v5918_v28 = vand.u32 4294901760, %v389_v29  ;;  %v20954_v58 = vand.u32 4294901760, %v16356_v31 }
 0x1e5   :  { %v16798_v9 = vpack.c.bf16 %v20950_v10, %v20949_v23  ;;  %v16804_v60 = vpack.c.bf16 %v20952_v37, %v20951_v32  ;;  %20953 = vst [vmem:[#allocation12_spill] sm:$0xff] %v16807_v48  ;;  %v20955_v52 = vand.u32 4294901760, %v20923_v63  ;;  %v20956_v43 = vand.u32 4294901760, %v16372_v12  ;;  %v9901_v10 = vpop.f32.mrb[63].mxu0  ;;  %v20959_v32 = vld [vmem:[#allocation39_spill] sm:$0xff] }
 0x1e6   :  { %v20957_v47 = vand.u32 4294901760, %v16386_v40  ;;  %v5969_v23 = vand.u32 4294901760, %v406_v22  ;;  %12440 = vmatpush3.bf16.msra.mxu1 %v20959_v32  ;;  %v20960_v5 = vand.u32 4294901760, %v20930_v7  ;;  %v20961_v62 = vand.u32 4294901760, %v16388_v38  ;;  %v408_v7 = vld [vmem:[%s19381_s2 + $0x5a0] sm:$0xff]  ;;  %v409_v38 = vld [vmem:[%s19381_s2 + $0x5a8] sm:$0xff]  ;;  %12416 = vmatpush3.bf16.msra.mxu0 %v12415_v24 }
 0x1e7   :  { %v16821_v6 = vpack.c.bf16 %v20955_v52, %v20954_v58  ;;  %v20962_v31 = vand.u32 4294901760, %v16409_v20  ;;  %v20964_v37 = vand.u32 4294901760, %v16454_v26  ;;  %v20965_v12 = vand.u32 4294901760, %v20925_v50  ;;  %12418 = vmatprep.subr.bf16.mxu0 %v12417_v30 }
 0x1e8   :  { %v16827_v59 = vpack.c.bf16 %v20957_v47, %v20956_v43  ;;  %5533 = vmatprep.mubr.f32.mxu1 %v20960_v5  ;;  %v16844_v58 = vsub.f32 %v405_v55, %v5966_v15  ;;  %v5972_v52 = vand.u32 4294901760, %v407_v3  ;;  %v9902_v20 = vadd.f32 %v9901_v10, %v9900_v11  ;;  %v20968_v43 = vld [vmem:[#allocation8_spill] sm:$0xff]  ;;  %v9903_v11 = vpop.f32.mrb[64].mxu0 }
 0x1e9   :  { %v16836_v63 = vpack.c.bf16 %v20962_v31, %v20961_v62  ;;  %v16842_v40 = vpack.c.bf16 %v20965_v12, %v20964_v37  ;;  %12442 = vmatprep.subr.bf16.mxu1 %v20968_v43  ;;  %v16853_v47 = vsub.f32 %v388_v42, %v5915_v4  ;;  %v5921_v5 = vand.u32 4294901760, %v390_v39  ;;  %v9944_v31 = vpop.f32.mrb[60].mxu1 }
 0x1ea   :  { %20958 = vst [vmem:[#allocation36_spill] sm:$0xff] %v16827_v59  ;;  %20967 = vst [vmem:[#allocation30_spill] sm:$0xff] %v16844_v58  ;;  %v5924_v62 = vand.u32 4294901760, %v391_v61  ;;  %v16855_v55 = vpack.c.bf16 %v5966_v15, %v5963_v54  ;;  %v16857_v37 = vpack.c.bf16 %v5918_v28, %v5915_v4  ;;  %v16859_v12 = vsub.f32 %v389_v29, %v5918_v28  ;;  %v9945_v24 = vpop.f32.mrb[61].mxu1  ;;  %v20973_v59 = vld [vmem:[#allocation25_spill] sm:$0xff]  ;;  %v20977_v28 = vld [vmem:[#allocation10_spill] sm:$0xff] }
 0x1eb   :  { %20963 = vst [vmem:[#allocation26_spill] sm:$0xff] %v16836_v63  ;;  %20966 = vst [vmem:[#allocation44_spill] sm:$0xff] %v16842_v40  ;;  %v19893_v44 = vand.u32 4294901760, %v16807_v48  ;;  %v2780_v27 = vadd.f32 %v9902_v20, %v16651_v8  ;;  %v16863_v10 = vsub.f32 %v406_v22, %v5969_v23  ;;  %v5975_v42 = vand.u32 4294901760, %v408_v7  ;;  %v9904_v63 = vpop.f32.mrb[65].mxu0  ;;  %12444 = vmatpush3.bf16.msra.mxu1 %v20973_v59  ;;  %v392_v8 = vld [vmem:[%s19381_s2 + $0x520] sm:$0xff] }
 0x1ec   :  { %20969 = vst [vmem:[#allocation7_spill] sm:$0xff] %v16853_v47  ;;  %20970 = vst [vmem:[#allocation33_spill] sm:$0xff] %v16855_v55  ;;  %v5978_v40 = vand.u32 4294901760, %v409_v38  ;;  %v9946_v43 = vadd.f32 %v9945_v24, %v9944_v31  ;;  %v16866_v54 = vpack.c.bf16 %v5972_v52, %v5969_v23  ;;  %v16868_v30 = vsub.f32 %v407_v3, %v5972_v52  ;;  %v393_v15 = vld [vmem:[%s19381_s2 + $0x528] sm:$0xff]  ;;  %v9947_v31 = vpop.f32.mrb[62].mxu1 }
 0x1ed   :  { %20971 = vst [vmem:[#allocation18_spill] sm:$0xff] %v16857_v37  ;;  %20972 = vst [vmem:[#allocation46_spill] sm:$0xff] %v16863_v10  ;;  %v19897_v29 = vand.u32 4294901760, %v16844_v58  ;;  %v9905_v22 = vadd.f32 %v9904_v63, %v9903_v11  ;;  %v20976_v4 = vpack.c.bf16 %v20925_v50, %v16454_v26  ;;  %12446 = vmatprep.subr.bf16.mxu1 %v20977_v28  ;;  %v9906_v63 = vpop.f32.mrb[66].mxu0 }
 0x1ee   :  { %20974 = vst [vmem:[#allocation16_spill] sm:$0xff] %v16866_v54  ;;  %20975 = vst [vmem:[#allocation40_spill] sm:$0xff] %v16868_v30  ;;  %v16881_v23 = vpack.c.bf16 %v5924_v62, %v5921_v5  ;;  %v16883_v3 = vsub.f32 %v390_v39, %v5921_v5  ;;  %v16886_v20 = vadd.f32 %v9946_v43, %v2765_v56  ;;  %v16900_v39 = vld [vmem:[%s19381_s2 + $0x5b0] sm:$0xff]  ;;  %v9948_v43 = vpop.f32.mrb[63].mxu1 }
 0x1ef   :  { %12420 = vmatpush3.bf16.msra.mxu0 %v20976_v4  ;;  %v16889_v24 = vsub.f32 %v391_v61, %v5924_v62  ;;  %v16894_v26 = vsub.f32 %v16807_v48, %v19893_v44  ;;  %v2795_v56 = vadd.f32 %v9905_v22, %v16665_v2  ;;  %v16903_v5 = vpack.c.bf16 %v5978_v40, %v5975_v42  ;;  %v9907_v62 = vpop.f32.mrb[67].mxu0  ;;  %v20982_v4 = vld [vmem:[#allocation38_spill] sm:$0xff]  ;;  %v20983_v44 = vld [vmem:[#allocation45_spill] sm:$0xff]  ;;  %v20985_v22 = vld [vmem:[#allocation28_spill] sm:$0xff] }
 0x1f0   :  { %20978 = vst [vmem:[#allocation19_spill] sm:$0xff] %v16881_v23  ;;  %20979 = vst [vmem:[#allocation29_spill] sm:$0xff] %v16883_v3  ;;  %12454 = vmatprep.subr.bf16.mxu0 %v16720_v35  ;;  %v5927_v35 = vand.u32 4294901760, %v392_v8  ;;  %v5930_v61 = vand.u32 4294901760, %v393_v15  ;;  %v9949_v11 = vadd.f32 %v9948_v43, %v9947_v31  ;;  %12448 = vmatpush3.bf16.msra.mxu1 %v20983_v44  ;;  %v20987_v31 = vand.u32 4294901760, %v16853_v47 }
 0x1f1   :  { %20980 = vst [vmem:[#allocation41_spill] sm:$0xff] %v16889_v24  ;;  %20981 = vst [vmem:[#allocation34_spill] sm:$0xff] %v16903_v5  ;;  %v16907_v50 = vsub.f32 %v408_v7, %v5975_v42  ;;  %v16912_v52 = vsub.f32 %v16844_v58, %v19897_v29  ;;  %v9908_v2 = vadd.f32 %v9907_v62, %v9906_v63  ;;  %v411_v7 = vld [vmem:[%s19381_s2 + $0x5b8] sm:$0xff]  ;;  %v5981_v42 = vand.u32 4294901760, %v16900_v39  ;;  %v9950_v29 = vpop.f32.mrb[64].mxu1 }
 0x1f2   :  { %5393 = vmatmul.mubr.f32.vlgmr.msra.gmra.mrb[130].mxu0 %v20982_v4  ;;  %v16916_v48 = vsub.f32 %v409_v38, %v5978_v40  ;;  %v6090_v43 = vsub.f32 %v16853_v47, %v20987_v31  ;;  %v16925_v5 = vadd.f32 %v9949_v11, %v2780_v27  ;;  %v20988_v63 = vld [vmem:[#allocation11_spill] sm:$0xff]  ;;  %v20989_v40 = vand.u32 4294901760, %v16859_v12  ;;  %v9909_v47 = vpop.f32.mrb[68].mxu0  ;;  %v9951_v58 = vpop.f32.mrb[65].mxu1 }
 0x1f3   :  { %20984 = vst [vmem:[#allocation49_spill] sm:$0xff] %v16907_v50  ;;  %12456 = vmatpush3.bf16.msra.mxu0 %v16726_v1  ;;  %5399 = vmatprep.mubr.f32.mxu0 %v20985_v22  ;;  %v6203_v1 = vand.u32 4294901760, %v16894_v26  ;;  %v2810_v31 = vadd.f32 %v9908_v2, %v16678_v51  ;;  %v16935_v23 = vpack.c.bf16 %v5930_v61, %v5927_v35  ;;  %v9910_v26 = vpop.f32.mrb[69].mxu0  ;;  %v6210_v51 = vand.u32 4294901760, %v16912_v52 }
 0x1f4   :  { %20986 = vst [vmem:[#allocation22_spill] sm:$0xff] %v16916_v48  ;;  %12450 = vmatprep.subr.bf16.mxu1 %v20988_v63  ;;  %12458 = vmatprep.subr.bf16.mxu0 %v16738_v19  ;;  %v6097_v38 = vsub.f32 %v16859_v12, %v20989_v40  ;;  %v16937_v27 = vsub.f32 %v392_v8, %v5927_v35  ;;  %v16943_v19 = vld [vmem:[%s19381_s2 + $0x530] sm:$0xff]  ;;  %v5984_v40 = vand.u32 4294901760, %v411_v7  ;;  %v16953_v8 = vld [vmem:[%s19381_s2 + $0x538] sm:$0xff]  ;;  %v19904_v11 = vand.u32 4294901760, %v16889_v24 }
 0x1f5   :  { %20990 = vst [vmem:[#allocation23_spill] sm:$0xff] %v16935_v23  ;;  %v9952_v54 = vadd.f32 %v9951_v58, %v9950_v29  ;;  %12452 = vmatpush3.bf16.msra.mxu1 %v16484_v13  ;;  %v16948_v2 = vsub.f32 %v393_v15, %v5930_v61  ;;  %v9911_v35 = vadd.f32 %v9910_v26, %v9909_v47  ;;  %v6091_v58 = vand.u32 4294901760, %v6090_v43  ;;  %v9953_v15 = vpop.f32.mrb[66].mxu1 }
 0x1f6   :  { %20991 = vst [vmem:[#allocation35_spill] sm:$0xff] %v16937_v27  ;;  %5402 = vmatmul.mubr.f32.gmra.mrb[132].mxu0 %v16541_v46  ;;  %12486 = vmatprep.subr.bf16.mxu1 %v20907_v25  ;;  %v6098_v52 = vand.u32 4294901760, %v6097_v38  ;;  %v20993_v61 = vand.u32 4294901760, %v16863_v10  ;;  %v9954_v26 = vpop.f32.mrb[67].mxu1  ;;  %v20994_v29 = vand.u32 4294901760, %v20982_v4  ;;  %v16977_v25 = vld [vmem:[%s19381_s2 + $0x5c0] sm:$0xff]  ;;  %v16985_v4 = vsub.f32 %v16900_v39, %v5981_v42 }
 0x1f7   :  { %20992 = vst [vmem:[#allocation27_spill] sm:$0xff] %v16948_v2  ;;  %12460 = vmatpush3.bf16.msra.mxu0 %v16744_v21  ;;  %5408 = vmatprep.mubr.f32.mxu0 %v16565_v18  ;;  %v16959_v62 = vadd.f32 %v9952_v54, %v2795_v56  ;;  %v5933_v21 = vand.u32 4294901760, %v16943_v19  ;;  %v2825_v43 = vadd.f32 %v9911_v35, %v16688_v41  ;;  %v20995_v54 = vand.u32 4294901760, %v16868_v30  ;;  %v9956_v39 = vpop.f32.mrb[68].mxu1 }
 0x1f8   :  { %12462 = vmatprep.subr.bf16.mxu0 %v16750_v53  ;;  %v6216_v47 = vsub.f32 %v16863_v10, %v20993_v61  ;;  %5537 = vmatmul.mubr.f32.vlgmr.msra.gmra.mrb[130].mxu1 %v20994_v29  ;;  %v5936_v53 = vand.u32 4294901760, %v16953_v8  ;;  %v19905_v38 = vand.u32 4294901760, %v16907_v50  ;;  %v9955_v61 = vadd.f32 %v9954_v26, %v9953_v15  ;;  %20997 = vst [vmem:[#allocation39_spill] sm:$0xff] %v16985_v4  ;;  %v9957_v35 = vpop.f32.mrb[69].mxu1 }
 0x1f9   :  { %v6223_v56 = vsub.f32 %v16868_v30, %v20995_v54  ;;  %12488 = vmatpush3.bf16.msra.mxu1 %v20910_v16  ;;  %v16982_v41 = vpack.c.bf16 %v5984_v40, %v5981_v42  ;;  %v16990_v29 = vsub.f32 %v411_v7, %v5984_v40  ;;  %v20999_v54 = vand.u32 4294901760, %v16883_v3  ;;  %v413_v40 = vld [vmem:[%s19381_s2 + $0x5c8] sm:$0xff] }
 0x1fa   :  { %5411 = vmatmul.mubr.f32.gmra.mrb[134].mxu0 %v16595_v34  ;;  %v6111_v16 = vsub.f32 %v16889_v24, %v19904_v11  ;;  %v16998_v26 = vadd.f32 %v9955_v61, %v2810_v31  ;;  %v21000_v42 = vand.u32 4294901760, %v20985_v22  ;;  %v17005_v7 = vpack.c.bf16 %v6098_v52, %v6091_v58  ;;  %v21002_v61 = vld [vmem:[#allocation6_spill] sm:$0xff]  ;;  %v21004_v58 = vld [vmem:[#allocation51_spill] sm:$0xff]  ;;  %v21005_v52 = vld [vmem:[#allocation13_spill] sm:$0xff] }
 0x1fb   :  { %20996 = vst [vmem:[#allocation5_spill] sm:$0xff] %v16982_v41  ;;  %12464 = vmatpush3.bf16.msra.mxu0 %v16761_v57  ;;  %5417 = vmatprep.mubr.f32.mxu0 %v16603_v49  ;;  %20998 = vst [vmem:[#allocation25_spill] sm:$0xff] %v16990_v29  ;;  %v6104_v15 = vsub.f32 %v16883_v3, %v20999_v54  ;;  %v17003_v57 = vpack.c.bf16 %v6210_v51, %v6203_v1  ;;  %v5987_v54 = vand.u32 4294901760, %v16977_v25  ;;  %v396_v1 = vld [vmem:[%s19381_s2 + $0x540] sm:$0xff] }
 0x1fc   :  { %5544 = vmatprep.mubr.f32.mxu1 %v21000_v42  ;;  %12466 = vmatprep.subr.bf16.mxu0 %v16767_v17  ;;  %v21001_v31 = vand.u32 4294901760, %v16541_v46  ;;  %v6217_v22 = vand.u32 4294901760, %v6216_v47  ;;  %v6224_v42 = vand.u32 4294901760, %v6223_v56  ;;  %v17014_v11 = vpack.c.bf16 %v5936_v53, %v5933_v21  ;;  %v397_v56 = vld [vmem:[%s19381_s2 + $0x548] sm:$0xff] }
 0x1fd   :  { %12490 = vmatprep.subr.bf16.mxu1 %v21002_v61  ;;  %v6230_v17 = vsub.f32 %v16907_v50, %v19905_v38  ;;  %v9958_v51 = vadd.f32 %v9957_v35, %v9956_v39  ;;  %v21006_v46 = vand.u32 4294901760, %v16916_v48  ;;  %v21007_v38 = vld [vmem:[#allocation14_spill] sm:$0xff]  ;;  %v17035_v35 = vsub.f32 %v16943_v19, %v5933_v21  ;;  %v21015_v19 = vld [vmem:[#allocation43_spill] sm:$0xff] }
 0x1fe   :  { %5548 = vmatmul.mubr.f32.gmra.mrb[132].mxu1 %v21001_v31  ;;  %21003 = vst [vmem:[#allocation10_spill] sm:$0xff] %v17014_v11  ;;  %5420 = vmatmul.mubr.f32.gmra.mrb[136].mxu0 %v21004_v58  ;;  %v6105_v39 = vand.u32 4294901760, %v6104_v15  ;;  %v5990_v50 = vand.u32 4294901760, %v413_v40  ;;  %v5939_v31 = vand.u32 4294901760, %v396_v1  ;;  %v21010_v21 = vand.u32 4294901760, %v16595_v34  ;;  %v21011_v15 = vld [vmem:[#allocation21_spill] sm:$0xff] }
 0x1ff   :  { %12492 = vmatpush3.bf16.msra.mxu1 %v21005_v52  ;;  %v6237_v47 = vsub.f32 %v16916_v48, %v21006_v46  ;;  %12468 = vmatpush3.bf16.msra.mxu0 %v16773_v0  ;;  %21008 = vst [vmem:[#allocation38_spill] sm:$0xff] %v17035_v35  ;;  %v6112_v52 = vand.u32 4294901760, %v6111_v16  ;;  %v17037_v24 = vadd.f32 %v9958_v51, %v2825_v43  ;;  %v21009_v46 = vand.u32 4294901760, %v16565_v18  ;;  %v414_v0 = vld [vmem:[%s19381_s2 + $0x5d0] sm:$0xff]  ;;  %v415_v51 = vld [vmem:[%s19381_s2 + $0x5d8] sm:$0xff] }
 0x200   :  { %5426 = vmatprep.mubr.f32.mxu0 %v21007_v38  ;;  %12470 = vmatprep.subr.bf16.mxu0 %v16783_v45  ;;  %v17050_v43 = vpack.c.bf16 %v6224_v42, %v6217_v22  ;;  %v17053_v18 = vsub.f32 %v16953_v8, %v5936_v53  ;;  %v17056_v45 = vsub.f32 %v16977_v25, %v5987_v54  ;;  %v5942_v16 = vand.u32 4294901760, %v397_v56 }
 0x201   :  { %5555 = vmatprep.mubr.f32.mxu1 %v21009_v46  ;;  %12494 = vmatprep.subr.bf16.mxu1 %v21011_v15  ;;  %v21014_v46 = vld [vmem:[#allocation24_spill] sm:$0xff]  ;;  %v6231_v34 = vand.u32 4294901760, %v6230_v17  ;;  %v21016_v22 = vand.u32 4294901760, %v16937_v27  ;;  %v21017_v8 = vand.u32 4294901760, %v16948_v2  ;;  %v21018_v25 = vand.u32 4294901760, %v16603_v49 }
 0x202   :  { %5559 = vmatmul.mubr.f32.gmra.mrb[134].mxu1 %v21010_v21  ;;  %21012 = vst [vmem:[#allocation45_spill] sm:$0xff] %v17053_v18  ;;  %21013 = vst [vmem:[#allocation28_spill] sm:$0xff] %v17056_v45  ;;  %5429 = vmatmul.mubr.f32.gmra.mrb[138].mxu0 %v21014_v46  ;;  %v6238_v21 = vand.u32 4294901760, %v6237_v47  ;;  %v17072_v15 = vpack.c.bf16 %v6112_v52, %v6105_v39  ;;  %v17074_v61 = vpack.c.bf16 %v5990_v50, %v5987_v54  ;;  %v398_v47 = vld [vmem:[%s19381_s2 + $0x550] sm:$0xff]  ;;  %v9991_v52 = vpop.f32.mrb[70].mxu0 }
 0x203   :  { %12496 = vmatpush3.bf16.msra.mxu1 %v21015_v19  ;;  %v6118_v42 = vsub.f32 %v16937_v27, %v21016_v22  ;;  %v6125_v53 = vsub.f32 %v16948_v2, %v21017_v8  ;;  %12472 = vmatpush3.bf16.msra.mxu0 %v16789_v36  ;;  %v17076_v19 = vsub.f32 %v413_v40, %v5990_v50  ;;  %v5993_v17 = vand.u32 4294901760, %v414_v0  ;;  %v21021_v22 = vld [vmem:[#allocation32_spill] sm:$0xff]  ;;  %v9992_v2 = vpop.f32.mrb[71].mxu0 }
 0x204   :  { %5566 = vmatprep.mubr.f32.mxu1 %v21018_v25  ;;  %21019 = vst [vmem:[#allocation11_spill] sm:$0xff] %v17074_v61  ;;  %12474 = vmatprep.subr.bf16.mxu0 %v16798_v9  ;;  %v17083_v8 = vsub.f32 %v396_v1, %v5939_v31  ;;  %v5996_v36 = vand.u32 4294901760, %v415_v51  ;;  %v21023_v49 = vand.u32 4294901760, %v16985_v4  ;;  %v21024_v54 = vand.u32 4294901760, %v16990_v29  ;;  %v399_v40 = vld [vmem:[%s19381_s2 + $0x558] sm:$0xff]  ;;  %v21026_v25 = vld [vmem:[#allocation42_spill] sm:$0xff] }
 0x205   :  { %21020 = vst [vmem:[#allocation6_spill] sm:$0xff] %v17076_v19  ;;  %12498 = vmatprep.subr.bf16.mxu1 %v21021_v22  ;;  %v21025_v9 = vand.u32 4294901760, %v21004_v58  ;;  %5747 = vmatprep.mubr.f32.mxu0 %v21026_v25  ;;  %v17097_v1 = vpack.c.bf16 %v5942_v16, %v5939_v31  ;;  %v17099_v22 = vsub.f32 %v397_v56, %v5942_v16  ;;  %v6119_v58 = vand.u32 4294901760, %v6118_v42 }
 0x206   :  { %21022 = vst [vmem:[#allocation51_spill] sm:$0xff] %v17083_v8  ;;  %v6244_v39 = vsub.f32 %v16985_v4, %v21023_v49  ;;  %v6251_v50 = vsub.f32 %v16990_v29, %v21024_v54  ;;  %v19922_v49 = vand.u32 4294901760, %v17035_v35  ;;  %v19921_v4 = vand.u32 4294901760, %v17053_v18 }
 0x207   :  { %5570 = vmatmul.mubr.f32.gmra.mrb[136].mxu1 %v21025_v9  ;;  %21027 = vst [vmem:[#allocation13_spill] sm:$0xff] %v17097_v1  ;;  %21028 = vst [vmem:[#allocation14_spill] sm:$0xff] %v17099_v22  ;;  %v21029_v54 = vand.u32 4294901760, %v21007_v38  ;;  %v17106_v29 = vpack.c.bf16 %v6238_v21, %v6231_v34  ;;  %v6126_v9 = vand.u32 4294901760, %v6125_v53  ;;  %v5945_v27 = vand.u32 4294901760, %v398_v47  ;;  %12476 = vmatpush3.bf16.msra.mxu0 %v16804_v60  ;;  %v417_v38 = vld [vmem:[%s19381_s2 + $0x5e8] sm:$0xff] }
 0x208   :  { %12500 = vmatpush3.bf16.msra.mxu1 %v20937_v14  ;;  %v9993_v48 = vadd.f32 %v9992_v2, %v9991_v52  ;;  %v17110_v56 = vsub.f32 %v414_v0, %v5993_v17  ;;  %v5948_v31 = vand.u32 4294901760, %v399_v40  ;;  %v416_v14 = vld [vmem:[%s19381_s2 + $0x5e0] sm:$0xff]  ;;  %v19920_v16 = vand.u32 4294901760, %v17056_v45  ;;  %12478 = vmatprep.subr.bf16.mxu0 %v16821_v6  ;;  %v9994_v21 = vpop.f32.mrb[72].mxu0 }
 0x209   :  { %5577 = vmatprep.mubr.f32.mxu1 %v21029_v54  ;;  %12502 = vmatprep.subr.bf16.mxu1 %v20944_v33  ;;  %v17120_v2 = vpack.c.bf16 %v5996_v36, %v5993_v17  ;;  %v6245_v60 = vand.u32 4294901760, %v6244_v39  ;;  %v6252_v34 = vand.u32 4294901760, %v6251_v50  ;;  %v19923_v33 = vand.u32 4294901760, %v17076_v19  ;;  %v9995_v17 = vpop.f32.mrb[73].mxu0  ;;  %v21033_v50 = vld [vmem:[#allocation36_spill] sm:$0xff] }
 0x20a   :  { %21030 = vst [vmem:[#allocation21_spill] sm:$0xff] %v17110_v56  ;;  %v3223_v0 = vadd.f32 %v9993_v48, %v16886_v20  ;;  %v21032_v42 = vand.u32 4294901760, %v21014_v46  ;;  %v17126_v53 = vsub.f32 %v415_v51, %v5996_v36  ;;  %v6132_v52 = vsub.f32 %v17035_v35, %v19922_v49  ;;  %v79_v36 = vld [vmem:[%s19379_s0 + $0x58] sm:$0xff] }
 0x20b   :  { %21031 = vst [vmem:[#allocation24_spill] sm:$0xff] %v17120_v2  ;;  %v6139_v6 = vsub.f32 %v17053_v18, %v19921_v4  ;;  %v17136_v48 = vpack.c.bf16 %v6126_v9, %v6119_v58  ;;  %v17138_v20 = vsub.f32 %v398_v47, %v5945_v27  ;;  %v5999_v46 = vand.u32 4294901760, %v416_v14  ;;  %12480 = vmatpush3.bf16.msra.mxu0 %v21033_v50  ;;  %v21034_v54 = vld [vmem:[#allocation8_spill] sm:$0xff]  ;;  %v21036_v58 = vld [vmem:[#allocation26_spill] sm:$0xff]  ;;  %v21041_v18 = vld [vmem:[#allocation37_spill] sm:$0xff] }
 0x20c   :  { %5581 = vmatmul.mubr.f32.gmra.mrb[138].mxu1 %v21032_v42  ;;  %v6002_v51 = vand.u32 4294901760, %v417_v38  ;;  %v9996_v39 = vadd.f32 %v9995_v17, %v9994_v21  ;;  %v17145_v42 = vpack.c.bf16 %v5948_v31, %v5945_v27  ;;  %v400_v47 = vld [vmem:[%s19381_s2 + $0x560] sm:$0xff]  ;;  %12482 = vmatprep.subr.bf16.mxu0 %v21036_v58  ;;  %v17154_v9 = vpack.c.bf16 %v6252_v34, %v6245_v60  ;;  %v401_v17 = vld [vmem:[%s19381_s2 + $0x568] sm:$0xff]  ;;  %v418_v50 = vld [vmem:[%s19381_s2 + $0x5f0] sm:$0xff] }
 0x20d   :  { %12504 = vmatpush3.bf16.msra.mxu1 %v20959_v32  ;;  %5879 = vmatprep.mubr.f32.mxu1 %v21026_v25  ;;  %v6258_v32 = vsub.f32 %v17056_v45, %v19920_v16  ;;  %v10038_v25 = vpop.f32.mrb[70].mxu1  ;;  %v17156_v21 = vsub.f32 %v399_v40, %v5948_v31  ;;  %v6265_v27 = vsub.f32 %v17076_v19, %v19923_v33  ;;  %v9997_v16 = vpop.f32.mrb[74].mxu0  ;;  %v6133_v49 = vand.u32 4294901760, %v6132_v52 }
 0x20e   :  { %12506 = vmatprep.subr.bf16.mxu1 %v21034_v54  ;;  %21035 = vst [vmem:[#allocation43_spill] sm:$0xff] %v17145_v42  ;;  %v3232_v54 = vadd.f32 %v9996_v39, %v16925_v5  ;;  %v10039_v4 = vpop.f32.mrb[71].mxu1  ;;  %v6140_v58 = vand.u32 4294901760, %v6139_v6  ;;  %v159_v60 = vmul.f32 %v79_v36, %v79_v36  ;;  %v9998_v34 = vpop.f32.mrb[75].mxu0  ;;  %v17167_v31 = vpack.c.bf16 %v6002_v51, %v5999_v46  ;;  %v21038_v5 = vld [vmem:[#allocation44_spill] sm:$0xff] }
 0x20f   :  { %v10040_v40 = vadd.f32 %v10039_v4, %v10038_v25  ;;  %v17169_v33 = vsub.f32 %v416_v14, %v5999_v46  ;;  %v5951_v19 = vand.u32 4294901760, %v400_v47  ;;  %v9999_v45 = vadd.f32 %v9998_v34, %v9997_v16  ;;  %12484 = vmatpush3.bf16.msra.mxu0 %v21038_v5  ;;  %v10041_v46 = vpop.f32.mrb[72].mxu1 }
 0x210   :  { %21037 = vst [vmem:[#allocation32_spill] sm:$0xff] %v17167_v31  ;;  %v17176_v52 = vsub.f32 %v417_v38, %v6002_v51  ;;  %v6259_v6 = vand.u32 4294901760, %v6258_v32  ;;  %v5954_v4 = vand.u32 4294901760, %v401_v17  ;;  %12518 = vmatprep.subr.bf16.mxu0 %v16855_v55  ;;  %v6266_v36 = vand.u32 4294901760, %v6265_v27  ;;  %v10000_v51 = vpop.f32.mrb[76].mxu0  ;;  %v10042_v32 = vpop.f32.mrb[73].mxu1 }
 0x211   :  { %12508 = vmatpush3.bf16.msra.mxu1 %v20973_v59  ;;  %v419_v59 = vld [vmem:[%s19381_s2 + $0x5f8] sm:$0xff]  ;;  %v17181_v14 = vadd.f32 %v10040_v40, %v3223_v0  ;;  %v21039_v16 = vand.u32 4294901760, %v17083_v8  ;;  %v3241_v38 = vadd.f32 %v9999_v45, %v16959_v62  ;;  %v17191_v25 = vpack.c.bf16 %v6140_v58, %v6133_v49  ;;  %v10001_v40 = vpop.f32.mrb[77].mxu0  ;;  %v402_v62 = vld [vmem:[%s19381_s2 + $0x570] sm:$0xff]  ;;  %v21042_v49 = vld [vmem:[#allocation17_spill] sm:$0xff] }
 0x212   :  { %12510 = vmatprep.subr.bf16.mxu1 %v20977_v28  ;;  %v6005_v34 = vand.u32 4294901760, %v418_v50  ;;  %v17193_v0 = vand.u32 4294901760, %v159_v60  ;;  %v10043_v5 = vadd.f32 %v10042_v32, %v10041_v46  ;;  %5749 = vmatmul.mubr.f32.vlgmr.msra.gmra.mrb[140].mxu0 %v21041_v18  ;;  %v17197_v27 = vsub.f32 %v400_v47, %v5951_v19  ;;  %v403_v47 = vld [vmem:[%s19381_s2 + $0x578] sm:$0xff]  ;;  %v10044_v28 = vpop.f32.mrb[74].mxu1 }
 0x213   :  { %v17187_v39 = vsub.f32 %v17083_v8, %v21039_v16  ;;  %v6008_v16 = vand.u32 4294901760, %v419_v59  ;;  %v10002_v45 = vadd.f32 %v10001_v40, %v10000_v51  ;;  %12520 = vmatpush3.bf16.msra.mxu0 %v16857_v37  ;;  %5754 = vmatprep.mubr.f32.mxu0 %v21042_v49  ;;  %v17205_v58 = vpack.c.bf16 %v5954_v4, %v5951_v19  ;;  %v21044_v51 = vld [vmem:[#allocation16_spill] sm:$0xff]  ;;  %v10003_v8 = vpop.f32.mrb[78].mxu0  ;;  %v10045_v35 = vpop.f32.mrb[75].mxu1  ;;  %v21050_v37 = vld [vmem:[#allocation19_spill] sm:$0xff] }
 0x214   :  { %21040 = vst [vmem:[#allocation42_spill] sm:$0xff] %v17193_v0  ;;  %v17207_v46 = vsub.f32 %v401_v17, %v5954_v4  ;;  %v17213_v32 = vadd.f32 %v10043_v5, %v3232_v54  ;;  %12522 = vmatprep.subr.bf16.mxu0 %v21044_v51  ;;  %v17217_v40 = vpack.c.bf16 %v6266_v36, %v6259_v6  ;;  %v21045_v17 = vand.u32 4294901760, %v17099_v22  ;;  %v78_v6 = vld [vmem:[%s19379_s0 + $0x50] sm:$0xff]  ;;  %v10004_v36 = vpop.f32.mrb[79].mxu0  ;;  %v21047_v51 = vld [vmem:[#allocation9_spill] sm:$0xff]  ;;  %v21051_v55 = vld [vmem:[#allocation20_spill] sm:$0xff] }
 0x215   :  { %12512 = vmatpush3.bf16.msra.mxu1 %v20983_v44  ;;  %21043 = vst [vmem:[#allocation36_spill] sm:$0xff] %v17205_v58  ;;  %v3250_v44 = vadd.f32 %v10002_v45, %v16998_v26  ;;  %v17226_v54 = vsub.f32 %v418_v50, %v6005_v34  ;;  %v5957_v5 = vand.u32 4294901760, %v402_v62  ;;  %v10046_v19 = vadd.f32 %v10045_v35, %v10044_v28 }
 0x216   :  { %12514 = vmatprep.subr.bf16.mxu1 %v20988_v63  ;;  %v17223_v4 = vsub.f32 %v17099_v22, %v21045_v17  ;;  %v17229_v63 = vsub.f32 %v159_v60, %v17193_v0  ;;  %5756 = vmatmul.mubr.f32.gmra.mrb[142].mxu0 %v21047_v51  ;;  %v17236_v17 = vpack.c.bf16 %v6008_v16, %v6005_v34  ;;  %v21049_v26 = vand.u32 4294901760, %v17110_v56  ;;  %v95_v60 = vld [vmem:[%s19379_s0 + $0xd8] sm:$0xff]  ;;  %v94_v34 = vld [vmem:[%s19379_s0 + $0xd0] sm:$0xff] }
 0x217   :  { %v5960_v45 = vand.u32 4294901760, %v403_v47  ;;  %v10005_v22 = vadd.f32 %v10004_v36, %v10003_v8  ;;  %12524 = vmatpush3.bf16.msra.mxu0 %v21050_v37  ;;  %5761 = vmatprep.mubr.f32.mxu0 %v21051_v55  ;;  %v21052_v35 = vand.u32 4294901760, %v17126_v53  ;;  %v19948_v28 = vand.u32 4294901760, %v17138_v20 }
 0x218   :  { %21046 = vst [vmem:[#allocation8_spill] sm:$0xff] %v17229_v63  ;;  %21048 = vst [vmem:[#allocation26_spill] sm:$0xff] %v17236_v17  ;;  %v6272_v50 = vsub.f32 %v17110_v56, %v21049_v26  ;;  %v17251_v3 = vadd.f32 %v10046_v19, %v3241_v38  ;;  %v10047_v26 = vpop.f32.mrb[76].mxu1  ;;  %v21053_v56 = vld [vmem:[#allocation34_spill] sm:$0xff]  ;;  %v17255_v8 = vsub.f32 %v419_v59, %v6008_v16  ;;  %v19952_v37 = vand.u32 4294901760, %v17169_v33  ;;  %v21054_v59 = vld [vmem:[#allocation31_spill] sm:$0xff] }
 0x219   :  { %12516 = vmatpush3.bf16.msra.mxu1 %v16484_v13  ;;  %v6279_v13 = vsub.f32 %v17126_v53, %v21052_v35  ;;  %12526 = vmatprep.subr.bf16.mxu0 %v21053_v56  ;;  %v158_v36 = vmul.f32 %v78_v6, %v78_v6  ;;  %v3259_v30 = vadd.f32 %v10005_v22, %v17037_v24  ;;  %v10048_v10 = vpop.f32.mrb[77].mxu1  ;;  %v19949_v35 = vand.u32 4294901760, %v17229_v63 }
 0x21a   :  { %12550 = vmatprep.subr.bf16.mxu1 %v17003_v57  ;;  %v175_v19 = vmul.f32 %v95_v60, %v95_v60  ;;  %v10049_v57 = vadd.f32 %v10048_v10, %v10047_v26  ;;  %5763 = vmatmul.mubr.f32.gmra.mrb[144].mxu0 %v21054_v59  ;;  %v6154_v16 = vand.u32 4294901760, %v17223_v4  ;;  %v6273_v24 = vand.u32 4294901760, %v6272_v50  ;;  %v10050_v4 = vpop.f32.mrb[78].mxu1 }
 0x21b   :  { %v17268_v22 = vsub.f32 %v402_v62, %v5957_v5  ;;  %12528 = vmatpush3.bf16.msra.mxu0 %v16935_v23  ;;  %v6280_v6 = vand.u32 4294901760, %v6279_v13  ;;  %v17272_v60 = vpack.c.bf16 %v5960_v45, %v5957_v5  ;;  %v6160_v10 = vsub.f32 %v17138_v20, %v19948_v28  ;;  %v111_v13 = vld [vmem:[%s19379_s0 + $0x158] sm:$0xff]  ;;  %v10051_v28 = vpop.f32.mrb[79].mxu1 }
 0x21c   :  { %5881 = vmatmul.mubr.f32.vlgmr.msra.gmra.mrb[140].mxu1 %v21041_v18  ;;  %v21055_v18 = vld [vmem:[#allocation47_spill] sm:$0xff]  ;;  %v21057_v26 = vand.u32 4294901760, %v17156_v21  ;;  %v17280_v38 = vadd.f32 %v10049_v57, %v3250_v44  ;;  %12530 = vmatprep.subr.bf16.mxu0 %v16982_v41  ;;  %v17284_v62 = vsub.f32 %v403_v47, %v5960_v45  ;;  %v17286_v50 = vand.u32 4294901760, %v158_v36 }
 0x21d   :  { %12552 = vmatpush3.bf16.msra.mxu1 %v17005_v7  ;;  %5768 = vmatprep.mubr.f32.mxu0 %v21055_v18  ;;  %21056 = vst [vmem:[#allocation44_spill] sm:$0xff] %v17272_v60  ;;  %v174_v5 = vmul.f32 %v94_v34, %v94_v34  ;;  %v6286_v44 = vsub.f32 %v17169_v33, %v19952_v37  ;;  %v21059_v47 = vand.u32 4294901760, %v17176_v52  ;;  %v17302_v34 = vand.u32 4294901760, %v175_v19  ;;  %v21063_v37 = vld [vmem:[#allocation50_spill] sm:$0xff] }
 0x21e   :  { %v6167_v7 = vsub.f32 %v17156_v21, %v21057_v26  ;;  %5886 = vmatprep.mubr.f32.mxu1 %v21042_v49  ;;  %21058 = vst [vmem:[#allocation37_spill] sm:$0xff] %v17286_v50  ;;  %12554 = vmatprep.subr.bf16.mxu1 %v17050_v43  ;;  %v6013_v49 = vsub.f32 %v17229_v63, %v19949_v35  ;;  %v21061_v26 = vld [vmem:[#allocation48_spill] sm:$0xff]  ;;  %v21062_v43 = vand.u32 4294901760, %v17187_v39  ;;  %v19957_v35 = vand.u32 4294901760, %v17197_v27  ;;  %v21066_v63 = vld [vmem:[#allocation30_spill] sm:$0xff] }
 0x21f   :  { %v6293_v45 = vsub.f32 %v17176_v52, %v21059_v47  ;;  %21060 = vst [vmem:[#allocation17_spill] sm:$0xff] %v17302_v34  ;;  %v10052_v57 = vadd.f32 %v10051_v28, %v10050_v4  ;;  %5770 = vmatmul.mubr.f32.gmra.mrb[146].mxu0 %v21061_v26  ;;  %v17314_v47 = vpack.c.bf16 %v6280_v6, %v6273_v24  ;;  %v6161_v41 = vand.u32 4294901760, %v6160_v10  ;;  %v127_v10 = vld [vmem:[%s19379_s0 + $0x1d8] sm:$0xff] }
 0x220   :  { %5888 = vmatmul.mubr.f32.gmra.mrb[142].mxu1 %v21047_v51  ;;  %v17308_v51 = vpack.c.bf16 %v6154_v16, %v21062_v43  ;;  %12532 = vmatpush3.bf16.msra.mxu0 %v17014_v11  ;;  %v6168_v28 = vand.u32 4294901760, %v6167_v7  ;;  %v191_v4 = vmul.f32 %v111_v13, %v111_v13  ;;  %v17324_v16 = vsub.f32 %v158_v36, %v17286_v50  ;;  %v21065_v43 = vld [vmem:[#allocation12_spill] sm:$0xff]  ;;  %v21069_v36 = vld [vmem:[#allocation15_spill] sm:$0xff] }
 0x221   :  { %12556 = vmatpush3.bf16.msra.mxu1 %v17072_v15  ;;  %5775 = vmatprep.mubr.f32.mxu0 %v21063_v37  ;;  %v110_v15 = vld [vmem:[%s19379_s0 + $0x150] sm:$0xff]  ;;  %v17319_v39 = vadd.f32 %v10052_v57, %v3259_v30  ;;  %v17328_v6 = vand.u32 4294901760, %v174_v5  ;;  %v6014_v30 = vand.u32 4294901760, %v6013_v49  ;;  %v6294_v7 = vand.u32 4294901760, %v6293_v45 }
 0x222   :  { %5893 = vmatprep.mubr.f32.mxu1 %v21051_v55  ;;  %12534 = vmatprep.subr.bf16.mxu0 %v17074_v61  ;;  %21064 = vst [vmem:[#allocation9_spill] sm:$0xff] %v17324_v16  ;;  %v6287_v55 = vand.u32 4294901760, %v6286_v44  ;;  %v17336_v13 = vsub.f32 %v175_v19, %v17302_v34  ;;  %v6174_v57 = vsub.f32 %v17197_v27, %v19957_v35  ;;  %v21070_v24 = vand.u32 4294901760, %v17207_v46  ;;  %v21071_v19 = vld [vmem:[#allocation7_spill] sm:$0xff] }
 0x223   :  { %21067 = vst [vmem:[#allocation20_spill] sm:$0xff] %v17328_v6  ;;  %12558 = vmatprep.subr.bf16.mxu1 %v17106_v29  ;;  %5777 = vmatmul.mubr.f32.gmra.mrb[148].mxu0 %v21069_v36  ;;  %v190_v61 = vmul.f32 %v110_v15, %v110_v15  ;;  %v17348_v29 = vpack.c.bf16 %v6168_v28, %v6161_v41  ;;  %v17352_v44 = vand.u32 4294901760, %v191_v4  ;;  %v126_v45 = vld [vmem:[%s19379_s0 + $0x1d0] sm:$0xff]  ;;  %v19965_v49 = vand.u32 4294901760, %v17268_v22 }
 0x224   :  { %5895 = vmatmul.mubr.f32.gmra.mrb[144].mxu1 %v21054_v59  ;;  %21068 = vst [vmem:[#allocation34_spill] sm:$0xff] %v17336_v13  ;;  %v6181_v59 = vsub.f32 %v17207_v46, %v21070_v24  ;;  %12536 = vmatpush3.bf16.msra.mxu0 %v17097_v1  ;;  %v143_v24 = vld [vmem:[%s19379_s0 + $0x258] sm:$0xff]  ;;  %v12573_v35 = vpack.c.bf16 %v6294_v7, %v6287_v55  ;;  %v6175_v28 = vand.u32 4294901760, %v6174_v57 }
 0x225   :  { %12560 = vmatpush3.bf16.msra.mxu1 %v17136_v48  ;;  %5900 = vmatprep.mubr.f32.mxu1 %v21055_v18  ;;  %21072 = vst [vmem:[#allocation31_spill] sm:$0xff] %v17352_v44  ;;  %v207_v48 = vmul.f32 %v127_v10, %v127_v10  ;;  %v17361_v18 = vsub.f32 %v174_v5, %v17328_v6  ;;  %v10085_v10 = vpop.f32.mrb[80].mxu0  ;;  %v19966_v5 = vand.u32 4294901760, %v17284_v62 }
 0x226   :  { %12538 = vmatprep.subr.bf16.mxu0 %v17120_v2  ;;  %12562 = vmatprep.subr.bf16.mxu1 %v17154_v9  ;;  %v19964_v9 = vand.u32 4294901760, %v17336_v13  ;;  %v10086_v15 = vpop.f32.mrb[81].mxu0  ;;  %v6182_v41 = vand.u32 4294901760, %v6181_v59  ;;  %v17374_v2 = vand.u32 4294901760, %v190_v61  ;;  %v206_v1 = vmul.f32 %v126_v45, %v126_v45 }
 0x227   :  { %6015 = vmatprep.mubr.f32.mxu0 %v6014_v30  ;;  %v10087_v11 = vadd.f32 %v10086_v15, %v10085_v10  ;;  %v17381_v30 = vand.u32 4294901760, %v207_v48  ;;  %v223_v55 = vmul.f32 %v143_v24, %v143_v24  ;;  %v21078_v59 = vand.u32 4294901760, %v17255_v8  ;;  %v10088_v24 = vpop.f32.mrb[82].mxu0 }
 0x228   :  { %5902 = vmatmul.mubr.f32.gmra.mrb[146].mxu1 %v21061_v26  ;;  %21073 = vst [vmem:[#allocation47_spill] sm:$0xff] %v17374_v2  ;;  %12540 = vmatpush3.bf16.msra.mxu0 %v17145_v42  ;;  %v17379_v26 = vsub.f32 %v191_v4, %v17352_v44  ;;  %v6028_v10 = vsub.f32 %v17336_v13, %v19964_v9  ;;  %v10089_v57 = vpop.f32.mrb[83].mxu0 }
 0x229   :  { %12564 = vmatpush3.bf16.msra.mxu1 %v17191_v25  ;;  %5907 = vmatprep.mubr.f32.mxu1 %v21063_v37  ;;  %21075 = vst [vmem:[#allocation50_spill] sm:$0xff] %v17381_v30  ;;  %v142_v37 = vld [vmem:[%s19379_s0 + $0x250] sm:$0xff]  ;;  %v21076_v25 = vand.u32 4294901760, %v17324_v16  ;;  %v6307_v45 = vsub.f32 %v17255_v8, %v21078_v59  ;;  %v3579_v15 = vadd.f32 %v10087_v11, %v17181_v14  ;;  %v17413_v14 = vand.u32 4294901760, %v206_v1 }
 0x22a   :  { %12566 = vmatprep.subr.bf16.mxu1 %v17217_v40  ;;  %21074 = vst [vmem:[#allocation48_spill] sm:$0xff] %v17379_v26  ;;  %12542 = vmatprep.subr.bf16.mxu0 %v17167_v31  ;;  %v21077_v40 = vand.u32 4294901760, %v17226_v54  ;;  %v12575_v59 = vpack.c.bf16 %v6182_v41, %v6175_v28  ;;  %v17411_v11 = vsub.f32 %v190_v61, %v17374_v2  ;;  %v10132_v41 = vpop.f32.mrb[80].mxu1  ;;  %v21083_v28 = vand.u32 4294901760, %v17361_v18 }
 0x22b   :  { %v6019_v7 = vsub.f32 %v17324_v16, %v21076_v25  ;;  %v6188_v25 = vsub.f32 %v17268_v22, %v19965_v49  ;;  %21080 = vst [vmem:[#allocation30_spill] sm:$0xff] %v17413_v14  ;;  %v10090_v9 = vadd.f32 %v10089_v57, %v10088_v24  ;;  %v6308_v24 = vand.u32 4294901760, %v6307_v45  ;;  %v10133_v13 = vpop.f32.mrb[81].mxu1 }
 0x22c   :  { %v6300_v4 = vsub.f32 %v17226_v54, %v21077_v40  ;;  %5909 = vmatmul.mubr.f32.gmra.mrb[148].mxu1 %v21069_v36  ;;  %v6195_v40 = vsub.f32 %v17284_v62, %v19966_v5  ;;  %21079 = vst [vmem:[#allocation12_spill] sm:$0xff] %v17411_v11  ;;  %v222_v36 = vmul.f32 %v142_v37, %v142_v37  ;;  %v6029_v49 = vand.u32 4294901760, %v6028_v10  ;;  %v10135_v10 = vpop.f32.mrb[82].mxu1 }
 0x22d   :  { %12568 = vmatpush3.bf16.msra.mxu1 %v17308_v51  ;;  %6311 = vmatprep.mubr.f32.mxu1 %v17193_v0  ;;  %v17419_v5 = vsub.f32 %v207_v48, %v17381_v30  ;;  %v17421_v51 = vand.u32 4294901760, %v223_v55  ;;  %v6020_v61 = vand.u32 4294901760, %v6019_v7  ;;  %v6034_v37 = vsub.f32 %v17361_v18, %v21083_v28 }
 0x22e   :  { %12544 = vmatpush3.bf16.msra.mxu0 %v17205_v58  ;;  %12570 = vmatprep.subr.bf16.mxu1 %v17314_v47  ;;  %v6301_v57 = vand.u32 4294901760, %v6300_v4  ;;  %v3586_v0 = vadd.f32 %v10090_v9, %v17213_v32  ;;  %v10091_v47 = vpop.f32.mrb[84].mxu0  ;;  %v6189_v58 = vand.u32 4294901760, %v6188_v25  ;;  %v6196_v48 = vand.u32 4294901760, %v6195_v40  ;;  %v21089_v25 = vld [vmem:[#allocation46_spill] sm:$0xff]  ;;  %v21090_v40 = vld [vmem:[#allocation40_spill] sm:$0xff] }
 0x22f   :  { %21081 = vst [vmem:[#allocation15_spill] sm:$0xff] %v17419_v5  ;;  %21082 = vst [vmem:[#allocation7_spill] sm:$0xff] %v17421_v51  ;;  %12546 = vmatprep.subr.bf16.mxu0 %v17236_v17  ;;  %v10092_v16 = vpop.f32.mrb[85].mxu0  ;;  %v10134_v31 = vadd.f32 %v10133_v13, %v10132_v41  ;;  %v17431_v7 = vsub.f32 %v206_v1, %v17413_v14  ;;  %v17433_v42 = vand.u32 4294901760, %v222_v36  ;;  %v21086_v32 = vand.u32 4294901760, %v17379_v26  ;;  %v21091_v17 = vld [vmem:[#allocation29_spill] sm:$0xff] }
 0x230   :  { %v10093_v4 = vadd.f32 %v10092_v16, %v10091_v47  ;;  %v17441_v13 = vsub.f32 %v223_v55, %v17421_v51  ;;  %v21088_v1 = vpack.c.bf16 %v21066_v63, %v21065_v43  ;;  %v12577_v16 = vpack.c.bf16 %v6308_v24, %v6301_v57  ;;  %v10094_v28 = vpop.f32.mrb[86].mxu0  ;;  %v10136_v47 = vpop.f32.mrb[83].mxu1  ;;  %v21092_v55 = vld [vmem:[#allocation41_spill] sm:$0xff] }
 0x231   :  { %12572 = vmatpush3.bf16.msra.mxu1 %v17348_v29  ;;  %21084 = vst [vmem:[#allocation52_spill] sm:$0xff] %v17431_v7  ;;  %21085 = vst [vmem:[#allocation53_spill] sm:$0xff] %v17433_v42  ;;  %v6043_v9 = vsub.f32 %v17379_v26, %v21086_v32  ;;  %v17443_v29 = vadd.f32 %v10134_v31, %v3579_v15  ;;  %v6035_v32 = vand.u32 4294901760, %v6034_v37  ;;  %v10095_v31 = vpop.f32.mrb[87].mxu0 }
 0x232   :  { %12548 = vmatpush3.bf16.msra.mxu0 %v17272_v60  ;;  %12574 = vmatprep.subr.bf16.mxu1 %v12573_v35  ;;  %21087 = vst [vmem:[#allocation54_spill] sm:$0xff] %v17441_v13  ;;  %v12585_v35 = vpack.c.bf16 %v21090_v40, %v21089_v25  ;;  %v3593_v41 = vadd.f32 %v10093_v4, %v17251_v3  ;;  %v21093_v60 = vand.u32 4294901760, %v17411_v11 }
 0x233   :  { %12582 = vmatprep.subr.bf16.mxu0 %v21088_v1  ;;  %v12579_v45 = vpack.c.bf16 %v6196_v48, %v6189_v58  ;;  %v12587_v26 = vpack.c.bf16 %v21092_v55, %v21091_v17  ;;  %v10137_v15 = vadd.f32 %v10136_v47, %v10135_v10  ;;  %v17458_v1 = vsub.f32 %v222_v36, %v17433_v42  ;;  %v21096_v36 = vld [vmem:[#allocation49_spill] sm:$0xff]  ;;  %v21097_v10 = vld [vmem:[#allocation22_spill] sm:$0xff] }
 0x234   :  { %v6049_v57 = vsub.f32 %v17411_v11, %v21093_v60  ;;  %v10096_v3 = vadd.f32 %v10095_v31, %v10094_v28  ;;  %v21094_v58 = vpack.c.bf16 %v16859_v12, %v21071_v19  ;;  %v6044_v37 = vand.u32 4294901760, %v6043_v9  ;;  %v10138_v60 = vpop.f32.mrb[84].mxu1  ;;  %v10097_v31 = vpop.f32.mrb[88].mxu0 }
 0x235   :  { %6021 = vmatmul.mubr.f32.vlgmr.msra.gmra.mrb[150].mxu0 %v6020_v61  ;;  %12576 = vmatpush3.bf16.msra.mxu1 %v12575_v59  ;;  %v21095_v48 = vand.u32 4294901760, %v17419_v5  ;;  %v17467_v4 = vadd.f32 %v10137_v15, %v3586_v0  ;;  %v12589_v28 = vpack.c.bf16 %v21097_v10, %v21096_v36  ;;  %v21100_v61 = vld [vmem:[#allocation27_spill] sm:$0xff] }
 0x236   :  { %12584 = vmatpush3.bf16.msra.mxu0 %v21094_v58  ;;  %6030 = vmatprep.mubr.f32.mxu0 %v6029_v49  ;;  %v3600_v47 = vadd.f32 %v10096_v3, %v17280_v38  ;;  %v10139_v58 = vpop.f32.mrb[85].mxu1  ;;  %v10098_v49 = vpop.f32.mrb[89].mxu0  ;;  %v6050_v24 = vand.u32 4294901760, %v6049_v57  ;;  %v21101_v3 = vand.u32 4294901760, %v17441_v13  ;;  %v21102_v57 = vld [vmem:[#allocation33_spill] sm:$0xff] }
 0x237   :  { %v6058_v59 = vsub.f32 %v17419_v5, %v21095_v48  ;;  %12578 = vmatprep.subr.bf16.mxu1 %v12577_v16  ;;  %12586 = vmatprep.subr.bf16.mxu0 %v12585_v35  ;;  %v10140_v9 = vadd.f32 %v10139_v58, %v10138_v60  ;;  %v21098_v48 = vand.u32 4294901760, %v17431_v7  ;;  %v10099_v16 = vadd.f32 %v10098_v49, %v10097_v31  ;;  %v21099_v35 = vld [vmem:[#allocation35_spill] sm:$0xff] }
 0x238   :  { %v12591_v5 = vpack.c.bf16 %v21100_v61, %v21099_v35  ;;  %v6073_v60 = vsub.f32 %v17441_v13, %v21101_v3  ;;  %v21103_v58 = vld [vmem:[#allocation39_spill] sm:$0xff]  ;;  %v21108_v3 = vld [vmem:[#allocation45_spill] sm:$0xff] }
 0x239   :  { %6036 = vmatmul.mubr.f32.gmra.mrb[152].mxu0 %v6035_v32  ;;  %12580 = vmatpush3.bf16.msra.mxu1 %v12579_v45  ;;  %v6064_v0 = vsub.f32 %v17431_v7, %v21098_v48  ;;  %v6059_v38 = vand.u32 4294901760, %v6058_v59  ;;  %v17481_v32 = vadd.f32 %v10140_v9, %v3593_v41  ;;  %v10141_v45 = vpop.f32.mrb[86].mxu1  ;;  %v21104_v48 = vld [vmem:[#allocation25_spill] sm:$0xff]  ;;  %v21105_v59 = vld [vmem:[#allocation18_spill] sm:$0xff]  ;;  %v21106_v41 = vand.u32 4294901760, %v17458_v1 }
 0x23a   :  { %12588 = vmatpush3.bf16.msra.mxu0 %v12587_v26  ;;  %6045 = vmatprep.mubr.f32.mxu0 %v6044_v37  ;;  %v12593_v15 = vpack.c.bf16 %v21104_v48, %v21103_v58  ;;  %v3607_v26 = vadd.f32 %v10099_v16, %v17319_v39  ;;  %v10142_v37 = vpop.f32.mrb[87].mxu1  ;;  %v6074_v7 = vand.u32 4294901760, %v6073_v60  ;;  %v21110_v16 = vld [vmem:[#allocation6_spill] sm:$0xff] }
 0x23b   :  { %12590 = vmatprep.subr.bf16.mxu0 %v12589_v28  ;;  %12614 = vmatprep.subr.bf16.mxu1 %v21102_v57  ;;  %v10143_v31 = vadd.f32 %v10142_v37, %v10141_v45  ;;  %v6065_v49 = vand.u32 4294901760, %v6064_v0  ;;  %v6079_v9 = vsub.f32 %v17458_v1, %v21106_v41  ;;  %v21107_v28 = vld [vmem:[#allocation38_spill] sm:$0xff]  ;;  %v10144_v39 = vpop.f32.mrb[88].mxu1  ;;  %v21111_v37 = vld [vmem:[#allocation16_spill] sm:$0xff] }
 0x23c   :  { %6313 = vmatmul.mubr.f32.vlgmr.msra.gmra.mrb[150].mxu1 %v17286_v50  ;;  %v12595_v13 = vpack.c.bf16 %v21108_v3, %v21107_v28  ;;  %v10145_v0 = vpop.f32.mrb[89].mxu1  ;;  %v21114_v60 = vld [vmem:[#allocation14_spill] sm:$0xff]  ;;  %v21121_v50 = vand.u32 4294901760, %v21089_v25  ;;  %v21128_v25 = vand.u32 4294901760, %v21099_v35 }
 0x23d   :  { %6051 = vmatmul.mubr.f32.gmra.mrb[154].mxu0 %v6050_v24  ;;  %12616 = vmatpush3.bf16.msra.mxu1 %v21105_v59  ;;  %v17494_v11 = vadd.f32 %v10143_v31, %v3600_v47  ;;  %v21109_v24 = vld [vmem:[#allocation28_spill] sm:$0xff]  ;;  %v6080_v41 = vand.u32 4294901760, %v6079_v9  ;;  %v21113_v47 = vld [vmem:[#allocation51_spill] sm:$0xff]  ;;  %v21118_v9 = vand.u32 4294901760, %v21066_v63 }
 0x23e   :  { %12592 = vmatpush3.bf16.msra.mxu0 %v12591_v5  ;;  %6060 = vmatprep.mubr.f32.mxu0 %v6059_v38  ;;  %v12597_v45 = vpack.c.bf16 %v21110_v16, %v21109_v24  ;;  %v10146_v5 = vadd.f32 %v10145_v0, %v10144_v39  ;;  %v21112_v38 = vld [vmem:[#allocation19_spill] sm:$0xff]  ;;  %v12599_v31 = vpack.c.bf16 %v21114_v60, %v21113_v47  ;;  %v21123_v63 = vld [vmem:[#allocation8_spill] sm:$0xff] }
 0x23f   :  { %6318 = vmatprep.mubr.f32.mxu1 %v17302_v34  ;;  %12594 = vmatprep.subr.bf16.mxu0 %v12593_v15  ;;  %v17507_v15 = vld [vmem:[%s19381_s2 + $0x680] sm:$0xff]  ;;  %v12607_v0 = vpack.c.bf16 %v17207_v46, %v17197_v27 }
 0x240   :  { %6320 = vmatmul.mubr.f32.gmra.mrb[152].mxu1 %v17328_v6  ;;  %12618 = vmatprep.subr.bf16.mxu1 %v21111_v37  ;;  %v17512_v6 = vld [vmem:[%s19381_s2 + $0x688] sm:$0xff]  ;;  %v17514_v39 = vadd.f32 %v10146_v5, %v3607_v26  ;;  %v12605_v26 = vpack.c.bf16 %v17176_v52, %v17169_v33  ;;  %v12609_v5 = vpack.c.bf16 %v17255_v8, %v17226_v54  ;;  %v21133_v35 = vand.u32 4294901760, %v17507_v15 }
 0x241   :  { %6066 = vmatmul.mubr.f32.gmra.mrb[156].mxu0 %v6065_v49  ;;  %12620 = vmatpush3.bf16.msra.mxu1 %v21112_v38  ;;  %v12603_v49 = vpack.c.bf16 %v17156_v21, %v17138_v20 }
 0x242   :  { %12596 = vmatpush3.bf16.msra.mxu0 %v12595_v13  ;;  %6075 = vmatprep.mubr.f32.mxu0 %v6074_v7  ;;  %v21115_v13 = vld [vmem:[#allocation21_spill] sm:$0xff] }
 0x243   :  { %6325 = vmatprep.mubr.f32.mxu1 %v17352_v44  ;;  %12598 = vmatprep.subr.bf16.mxu0 %v12597_v45  ;;  %v12601_v7 = vpack.c.bf16 %v17126_v53, %v21115_v13  ;;  %v21117_v44 = vand.u32 4294901760, %v21065_v43  ;;  %v420_v43 = vld [vmem:[%s19381_s2 + $0x600] sm:$0xff] }
 0x244   :  { %6327 = vmatmul.mubr.f32.gmra.mrb[154].mxu1 %v17374_v2  ;;  %12622 = vmatprep.subr.bf16.mxu1 %v21053_v56  ;;  %v21116_v2 = vld [vmem:[#allocation5_spill] sm:$0xff] }
 0x245   :  { %6081 = vmatmul.mubr.f32.gmra.mrb[158].mxu0 %v6080_v41  ;;  %12624 = vmatpush3.bf16.msra.mxu1 %v16935_v23  ;;  %v17540_v45 = vpack.c.bf16 %v21118_v9, %v21117_v44  ;;  %v21122_v23 = vand.u32 4294901760, %v21090_v40  ;;  %v21129_v40 = vand.u32 4294901760, %v21100_v61  ;;  %v17591_v61 = vsub.f32 %v17507_v15, %v21133_v35 }
 0x246   :  { %12600 = vmatpush3.bf16.msra.mxu0 %v12599_v31  ;;  %6332 = vmatprep.mubr.f32.mxu1 %v17381_v30  ;;  %v21119_v31 = vand.u32 4294901760, %v21071_v19  ;;  %v21120_v30 = vand.u32 4294901760, %v16859_v12  ;;  %v21124_v19 = vand.u32 4294901760, %v21091_v17  ;;  %v21125_v12 = vand.u32 4294901760, %v21092_v55  ;;  %v421_v17 = vld [vmem:[%s19381_s2 + $0x608] sm:$0xff] }
 0x247   :  { %12602 = vmatprep.subr.bf16.mxu0 %v12601_v7  ;;  %12626 = vmatprep.subr.bf16.mxu1 %v21116_v2  ;;  %v17552_v41 = vpack.c.bf16 %v21122_v23, %v21121_v50  ;;  %v10179_v7 = vpop.f32.mrb[90].mxu0  ;;  %v21127_v23 = vand.u32 4294901760, %v21097_v10  ;;  %v17575_v9 = vpack.c.bf16 %v21129_v40, %v21128_v25  ;;  %v21130_v55 = vld [vmem:[#allocation10_spill] sm:$0xff]  ;;  %v21132_v10 = vand.u32 4294901760, %v21104_v48  ;;  %21134 = vst [vmem:[#allocation46_spill] sm:$0xff] %v17591_v61  ;;  %v21137_v25 = vld [vmem:[#allocation11_spill] sm:$0xff] }
 0x248   :  { %v17546_v34 = vpack.c.bf16 %v21120_v30, %v21119_v31  ;;  %6334 = vmatmul.mubr.f32.gmra.mrb[156].mxu1 %v17413_v14  ;;  %6476 = vmatprep.mubr.f32.mxu0 %v21123_v63  ;;  %v17563_v44 = vpack.c.bf16 %v21125_v12, %v21124_v19  ;;  %v21126_v30 = vand.u32 4294901760, %v21096_v36  ;;  %v10180_v31 = vpop.f32.mrb[91].mxu0  ;;  %v21131_v36 = vand.u32 4294901760, %v21103_v58  ;;  %v439_v58 = vld [vmem:[%s19381_s2 + $0x698] sm:$0xff] }
 0x249   :  { %12628 = vmatpush3.bf16.msra.mxu1 %v21130_v55  ;;  %6339 = vmatprep.mubr.f32.mxu1 %v17421_v51  ;;  %v21135_v12 = vand.u32 4294901760, %v17512_v6  ;;  %v10181_v48 = vadd.f32 %v10180_v31, %v10179_v7  ;;  %v21138_v40 = vand.u32 4294901760, %v21107_v28  ;;  %v21140_v35 = vand.u32 4294901760, %v21109_v24 }
 0x24a   :  { %v17569_v50 = vpack.c.bf16 %v21127_v23, %v21126_v30  ;;  %v17586_v19 = vpack.c.bf16 %v21132_v10, %v21131_v36  ;;  %v438_v23 = vld [vmem:[%s19381_s2 + $0x690] sm:$0xff]  ;;  %12604 = vmatpush3.bf16.msra.mxu0 %v12603_v49  ;;  %12630 = vmatprep.subr.bf16.mxu1 %v21137_v25  ;;  %v21139_v36 = vand.u32 4294901760, %v21108_v3  ;;  %v7001_v14 = vand.u32 4294901760, %v420_v43 }
 0x24b   :  { %v17596_v30 = vsub.f32 %v17512_v6, %v21135_v12  ;;  %v21141_v12 = vand.u32 4294901760, %v21110_v16  ;;  %12606 = vmatprep.subr.bf16.mxu0 %v12605_v26  ;;  %v21142_v55 = vand.u32 4294901760, %v21113_v47  ;;  %v21143_v49 = vand.u32 4294901760, %v21114_v60  ;;  %v422_v47 = vld [vmem:[%s19381_s2 + $0x610] sm:$0xff]  ;;  %v423_v60 = vld [vmem:[%s19381_s2 + $0x618] sm:$0xff] }
 0x24c   :  { %v17609_v10 = vpack.c.bf16 %v21139_v36, %v21138_v40  ;;  %v21144_v28 = vand.u32 4294901760, %v21115_v13  ;;  %v21145_v3 = vand.u32 4294901760, %v17126_v53  ;;  %v21146_v24 = vand.u32 4294901760, %v17138_v20  ;;  %v10182_v53 = vpop.f32.mrb[92].mxu0  ;;  %6341 = vmatmul.mubr.f32.gmra.mrb[158].mxu1 %v17433_v42 }
 0x24d   :  { %21136 = vst [vmem:[#allocation40_spill] sm:$0xff] %v17596_v30  ;;  %v17615_v51 = vpack.c.bf16 %v21141_v12, %v21140_v35  ;;  %v17621_v7 = vpack.c.bf16 %v21143_v49, %v21142_v55  ;;  %v21147_v16 = vand.u32 4294901760, %v17156_v21  ;;  %v7004_v36 = vand.u32 4294901760, %v421_v17  ;;  %v10183_v12 = vpop.f32.mrb[93].mxu0  ;;  %v21150_v49 = vld [vmem:[#allocation13_spill] sm:$0xff] }
 0x24e   :  { %v17627_v31 = vpack.c.bf16 %v21145_v3, %v21144_v28  ;;  %v3851_v13 = vadd.f32 %v10181_v48, %v17443_v29  ;;  %v21148_v20 = vand.u32 4294901760, %v17169_v33  ;;  %v21149_v21 = vand.u32 4294901760, %v17176_v52  ;;  %12632 = vmatpush3.bf16.msra.mxu1 %v21150_v49  ;;  %12608 = vmatpush3.bf16.msra.mxu0 %v12607_v0  ;;  %v10185_v42 = vpop.f32.mrb[94].mxu0 }
 0x24f   :  { %v17633_v40 = vpack.c.bf16 %v21147_v16, %v21146_v24  ;;  %v7055_v55 = vand.u32 4294901760, %v438_v23  ;;  %v7058_v35 = vand.u32 4294901760, %v439_v58  ;;  %v21151_v28 = vand.u32 4294901760, %v21123_v63  ;;  %v440_v16 = vld [vmem:[%s19381_s2 + $0x6a0] sm:$0xff]  ;;  %v441_v63 = vld [vmem:[%s19381_s2 + $0x6a8] sm:$0xff]  ;;  %12610 = vmatprep.subr.bf16.mxu0 %v12609_v5 }
 0x250   :  { %v17647_v26 = vpack.c.bf16 %v21149_v21, %v21148_v20  ;;  %v21152_v3 = vand.u32 4294901760, %v17197_v27  ;;  %v21153_v29 = vand.u32 4294901760, %v17207_v46  ;;  %v21155_v33 = vand.u32 4294901760, %v17226_v54  ;;  %v21158_v21 = vld [vmem:[#allocation24_spill] sm:$0xff] }
 0x251   :  { %6619 = vmatprep.mubr.f32.mxu1 %v21151_v28  ;;  %v21156_v52 = vand.u32 4294901760, %v17255_v8  ;;  %v10184_v20 = vadd.f32 %v10183_v12, %v10182_v53  ;;  %12634 = vmatprep.subr.bf16.mxu1 %v21158_v21  ;;  %v17673_v54 = vsub.f32 %v420_v43, %v7001_v14  ;;  %v7007_v8 = vand.u32 4294901760, %v422_v47 }
 0x252   :  { %v17656_v48 = vpack.c.bf16 %v21153_v29, %v21152_v3  ;;  %v7010_v28 = vand.u32 4294901760, %v423_v60  ;;  %v10226_v3 = vpop.f32.mrb[90].mxu1  ;;  %v21160_v29 = vand.u32 4294901760, %v17268_v22  ;;  %v21162_v27 = vand.u32 4294901760, %v17507_v15  ;;  %v424_v15 = vld [vmem:[%s19381_s2 + $0x620] sm:$0xff] }
 0x253   :  { %v17662_v24 = vpack.c.bf16 %v21156_v52, %v21155_v33  ;;  %21159 = vst [vmem:[#allocation49_spill] sm:$0xff] %v17673_v54  ;;  %v21161_v33 = vand.u32 4294901760, %v17284_v62  ;;  %v21163_v46 = vand.u32 4294901760, %v17512_v6  ;;  %v17687_v0 = vpack.c.bf16 %v7004_v36, %v7001_v14  ;;  %v10227_v5 = vpop.f32.mrb[91].mxu1  ;;  %v425_v6 = vld [vmem:[%s19381_s2 + $0x628] sm:$0xff]  ;;  %v10186_v14 = vpop.f32.mrb[95].mxu0 }
 0x254   :  { %21154 = vst [vmem:[#allocation29_spill] sm:$0xff] %v17656_v48  ;;  %v17689_v43 = vsub.f32 %v421_v17, %v7004_v36  ;;  %v3866_v12 = vadd.f32 %v10184_v20, %v17467_v4  ;;  %v7061_v21 = vand.u32 4294901760, %v440_v16  ;;  %v7064_v48 = vand.u32 4294901760, %v441_v63  ;;  %v21168_v17 = vld [vmem:[#allocation43_spill] sm:$0xff] }
 0x255   :  { %21157 = vst [vmem:[#allocation41_spill] sm:$0xff] %v17662_v24  ;;  %v17679_v52 = vpack.c.bf16 %v21161_v33, %v21160_v29  ;;  %v17685_v53 = vpack.c.bf16 %v21163_v46, %v21162_v27  ;;  %21165 = vst [vmem:[#allocation35_spill] sm:$0xff] %v17687_v0  ;;  %v17692_v24 = vpack.c.bf16 %v7058_v35, %v7055_v55  ;;  %12636 = vmatpush3.bf16.msra.mxu1 %v21168_v17  ;;  %v21172_v0 = vld [vmem:[#allocation32_spill] sm:$0xff] }
 0x256   :  { %21166 = vst [vmem:[#allocation27_spill] sm:$0xff] %v17689_v43  ;;  %v10228_v27 = vadd.f32 %v10227_v5, %v10226_v3  ;;  %v17701_v36 = vsub.f32 %v438_v23, %v7055_v55  ;;  %v21169_v4 = vand.u32 4294901760, %v17591_v61  ;;  %v21170_v20 = vand.u32 4294901760, %v17596_v30  ;;  %12638 = vmatprep.subr.bf16.mxu1 %v21172_v0 }
 0x257   :  { %21164 = vst [vmem:[#allocation22_spill] sm:$0xff] %v17685_v53  ;;  %21167 = vst [vmem:[#allocation33_spill] sm:$0xff] %v17692_v24  ;;  %v10187_v33 = vadd.f32 %v10186_v14, %v10185_v42  ;;  %v21171_v24 = vpack.c.bf16 %v17284_v62, %v17268_v22  ;;  %v17713_v3 = vsub.f32 %v439_v58, %v7058_v35  ;;  %v10188_v62 = vpop.f32.mrb[96].mxu0 }
 0x258   :  { %v7288_v46 = vsub.f32 %v17591_v61, %v21169_v4  ;;  %v7295_v29 = vsub.f32 %v17596_v30, %v21170_v20  ;;  %v17715_v5 = vpack.c.bf16 %v7010_v28, %v7007_v8  ;;  %v17718_v55 = vadd.f32 %v10228_v27, %v3851_v13  ;;  %v10229_v4 = vpop.f32.mrb[92].mxu1  ;;  %v10189_v23 = vpop.f32.mrb[97].mxu0  ;;  %v21177_v27 = vld [vmem:[#allocation9_spill] sm:$0xff]  ;;  %v21178_v30 = vld [vmem:[#allocation36_spill] sm:$0xff] }
 0x259   :  { %12612 = vmatpush3.bf16.msra.mxu0 %v21171_v24  ;;  %21173 = vst [vmem:[#allocation39_spill] sm:$0xff] %v17713_v3  ;;  %v7013_v61 = vand.u32 4294901760, %v424_v15  ;;  %v7016_v20 = vand.u32 4294901760, %v425_v6  ;;  %v3881_v22 = vadd.f32 %v10187_v33, %v17481_v32  ;;  %v10230_v24 = vpop.f32.mrb[93].mxu1  ;;  %v17723_v14 = vsub.f32 %v422_v47, %v7007_v8  ;;  %12640 = vmatpush3.bf16.msra.mxu1 %v21178_v30  ;;  %v442_v32 = vld [vmem:[%s19381_s2 + $0x6b0] sm:$0xff] }
 0x25a   :  { %21174 = vst [vmem:[#allocation25_spill] sm:$0xff] %v17715_v5  ;;  %12646 = vmatprep.subr.bf16.mxu0 %v17540_v45  ;;  %v17725_v58 = vsub.f32 %v423_v60, %v7010_v28  ;;  %v17727_v35 = vpack.c.bf16 %v7064_v48, %v7061_v21  ;;  %v10231_v13 = vadd.f32 %v10230_v24, %v10229_v4  ;;  %v7289_v5 = vand.u32 4294901760, %v7288_v46  ;;  %v21179_v60 = vld [vmem:[#allocation34_spill] sm:$0xff]  ;;  %v10232_v46 = vpop.f32.mrb[94].mxu1 }
 0x25b   :  { %21175 = vst [vmem:[#allocation18_spill] sm:$0xff] %v17723_v14  ;;  %v17731_v45 = vsub.f32 %v440_v16, %v7061_v21  ;;  %v7296_v42 = vand.u32 4294901760, %v7295_v29  ;;  %v10190_v47 = vadd.f32 %v10189_v23, %v10188_v62  ;;  %v17738_v8 = vsub.f32 %v441_v63, %v7064_v48  ;;  %v443_v16 = vld [vmem:[%s19381_s2 + $0x6b8] sm:$0xff]  ;;  %v21182_v29 = vld [vmem:[#allocation26_spill] sm:$0xff]  ;;  %v10191_v62 = vpop.f32.mrb[98].mxu0  ;;  %v10233_v24 = vpop.f32.mrb[95].mxu1 }
 0x25c   :  { %21176 = vst [vmem:[#allocation38_spill] sm:$0xff] %v17727_v35  ;;  %6479 = vmatmul.mubr.f32.vlgmr.msra.gmra.mrb[160].mxu0 %v21177_v27  ;;  %v21181_v28 = vand.u32 4294901760, %v17673_v54  ;;  %v17746_v21 = vadd.f32 %v10231_v13, %v3866_v12  ;;  %12642 = vmatprep.subr.bf16.mxu1 %v21182_v29  ;;  %v21184_v48 = vand.u32 4294901760, %v17689_v43  ;;  %v7067_v12 = vand.u32 4294901760, %v442_v32  ;;  %v21188_v13 = vld [vmem:[#allocation48_spill] sm:$0xff] }
 0x25d   :  { %12648 = vmatpush3.bf16.msra.mxu0 %v17546_v34  ;;  %6485 = vmatprep.mubr.f32.mxu0 %v21179_v60  ;;  %21180 = vst [vmem:[#allocation45_spill] sm:$0xff] %v17738_v8  ;;  %v17750_v34 = vpack.c.bf16 %v7016_v20, %v7013_v61  ;;  %v3896_v4 = vadd.f32 %v10190_v47, %v17494_v11  ;;  %v7070_v47 = vand.u32 4294901760, %v443_v16 }
 0x25e   :  { %v7176_v33 = vsub.f32 %v17673_v54, %v21181_v28  ;;  %12650 = vmatprep.subr.bf16.mxu0 %v17552_v41  ;;  %v7183_v63 = vsub.f32 %v17689_v43, %v21184_v48  ;;  %v17757_v28 = vsub.f32 %v424_v15, %v7013_v61  ;;  %v426_v41 = vld [vmem:[%s19381_s2 + $0x630] sm:$0xff]  ;;  %v10192_v54 = vpop.f32.mrb[99].mxu0  ;;  %v21186_v48 = vld [vmem:[#allocation44_spill] sm:$0xff]  ;;  %v17765_v23 = vpack.c.bf16 %v7296_v42, %v7289_v5  ;;  %v10235_v5 = vpop.f32.mrb[96].mxu1 }
 0x25f   :  { %21183 = vst [vmem:[#allocation28_spill] sm:$0xff] %v17750_v34  ;;  %v10234_v34 = vadd.f32 %v10233_v24, %v10232_v46  ;;  %12644 = vmatpush3.bf16.msra.mxu1 %v21186_v48  ;;  %v17767_v11 = vsub.f32 %v425_v6, %v7016_v20  ;;  %v427_v61 = vld [vmem:[%s19381_s2 + $0x638] sm:$0xff]  ;;  %v10193_v15 = vadd.f32 %v10192_v54, %v10191_v62  ;;  %v21189_v20 = vand.u32 4294901760, %v17701_v36 }
 0x260   :  { %21185 = vst [vmem:[#allocation6_spill] sm:$0xff] %v17757_v28  ;;  %6488 = vmatmul.mubr.f32.gmra.mrb[162].mxu0 %v17361_v18  ;;  %v7177_v43 = vand.u32 4294901760, %v7176_v33  ;;  %12678 = vmatprep.subr.bf16.mxu1 %v21102_v57  ;;  %v7184_v6 = vand.u32 4294901760, %v7183_v63  ;;  %v10236_v33 = vpop.f32.mrb[97].mxu1  ;;  %v21190_v62 = vand.u32 4294901760, %v21177_v27  ;;  %v17786_v24 = vsub.f32 %v442_v32, %v7067_v12  ;;  %v21193_v63 = vld [vmem:[#allocation12_spill] sm:$0xff] }
 0x261   :  { %21187 = vst [vmem:[#allocation16_spill] sm:$0xff] %v17767_v11  ;;  %12652 = vmatpush3.bf16.msra.mxu0 %v17563_v44  ;;  %6494 = vmatprep.mubr.f32.mxu0 %v21188_v13  ;;  %v17776_v35 = vadd.f32 %v10234_v34, %v3881_v22  ;;  %v7302_v54 = vsub.f32 %v17701_v36, %v21189_v20  ;;  %v7019_v44 = vand.u32 4294901760, %v426_v41  ;;  %v21192_v22 = vand.u32 4294901760, %v17713_v3  ;;  %v445_v27 = vld [vmem:[%s19381_s2 + $0x6c8] sm:$0xff]  ;;  %v21196_v32 = vld [vmem:[#allocation15_spill] sm:$0xff] }
 0x262   :  { %12654 = vmatprep.subr.bf16.mxu0 %v17569_v50  ;;  %v3911_v42 = vadd.f32 %v10193_v15, %v17514_v39  ;;  %6623 = vmatmul.mubr.f32.vlgmr.msra.gmra.mrb[160].mxu1 %v21190_v62  ;;  %21191 = vst [vmem:[#allocation19_spill] sm:$0xff] %v17786_v24  ;;  %v7022_v34 = vand.u32 4294901760, %v427_v61  ;;  %v10237_v57 = vadd.f32 %v10236_v33, %v10235_v5  ;;  %v444_v39 = vld [vmem:[%s19381_s2 + $0x6c0] sm:$0xff]  ;;  %v21197_v15 = vand.u32 4294901760, %v17723_v14  ;;  %v10238_v62 = vpop.f32.mrb[98].mxu1 }
 0x263   :  { %v7309_v50 = vsub.f32 %v17713_v3, %v21192_v22  ;;  %12680 = vmatpush3.bf16.msra.mxu1 %v21105_v59  ;;  %v17793_v20 = vpack.c.bf16 %v7070_v47, %v7067_v12  ;;  %v17795_v46 = vsub.f32 %v443_v16, %v7070_v47  ;;  %v21198_v12 = vand.u32 4294901760, %v17725_v58 }
 0x264   :  { %6497 = vmatmul.mubr.f32.gmra.mrb[164].mxu0 %v21193_v63  ;;  %v7190_v59 = vsub.f32 %v17723_v14, %v21197_v15  ;;  %v17813_v33 = vadd.f32 %v10237_v57, %v3896_v4  ;;  %v21199_v22 = vand.u32 4294901760, %v21179_v60  ;;  %v7303_v3 = vand.u32 4294901760, %v7302_v54  ;;  %v10239_v14 = vpop.f32.mrb[99].mxu1  ;;  %12682 = vmatprep.subr.bf16.mxu1 %v21111_v37  ;;  %v21203_v60 = vld [vmem:[#allocation52_spill] sm:$0xff]  ;;  %v21205_v54 = vld [vmem:[#allocation54_spill] sm:$0xff] }
 0x265   :  { %21194 = vst [vmem:[#allocation51_spill] sm:$0xff] %v17793_v20  ;;  %21195 = vst [vmem:[#allocation14_spill] sm:$0xff] %v17795_v46  ;;  %12656 = vmatpush3.bf16.msra.mxu0 %v17575_v9  ;;  %6503 = vmatprep.mubr.f32.mxu0 %v21196_v32  ;;  %v7197_v16 = vsub.f32 %v17725_v58, %v21198_v12  ;;  %v17818_v9 = vpack.c.bf16 %v7184_v6, %v7177_v43  ;;  %v21201_v12 = vand.u32 4294901760, %v17361_v18  ;;  %v429_v18 = vld [vmem:[%s19381_s2 + $0x648] sm:$0xff] }
 0x266   :  { %6630 = vmatprep.mubr.f32.mxu1 %v21199_v22  ;;  %12658 = vmatprep.subr.bf16.mxu0 %v17586_v19  ;;  %v17820_v15 = vsub.f32 %v426_v41, %v7019_v44  ;;  %v7310_v5 = vand.u32 4294901760, %v7309_v50  ;;  %v17825_v4 = vpack.c.bf16 %v7022_v34, %v7019_v44  ;;  %v7073_v57 = vand.u32 4294901760, %v444_v39  ;;  %v428_v19 = vld [vmem:[%s19381_s2 + $0x640] sm:$0xff] }
 0x267   :  { %6634 = vmatmul.mubr.f32.gmra.mrb[162].mxu1 %v21201_v12  ;;  %v7076_v47 = vand.u32 4294901760, %v445_v27  ;;  %v10240_v43 = vadd.f32 %v10239_v14, %v10238_v62  ;;  %v17832_v41 = vsub.f32 %v427_v61, %v7022_v34  ;;  %v20032_v37 = vand.u32 4294901760, %v17757_v28 }
 0x268   :  { %21200 = vst [vmem:[#allocation21_spill] sm:$0xff] %v17820_v15  ;;  %21202 = vst [vmem:[#allocation5_spill] sm:$0xff] %v17825_v4  ;;  %6506 = vmatmul.mubr.f32.gmra.mrb[166].mxu0 %v21203_v60  ;;  %12684 = vmatpush3.bf16.msra.mxu1 %v21112_v38  ;;  %v20030_v6 = vand.u32 4294901760, %v17767_v11  ;;  %v7191_v44 = vand.u32 4294901760, %v7190_v59  ;;  %v7198_v14 = vand.u32 4294901760, %v7197_v16  ;;  %v21206_v50 = vand.u32 4294901760, %v17731_v45 }
 0x269   :  { %21204 = vst [vmem:[#allocation8_spill] sm:$0xff] %v17832_v41  ;;  %12660 = vmatpush3.bf16.msra.mxu0 %v17609_v10  ;;  %6512 = vmatprep.mubr.f32.mxu0 %v21205_v54  ;;  %v21207_v61 = vand.u32 4294901760, %v17738_v8  ;;  %v17847_v62 = vadd.f32 %v10240_v43, %v3911_v42  ;;  %v21208_v22 = vand.u32 4294901760, %v21188_v13  ;;  %v7025_v10 = vand.u32 4294901760, %v428_v19  ;;  %v446_v59 = vld [vmem:[%s19381_s2 + $0x6d0] sm:$0xff] }
 0x26a   :  { %v7316_v38 = vsub.f32 %v17731_v45, %v21206_v50  ;;  %12662 = vmatprep.subr.bf16.mxu0 %v17615_v51  ;;  %v20029_v16 = vand.u32 4294901760, %v17786_v24  ;;  %v20031_v12 = vand.u32 4294901760, %v17795_v46  ;;  %v21209_v50 = vand.u32 4294901760, %v21193_v63  ;;  %12686 = vmatprep.subr.bf16.mxu1 %v21053_v56 }
 0x26b   :  { %v7323_v34 = vsub.f32 %v17738_v8, %v21207_v61  ;;  %6641 = vmatprep.mubr.f32.mxu1 %v21208_v22  ;;  %v17860_v42 = vpack.c.bf16 %v7310_v5, %v7303_v3  ;;  %v17862_v13 = vpack.c.bf16 %v7076_v47, %v7073_v57  ;;  %v17864_v43 = vsub.f32 %v444_v39, %v7073_v57  ;;  %v21212_v61 = vld [vmem:[#allocation23_spill] sm:$0xff]  ;;  %v21244_v8 = vld [vmem:[#allocation38_spill] sm:$0xff] }
 0x26c   :  { %6645 = vmatmul.mubr.f32.gmra.mrb[164].mxu1 %v21209_v50  ;;  %v7028_v51 = vand.u32 4294901760, %v429_v18  ;;  %6515 = vmatmul.mubr.f32.gmra.mrb[168].mxu0 %v17458_v1  ;;  %v17868_v22 = vsub.f32 %v445_v27, %v7076_v47  ;;  %v7204_v63 = vsub.f32 %v17757_v28, %v20032_v37  ;;  %v7211_v56 = vsub.f32 %v17767_v11, %v20030_v6  ;;  %v447_v3 = vld [vmem:[%s19381_s2 + $0x6d8] sm:$0xff]  ;;  %v430_v50 = vld [vmem:[%s19381_s2 + $0x650] sm:$0xff] }
 0x26d   :  { %21210 = vst [vmem:[#allocation11_spill] sm:$0xff] %v17862_v13  ;;  %21211 = vst [vmem:[#allocation13_spill] sm:$0xff] %v17864_v43  ;;  %12688 = vmatpush3.bf16.msra.mxu1 %v21212_v61  ;;  %12664 = vmatpush3.bf16.msra.mxu0 %v17621_v7  ;;  %v21214_v39 = vand.u32 4294901760, %v21196_v32  ;;  %v17882_v5 = vpack.c.bf16 %v7198_v14, %v7191_v44  ;;  %v7317_v27 = vand.u32 4294901760, %v7316_v38  ;;  %v7324_v47 = vand.u32 4294901760, %v7323_v34  ;;  %v431_v44 = vld [vmem:[%s19381_s2 + $0x658] sm:$0xff] }
 0x26e   :  { %21213 = vst [vmem:[#allocation43_spill] sm:$0xff] %v17868_v22  ;;  %v7079_v57 = vand.u32 4294901760, %v446_v59  ;;  %12666 = vmatprep.subr.bf16.mxu0 %v17627_v31  ;;  %12690 = vmatprep.subr.bf16.mxu1 %v21116_v2  ;;  %v17889_v61 = vsub.f32 %v428_v19, %v7025_v10  ;;  %v7330_v7 = vsub.f32 %v17786_v24, %v20029_v16  ;;  %v10273_v14 = vpop.f32.mrb[100].mxu0  ;;  %v21216_v38 = vand.u32 4294901760, %v21203_v60  ;;  %v21217_v31 = vld [vmem:[#allocation42_spill] sm:$0xff] }
 0x26f   :  { %6652 = vmatprep.mubr.f32.mxu1 %v21214_v39  ;;  %v7337_v32 = vsub.f32 %v17795_v46, %v20031_v12  ;;  %6833 = vmatprep.mubr.f32.mxu0 %v21217_v31  ;;  %v17903_v2 = vpack.c.bf16 %v7028_v51, %v7025_v10  ;;  %v17905_v19 = vsub.f32 %v429_v18, %v7028_v51  ;;  %v7082_v34 = vand.u32 4294901760, %v447_v3  ;;  %v10274_v16 = vpop.f32.mrb[101].mxu0  ;;  %v21220_v6 = vld [vmem:[#allocation10_spill] sm:$0xff] }
 0x270   :  { %21215 = vst [vmem:[#allocation32_spill] sm:$0xff] %v17889_v61  ;;  %6656 = vmatmul.mubr.f32.gmra.mrb[166].mxu1 %v21216_v38  ;;  %v20038_v39 = vand.u32 4294901760, %v17820_v15  ;;  %v21221_v12 = vand.u32 4294901760, %v21205_v54  ;;  %v7205_v37 = vand.u32 4294901760, %v7204_v63  ;;  %v7212_v46 = vand.u32 4294901760, %v7211_v56  ;;  %v10276_v63 = vpop.f32.mrb[102].mxu0 }
 0x271   :  { %21218 = vst [vmem:[#allocation9_spill] sm:$0xff] %v17903_v2  ;;  %21219 = vst [vmem:[#allocation36_spill] sm:$0xff] %v17905_v19  ;;  %12692 = vmatpush3.bf16.msra.mxu1 %v21220_v6  ;;  %v7031_v24 = vand.u32 4294901760, %v430_v50  ;;  %v20037_v60 = vand.u32 4294901760, %v17832_v41  ;;  %v10275_v38 = vadd.f32 %v10274_v16, %v10273_v14  ;;  %12668 = vmatpush3.bf16.msra.mxu0 %v17633_v40  ;;  %v7034_v51 = vand.u32 4294901760, %v431_v44  ;;  %v448_v6 = vld [vmem:[%s19381_s2 + $0x6e0] sm:$0xff] }
 0x272   :  { %6663 = vmatprep.mubr.f32.mxu1 %v21221_v12  ;;  %12694 = vmatprep.subr.bf16.mxu1 %v21137_v25  ;;  %v17914_v18 = vpack.c.bf16 %v7324_v47, %v7317_v27  ;;  %v17916_v10 = vsub.f32 %v446_v59, %v7079_v57  ;;  %v7331_v54 = vand.u32 4294901760, %v7330_v7  ;;  %v7338_v12 = vand.u32 4294901760, %v7337_v32  ;;  %v449_v16 = vld [vmem:[%s19381_s2 + $0x6e8] sm:$0xff]  ;;  %v10277_v7 = vpop.f32.mrb[103].mxu0 }
 0x273   :  { %12670 = vmatprep.subr.bf16.mxu0 %v17647_v26  ;;  %v20039_v40 = vand.u32 4294901760, %v17864_v43  ;;  %v20042_v25 = vand.u32 4294901760, %v17868_v22  ;;  %v4309_v59 = vadd.f32 %v10275_v38, %v17718_v55  ;;  %v21223_v56 = vand.u32 4294901760, %v17458_v1  ;;  %v21227_v38 = vld [vmem:[#allocation24_spill] sm:$0xff] }
 0x274   :  { %21222 = vst [vmem:[#allocation34_spill] sm:$0xff] %v17916_v10  ;;  %v17930_v27 = vpack.c.bf16 %v7082_v34, %v7079_v57  ;;  %v17932_v47 = vsub.f32 %v447_v3, %v7082_v34  ;;  %v7218_v26 = vsub.f32 %v17820_v15, %v20038_v39  ;;  %v17939_v32 = vpack.c.bf16 %v7212_v46, %v7205_v37  ;;  %v81_v3 = vld [vmem:[%s19379_s0 + $0x68] sm:$0xff] }
 0x275   :  { %6667 = vmatmul.mubr.f32.gmra.mrb[168].mxu1 %v21223_v56  ;;  %v17941_v55 = vsub.f32 %v430_v50, %v7031_v24  ;;  %v7225_v1 = vsub.f32 %v17832_v41, %v20037_v60  ;;  %v7085_v57 = vand.u32 4294901760, %v448_v6  ;;  %v10278_v14 = vadd.f32 %v10277_v7, %v10276_v63  ;;  %v21226_v34 = vld [vmem:[#allocation29_spill] sm:$0xff]  ;;  %v21235_v41 = vld [vmem:[#allocation35_spill] sm:$0xff] }
 0x276   :  { %21224 = vst [vmem:[#allocation26_spill] sm:$0xff] %v17930_v27  ;;  %12696 = vmatpush3.bf16.msra.mxu1 %v21150_v49  ;;  %6965 = vmatprep.mubr.f32.mxu1 %v21217_v31  ;;  %v17951_v49 = vpack.c.bf16 %v7034_v51, %v7031_v24  ;;  %v17953_v46 = vsub.f32 %v431_v44, %v7034_v51  ;;  %v7088_v37 = vand.u32 4294901760, %v449_v16  ;;  %v432_v50 = vld [vmem:[%s19381_s2 + $0x660] sm:$0xff]  ;;  %v10320_v31 = vpop.f32.mrb[100].mxu1  ;;  %v433_v44 = vld [vmem:[%s19381_s2 + $0x668] sm:$0xff]  ;;  %v17979_v51 = vld [vmem:[%s19381_s2 + $0x6f0] sm:$0xff] }
 0x277   :  { %21225 = vst [vmem:[#allocation44_spill] sm:$0xff] %v17941_v55  ;;  %12672 = vmatpush3.bf16.msra.mxu0 %v21226_v34  ;;  %12698 = vmatprep.subr.bf16.mxu1 %v21227_v38  ;;  %v21229_v56 = vld [vmem:[#allocation41_spill] sm:$0xff]  ;;  %v17959_v60 = vpack.c.bf16 %v7338_v12, %v7331_v54  ;;  %v7344_v63 = vsub.f32 %v17864_v43, %v20039_v40  ;;  %v10279_v34 = vpop.f32.mrb[104].mxu0  ;;  %v10321_v38 = vpop.f32.mrb[101].mxu1  ;;  %v7219_v54 = vand.u32 4294901760, %v7218_v26  ;;  %v20049_v12 = vand.u32 4294901760, %v17905_v19 }
 0x278   :  { %21228 = vst [vmem:[#allocation48_spill] sm:$0xff] %v17951_v49  ;;  %12674 = vmatprep.subr.bf16.mxu0 %v21229_v56  ;;  %v7351_v24 = vsub.f32 %v17868_v22, %v20042_v25  ;;  %v4318_v7 = vadd.f32 %v10278_v14, %v17746_v21  ;;  %v161_v56 = vmul.f32 %v81_v3, %v81_v3  ;;  %v10280_v39 = vpop.f32.mrb[105].mxu0  ;;  %v7226_v43 = vand.u32 4294901760, %v7225_v1 }
 0x279   :  { %v10322_v40 = vadd.f32 %v10321_v38, %v10320_v31  ;;  %v17974_v25 = vsub.f32 %v448_v6, %v7085_v57  ;;  %v7037_v22 = vand.u32 4294901760, %v432_v50  ;;  %v10281_v21 = vadd.f32 %v10280_v39, %v10279_v34  ;;  %v10323_v6 = vpop.f32.mrb[102].mxu1  ;;  %v21234_v34 = vld [vmem:[#allocation37_spill] sm:$0xff] }
 0x27a   :  { %12700 = vmatpush3.bf16.msra.mxu1 %v21168_v17  ;;  %v17983_v26 = vpack.c.bf16 %v7088_v37, %v7085_v57  ;;  %v17985_v3 = vsub.f32 %v449_v16, %v7088_v37  ;;  %v7040_v14 = vand.u32 4294901760, %v433_v44  ;;  %v7345_v1 = vand.u32 4294901760, %v7344_v63  ;;  %v10282_v16 = vpop.f32.mrb[106].mxu0 }
 0x27b   :  { %21230 = vst [vmem:[#allocation12_spill] sm:$0xff] %v17974_v25  ;;  %12676 = vmatpush3.bf16.msra.mxu0 %v17679_v52  ;;  %12702 = vmatprep.subr.bf16.mxu1 %v21172_v0  ;;  %v17987_v17 = vadd.f32 %v10322_v40, %v4309_v59  ;;  %v7352_v31 = vand.u32 4294901760, %v7351_v24  ;;  %v21232_v38 = vand.u32 4294901760, %v17889_v61  ;;  %v17998_v52 = vld [vmem:[%s19381_s2 + $0x6f8] sm:$0xff]  ;;  %v4327_v0 = vadd.f32 %v10281_v21, %v17776_v35  ;;  %v10324_v40 = vpop.f32.mrb[103].mxu1  ;;  %v10283_v63 = vpop.f32.mrb[107].mxu0 }
 0x27c   :  { %21231 = vst [vmem:[#allocation15_spill] sm:$0xff] %v17983_v26  ;;  %12710 = vmatprep.subr.bf16.mxu0 %v17685_v53  ;;  %v18004_v59 = vsub.f32 %v17905_v19, %v20049_v12  ;;  %v7091_v57 = vand.u32 4294901760, %v17979_v51  ;;  %v18007_v37 = vand.u32 4294901760, %v161_v56  ;;  %v10325_v24 = vadd.f32 %v10324_v40, %v10323_v6  ;;  %v21236_v12 = vld [vmem:[#allocation17_spill] sm:$0xff]  ;;  %v18042_v40 = vld [vmem:[%s19381_s2 + $0x678] sm:$0xff] }
 0x27d   :  { %v17993_v39 = vsub.f32 %v17889_v61, %v21232_v38  ;;  %v18011_v38 = vpack.c.bf16 %v7226_v43, %v7219_v54  ;;  %v18013_v35 = vsub.f32 %v432_v50, %v7037_v22  ;;  %v10284_v61 = vadd.f32 %v10283_v63, %v10282_v16  ;;  %v80_v43 = vld [vmem:[%s19379_s0 + $0x60] sm:$0xff]  ;;  %v10326_v54 = vpop.f32.mrb[104].mxu1  ;;  %v21243_v53 = vld [vmem:[#allocation31_spill] sm:$0xff] }
 0x27e   :  { %21233 = vst [vmem:[#allocation52_spill] sm:$0xff] %v18007_v37  ;;  %6835 = vmatmul.mubr.f32.vlgmr.msra.gmra.mrb[170].mxu0 %v21234_v34  ;;  %12704 = vmatpush3.bf16.msra.mxu1 %v21178_v30  ;;  %v18018_v19 = vpack.c.bf16 %v7040_v14, %v7037_v22  ;;  %v18020_v15 = vsub.f32 %v433_v44, %v7040_v14  ;;  %v7094_v6 = vand.u32 4294901760, %v17998_v52  ;;  %v18026_v30 = vld [vmem:[%s19381_s2 + $0x670] sm:$0xff]  ;;  %v21238_v22 = vld [vmem:[#allocation33_spill] sm:$0xff]  ;;  %v7240_v21 = vand.u32 4294901760, %v18004_v59 }
 0x27f   :  { %12712 = vmatpush3.bf16.msra.mxu0 %v21235_v41  ;;  %6840 = vmatprep.mubr.f32.mxu0 %v21236_v12  ;;  %v18031_v50 = vadd.f32 %v10325_v24, %v4318_v7  ;;  %v18035_v44 = vpack.c.bf16 %v7352_v31, %v7345_v1  ;;  %v7233_v14 = vand.u32 4294901760, %v17993_v39  ;;  %v4336_v63 = vadd.f32 %v10284_v61, %v17813_v33  ;;  %v10285_v7 = vpop.f32.mrb[108].mxu0  ;;  %v10327_v24 = vpop.f32.mrb[105].mxu1  ;;  %v97_v31 = vld [vmem:[%s19379_s0 + $0xe8] sm:$0xff] }
 0x280   :  { %21237 = vst [vmem:[#allocation54_spill] sm:$0xff] %v18018_v19  ;;  %12706 = vmatprep.subr.bf16.mxu1 %v21182_v29  ;;  %12714 = vmatprep.subr.bf16.mxu0 %v21238_v22  ;;  %v18047_v29 = vsub.f32 %v17979_v51, %v7091_v57  ;;  %v18050_v1 = vsub.f32 %v161_v56, %v18007_v37  ;;  %v10286_v39 = vpop.f32.mrb[109].mxu0  ;;  %v21240_v22 = vld [vmem:[#allocation20_spill] sm:$0xff]  ;;  %v21241_v33 = vand.u32 4294901760, %v17916_v10  ;;  %v7043_v51 = vand.u32 4294901760, %v18026_v30  ;;  %v21242_v41 = vld [vmem:[#allocation25_spill] sm:$0xff] }
 0x281   :  { %v10328_v16 = vadd.f32 %v10327_v24, %v10326_v54  ;;  %v160_v59 = vmul.f32 %v80_v43, %v80_v43  ;;  %v10287_v56 = vadd.f32 %v10286_v39, %v10285_v7  ;;  %v7046_v11 = vand.u32 4294901760, %v18042_v40  ;;  %v10329_v28 = vpop.f32.mrb[106].mxu1 }
 0x282   :  { %21239 = vst [vmem:[#allocation23_spill] sm:$0xff] %v18050_v1  ;;  %6842 = vmatmul.mubr.f32.gmra.mrb[172].mxu0 %v21240_v22  ;;  %12708 = vmatpush3.bf16.msra.mxu1 %v21186_v48  ;;  %v18060_v61 = vsub.f32 %v17916_v10, %v21241_v33  ;;  %v21245_v43 = vand.u32 4294901760, %v17932_v47  ;;  %v20066_v39 = vand.u32 4294901760, %v17974_v25  ;;  %v177_v33 = vmul.f32 %v97_v31, %v97_v31 }
 0x283   :  { %12716 = vmatpush3.bf16.msra.mxu0 %v21242_v41  ;;  %6847 = vmatprep.mubr.f32.mxu0 %v21243_v53  ;;  %v18068_v48 = vadd.f32 %v10328_v16, %v4327_v0  ;;  %v4345_v10 = vadd.f32 %v10287_v56, %v17847_v62  ;;  %v10330_v41 = vpop.f32.mrb[107].mxu1  ;;  %v18078_v24 = vpack.c.bf16 %v7094_v6, %v7091_v57  ;;  %v18089_v62 = vand.u32 4294901760, %v160_v59  ;;  %v96_v57 = vld [vmem:[%s19379_s0 + $0xe0] sm:$0xff]  ;;  %v21249_v56 = vld [vmem:[#allocation50_spill] sm:$0xff] }
 0x284   :  { %12718 = vmatprep.subr.bf16.mxu0 %v21244_v8  ;;  %12742 = vmatprep.subr.bf16.mxu1 %v17765_v23  ;;  %v7365_v7 = vsub.f32 %v17932_v47, %v21245_v43  ;;  %v10331_v54 = vadd.f32 %v10330_v41, %v10329_v28  ;;  %v21246_v23 = vld [vmem:[#allocation47_spill] sm:$0xff]  ;;  %v18084_v43 = vpack.c.bf16 %v7240_v21, %v7233_v14  ;;  %v7359_v28 = vand.u32 4294901760, %v18060_v61  ;;  %v10332_v16 = vpop.f32.mrb[108].mxu1 }
 0x285   :  { %6967 = vmatmul.mubr.f32.vlgmr.msra.gmra.mrb[170].mxu1 %v21234_v34  ;;  %v18087_v31 = vsub.f32 %v17998_v52, %v7094_v6  ;;  %21247 = vst [vmem:[#allocation42_spill] sm:$0xff] %v18089_v62  ;;  %v21248_v34 = vld [vmem:[#allocation28_spill] sm:$0xff]  ;;  %v18097_v41 = vpack.c.bf16 %v7046_v11, %v7043_v51  ;;  %v21251_v52 = vand.u32 4294901760, %v17953_v46  ;;  %v7372_v61 = vsub.f32 %v17974_v25, %v20066_v39 }
 0x286   :  { %6849 = vmatmul.mubr.f32.gmra.mrb[174].mxu0 %v21246_v23  ;;  %12744 = vmatpush3.bf16.msra.mxu1 %v17818_v9  ;;  %v21250_v9 = vand.u32 4294901760, %v17941_v55  ;;  %v18105_v14 = vadd.f32 %v10331_v54, %v4336_v63  ;;  %v7366_v0 = vand.u32 4294901760, %v7365_v7  ;;  %v21254_v54 = vand.u32 4294901760, %v17985_v3 }
 0x287   :  { %12720 = vmatpush3.bf16.msra.mxu0 %v21248_v34  ;;  %6854 = vmatprep.mubr.f32.mxu0 %v21249_v56  ;;  %v7253_v6 = vsub.f32 %v17953_v46, %v21251_v52  ;;  %v18112_v34 = vand.u32 4294901760, %v177_v33  ;;  %v176_v52 = vmul.f32 %v96_v57, %v96_v57  ;;  %v18128_v25 = vsub.f32 %v18026_v30, %v7043_v51 }
 0x288   :  { %v7246_v21 = vsub.f32 %v17941_v55, %v21250_v9  ;;  %6972 = vmatprep.mubr.f32.mxu1 %v21236_v12  ;;  %12722 = vmatprep.subr.bf16.mxu0 %v17793_v20  ;;  %v113_v9 = vld [vmem:[%s19379_s0 + $0x168] sm:$0xff]  ;;  %v10333_v55 = vpop.f32.mrb[109].mxu1  ;;  %v21253_v12 = vand.u32 4294901760, %v18050_v1  ;;  %v7379_v7 = vsub.f32 %v17985_v3, %v21254_v54  ;;  %v18137_v54 = vsub.f32 %v18042_v40, %v7046_v11 }
 0x289   :  { %21252 = vst [vmem:[#allocation10_spill] sm:$0xff] %v18112_v34  ;;  %6974 = vmatmul.mubr.f32.gmra.mrb[172].mxu1 %v21240_v22  ;;  %12746 = vmatprep.subr.bf16.mxu1 %v17860_v42  ;;  %v10334_v39 = vadd.f32 %v10333_v55, %v10332_v16  ;;  %v21255_v20 = vld [vmem:[#allocation30_spill] sm:$0xff]  ;;  %v18131_v22 = vsub.f32 %v160_v59, %v18089_v62  ;;  %v20071_v42 = vand.u32 4294901760, %v18013_v35  ;;  %v7254_v16 = vand.u32 4294901760, %v7253_v6  ;;  %v21262_v6 = vld [vmem:[#allocation40_spill] sm:$0xff] }
 0x28a   :  { %v7099_v63 = vsub.f32 %v18050_v1, %v21253_v12  ;;  %6856 = vmatmul.mubr.f32.gmra.mrb[176].mxu0 %v21255_v20  ;;  %12748 = vmatpush3.bf16.msra.mxu1 %v17882_v5  ;;  %v21257_v12 = vld [vmem:[#allocation7_spill] sm:$0xff]  ;;  %v7247_v55 = vand.u32 4294901760, %v7246_v21  ;;  %v193_v57 = vmul.f32 %v113_v9, %v113_v9  ;;  %v112_v5 = vld [vmem:[%s19379_s0 + $0x160] sm:$0xff]  ;;  %v18146_v51 = vpack.c.bf16 %v7366_v0, %v7359_v28  ;;  %v129_v40 = vld [vmem:[%s19379_s0 + $0x1e8] sm:$0xff] }
 0x28b   :  { %21256 = vst [vmem:[#allocation29_spill] sm:$0xff] %v18131_v22  ;;  %12724 = vmatpush3.bf16.msra.mxu0 %v17825_v4  ;;  %6861 = vmatprep.mubr.f32.mxu0 %v21257_v12  ;;  %v18142_v30 = vadd.f32 %v10334_v39, %v4345_v10  ;;  %v18150_v11 = vsub.f32 %v177_v33, %v18112_v34  ;;  %v7373_v39 = vand.u32 4294901760, %v7372_v61  ;;  %v18157_v21 = vand.u32 4294901760, %v176_v52  ;;  %v21260_v0 = vld [vmem:[#allocation53_spill] sm:$0xff]  ;;  %v21261_v28 = vld [vmem:[#allocation46_spill] sm:$0xff] }
 0x28c   :  { %6979 = vmatprep.mubr.f32.mxu1 %v21243_v53  ;;  %12726 = vmatprep.subr.bf16.mxu0 %v17862_v13  ;;  %v7100_v10 = vand.u32 4294901760, %v7099_v63  ;;  %v7380_v53 = vand.u32 4294901760, %v7379_v7  ;;  %v18171_v61 = vpack.c.bf16 %v7254_v16, %v7247_v55  ;;  %v21263_v63 = vld [vmem:[#allocation49_spill] sm:$0xff]  ;;  %v21264_v7 = vld [vmem:[#allocation27_spill] sm:$0xff]  ;;  %v18175_v59 = vand.u32 4294901760, %v193_v57 }
 0x28d   :  { %21258 = vst [vmem:[#allocation24_spill] sm:$0xff] %v18150_v11  ;;  %6981 = vmatmul.mubr.f32.gmra.mrb[174].mxu1 %v21246_v23  ;;  %12750 = vmatprep.subr.bf16.mxu1 %v17914_v18  ;;  %21259 = vst [vmem:[#allocation41_spill] sm:$0xff] %v18157_v21  ;;  %v18167_v23 = vsub.f32 %v18013_v35, %v20071_v42  ;;  %v192_v18 = vmul.f32 %v112_v5, %v112_v5  ;;  %v128_v9 = vld [vmem:[%s19379_s0 + $0x1e0] sm:$0xff]  ;;  %v21266_v5 = vand.u32 4294901760, %v18020_v15 }
 0x28e   :  { %6863 = vmatmul.mubr.f32.gmra.mrb[178].mxu0 %v21260_v0  ;;  %12752 = vmatpush3.bf16.msra.mxu1 %v17939_v32  ;;  %21265 = vst [vmem:[#allocation37_spill] sm:$0xff] %v18175_v59  ;;  %v209_v33 = vmul.f32 %v129_v40, %v129_v40  ;;  %v145_v40 = vld [vmem:[%s19379_s0 + $0x268] sm:$0xff]  ;;  %v10367_v32 = vpop.f32.mrb[110].mxu0  ;;  %v21267_v42 = vand.u32 4294901760, %v18131_v22 }
 0x28f   :  { %12728 = vmatpush3.bf16.msra.mxu0 %v17903_v2  ;;  %6986 = vmatprep.mubr.f32.mxu1 %v21249_v56  ;;  %v7267_v56 = vsub.f32 %v18020_v15, %v21266_v5  ;;  %v10368_v2 = vpop.f32.mrb[111].mxu0 }
 0x290   :  { %12730 = vmatprep.subr.bf16.mxu0 %v17930_v27  ;;  %12754 = vmatprep.subr.bf16.mxu1 %v17959_v60  ;;  %v12765_v27 = vpack.c.bf16 %v7380_v53, %v7373_v39  ;;  %v18193_v60 = vsub.f32 %v176_v52, %v18157_v21  ;;  %v18202_v16 = vsub.f32 %v18131_v22, %v21267_v42  ;;  %v144_v42 = vld [vmem:[%s19379_s0 + $0x260] sm:$0xff]  ;;  %v10370_v5 = vpop.f32.mrb[112].mxu0  ;;  %v21274_v22 = vand.u32 4294901760, %v18128_v25 }
 0x291   :  { %6988 = vmatmul.mubr.f32.gmra.mrb[176].mxu1 %v21255_v20  ;;  %7101 = vmatprep.mubr.f32.mxu0 %v7100_v10  ;;  %v7261_v20 = vand.u32 4294901760, %v18167_v23  ;;  %v18205_v10 = vand.u32 4294901760, %v192_v18  ;;  %v208_v52 = vmul.f32 %v128_v9, %v128_v9  ;;  %v10369_v39 = vadd.f32 %v10368_v2, %v10367_v32 }
 0x292   :  { %12756 = vmatpush3.bf16.msra.mxu1 %v18011_v38  ;;  %6993 = vmatprep.mubr.f32.mxu1 %v21257_v12  ;;  %v18210_v53 = vsub.f32 %v193_v57, %v18175_v59  ;;  %v18212_v38 = vand.u32 4294901760, %v209_v33  ;;  %v225_v12 = vmul.f32 %v145_v40, %v145_v40  ;;  %v7268_v23 = vand.u32 4294901760, %v7267_v56 }
 0x293   :  { %21268 = vst [vmem:[#allocation17_spill] sm:$0xff] %v18205_v10  ;;  %12732 = vmatpush3.bf16.msra.mxu0 %v17951_v49  ;;  %12758 = vmatprep.subr.bf16.mxu1 %v18035_v44  ;;  %v21271_v9 = vand.u32 4294901760, %v18150_v11  ;;  %v21272_v44 = vand.u32 4294901760, %v18047_v29  ;;  %v21273_v32 = vand.u32 4294901760, %v18087_v31  ;;  %v4665_v55 = vadd.f32 %v10369_v39, %v17987_v17 }
 0x294   :  { %21269 = vst [vmem:[#allocation20_spill] sm:$0xff] %v18210_v53  ;;  %21270 = vst [vmem:[#allocation31_spill] sm:$0xff] %v18212_v38  ;;  %12734 = vmatprep.subr.bf16.mxu0 %v17983_v26  ;;  %v18242_v17 = vsub.f32 %v192_v18, %v18205_v10  ;;  %v224_v39 = vmul.f32 %v144_v42, %v144_v42  ;;  %v12767_v18 = vpack.c.bf16 %v7268_v23, %v7261_v20  ;;  %v21286_v20 = vld [vmem:[#allocation18_spill] sm:$0xff] }
 0x295   :  { %v18221_v2 = vsub.f32 %v18150_v11, %v21271_v9  ;;  %v7386_v57 = vsub.f32 %v18047_v29, %v21272_v44  ;;  %v7393_v40 = vsub.f32 %v18087_v31, %v21273_v32  ;;  %6995 = vmatmul.mubr.f32.gmra.mrb[178].mxu1 %v21260_v0  ;;  %v7274_v9 = vsub.f32 %v18128_v25, %v21274_v22  ;;  %v10371_v44 = vpop.f32.mrb[113].mxu0 }
 0x296   :  { %v21275_v11 = vand.u32 4294901760, %v18137_v54  ;;  %12760 = vmatpush3.bf16.msra.mxu1 %v18084_v43  ;;  %v7106_v32 = vand.u32 4294901760, %v18202_v16  ;;  %7397 = vmatprep.mubr.f32.mxu1 %v18007_v37  ;;  %v18244_v0 = vand.u32 4294901760, %v208_v52  ;;  %v10372_v56 = vadd.f32 %v10371_v44, %v10370_v5  ;;  %v10414_v16 = vpop.f32.mrb[110].mxu1  ;;  %v10373_v44 = vpop.f32.mrb[114].mxu0 }
 0x297   :  { %12736 = vmatpush3.bf16.msra.mxu0 %v18018_v19  ;;  %12762 = vmatprep.subr.bf16.mxu1 %v18146_v51  ;;  %v18252_v43 = vand.u32 4294901760, %v225_v12  ;;  %v7115_v37 = vand.u32 4294901760, %v18221_v2  ;;  %v7387_v49 = vand.u32 4294901760, %v7386_v57  ;;  %v7394_v42 = vand.u32 4294901760, %v7393_v40  ;;  %v10415_v19 = vpop.f32.mrb[111].mxu1  ;;  %v10374_v4 = vpop.f32.mrb[115].mxu0 }
 0x298   :  { %v7281_v26 = vsub.f32 %v18137_v54, %v21275_v11  ;;  %21276 = vst [vmem:[#allocation47_spill] sm:$0xff] %v18244_v0  ;;  %v18250_v11 = vsub.f32 %v209_v33, %v18212_v38  ;;  %12738 = vmatprep.subr.bf16.mxu0 %v18078_v24  ;;  %v4672_v5 = vadd.f32 %v10372_v56, %v18031_v50  ;;  %v21279_v51 = vand.u32 4294901760, %v18193_v60  ;;  %v10417_v56 = vpop.f32.mrb[112].mxu1 }
 0x299   :  { %21278 = vst [vmem:[#allocation30_spill] sm:$0xff] %v18252_v43  ;;  %v7275_v33 = vand.u32 4294901760, %v7274_v9  ;;  %v10416_v1 = vadd.f32 %v10415_v19, %v10414_v16  ;;  %v18263_v23 = vsub.f32 %v208_v52, %v18244_v0  ;;  %v18265_v2 = vand.u32 4294901760, %v224_v39  ;;  %v21285_v9 = vld [vmem:[#allocation39_spill] sm:$0xff] }
 0x29a   :  { %21277 = vst [vmem:[#allocation50_spill] sm:$0xff] %v18250_v11  ;;  %v7120_v22 = vsub.f32 %v18193_v60, %v21279_v51  ;;  %v7282_v13 = vand.u32 4294901760, %v7281_v26  ;;  %12764 = vmatpush3.bf16.msra.mxu1 %v18171_v61  ;;  %v10375_v50 = vadd.f32 %v10374_v4, %v10373_v44  ;;  %v21282_v57 = vand.u32 4294901760, %v18210_v53  ;;  %v10376_v44 = vpop.f32.mrb[116].mxu0  ;;  %v10418_v51 = vpop.f32.mrb[113].mxu1 }
 0x29b   :  { %21280 = vst [vmem:[#allocation7_spill] sm:$0xff] %v18263_v23  ;;  %21281 = vst [vmem:[#allocation53_spill] sm:$0xff] %v18265_v2  ;;  %12740 = vmatpush3.bf16.msra.mxu0 %v18097_v41  ;;  %12766 = vmatprep.subr.bf16.mxu1 %v12765_v27  ;;  %v18273_v19 = vsub.f32 %v225_v12, %v18252_v43  ;;  %v18275_v61 = vadd.f32 %v10416_v1, %v4665_v55  ;;  %v10377_v1 = vpop.f32.mrb[117].mxu0 }
 0x29c   :  { %v7129_v40 = vsub.f32 %v18210_v53, %v21282_v57  ;;  %v21284_v52 = vpack.c.bf16 %v21262_v6, %v21261_v28  ;;  %v12769_v4 = vpack.c.bf16 %v7394_v42, %v7387_v49  ;;  %v12777_v27 = vpack.c.bf16 %v21285_v9, %v17701_v36 }
 0x29d   :  { %21283 = vst [vmem:[#allocation46_spill] sm:$0xff] %v18273_v19  ;;  %v4679_v16 = vadd.f32 %v10375_v50, %v18068_v48  ;;  %v7121_v57 = vand.u32 4294901760, %v7120_v22  ;;  %v12771_v26 = vpack.c.bf16 %v7282_v13, %v7275_v33  ;;  %v12779_v12 = vpack.c.bf16 %v17725_v58, %v21286_v20 }
 0x29e   :  { %12774 = vmatprep.subr.bf16.mxu0 %v21284_v52  ;;  %v10419_v55 = vadd.f32 %v10418_v51, %v10417_v56  ;;  %7107 = vmatmul.mubr.f32.vlgmr.msra.gmra.mrb[180].mxu0 %v7106_v32  ;;  %v21287_v53 = vand.u32 4294901760, %v18242_v17  ;;  %v20096_v42 = vand.u32 4294901760, %v18263_v23  ;;  %v18290_v52 = vsub.f32 %v224_v39, %v18265_v2  ;;  %v21291_v39 = vld [vmem:[#allocation45_spill] sm:$0xff]  ;;  %v10379_v51 = vpop.f32.mrb[118].mxu0 }
 0x29f   :  { %12768 = vmatpush3.bf16.msra.mxu1 %v12767_v18  ;;  %v10378_v48 = vadd.f32 %v10377_v1, %v10376_v44  ;;  %v21289_v13 = vpack.c.bf16 %v21264_v7, %v21263_v63  ;;  %7116 = vmatprep.mubr.f32.mxu0 %v7115_v37  ;;  %v7130_v22 = vand.u32 4294901760, %v7129_v40  ;;  %v21290_v33 = vand.u32 4294901760, %v18250_v11  ;;  %v10380_v37 = vpop.f32.mrb[119].mxu0 }
 0x2a0   :  { %v7135_v49 = vsub.f32 %v18242_v17, %v21287_v53  ;;  %21288 = vst [vmem:[#allocation40_spill] sm:$0xff] %v18290_v52  ;;  %v18299_v50 = vadd.f32 %v10419_v55, %v4672_v5  ;;  %v10420_v53 = vpop.f32.mrb[114].mxu1  ;;  %12770 = vmatprep.subr.bf16.mxu1 %v12769_v4  ;;  %v12781_v56 = vpack.c.bf16 %v21291_v39, %v17731_v45 }
 0x2a1   :  { %12776 = vmatpush3.bf16.msra.mxu0 %v21289_v13  ;;  %v7144_v32 = vsub.f32 %v18250_v11, %v21290_v33  ;;  %v4686_v44 = vadd.f32 %v10378_v48, %v18105_v14  ;;  %v10421_v1 = vpop.f32.mrb[115].mxu1  ;;  %v7150_v5 = vsub.f32 %v18263_v23, %v20096_v42  ;;  %v10381_v4 = vadd.f32 %v10380_v37, %v10379_v51  ;;  %v21293_v33 = vld [vmem:[#allocation16_spill] sm:$0xff]  ;;  %v21297_v42 = vld [vmem:[#allocation14_spill] sm:$0xff] }
 0x2a2   :  { %12778 = vmatprep.subr.bf16.mxu0 %v12777_v27  ;;  %v10422_v40 = vadd.f32 %v10421_v1, %v10420_v53  ;;  %7122 = vmatmul.mubr.f32.gmra.mrb[182].mxu0 %v7121_v57  ;;  %v7136_v13 = vand.u32 4294901760, %v7135_v49  ;;  %v21292_v27 = vld [vmem:[#allocation6_spill] sm:$0xff]  ;;  %v21294_v48 = vand.u32 4294901760, %v18273_v19  ;;  %v21296_v1 = vld [vmem:[#allocation19_spill] sm:$0xff] }
 0x2a3   :  { %12772 = vmatpush3.bf16.msra.mxu1 %v12771_v26  ;;  %7131 = vmatprep.mubr.f32.mxu0 %v7130_v22  ;;  %v12783_v18 = vpack.c.bf16 %v21293_v33, %v21292_v27  ;;  %v7145_v14 = vand.u32 4294901760, %v7144_v32  ;;  %v10423_v26 = vpop.f32.mrb[116].mxu1  ;;  %v21295_v49 = vld [vmem:[#allocation22_spill] sm:$0xff]  ;;  %v12785_v55 = vpack.c.bf16 %v21297_v42, %v21296_v1  ;;  %v21298_v32 = vld [vmem:[#allocation35_spill] sm:$0xff]  ;;  %v7151_v37 = vand.u32 4294901760, %v7150_v5 }
 0x2a4   :  { %v7159_v53 = vsub.f32 %v18273_v19, %v21294_v48  ;;  %v18313_v57 = vadd.f32 %v10422_v40, %v4679_v16  ;;  %12806 = vmatprep.subr.bf16.mxu1 %v21295_v49  ;;  %v10424_v22 = vpop.f32.mrb[117].mxu1  ;;  %v21299_v16 = vand.u32 4294901760, %v18290_v52  ;;  %v21301_v48 = vld [vmem:[#allocation8_spill] sm:$0xff] }
 0x2a5   :  { %12780 = vmatpush3.bf16.msra.mxu0 %v12779_v12  ;;  %v4693_v12 = vadd.f32 %v10381_v4, %v18142_v30  ;;  %v10425_v51 = vadd.f32 %v10424_v22, %v10423_v26  ;;  %v10426_v30 = vpop.f32.mrb[118].mxu1  ;;  %v21303_v4 = vld [vmem:[#allocation43_spill] sm:$0xff]  ;;  %v21304_v22 = vld [vmem:[#allocation33_spill] sm:$0xff] }
 0x2a6   :  { %12782 = vmatprep.subr.bf16.mxu0 %v12781_v56  ;;  %7399 = vmatmul.mubr.f32.vlgmr.msra.gmra.mrb[180].mxu1 %v18089_v62  ;;  %v7165_v40 = vsub.f32 %v18290_v52, %v21299_v16  ;;  %v21300_v56 = vld [vmem:[#allocation21_spill] sm:$0xff]  ;;  %v7160_v23 = vand.u32 4294901760, %v7159_v53  ;;  %v10427_v5 = vpop.f32.mrb[119].mxu1  ;;  %v21307_v53 = vld [vmem:[#allocation36_spill] sm:$0xff]  ;;  %v21312_v62 = vld [vmem:[#allocation51_spill] sm:$0xff] }
 0x2a7   :  { %7137 = vmatmul.mubr.f32.gmra.mrb[184].mxu0 %v7136_v13  ;;  %12808 = vmatpush3.bf16.msra.mxu1 %v21298_v32  ;;  %v12787_v19 = vpack.c.bf16 %v21301_v48, %v21300_v56  ;;  %v18326_v11 = vadd.f32 %v10425_v51, %v4686_v44  ;;  %v21302_v13 = vld [vmem:[#allocation13_spill] sm:$0xff]  ;;  %v21306_v44 = vld [vmem:[#allocation32_spill] sm:$0xff] }
 0x2a8   :  { %7146 = vmatprep.mubr.f32.mxu0 %v7145_v14  ;;  %7404 = vmatprep.mubr.f32.mxu1 %v18112_v34  ;;  %v12789_v26 = vpack.c.bf16 %v21303_v4, %v21302_v13  ;;  %v21305_v14 = vld [vmem:[#allocation25_spill] sm:$0xff]  ;;  %v7166_v16 = vand.u32 4294901760, %v7165_v40  ;;  %v12791_v51 = vpack.c.bf16 %v21307_v53, %v21306_v44  ;;  %v21310_v40 = vld [vmem:[#allocation44_spill] sm:$0xff] }
 0x2a9   :  { %12784 = vmatpush3.bf16.msra.mxu0 %v12783_v18  ;;  %12810 = vmatprep.subr.bf16.mxu1 %v21304_v22  ;;  %v10428_v18 = vadd.f32 %v10427_v5, %v10426_v30  ;;  %v12795_v5 = vpack.c.bf16 %v17953_v46, %v21310_v40  ;;  %v21311_v34 = vld [vmem:[#allocation12_spill] sm:$0xff] }
 0x2aa   :  { %12786 = vmatprep.subr.bf16.mxu0 %v12785_v55  ;;  %7406 = vmatmul.mubr.f32.gmra.mrb[182].mxu1 %v18157_v21  ;;  %v18339_v55 = vld [vmem:[%s19381_s2 + $0x780] sm:$0xff]  ;;  %v18344_v21 = vld [vmem:[%s19381_s2 + $0x788] sm:$0xff] }
 0x2ab   :  { %7152 = vmatmul.mubr.f32.gmra.mrb[186].mxu0 %v7151_v37  ;;  %12812 = vmatpush3.bf16.msra.mxu1 %v21305_v14  ;;  %v18346_v30 = vadd.f32 %v10428_v18, %v4693_v12  ;;  %v21309_v37 = vld [vmem:[#allocation28_spill] sm:$0xff]  ;;  %v12797_v12 = vpack.c.bf16 %v17985_v3, %v21311_v34  ;;  %v21314_v18 = vand.u32 4294901760, %v21262_v6  ;;  %v21318_v14 = vand.u32 4294901760, %v21285_v9  ;;  %v21319_v6 = vld [vmem:[#allocation23_spill] sm:$0xff] }
 0x2ac   :  { %7161 = vmatprep.mubr.f32.mxu0 %v7160_v23  ;;  %7411 = vmatprep.mubr.f32.mxu1 %v18175_v59 }
 0x2ad   :  { %12788 = vmatpush3.bf16.msra.mxu0 %v12787_v19  ;;  %v21308_v19 = vld [vmem:[#allocation34_spill] sm:$0xff]  ;;  %12814 = vmatprep.subr.bf16.mxu1 %v21244_v8  ;;  %v21317_v8 = vand.u32 4294901760, %v17701_v36  ;;  %v21322_v36 = vand.u32 4294901760, %v17731_v45  ;;  %v21327_v45 = vand.u32 4294901760, %v21296_v1 }
 0x2ae   :  { %12790 = vmatprep.subr.bf16.mxu0 %v12789_v26  ;;  %v12793_v23 = vpack.c.bf16 %v17932_v47, %v21308_v19  ;;  %7413 = vmatmul.mubr.f32.gmra.mrb[184].mxu1 %v18205_v10  ;;  %v12799_v10 = vpack.c.bf16 %v18020_v15, %v18013_v35 }
 0x2af   :  { %7167 = vmatmul.mubr.f32.gmra.mrb[188].mxu0 %v7166_v16  ;;  %12816 = vmatpush3.bf16.msra.mxu1 %v21309_v37  ;;  %v12801_v16 = vpack.c.bf16 %v18087_v31, %v18047_v29  ;;  %v21313_v37 = vand.u32 4294901760, %v21261_v28  ;;  %v18384_v59 = vpack.c.bf16 %v21318_v14, %v21317_v8  ;;  %v452_v28 = vld [vmem:[%s19381_s2 + $0x700] sm:$0xff]  ;;  %v21323_v8 = vand.u32 4294901760, %v21291_v39 }
 0x2b0   :  { %7418 = vmatprep.mubr.f32.mxu1 %v18212_v38  ;;  %12818 = vmatprep.subr.bf16.mxu1 %v21312_v62  ;;  %v21316_v38 = vand.u32 4294901760, %v21264_v7  ;;  %v21321_v7 = vand.u32 4294901760, %v17725_v58  ;;  %v21324_v14 = vand.u32 4294901760, %v21292_v27  ;;  %v21326_v58 = vld [vmem:[#allocation5_spill] sm:$0xff]  ;;  %v21328_v39 = vand.u32 4294901760, %v21297_v42  ;;  %v471_v42 = vld [vmem:[%s19381_s2 + $0x798] sm:$0xff] }
 0x2b1   :  { %12792 = vmatpush3.bf16.msra.mxu0 %v12791_v51  ;;  %v18372_v26 = vpack.c.bf16 %v21314_v18, %v21313_v37  ;;  %v21315_v51 = vand.u32 4294901760, %v21263_v63  ;;  %7562 = vmatprep.mubr.f32.mxu0 %v21319_v6  ;;  %v21320_v63 = vand.u32 4294901760, %v21286_v20  ;;  %v18401_v9 = vpack.c.bf16 %v21323_v8, %v21322_v36  ;;  %v453_v20 = vld [vmem:[%s19381_s2 + $0x708] sm:$0xff]  ;;  %v470_v8 = vld [vmem:[%s19381_s2 + $0x790] sm:$0xff] }
 0x2b2   :  { %12794 = vmatprep.subr.bf16.mxu0 %v12793_v23  ;;  %v10461_v23 = vpop.f32.mrb[120].mxu0  ;;  %7420 = vmatmul.mubr.f32.gmra.mrb[186].mxu1 %v18244_v0  ;;  %v21325_v37 = vand.u32 4294901760, %v21293_v33  ;;  %v21329_v27 = vand.u32 4294901760, %v18339_v55  ;;  %v8087_v0 = vand.u32 4294901760, %v452_v28 }
 0x2b3   :  { %v18378_v52 = vpack.c.bf16 %v21316_v38, %v21315_v51  ;;  %v18395_v38 = vpack.c.bf16 %v21321_v7, %v21320_v63  ;;  %v10462_v51 = vpop.f32.mrb[121].mxu0  ;;  %12820 = vmatpush3.bf16.msra.mxu1 %v21326_v58  ;;  %7425 = vmatprep.mubr.f32.mxu1 %v18252_v43  ;;  %v18418_v63 = vpack.c.bf16 %v21328_v39, %v21327_v45  ;;  %v21331_v7 = vand.u32 4294901760, %v18344_v21 }
 0x2b4   :  { %v18407_v18 = vpack.c.bf16 %v21325_v37, %v21324_v14  ;;  %v18423_v33 = vsub.f32 %v18339_v55, %v21329_v27  ;;  %v10463_v1 = vadd.f32 %v10462_v51, %v10461_v23  ;;  %v21333_v14 = vld [vmem:[#allocation11_spill] sm:$0xff]  ;;  %v21334_v37 = vand.u32 4294901760, %v21300_v56 }
 0x2b5   :  { %v18428_v36 = vsub.f32 %v18344_v21, %v21331_v7  ;;  %12796 = vmatpush3.bf16.msra.mxu0 %v12795_v5  ;;  %12822 = vmatprep.subr.bf16.mxu1 %v21333_v14  ;;  %v21335_v45 = vand.u32 4294901760, %v21301_v48  ;;  %v21336_v27 = vand.u32 4294901760, %v21302_v13  ;;  %v21337_v7 = vand.u32 4294901760, %v21303_v4 }
 0x2b6   :  { %21330 = vst [vmem:[#allocation49_spill] sm:$0xff] %v18423_v33  ;;  %12798 = vmatprep.subr.bf16.mxu0 %v12797_v12  ;;  %v21338_v58 = vand.u32 4294901760, %v21306_v44  ;;  %v21339_v5 = vand.u32 4294901760, %v21307_v53  ;;  %v21340_v56 = vand.u32 4294901760, %v21308_v19  ;;  %v21341_v48 = vand.u32 4294901760, %v17932_v47  ;;  %v454_v44 = vld [vmem:[%s19381_s2 + $0x710] sm:$0xff]  ;;  %7427 = vmatmul.mubr.f32.gmra.mrb[188].mxu1 %v18265_v2 }
 0x2b7   :  { %21332 = vst [vmem:[#allocation27_spill] sm:$0xff] %v18428_v36  ;;  %v18441_v39 = vpack.c.bf16 %v21335_v45, %v21334_v37  ;;  %v18447_v43 = vpack.c.bf16 %v21337_v7, %v21336_v27  ;;  %v21342_v13 = vand.u32 4294901760, %v21310_v40  ;;  %v21343_v4 = vand.u32 4294901760, %v17953_v46  ;;  %v455_v53 = vld [vmem:[%s19381_s2 + $0x718] sm:$0xff]  ;;  %v10464_v47 = vpop.f32.mrb[122].mxu0 }
 0x2b8   :  { %v18453_v23 = vpack.c.bf16 %v21339_v5, %v21338_v58  ;;  %v18459_v51 = vpack.c.bf16 %v21341_v48, %v21340_v56  ;;  %v8090_v45 = vand.u32 4294901760, %v453_v20  ;;  %v4937_v19 = vadd.f32 %v10463_v1, %v18275_v61  ;;  %v10465_v7 = vpop.f32.mrb[123].mxu0  ;;  %v21346_v5 = vld [vmem:[#allocation9_spill] sm:$0xff] }
 0x2b9   :  { %v18465_v37 = vpack.c.bf16 %v21343_v4, %v21342_v13  ;;  %v21344_v40 = vand.u32 4294901760, %v21311_v34  ;;  %v21345_v46 = vand.u32 4294901760, %v17985_v3  ;;  %v8141_v58 = vand.u32 4294901760, %v470_v8  ;;  %12824 = vmatpush3.bf16.msra.mxu1 %v21346_v5  ;;  %v472_v4 = vld [vmem:[%s19381_s2 + $0x7a0] sm:$0xff]  ;;  %12800 = vmatpush3.bf16.msra.mxu0 %v12799_v10  ;;  %v10467_v2 = vpop.f32.mrb[124].mxu0 }
 0x2ba   :  { %v8144_v27 = vand.u32 4294901760, %v471_v42  ;;  %v21347_v56 = vand.u32 4294901760, %v21319_v6  ;;  %v21348_v48 = vand.u32 4294901760, %v18013_v35  ;;  %v21349_v61 = vand.u32 4294901760, %v18020_v15  ;;  %v473_v6 = vld [vmem:[%s19381_s2 + $0x7a8] sm:$0xff]  ;;  %12802 = vmatprep.subr.bf16.mxu0 %v12801_v16 }
 0x2bb   :  { %v18479_v12 = vpack.c.bf16 %v21345_v46, %v21344_v40  ;;  %v21351_v34 = vand.u32 4294901760, %v18047_v29  ;;  %v21352_v3 = vand.u32 4294901760, %v18087_v31  ;;  %v10466_v40 = vadd.f32 %v10465_v7, %v10464_v47  ;;  %v21354_v46 = vld [vmem:[#allocation26_spill] sm:$0xff] }
 0x2bc   :  { %7705 = vmatprep.mubr.f32.mxu1 %v21347_v56  ;;  %v18488_v1 = vpack.c.bf16 %v21349_v61, %v21348_v48  ;;  %12826 = vmatprep.subr.bf16.mxu1 %v21354_v46  ;;  %v18505_v29 = vsub.f32 %v452_v28, %v8087_v0  ;;  %v8093_v31 = vand.u32 4294901760, %v454_v44  ;;  %v8096_v56 = vand.u32 4294901760, %v455_v53  ;;  %v10508_v48 = vpop.f32.mrb[120].mxu1 }
 0x2bd   :  { %v18494_v13 = vpack.c.bf16 %v21352_v3, %v21351_v34  ;;  %v21356_v61 = vand.u32 4294901760, %v18128_v25  ;;  %v21357_v34 = vand.u32 4294901760, %v18137_v54  ;;  %v21358_v35 = vand.u32 4294901760, %v18339_v55  ;;  %v10509_v16 = vpop.f32.mrb[121].mxu1  ;;  %v456_v55 = vld [vmem:[%s19381_s2 + $0x720] sm:$0xff] }
 0x2be   :  { %21350 = vst [vmem:[#allocation39_spill] sm:$0xff] %v18488_v1  ;;  %21355 = vst [vmem:[#allocation45_spill] sm:$0xff] %v18505_v29  ;;  %v21359_v15 = vand.u32 4294901760, %v18344_v21  ;;  %v18519_v10 = vpack.c.bf16 %v8090_v45, %v8087_v0  ;;  %v18521_v28 = vsub.f32 %v453_v20, %v8090_v45  ;;  %v4952_v7 = vadd.f32 %v10466_v40, %v18299_v50  ;;  %v457_v21 = vld [vmem:[%s19381_s2 + $0x728] sm:$0xff]  ;;  %v10468_v0 = vpop.f32.mrb[125].mxu0  ;;  %v21364_v20 = vld [vmem:[#allocation48_spill] sm:$0xff] }
 0x2bf   :  { %21353 = vst [vmem:[#allocation18_spill] sm:$0xff] %v18494_v13  ;;  %v18511_v3 = vpack.c.bf16 %v21357_v34, %v21356_v61  ;;  %v18524_v13 = vpack.c.bf16 %v8144_v27, %v8141_v58  ;;  %v8147_v46 = vand.u32 4294901760, %v472_v4  ;;  %v8150_v1 = vand.u32 4294901760, %v473_v6  ;;  %12828 = vmatpush3.bf16.msra.mxu1 %v21364_v20 }
 0x2c0   :  { %v18517_v47 = vpack.c.bf16 %v21359_v15, %v21358_v35  ;;  %21361 = vst [vmem:[#allocation16_spill] sm:$0xff] %v18519_v10  ;;  %21362 = vst [vmem:[#allocation22_spill] sm:$0xff] %v18521_v28  ;;  %v10510_v35 = vadd.f32 %v10509_v16, %v10508_v48  ;;  %v18533_v45 = vsub.f32 %v470_v8, %v8141_v58  ;;  %v21365_v50 = vand.u32 4294901760, %v18423_v33  ;;  %v21368_v10 = vld [vmem:[#allocation15_spill] sm:$0xff] }
 0x2c1   :  { %21363 = vst [vmem:[#allocation19_spill] sm:$0xff] %v18524_v13  ;;  %v21366_v40 = vand.u32 4294901760, %v18428_v36  ;;  %v10469_v34 = vadd.f32 %v10468_v0, %v10467_v2  ;;  %v21367_v13 = vpack.c.bf16 %v18137_v54, %v18128_v25  ;;  %12830 = vmatprep.subr.bf16.mxu1 %v21368_v10  ;;  %v18545_v48 = vsub.f32 %v471_v42, %v8144_v27  ;;  %v10470_v54 = vpop.f32.mrb[126].mxu0 }
 0x2c2   :  { %21360 = vst [vmem:[#allocation6_spill] sm:$0xff] %v18517_v47  ;;  %v8374_v15 = vsub.f32 %v18423_v33, %v21365_v50  ;;  %v18547_v16 = vpack.c.bf16 %v8096_v56, %v8093_v31  ;;  %v18550_v58 = vadd.f32 %v10510_v35, %v4937_v19  ;;  %v10511_v50 = vpop.f32.mrb[122].mxu1  ;;  %v8099_v33 = vand.u32 4294901760, %v456_v55  ;;  %v10471_v8 = vpop.f32.mrb[127].mxu0  ;;  %v21372_v35 = vld [vmem:[#allocation29_spill] sm:$0xff] }
 0x2c3   :  { %v8381_v61 = vsub.f32 %v18428_v36, %v21366_v40  ;;  %12804 = vmatpush3.bf16.msra.mxu0 %v21367_v13  ;;  %v8102_v40 = vand.u32 4294901760, %v457_v21  ;;  %v4967_v25 = vadd.f32 %v10469_v34, %v18313_v57  ;;  %v10512_v13 = vpop.f32.mrb[123].mxu1  ;;  %v18555_v0 = vsub.f32 %v454_v44, %v8093_v31  ;;  %v21373_v36 = vld [vmem:[#allocation54_spill] sm:$0xff] }
 0x2c4   :  { %21369 = vst [vmem:[#allocation14_spill] sm:$0xff] %v18547_v16  ;;  %12838 = vmatprep.subr.bf16.mxu0 %v18372_v26  ;;  %v18557_v42 = vsub.f32 %v455_v53, %v8096_v56  ;;  %v18559_v27 = vpack.c.bf16 %v8150_v1, %v8147_v46  ;;  %v10513_v19 = vadd.f32 %v10512_v13, %v10511_v50  ;;  %v8375_v16 = vand.u32 4294901760, %v8374_v15  ;;  %v474_v57 = vld [vmem:[%s19381_s2 + $0x7b0] sm:$0xff]  ;;  %v21375_v53 = vld [vmem:[#allocation24_spill] sm:$0xff]  ;;  %v10514_v15 = vpop.f32.mrb[124].mxu1  ;;  %v10473_v50 = vpop.f32.mrb[128].mxu0 }
 0x2c5   :  { %21370 = vst [vmem:[#allocation35_spill] sm:$0xff] %v18555_v0  ;;  %12832 = vmatpush3.bf16.msra.mxu1 %v21373_v36  ;;  %v18563_v26 = vsub.f32 %v472_v4, %v8147_v46  ;;  %v8382_v2 = vand.u32 4294901760, %v8381_v61  ;;  %v10472_v44 = vadd.f32 %v10471_v8, %v10470_v54  ;;  %v18570_v31 = vsub.f32 %v473_v6, %v8150_v1  ;;  %v475_v4 = vld [vmem:[%s19381_s2 + $0x7b8] sm:$0xff]  ;;  %v10515_v54 = vpop.f32.mrb[125].mxu1 }
 0x2c6   :  { %21371 = vst [vmem:[#allocation21_spill] sm:$0xff] %v18557_v42  ;;  %7565 = vmatmul.mubr.f32.vlgmr.msra.gmra.mrb[190].mxu0 %v21372_v35  ;;  %v21377_v56 = vand.u32 4294901760, %v18505_v29  ;;  %v18578_v46 = vadd.f32 %v10513_v19, %v4952_v7  ;;  %12834 = vmatprep.subr.bf16.mxu1 %v18078_v24  ;;  %v21378_v1 = vand.u32 4294901760, %v18521_v28  ;;  %v18589_v13 = vsub.f32 %v456_v55, %v8099_v33  ;;  %v21381_v19 = vld [vmem:[#allocation20_spill] sm:$0xff] }
 0x2c7   :  { %21374 = vst [vmem:[#allocation8_spill] sm:$0xff] %v18563_v26  ;;  %12840 = vmatpush3.bf16.msra.mxu0 %v18378_v52  ;;  %7571 = vmatprep.mubr.f32.mxu0 %v21375_v53  ;;  %21376 = vst [vmem:[#allocation13_spill] sm:$0xff] %v18570_v31  ;;  %v18582_v52 = vpack.c.bf16 %v8102_v40, %v8099_v33  ;;  %v4982_v8 = vadd.f32 %v10472_v44, %v18326_v11  ;;  %v8153_v7 = vand.u32 4294901760, %v474_v57  ;;  %v459_v33 = vld [vmem:[%s19381_s2 + $0x738] sm:$0xff] }
 0x2c8   :  { %v8262_v34 = vsub.f32 %v18505_v29, %v21377_v56  ;;  %12842 = vmatprep.subr.bf16.mxu0 %v18384_v59  ;;  %v8269_v6 = vsub.f32 %v18521_v28, %v21378_v1  ;;  %21379 = vst [vmem:[#allocation43_spill] sm:$0xff] %v18589_v13  ;;  %v458_v59 = vld [vmem:[%s19381_s2 + $0x730] sm:$0xff]  ;;  %v10474_v56 = vpop.f32.mrb[129].mxu0  ;;  %v10516_v29 = vadd.f32 %v10515_v54, %v10514_v15  ;;  %v8156_v44 = vand.u32 4294901760, %v475_v4 }
 0x2c9   :  { %12836 = vmatpush3.bf16.msra.mxu1 %v18097_v41  ;;  %v18597_v1 = vpack.c.bf16 %v8382_v2, %v8375_v16  ;;  %v18599_v11 = vsub.f32 %v457_v21, %v8102_v40  ;;  %v10475_v55 = vadd.f32 %v10474_v56, %v10473_v50  ;;  %v20135_v15 = vand.u32 4294901760, %v18555_v0  ;;  %v10517_v16 = vpop.f32.mrb[126].mxu1 }
 0x2ca   :  { %7574 = vmatmul.mubr.f32.gmra.mrb[192].mxu0 %v18193_v60  ;;  %v8263_v61 = vand.u32 4294901760, %v8262_v34  ;;  %v18608_v28 = vadd.f32 %v10516_v29, %v4967_v25  ;;  %12870 = vmatprep.subr.bf16.mxu1 %v21295_v49  ;;  %v8270_v21 = vand.u32 4294901760, %v8269_v6  ;;  %v21382_v40 = vand.u32 4294901760, %v18533_v45  ;;  %v10518_v34 = vpop.f32.mrb[127].mxu1 }
 0x2cb   :  { %21380 = vst [vmem:[#allocation33_spill] sm:$0xff] %v18599_v11  ;;  %12844 = vmatpush3.bf16.msra.mxu0 %v18395_v38  ;;  %7580 = vmatprep.mubr.f32.mxu0 %v21381_v19  ;;  %v8105_v38 = vand.u32 4294901760, %v458_v59  ;;  %v4997_v50 = vadd.f32 %v10475_v55, %v18346_v30  ;;  %v21383_v56 = vand.u32 4294901760, %v21372_v35  ;;  %v18618_v54 = vsub.f32 %v474_v57, %v8153_v7  ;;  %v476_v30 = vld [vmem:[%s19381_s2 + $0x7c0] sm:$0xff]  ;;  %v477_v35 = vld [vmem:[%s19381_s2 + $0x7c8] sm:$0xff] }
 0x2cc   :  { %12846 = vmatprep.subr.bf16.mxu0 %v18401_v9  ;;  %v8388_v2 = vsub.f32 %v18533_v45, %v21382_v40  ;;  %v21385_v29 = vand.u32 4294901760, %v18545_v48  ;;  %v8108_v25 = vand.u32 4294901760, %v459_v33  ;;  %v10519_v49 = vadd.f32 %v10518_v34, %v10517_v16  ;;  %v21388_v57 = vld [vmem:[#allocation50_spill] sm:$0xff]  ;;  %v10520_v34 = vpop.f32.mrb[128].mxu1 }
 0x2cd   :  { %7709 = vmatmul.mubr.f32.vlgmr.msra.gmra.mrb[190].mxu1 %v21383_v56  ;;  %21384 = vst [vmem:[#allocation32_spill] sm:$0xff] %v18618_v54  ;;  %v18625_v6 = vpack.c.bf16 %v8156_v44, %v8153_v7  ;;  %v18627_v40 = vsub.f32 %v475_v4, %v8156_v44  ;;  %v21389_v7 = vand.u32 4294901760, %v18557_v42  ;;  %v21390_v56 = vand.u32 4294901760, %v21375_v53 }
 0x2ce   :  { %v8395_v9 = vsub.f32 %v18545_v48, %v21385_v29  ;;  %7583 = vmatmul.mubr.f32.gmra.mrb[194].mxu0 %v18242_v17  ;;  %12872 = vmatpush3.bf16.msra.mxu1 %v21298_v32  ;;  %v8276_v32 = vsub.f32 %v18555_v0, %v20135_v15  ;;  %v18645_v16 = vadd.f32 %v10519_v49, %v4982_v8  ;;  %v8389_v29 = vand.u32 4294901760, %v8388_v2  ;;  %v10521_v0 = vpop.f32.mrb[129].mxu1 }
 0x2cf   :  { %21386 = vst [vmem:[#allocation36_spill] sm:$0xff] %v18625_v6  ;;  %21387 = vst [vmem:[#allocation34_spill] sm:$0xff] %v18627_v40  ;;  %12848 = vmatpush3.bf16.msra.mxu0 %v18407_v18  ;;  %7589 = vmatprep.mubr.f32.mxu0 %v21388_v57  ;;  %v8283_v4 = vsub.f32 %v18557_v42, %v21389_v7  ;;  %v18650_v18 = vpack.c.bf16 %v8270_v21, %v8263_v61  ;;  %v21392_v7 = vand.u32 4294901760, %v18193_v60  ;;  %v21393_v61 = vld [vmem:[#allocation7_spill] sm:$0xff]  ;;  %v461_v60 = vld [vmem:[%s19381_s2 + $0x748] sm:$0xff] }
 0x2d0   :  { %7716 = vmatprep.mubr.f32.mxu1 %v21390_v56  ;;  %12850 = vmatprep.subr.bf16.mxu0 %v18418_v63  ;;  %v18652_v15 = vsub.f32 %v458_v59, %v8105_v38  ;;  %v8396_v55 = vand.u32 4294901760, %v8395_v9  ;;  %v18657_v8 = vpack.c.bf16 %v8108_v25, %v8105_v38  ;;  %v8159_v49 = vand.u32 4294901760, %v476_v30  ;;  %v460_v63 = vld [vmem:[%s19381_s2 + $0x740] sm:$0xff]  ;;  %v21396_v38 = vld [vmem:[#allocation46_spill] sm:$0xff] }
 0x2d1   :  { %7720 = vmatmul.mubr.f32.gmra.mrb[192].mxu1 %v21392_v7  ;;  %12874 = vmatprep.subr.bf16.mxu1 %v21304_v22  ;;  %v8162_v44 = vand.u32 4294901760, %v477_v35  ;;  %v10522_v53 = vadd.f32 %v10521_v0, %v10520_v34  ;;  %v21394_v59 = vld [vmem:[#allocation25_spill] sm:$0xff]  ;;  %v18664_v21 = vsub.f32 %v459_v33, %v8108_v25  ;;  %v8277_v9 = vand.u32 4294901760, %v8276_v32  ;;  %v478_v32 = vld [vmem:[%s19381_s2 + $0x7d0] sm:$0xff]  ;;  %v21404_v22 = vld [vmem:[#allocation28_spill] sm:$0xff] }
 0x2d2   :  { %21391 = vst [vmem:[#allocation44_spill] sm:$0xff] %v18652_v15  ;;  %7592 = vmatmul.mubr.f32.gmra.mrb[196].mxu0 %v21393_v61  ;;  %12876 = vmatpush3.bf16.msra.mxu1 %v21394_v59  ;;  %v8284_v0 = vand.u32 4294901760, %v8283_v4  ;;  %v21397_v34 = vand.u32 4294901760, %v18563_v26  ;;  %v21398_v33 = vand.u32 4294901760, %v18570_v31  ;;  %v21399_v59 = vand.u32 4294901760, %v21381_v19 }
 0x2d3   :  { %21395 = vst [vmem:[#allocation12_spill] sm:$0xff] %v18664_v21  ;;  %12852 = vmatpush3.bf16.msra.mxu0 %v18441_v39  ;;  %7598 = vmatprep.mubr.f32.mxu0 %v21396_v38  ;;  %v18679_v7 = vadd.f32 %v10522_v53, %v4997_v50  ;;  %v8111_v39 = vand.u32 4294901760, %v460_v63  ;;  %v20140_v4 = vand.u32 4294901760, %v18618_v54  ;;  %v21400_v2 = vand.u32 4294901760, %v18242_v17 }
 0x2d4   :  { %v8402_v56 = vsub.f32 %v18563_v26, %v21397_v34  ;;  %v8409_v25 = vsub.f32 %v18570_v31, %v21398_v33  ;;  %7727 = vmatprep.mubr.f32.mxu1 %v21399_v59  ;;  %12854 = vmatprep.subr.bf16.mxu0 %v18447_v43  ;;  %v21401_v33 = vld [vmem:[#allocation38_spill] sm:$0xff]  ;;  %v18692_v50 = vpack.c.bf16 %v8396_v55, %v8389_v29  ;;  %v8114_v43 = vand.u32 4294901760, %v461_v60  ;;  %v21403_v59 = vld [vmem:[#allocation40_spill] sm:$0xff] }
 0x2d5   :  { %7731 = vmatmul.mubr.f32.gmra.mrb[194].mxu1 %v21400_v2  ;;  %12878 = vmatprep.subr.bf16.mxu1 %v21401_v33  ;;  %v18694_v19 = vpack.c.bf16 %v8162_v44, %v8159_v49  ;;  %v18696_v53 = vsub.f32 %v476_v30, %v8159_v49  ;;  %v18700_v31 = vsub.f32 %v477_v35, %v8162_v44  ;;  %v21406_v34 = vand.u32 4294901760, %v18589_v13  ;;  %v479_v30 = vld [vmem:[%s19381_s2 + $0x7d8] sm:$0xff] }
 0x2d6   :  { %7601 = vmatmul.mubr.f32.gmra.mrb[198].mxu0 %v21403_v59  ;;  %12880 = vmatpush3.bf16.msra.mxu1 %v21404_v22  ;;  %v21407_v2 = vand.u32 4294901760, %v18599_v11  ;;  %v21408_v29 = vand.u32 4294901760, %v21388_v57  ;;  %v18714_v49 = vpack.c.bf16 %v8284_v0, %v8277_v9  ;;  %v8403_v35 = vand.u32 4294901760, %v8402_v56  ;;  %v463_v0 = vld [vmem:[%s19381_s2 + $0x758] sm:$0xff]  ;;  %v10555_v56 = vpop.f32.mrb[130].mxu0 }
 0x2d7   :  { %21402 = vst [vmem:[#allocation51_spill] sm:$0xff] %v18696_v53  ;;  %21405 = vst [vmem:[#allocation23_spill] sm:$0xff] %v18700_v31  ;;  %v8290_v17 = vsub.f32 %v18589_v13, %v21406_v34  ;;  %12856 = vmatpush3.bf16.msra.mxu0 %v18453_v23  ;;  %v8410_v44 = vand.u32 4294901760, %v8409_v25  ;;  %v8165_v22 = vand.u32 4294901760, %v478_v32  ;;  %v462_v34 = vld [vmem:[%s19381_s2 + $0x750] sm:$0xff]  ;;  %12882 = vmatprep.subr.bf16.mxu1 %v21312_v62  ;;  %v21410_v57 = vand.u32 4294901760, %v18627_v40 }
 0x2d8   :  { %v8297_v55 = vsub.f32 %v18599_v11, %v21407_v2  ;;  %7738 = vmatprep.mubr.f32.mxu1 %v21408_v29  ;;  %12858 = vmatprep.subr.bf16.mxu0 %v18459_v51  ;;  %v18721_v33 = vsub.f32 %v460_v63, %v8111_v39  ;;  %v8416_v23 = vsub.f32 %v18618_v54, %v20140_v4  ;;  %v21411_v25 = vand.u32 4294901760, %v21393_v61  ;;  %v21412_v51 = vld [vmem:[#allocation52_spill] sm:$0xff]  ;;  %v10556_v4 = vpop.f32.mrb[131].mxu0  ;;  %v21415_v54 = vld [vmem:[#allocation5_spill] sm:$0xff] }
 0x2d9   :  { %v8423_v9 = vsub.f32 %v18627_v40, %v21410_v57  ;;  %7919 = vmatprep.mubr.f32.mxu0 %v21412_v51  ;;  %v18735_v62 = vpack.c.bf16 %v8114_v43, %v8111_v39  ;;  %v18737_v63 = vsub.f32 %v461_v60, %v8114_v43  ;;  %v8168_v2 = vand.u32 4294901760, %v479_v30 }
 0x2da   :  { %21409 = vst [vmem:[#allocation11_spill] sm:$0xff] %v18721_v33  ;;  %7742 = vmatmul.mubr.f32.gmra.mrb[196].mxu1 %v21411_v25  ;;  %v20150_v29 = vand.u32 4294901760, %v18652_v15  ;;  %v21416_v57 = vand.u32 4294901760, %v21396_v38  ;;  %v8291_v40 = vand.u32 4294901760, %v8290_v17  ;;  %v8298_v11 = vand.u32 4294901760, %v8297_v55  ;;  %v10558_v55 = vpop.f32.mrb[132].mxu0 }
 0x2db   :  { %21413 = vst [vmem:[#allocation9_spill] sm:$0xff] %v18735_v62  ;;  %21414 = vst [vmem:[#allocation48_spill] sm:$0xff] %v18737_v63  ;;  %12884 = vmatpush3.bf16.msra.mxu1 %v21415_v54  ;;  %v8117_v13 = vand.u32 4294901760, %v462_v34  ;;  %v20149_v61 = vand.u32 4294901760, %v18664_v21  ;;  %v10557_v25 = vadd.f32 %v10556_v4, %v10555_v56  ;;  %12860 = vmatpush3.bf16.msra.mxu0 %v18465_v37  ;;  %v8120_v43 = vand.u32 4294901760, %v463_v0  ;;  %v480_v54 = vld [vmem:[%s19381_s2 + $0x7e0] sm:$0xff] }
 0x2dc   :  { %7749 = vmatprep.mubr.f32.mxu1 %v21416_v57  ;;  %12886 = vmatprep.subr.bf16.mxu1 %v21333_v14  ;;  %v18746_v60 = vpack.c.bf16 %v8410_v44, %v8403_v35  ;;  %v18748_v39 = vsub.f32 %v478_v32, %v8165_v22  ;;  %v8417_v38 = vand.u32 4294901760, %v8416_v23  ;;  %v8424_v17 = vand.u32 4294901760, %v8423_v9  ;;  %v481_v4 = vld [vmem:[%s19381_s2 + $0x7e8] sm:$0xff]  ;;  %v10559_v23 = vpop.f32.mrb[133].mxu0  ;;  %v21421_v57 = vld [vmem:[#allocation39_spill] sm:$0xff] }
 0x2dd   :  { %12862 = vmatprep.subr.bf16.mxu0 %v18479_v12  ;;  %v20151_v37 = vand.u32 4294901760, %v18696_v53  ;;  %v20154_v14 = vand.u32 4294901760, %v18700_v31  ;;  %v5395_v32 = vadd.f32 %v10557_v25, %v18550_v58  ;;  %v21418_v35 = vand.u32 4294901760, %v21403_v59  ;;  %v21422_v25 = vld [vmem:[#allocation26_spill] sm:$0xff] }
 0x2de   :  { %21417 = vst [vmem:[#allocation15_spill] sm:$0xff] %v18748_v39  ;;  %v18762_v44 = vpack.c.bf16 %v8168_v2, %v8165_v22  ;;  %v18764_v56 = vsub.f32 %v479_v30, %v8168_v2  ;;  %v8304_v12 = vsub.f32 %v18652_v15, %v20150_v29  ;;  %v18771_v9 = vpack.c.bf16 %v8298_v11, %v8291_v40  ;;  %v83_v30 = vld [vmem:[%s19379_s0 + $0x78] sm:$0xff] }
 0x2df   :  { %7753 = vmatmul.mubr.f32.gmra.mrb[198].mxu1 %v21418_v35  ;;  %v18773_v58 = vsub.f32 %v462_v34, %v8117_v13  ;;  %v8311_v59 = vsub.f32 %v18664_v21, %v20149_v61  ;;  %v8171_v22 = vand.u32 4294901760, %v480_v54  ;;  %v10560_v2 = vadd.f32 %v10559_v23, %v10558_v55  ;;  %12864 = vmatpush3.bf16.msra.mxu0 %v21421_v57  ;;  %v464_v34 = vld [vmem:[%s19381_s2 + $0x760] sm:$0xff]  ;;  %v21424_v35 = vld [vmem:[#allocation18_spill] sm:$0xff]  ;;  %v10561_v57 = vpop.f32.mrb[134].mxu0 }
 0x2e0   :  { %21419 = vst [vmem:[#allocation29_spill] sm:$0xff] %v18762_v44  ;;  %12888 = vmatpush3.bf16.msra.mxu1 %v21346_v5  ;;  %8051 = vmatprep.mubr.f32.mxu1 %v21412_v51  ;;  %v18783_v5 = vpack.c.bf16 %v8120_v43, %v8117_v13  ;;  %v18785_v11 = vsub.f32 %v463_v0, %v8120_v43  ;;  %v8174_v40 = vand.u32 4294901760, %v481_v4  ;;  %v10602_v51 = vpop.f32.mrb[130].mxu1  ;;  %v465_v0 = vld [vmem:[%s19381_s2 + $0x768] sm:$0xff]  ;;  %v10562_v29 = vpop.f32.mrb[135].mxu0  ;;  %v18811_v43 = vld [vmem:[%s19381_s2 + $0x7f0] sm:$0xff] }
 0x2e1   :  { %21420 = vst [vmem:[#allocation54_spill] sm:$0xff] %v18773_v58  ;;  %12890 = vmatprep.subr.bf16.mxu1 %v21422_v25  ;;  %12866 = vmatprep.subr.bf16.mxu0 %v21424_v35  ;;  %v18791_v61 = vpack.c.bf16 %v8424_v17, %v8417_v38  ;;  %v8430_v55 = vsub.f32 %v18696_v53, %v20151_v37  ;;  %v10603_v25 = vpop.f32.mrb[131].mxu1  ;;  %v8305_v38 = vand.u32 4294901760, %v8304_v12  ;;  %v20161_v17 = vand.u32 4294901760, %v18737_v63  ;;  %v21430_v21 = vld [vmem:[#allocation16_spill] sm:$0xff] }
 0x2e2   :  { %21423 = vst [vmem:[#allocation24_spill] sm:$0xff] %v18783_v5  ;;  %v8437_v13 = vsub.f32 %v18700_v31, %v20154_v14  ;;  %v5404_v23 = vadd.f32 %v10560_v2, %v18578_v46  ;;  %v163_v35 = vmul.f32 %v83_v30, %v83_v30  ;;  %v10604_v37 = vadd.f32 %v10603_v25, %v10602_v51 }
 0x2e3   :  { %v8312_v53 = vand.u32 4294901760, %v8311_v59  ;;  %v18806_v14 = vsub.f32 %v480_v54, %v8171_v22  ;;  %v8123_v31 = vand.u32 4294901760, %v464_v34  ;;  %v10563_v46 = vadd.f32 %v10562_v29, %v10561_v57  ;;  %12868 = vmatpush3.bf16.msra.mxu0 %v18511_v3  ;;  %v10605_v54 = vpop.f32.mrb[132].mxu1  ;;  %v18830_v3 = vld [vmem:[%s19381_s2 + $0x7f8] sm:$0xff]  ;;  %v21429_v57 = vld [vmem:[#allocation42_spill] sm:$0xff] }
 0x2e4   :  { %12892 = vmatpush3.bf16.msra.mxu1 %v21364_v20  ;;  %v18815_v12 = vpack.c.bf16 %v8174_v40, %v8171_v22  ;;  %v18817_v30 = vsub.f32 %v481_v4, %v8174_v40  ;;  %v8126_v2 = vand.u32 4294901760, %v465_v0  ;;  %v18819_v20 = vadd.f32 %v10604_v37, %v5395_v32  ;;  %12902 = vmatprep.subr.bf16.mxu0 %v18517_v47  ;;  %v10564_v4 = vpop.f32.mrb[136].mxu0  ;;  %v10606_v37 = vpop.f32.mrb[133].mxu1  ;;  %v21438_v47 = vld [vmem:[#allocation37_spill] sm:$0xff] }
 0x2e5   :  { %21425 = vst [vmem:[#allocation20_spill] sm:$0xff] %v18806_v14  ;;  %12894 = vmatprep.subr.bf16.mxu1 %v21368_v10  ;;  %v8431_v59 = vand.u32 4294901760, %v8430_v55  ;;  %v8438_v51 = vand.u32 4294901760, %v8437_v13  ;;  %v21427_v25 = vand.u32 4294901760, %v18721_v33  ;;  %v5413_v10 = vadd.f32 %v10563_v46, %v18608_v28  ;;  %v10565_v55 = vpop.f32.mrb[137].mxu0 }
 0x2e6   :  { %21426 = vst [vmem:[#allocation50_spill] sm:$0xff] %v18815_v12  ;;  %v18836_v32 = vsub.f32 %v18737_v63, %v20161_v17  ;;  %v8177_v22 = vand.u32 4294901760, %v18811_v43  ;;  %v18839_v40 = vand.u32 4294901760, %v163_v35  ;;  %v10607_v13 = vadd.f32 %v10606_v37, %v10605_v54  ;;  %7921 = vmatmul.mubr.f32.vlgmr.msra.gmra.mrb[200].mxu0 %v21429_v57  ;;  %v21431_v17 = vld [vmem:[#allocation10_spill] sm:$0xff]  ;;  %v18874_v37 = vld [vmem:[%s19381_s2 + $0x778] sm:$0xff] }
 0x2e7   :  { %v18825_v29 = vsub.f32 %v18721_v33, %v21427_v25  ;;  %v18843_v25 = vpack.c.bf16 %v8312_v53, %v8305_v38  ;;  %v18845_v28 = vsub.f32 %v464_v34, %v8123_v31  ;;  %v10566_v33 = vadd.f32 %v10565_v55, %v10564_v4  ;;  %12904 = vmatpush3.bf16.msra.mxu0 %v21430_v21  ;;  %v82_v53 = vld [vmem:[%s19379_s0 + $0x70] sm:$0xff]  ;;  %v10608_v38 = vpop.f32.mrb[134].mxu1 }
 0x2e8   :  { %21428 = vst [vmem:[#allocation7_spill] sm:$0xff] %v18839_v40  ;;  %12896 = vmatpush3.bf16.msra.mxu1 %v21373_v36  ;;  %7926 = vmatprep.mubr.f32.mxu0 %v21431_v17  ;;  %v18850_v63 = vpack.c.bf16 %v8126_v2, %v8123_v31  ;;  %v18852_v15 = vsub.f32 %v465_v0, %v8126_v2  ;;  %v8180_v54 = vand.u32 4294901760, %v18830_v3  ;;  %v18858_v36 = vld [vmem:[%s19381_s2 + $0x770] sm:$0xff]  ;;  %v8326_v46 = vand.u32 4294901760, %v18836_v32 }
 0x2e9   :  { %v18863_v34 = vadd.f32 %v10607_v13, %v5404_v23  ;;  %12898 = vmatprep.subr.bf16.mxu1 %v18078_v24  ;;  %v21433_v31 = vld [vmem:[#allocation19_spill] sm:$0xff]  ;;  %v18867_v0 = vpack.c.bf16 %v8438_v51, %v8431_v59  ;;  %v8319_v2 = vand.u32 4294901760, %v18825_v29  ;;  %v5422_v55 = vadd.f32 %v10566_v33, %v18645_v16  ;;  %v10567_v23 = vpop.f32.mrb[138].mxu0  ;;  %v10609_v13 = vpop.f32.mrb[135].mxu1  ;;  %v21437_v21 = vld [vmem:[#allocation14_spill] sm:$0xff] }
 0x2ea   :  { %21432 = vst [vmem:[#allocation25_spill] sm:$0xff] %v18850_v63  ;;  %12906 = vmatprep.subr.bf16.mxu0 %v21433_v31  ;;  %v18879_v24 = vsub.f32 %v18811_v43, %v8177_v22  ;;  %v18882_v59 = vsub.f32 %v163_v35, %v18839_v40  ;;  %v99_v51 = vld [vmem:[%s19379_s0 + $0xf8] sm:$0xff]  ;;  %v10568_v29 = vpop.f32.mrb[139].mxu0  ;;  %v10610_v4 = vadd.f32 %v10609_v13, %v10608_v38  ;;  %v21435_v31 = vld [vmem:[#allocation41_spill] sm:$0xff]  ;;  %v21436_v16 = vand.u32 4294901760, %v18748_v39  ;;  %v10611_v42 = vpop.f32.mrb[136].mxu1 }
 0x2eb   :  { %7928 = vmatmul.mubr.f32.gmra.mrb[202].mxu0 %v21435_v31  ;;  %v8129_v43 = vand.u32 4294901760, %v18858_v36  ;;  %v162_v32 = vmul.f32 %v82_v53, %v82_v53  ;;  %v10569_v35 = vadd.f32 %v10568_v29, %v10567_v23  ;;  %v8132_v26 = vand.u32 4294901760, %v18874_v37 }
 0x2ec   :  { %21434 = vst [vmem:[#allocation46_spill] sm:$0xff] %v18879_v24  ;;  %12900 = vmatpush3.bf16.msra.mxu1 %v18097_v41  ;;  %v18892_v33 = vsub.f32 %v18748_v39, %v21436_v16  ;;  %12908 = vmatpush3.bf16.msra.mxu0 %v21437_v21  ;;  %v18900_v41 = vadd.f32 %v10610_v4, %v5413_v10  ;;  %v21439_v53 = vand.u32 4294901760, %v18764_v56  ;;  %v20176_v29 = vand.u32 4294901760, %v18806_v14  ;;  %v10612_v21 = vpop.f32.mrb[137].mxu1 }
 0x2ed   :  { %7933 = vmatprep.mubr.f32.mxu0 %v21438_v47  ;;  %12910 = vmatprep.subr.bf16.mxu0 %v18559_v27  ;;  %v179_v16 = vmul.f32 %v99_v51, %v99_v51  ;;  %v5431_v39 = vadd.f32 %v10569_v35, %v18679_v7  ;;  %v18910_v13 = vpack.c.bf16 %v8180_v54, %v8177_v22  ;;  %v18921_v7 = vand.u32 4294901760, %v162_v32  ;;  %v98_v22 = vld [vmem:[%s19379_s0 + $0xf0] sm:$0xff]  ;;  %v10614_v35 = vpop.f32.mrb[138].mxu1 }
 0x2ee   :  { %12934 = vmatprep.subr.bf16.mxu1 %v18597_v1  ;;  %v8451_v23 = vsub.f32 %v18764_v56, %v21439_v53  ;;  %v10613_v38 = vadd.f32 %v10612_v21, %v10611_v42  ;;  %v21440_v1 = vld [vmem:[#allocation17_spill] sm:$0xff]  ;;  %v18916_v53 = vpack.c.bf16 %v8326_v46, %v8319_v2  ;;  %v18919_v51 = vsub.f32 %v18830_v3, %v8180_v54 }
 0x2ef   :  { %8053 = vmatmul.mubr.f32.vlgmr.msra.gmra.mrb[200].mxu1 %v21429_v57  ;;  %7935 = vmatmul.mubr.f32.gmra.mrb[204].mxu0 %v21440_v1  ;;  %21442 = vst [vmem:[#allocation40_spill] sm:$0xff] %v18921_v7  ;;  %v21443_v57 = vld [vmem:[#allocation31_spill] sm:$0xff]  ;;  %v8445_v42 = vand.u32 4294901760, %v18892_v33  ;;  %v18929_v21 = vpack.c.bf16 %v8132_v26, %v8129_v43  ;;  %v21445_v3 = vand.u32 4294901760, %v18785_v11  ;;  %v8458_v33 = vsub.f32 %v18806_v14, %v20176_v29 }
 0x2f0   :  { %12936 = vmatpush3.bf16.msra.mxu1 %v18650_v18  ;;  %21441 = vst [vmem:[#allocation38_spill] sm:$0xff] %v18919_v51  ;;  %12912 = vmatpush3.bf16.msra.mxu0 %v18582_v52  ;;  %v21444_v18 = vand.u32 4294901760, %v18773_v58  ;;  %v18937_v2 = vadd.f32 %v10613_v38, %v5422_v55  ;;  %v8452_v4 = vand.u32 4294901760, %v8451_v23  ;;  %v18944_v10 = vand.u32 4294901760, %v179_v16  ;;  %v21449_v14 = vld [vmem:[#allocation47_spill] sm:$0xff] }
 0x2f1   :  { %7940 = vmatprep.mubr.f32.mxu0 %v21443_v57  ;;  %v8339_v54 = vsub.f32 %v18785_v11, %v21445_v3  ;;  %8058 = vmatprep.mubr.f32.mxu1 %v21431_v17  ;;  %v21447_v17 = vand.u32 4294901760, %v18882_v59  ;;  %v21448_v38 = vand.u32 4294901760, %v18817_v30  ;;  %v178_v3 = vmul.f32 %v98_v22, %v98_v22 }
 0x2f2   :  { %v8332_v46 = vsub.f32 %v18773_v58, %v21444_v18  ;;  %12914 = vmatprep.subr.bf16.mxu0 %v18625_v6  ;;  %21446 = vst [vmem:[#allocation28_spill] sm:$0xff] %v18944_v10  ;;  %v115_v18 = vld [vmem:[%s19379_s0 + $0x178] sm:$0xff]  ;;  %v10615_v58 = vpop.f32.mrb[139].mxu1  ;;  %12938 = vmatprep.subr.bf16.mxu1 %v18692_v50  ;;  %v18960_v6 = vsub.f32 %v18858_v36, %v8129_v43  ;;  %v20181_v50 = vand.u32 4294901760, %v18845_v28 }
 0x2f3   :  { %8060 = vmatmul.mubr.f32.gmra.mrb[202].mxu1 %v21435_v31  ;;  %v8185_v55 = vsub.f32 %v18882_v59, %v21447_v17  ;;  %v8465_v23 = vsub.f32 %v18817_v30, %v21448_v38  ;;  %v10616_v29 = vadd.f32 %v10615_v58, %v10614_v35  ;;  %7942 = vmatmul.mubr.f32.gmra.mrb[206].mxu0 %v21449_v14  ;;  %v21452_v17 = vld [vmem:[#allocation30_spill] sm:$0xff]  ;;  %v8340_v22 = vand.u32 4294901760, %v8339_v54  ;;  %v21458_v54 = vld [vmem:[#allocation27_spill] sm:$0xff] }
 0x2f4   :  { %12940 = vmatpush3.bf16.msra.mxu1 %v18714_v49  ;;  %21450 = vst [vmem:[#allocation52_spill] sm:$0xff] %v18960_v6  ;;  %v18963_v31 = vsub.f32 %v162_v32, %v18921_v7  ;;  %12916 = vmatpush3.bf16.msra.mxu0 %v18657_v8  ;;  %v18969_v38 = vsub.f32 %v18874_v37, %v8132_v26  ;;  %v8333_v58 = vand.u32 4294901760, %v8332_v46  ;;  %v114_v49 = vld [vmem:[%s19379_s0 + $0x170] sm:$0xff]  ;;  %v131_v37 = vld [vmem:[%s19379_s0 + $0x1f8] sm:$0xff]  ;;  %v18989_v46 = vand.u32 4294901760, %v178_v3 }
 0x2f5   :  { %7947 = vmatprep.mubr.f32.mxu0 %v21452_v17  ;;  %v195_v35 = vmul.f32 %v115_v18, %v115_v18  ;;  %v18974_v36 = vadd.f32 %v10616_v29, %v5431_v39  ;;  %8065 = vmatprep.mubr.f32.mxu1 %v21438_v47  ;;  %v18978_v43 = vpack.c.bf16 %v8452_v4, %v8445_v42  ;;  %v8186_v39 = vand.u32 4294901760, %v8185_v55  ;;  %v21456_v4 = vld [vmem:[#allocation53_spill] sm:$0xff]  ;;  %v130_v18 = vld [vmem:[%s19379_s0 + $0x1f0] sm:$0xff] }
 0x2f6   :  { %21451 = vst [vmem:[#allocation5_spill] sm:$0xff] %v18963_v31  ;;  %21453 = vst [vmem:[#allocation39_spill] sm:$0xff] %v18969_v38  ;;  %12918 = vmatprep.subr.bf16.mxu0 %v18694_v19  ;;  %v18982_v26 = vsub.f32 %v179_v16, %v18944_v10  ;;  %12942 = vmatprep.subr.bf16.mxu1 %v18746_v60  ;;  %v8459_v29 = vand.u32 4294901760, %v8458_v33  ;;  %v8466_v47 = vand.u32 4294901760, %v8465_v23  ;;  %v21457_v42 = vld [vmem:[#allocation49_spill] sm:$0xff]  ;;  %v21460_v23 = vld [vmem:[#allocation22_spill] sm:$0xff] }
 0x2f7   :  { %8067 = vmatmul.mubr.f32.gmra.mrb[204].mxu1 %v21440_v1  ;;  %21455 = vst [vmem:[#allocation18_spill] sm:$0xff] %v18989_v46  ;;  %7949 = vmatmul.mubr.f32.gmra.mrb[208].mxu0 %v21456_v4  ;;  %v18999_v1 = vsub.f32 %v18845_v28, %v20181_v50  ;;  %v194_v60 = vmul.f32 %v114_v49, %v114_v49  ;;  %v21459_v55 = vld [vmem:[#allocation45_spill] sm:$0xff]  ;;  %v19007_v32 = vand.u32 4294901760, %v195_v35  ;;  %v21462_v49 = vand.u32 4294901760, %v18852_v15 }
 0x2f8   :  { %21454 = vst [vmem:[#allocation26_spill] sm:$0xff] %v18982_v26  ;;  %12944 = vmatpush3.bf16.msra.mxu1 %v18771_v9  ;;  %12920 = vmatpush3.bf16.msra.mxu0 %v18735_v62  ;;  %v19003_v33 = vpack.c.bf16 %v8340_v22, %v8333_v58  ;;  %v211_v16 = vmul.f32 %v131_v37, %v131_v37  ;;  %v147_v37 = vld [vmem:[%s19379_s0 + $0x278] sm:$0xff]  ;;  %v10649_v9 = vpop.f32.mrb[140].mxu0  ;;  %v21463_v50 = vand.u32 4294901760, %v18963_v31 }
 0x2f9   :  { %8072 = vmatprep.mubr.f32.mxu1 %v21443_v57  ;;  %21461 = vst [vmem:[#allocation42_spill] sm:$0xff] %v19007_v32  ;;  %12922 = vmatprep.subr.bf16.mxu0 %v18762_v44  ;;  %v8353_v57 = vsub.f32 %v18852_v15, %v21462_v49  ;;  %v12957_v44 = vpack.c.bf16 %v8466_v47, %v8459_v29  ;;  %v10650_v62 = vpop.f32.mrb[141].mxu0 }
 0x2fa   :  { %12946 = vmatprep.subr.bf16.mxu1 %v18791_v61  ;;  %8187 = vmatprep.mubr.f32.mxu0 %v8186_v39  ;;  %v19025_v61 = vsub.f32 %v178_v3, %v18989_v46  ;;  %v19034_v22 = vsub.f32 %v18963_v31, %v21463_v50  ;;  %v19037_v39 = vand.u32 4294901760, %v194_v60  ;;  %v210_v3 = vmul.f32 %v130_v18, %v130_v18  ;;  %v146_v50 = vld [vmem:[%s19379_s0 + $0x270] sm:$0xff]  ;;  %v10652_v49 = vpop.f32.mrb[142].mxu0 }
 0x2fb   :  { %8074 = vmatmul.mubr.f32.gmra.mrb[206].mxu1 %v21449_v14  ;;  %v8347_v14 = vand.u32 4294901760, %v18999_v1  ;;  %v10651_v29 = vadd.f32 %v10650_v62, %v10649_v9  ;;  %v19042_v47 = vsub.f32 %v195_v35, %v19007_v32  ;;  %v8354_v1 = vand.u32 4294901760, %v8353_v57 }
 0x2fc   :  { %12948 = vmatpush3.bf16.msra.mxu1 %v18843_v25  ;;  %8079 = vmatprep.mubr.f32.mxu1 %v21452_v17  ;;  %21464 = vst [vmem:[#allocation10_spill] sm:$0xff] %v19037_v39  ;;  %v19044_v25 = vand.u32 4294901760, %v211_v16  ;;  %v227_v17 = vmul.f32 %v147_v37, %v147_v37  ;;  %v21467_v18 = vand.u32 4294901760, %v18982_v26  ;;  %v21469_v9 = vand.u32 4294901760, %v18919_v51 }
 0x2fd   :  { %12924 = vmatpush3.bf16.msra.mxu0 %v18783_v5  ;;  %12950 = vmatprep.subr.bf16.mxu1 %v18867_v0  ;;  %21465 = vst [vmem:[#allocation41_spill] sm:$0xff] %v19042_v47  ;;  %v21468_v0 = vand.u32 4294901760, %v18879_v24  ;;  %v5751_v58 = vadd.f32 %v10651_v29, %v18819_v20  ;;  %v21470_v31 = vand.u32 4294901760, %v18960_v6  ;;  %v19074_v20 = vsub.f32 %v194_v60, %v19037_v39 }
 0x2fe   :  { %21466 = vst [vmem:[#allocation37_spill] sm:$0xff] %v19044_v25  ;;  %12926 = vmatprep.subr.bf16.mxu0 %v18815_v12  ;;  %v19053_v62 = vsub.f32 %v18982_v26, %v21467_v18  ;;  %v8479_v37 = vsub.f32 %v18919_v51, %v21469_v9  ;;  %v21471_v26 = vand.u32 4294901760, %v18969_v38  ;;  %v8192_v9 = vand.u32 4294901760, %v19034_v22  ;;  %v10696_v22 = vpop.f32.mrb[140].mxu1 }
 0x2ff   :  { %v8472_v35 = vsub.f32 %v18879_v24, %v21468_v0  ;;  %8081 = vmatmul.mubr.f32.gmra.mrb[208].mxu1 %v21456_v4  ;;  %v8360_v18 = vsub.f32 %v18960_v6, %v21470_v31  ;;  %v10653_v0 = vpop.f32.mrb[143].mxu0  ;;  %21472 = vst [vmem:[#allocation17_spill] sm:$0xff] %v19074_v20  ;;  %v19076_v4 = vand.u32 4294901760, %v210_v3  ;;  %v226_v29 = vmul.f32 %v146_v50, %v146_v50 }
 0x300   :  { %v8367_v12 = vsub.f32 %v18969_v38, %v21471_v26  ;;  %12952 = vmatpush3.bf16.msra.mxu1 %v18916_v53  ;;  %8483 = vmatprep.mubr.f32.mxu1 %v18839_v40  ;;  %v10654_v57 = vadd.f32 %v10653_v0, %v10652_v49  ;;  %v19082_v26 = vsub.f32 %v211_v16, %v19044_v25  ;;  %v19084_v53 = vand.u32 4294901760, %v227_v17  ;;  %v10655_v0 = vpop.f32.mrb[144].mxu0 }
 0x301   :  { %21473 = vst [vmem:[#allocation31_spill] sm:$0xff] %v19076_v4  ;;  %12928 = vmatpush3.bf16.msra.mxu0 %v18850_v63  ;;  %12954 = vmatprep.subr.bf16.mxu1 %v18978_v43  ;;  %v12959_v60 = vpack.c.bf16 %v8354_v1, %v8347_v14  ;;  %v8201_v40 = vand.u32 4294901760, %v19053_v62  ;;  %v8473_v5 = vand.u32 4294901760, %v8472_v35  ;;  %v8480_v50 = vand.u32 4294901760, %v8479_v37  ;;  %v10697_v63 = vpop.f32.mrb[141].mxu1  ;;  %v10656_v6 = vpop.f32.mrb[145].mxu0 }
 0x302   :  { %21474 = vst [vmem:[#allocation47_spill] sm:$0xff] %v19082_v26  ;;  %21475 = vst [vmem:[#allocation30_spill] sm:$0xff] %v19084_v53  ;;  %12930 = vmatprep.subr.bf16.mxu0 %v18910_v13  ;;  %v5758_v49 = vadd.f32 %v10654_v57, %v18863_v34  ;;  %v21476_v43 = vand.u32 4294901760, %v19025_v61  ;;  %v8361_v16 = vand.u32 4294901760, %v8360_v18  ;;  %v8368_v38 = vand.u32 4294901760, %v8367_v12  ;;  %v10699_v57 = vpop.f32.mrb[142].mxu1 }
 0x303   :  { %v10698_v51 = vadd.f32 %v10697_v63, %v10696_v22  ;;  %v19095_v1 = vsub.f32 %v210_v3, %v19076_v4  ;;  %v19097_v62 = vand.u32 4294901760, %v226_v29  ;;  %v10657_v34 = vadd.f32 %v10656_v6, %v10655_v0  ;;  %v10658_v22 = vpop.f32.mrb[146].mxu0  ;;  %v10700_v0 = vpop.f32.mrb[143].mxu1  ;;  %v21482_v12 = vld [vmem:[#allocation35_spill] sm:$0xff] }
 0x304   :  { %v8206_v31 = vsub.f32 %v19025_v61, %v21476_v43  ;;  %12956 = vmatpush3.bf16.msra.mxu1 %v19003_v33  ;;  %v21479_v35 = vand.u32 4294901760, %v19042_v47  ;;  %v19105_v63 = vsub.f32 %v227_v17, %v19084_v53  ;;  %v21481_v3 = vpack.c.bf16 %v21458_v54, %v21457_v42  ;;  %v21483_v17 = vld [vmem:[#allocation21_spill] sm:$0xff] }
 0x305   :  { %21477 = vst [vmem:[#allocation53_spill] sm:$0xff] %v19095_v1  ;;  %21478 = vst [vmem:[#allocation49_spill] sm:$0xff] %v19097_v62  ;;  %12932 = vmatpush3.bf16.msra.mxu0 %v18929_v21  ;;  %12958 = vmatprep.subr.bf16.mxu1 %v12957_v44  ;;  %v19107_v33 = vadd.f32 %v10698_v51, %v5751_v58  ;;  %v12961_v6 = vpack.c.bf16 %v8480_v50, %v8473_v5  ;;  %v10659_v51 = vpop.f32.mrb[147].mxu0 }
 0x306   :  { %v8215_v37 = vsub.f32 %v19042_v47, %v21479_v35  ;;  %21480 = vst [vmem:[#allocation27_spill] sm:$0xff] %v19105_v63  ;;  %12966 = vmatprep.subr.bf16.mxu0 %v21481_v3  ;;  %v12969_v44 = vpack.c.bf16 %v18545_v48, %v18533_v45  ;;  %v5765_v18 = vadd.f32 %v10657_v34, %v18900_v41  ;;  %v8207_v43 = vand.u32 4294901760, %v8206_v31 }
 0x307   :  { %v12963_v35 = vpack.c.bf16 %v8368_v38, %v8361_v16  ;;  %v12971_v14 = vpack.c.bf16 %v21483_v17, %v21482_v12  ;;  %v10701_v58 = vadd.f32 %v10700_v0, %v10699_v57  ;;  %v21484_v47 = vand.u32 4294901760, %v19074_v20  ;;  %v21488_v57 = vld [vmem:[#allocation13_spill] sm:$0xff] }
 0x308   :  { %8193 = vmatmul.mubr.f32.vlgmr.msra.gmra.mrb[210].mxu0 %v8192_v9  ;;  %12960 = vmatpush3.bf16.msra.mxu1 %v12959_v60  ;;  %v19122_v3 = vsub.f32 %v226_v29, %v19097_v62  ;;  %v10660_v41 = vadd.f32 %v10659_v51, %v10658_v22  ;;  %v21485_v38 = vpack.c.bf16 %v21460_v23, %v21459_v55  ;;  %v8216_v31 = vand.u32 4294901760, %v8215_v37  ;;  %v21487_v29 = vld [vmem:[#allocation8_spill] sm:$0xff]  ;;  %v10661_v51 = vpop.f32.mrb[148].mxu0  ;;  %v21491_v60 = vld [vmem:[#allocation33_spill] sm:$0xff] }
 0x309   :  { %v8221_v5 = vsub.f32 %v19074_v20, %v21484_v47  ;;  %8202 = vmatprep.mubr.f32.mxu0 %v8201_v40  ;;  %v21486_v16 = vand.u32 4294901760, %v19082_v26  ;;  %v19131_v34 = vadd.f32 %v10701_v58, %v5758_v49  ;;  %v10702_v47 = vpop.f32.mrb[144].mxu1  ;;  %12962 = vmatprep.subr.bf16.mxu1 %v12961_v6  ;;  %v12973_v22 = vpack.c.bf16 %v21488_v57, %v21487_v29  ;;  %v10662_v40 = vpop.f32.mrb[149].mxu0 }
 0x30a   :  { %12968 = vmatpush3.bf16.msra.mxu0 %v21485_v38  ;;  %v5772_v0 = vadd.f32 %v10660_v41, %v18937_v2  ;;  %v10703_v38 = vpop.f32.mrb[145].mxu1  ;;  %v10663_v6 = vadd.f32 %v10662_v40, %v10661_v51  ;;  %v21492_v41 = vand.u32 4294901760, %v19105_v63 }
 0x30b   :  { %v8230_v9 = vsub.f32 %v19082_v26, %v21486_v16  ;;  %12970 = vmatprep.subr.bf16.mxu0 %v12969_v44  ;;  %v10704_v37 = vadd.f32 %v10703_v38, %v10702_v47  ;;  %v8222_v50 = vand.u32 4294901760, %v8221_v5  ;;  %v21489_v16 = vand.u32 4294901760, %v19095_v1  ;;  %v21490_v44 = vld [vmem:[#allocation43_spill] sm:$0xff]  ;;  %v21493_v5 = vld [vmem:[#allocation6_spill] sm:$0xff]  ;;  %v21494_v38 = vld [vmem:[#allocation32_spill] sm:$0xff] }
 0x30c   :  { %8208 = vmatmul.mubr.f32.gmra.mrb[212].mxu0 %v8207_v43  ;;  %12964 = vmatpush3.bf16.msra.mxu1 %v12963_v35  ;;  %v12975_v26 = vpack.c.bf16 %v21491_v60, %v21490_v44  ;;  %v8245_v47 = vsub.f32 %v19105_v63, %v21492_v41  ;;  %v10705_v35 = vpop.f32.mrb[146].mxu1  ;;  %v21499_v41 = vld [vmem:[#allocation12_spill] sm:$0xff] }
 0x30d   :  { %v8236_v49 = vsub.f32 %v19095_v1, %v21489_v16  ;;  %8217 = vmatprep.mubr.f32.mxu0 %v8216_v31  ;;  %v8231_v2 = vand.u32 4294901760, %v8230_v9  ;;  %v19145_v43 = vadd.f32 %v10704_v37, %v5765_v18  ;;  %12998 = vmatprep.subr.bf16.mxu1 %v21493_v5  ;;  %v21495_v16 = vld [vmem:[#allocation34_spill] sm:$0xff]  ;;  %v10706_v31 = vpop.f32.mrb[147].mxu1  ;;  %v21496_v9 = vld [vmem:[#allocation16_spill] sm:$0xff]  ;;  %v21497_v18 = vand.u32 4294901760, %v19122_v3 }
 0x30e   :  { %12972 = vmatpush3.bf16.msra.mxu0 %v12971_v14  ;;  %v12977_v58 = vpack.c.bf16 %v21495_v16, %v21494_v38  ;;  %v5779_v14 = vadd.f32 %v10663_v6, %v18974_v36  ;;  %v10707_v51 = vadd.f32 %v10706_v31, %v10705_v35  ;;  %v8246_v1 = vand.u32 4294901760, %v8245_v47  ;;  %v10708_v36 = vpop.f32.mrb[148].mxu1  ;;  %v21501_v6 = vld [vmem:[#allocation23_spill] sm:$0xff]  ;;  %v21505_v47 = vld [vmem:[#allocation48_spill] sm:$0xff] }
 0x30f   :  { %12974 = vmatprep.subr.bf16.mxu0 %v12973_v22  ;;  %8485 = vmatmul.mubr.f32.vlgmr.msra.gmra.mrb[210].mxu1 %v18921_v7  ;;  %v8237_v40 = vand.u32 4294901760, %v8236_v49  ;;  %v8251_v37 = vsub.f32 %v19122_v3, %v21497_v18  ;;  %v21498_v22 = vld [vmem:[#allocation44_spill] sm:$0xff]  ;;  %v10709_v49 = vpop.f32.mrb[149].mxu1  ;;  %v21502_v31 = vld [vmem:[#allocation19_spill] sm:$0xff] }
 0x310   :  { %8223 = vmatmul.mubr.f32.gmra.mrb[214].mxu0 %v8222_v50  ;;  %13000 = vmatpush3.bf16.msra.mxu1 %v21496_v9  ;;  %v12979_v63 = vpack.c.bf16 %v21499_v41, %v21498_v22  ;;  %v19158_v20 = vadd.f32 %v10707_v51, %v5772_v0  ;;  %v21500_v50 = vld [vmem:[#allocation51_spill] sm:$0xff]  ;;  %v10790_v7 = vpop.f32.mrb[150].mxu1 }
 0x311   :  { %8232 = vmatprep.mubr.f32.mxu0 %v8231_v2  ;;  %8490 = vmatprep.mubr.f32.mxu1 %v18944_v10  ;;  %v12981_v35 = vpack.c.bf16 %v21501_v6, %v21500_v50  ;;  %v21503_v2 = vld [vmem:[#allocation14_spill] sm:$0xff]  ;;  %v8252_v18 = vand.u32 4294901760, %v8251_v37  ;;  %v21504_v0 = vld [vmem:[#allocation11_spill] sm:$0xff] }
 0x312   :  { %12976 = vmatpush3.bf16.msra.mxu0 %v12975_v26  ;;  %13002 = vmatprep.subr.bf16.mxu1 %v21502_v31  ;;  %v10710_v26 = vadd.f32 %v10709_v49, %v10708_v36  ;;  %v12983_v51 = vpack.c.bf16 %v21505_v47, %v21504_v0  ;;  %v10743_v36 = vpop.f32.mrb[150].mxu0 }
 0x313   :  { %12978 = vmatprep.subr.bf16.mxu0 %v12977_v58  ;;  %8492 = vmatmul.mubr.f32.gmra.mrb[212].mxu1 %v18989_v46  ;;  %v21506_v58 = vld [vmem:[#allocation15_spill] sm:$0xff] }
 0x314   :  { %8238 = vmatmul.mubr.f32.gmra.mrb[216].mxu0 %v8237_v40  ;;  %13004 = vmatpush3.bf16.msra.mxu1 %v21503_v2  ;;  %v19168_v10 = vadd.f32 %v10710_v26, %v5779_v14  ;;  %v12985_v46 = vpack.c.bf16 %v18764_v56, %v21506_v58  ;;  %v21508_v14 = vld [vmem:[#allocation36_spill] sm:$0xff]  ;;  %v21510_v26 = vld [vmem:[#allocation38_spill] sm:$0xff] }
 0x315   :  { %8247 = vmatprep.mubr.f32.mxu0 %v8246_v1  ;;  %8497 = vmatprep.mubr.f32.mxu1 %v19007_v32  ;;  %v21507_v1 = vld [vmem:[#allocation54_spill] sm:$0xff]  ;;  %v21509_v40 = vld [vmem:[#allocation20_spill] sm:$0xff] }
 0x316   :  { %12980 = vmatpush3.bf16.msra.mxu0 %v12979_v63  ;;  %13006 = vmatprep.subr.bf16.mxu1 %v18559_v27  ;;  %v12987_v63 = vpack.c.bf16 %v18785_v11, %v21507_v1  ;;  %v12989_v37 = vpack.c.bf16 %v18817_v30, %v21509_v40 }
 0x317   :  { %12982 = vmatprep.subr.bf16.mxu0 %v12981_v35  ;;  %8499 = vmatmul.mubr.f32.gmra.mrb[214].mxu1 %v19037_v39  ;;  %v10744_v35 = vpop.f32.mrb[151].mxu0  ;;  %v21511_v39 = vld [vmem:[#allocation9_spill] sm:$0xff] }
 0x318   :  { %8253 = vmatmul.mubr.f32.gmra.mrb[218].mxu0 %v8252_v18  ;;  %13008 = vmatpush3.bf16.msra.mxu1 %v18582_v52  ;;  %v10745_v49 = vadd.f32 %v10744_v35, %v10743_v36  ;;  %v12993_v18 = vpack.c.bf16 %v21510_v26, %v18879_v24  ;;  %v21512_v36 = vand.u32 4294901760, %v18882_v59  ;;  %v21513_v35 = vld [vmem:[#allocation29_spill] sm:$0xff]  ;;  %v10791_v24 = vpop.f32.mrb[151].mxu1 }
 0x319   :  { %8504 = vmatprep.mubr.f32.mxu1 %v19044_v25  ;;  %13010 = vmatprep.subr.bf16.mxu1 %v21508_v14 }
 0x31a   :  { %12984 = vmatpush3.bf16.msra.mxu0 %v12983_v51  ;;  %8648 = vmatprep.mubr.f32.mxu0 %v18882_v59  ;;  %v6023_v51 = vadd.f32 %v10745_v49, %v19107_v33  ;;  %v21516_v33 = vand.u32 4294901760, %v21457_v42  ;;  %v21517_v49 = vand.u32 4294901760, %v21458_v54  ;;  %v10793_v54 = vpop.f32.mrb[152].mxu1 }
 0x31b   :  { %12986 = vmatprep.subr.bf16.mxu0 %v12985_v46  ;;  %8506 = vmatmul.mubr.f32.gmra.mrb[216].mxu1 %v19076_v4  ;;  %v12991_v46 = vpack.c.bf16 %v18852_v15, %v18845_v28  ;;  %v10746_v4 = vpop.f32.mrb[152].mxu0 }
 0x31c   :  { %13012 = vmatpush3.bf16.msra.mxu1 %v18657_v8  ;;  %8511 = vmatprep.mubr.f32.mxu1 %v19084_v53  ;;  %v10747_v25 = vpop.f32.mrb[153].mxu0  ;;  %v21514_v53 = vld [vmem:[#allocation52_spill] sm:$0xff] }
 0x31d   :  { %13014 = vmatprep.subr.bf16.mxu1 %v18694_v19 }
 0x31e   :  { %12988 = vmatpush3.bf16.msra.mxu0 %v12987_v63  ;;  %v10748_v63 = vadd.f32 %v10747_v25, %v10746_v4  ;;  %v21518_v25 = vld [vmem:[#allocation24_spill] sm:$0xff] }
 0x31f   :  { %12990 = vmatprep.subr.bf16.mxu0 %v12989_v37  ;;  %8513 = vmatmul.mubr.f32.gmra.mrb[218].mxu1 %v19097_v62  ;;  %v21515_v37 = vld [vmem:[#allocation39_spill] sm:$0xff]  ;;  %v13029_v62 = vpack.c.bf16 %v21517_v49, %v21516_v33 }
 0x320   :  { %13016 = vmatpush3.bf16.msra.mxu1 %v21511_v39  ;;  %8791 = vmatprep.mubr.f32.mxu1 %v21512_v36  ;;  %v12995_v32 = vpack.c.bf16 %v21515_v37, %v21514_v53  ;;  %v6038_v26 = vadd.f32 %v10748_v63, %v19131_v34  ;;  %v10749_v39 = vpop.f32.mrb[154].mxu0  ;;  %v10792_v36 = vadd.f32 %v10791_v24, %v10790_v7  ;;  %v21520_v37 = vand.u32 4294901760, %v21459_v55  ;;  %v21525_v55 = vld [vmem:[#allocation25_spill] sm:$0xff] }
 0x321   :  { %13018 = vmatprep.subr.bf16.mxu1 %v21513_v35  ;;  %v10750_v59 = vpop.f32.mrb[155].mxu0  ;;  %v21522_v34 = vand.u32 4294901760, %v18533_v45  ;;  %v21523_v63 = vand.u32 4294901760, %v18545_v48  ;;  %v21528_v45 = vand.u32 4294901760, %v21483_v17 }
 0x322   :  { %12992 = vmatpush3.bf16.msra.mxu0 %v12991_v46  ;;  %v10751_v4 = vadd.f32 %v10750_v59, %v10749_v39  ;;  %v21519_v46 = vld [vmem:[#allocation50_spill] sm:$0xff]  ;;  %v19210_v53 = vadd.f32 %v10792_v36, %v6023_v51  ;;  %v10752_v39 = vpop.f32.mrb[156].mxu0  ;;  %v21524_v59 = vld [vmem:[#allocation5_spill] sm:$0xff]  ;;  %v21529_v36 = vand.u32 4294901760, %v21487_v29  ;;  %v21533_v29 = vand.u32 4294901760, %v21491_v60 }
 0x323   :  { %12994 = vmatprep.subr.bf16.mxu0 %v12993_v18  ;;  %v21521_v18 = vand.u32 4294901760, %v21460_v23  ;;  %v13033_v24 = vpack.c.bf16 %v21523_v63, %v21522_v34  ;;  %v10753_v33 = vpop.f32.mrb[157].mxu0  ;;  %v21526_v51 = vld [vmem:[#allocation26_spill] sm:$0xff]  ;;  %v21537_v60 = vld [vmem:[#allocation17_spill] sm:$0xff] }
 0x324   :  { %13020 = vmatpush3.bf16.msra.mxu1 %v21518_v25  ;;  %v6053_v7 = vadd.f32 %v10751_v4, %v19145_v43  ;;  %v10754_v23 = vadd.f32 %v10753_v33, %v10752_v39  ;;  %v21530_v4 = vand.u32 4294901760, %v21488_v57  ;;  %v21535_v33 = vand.u32 4294901760, %v21495_v16 }
 0x325   :  { %13022 = vmatprep.subr.bf16.mxu1 %v21519_v46  ;;  %v13031_v42 = vpack.c.bf16 %v21521_v18, %v21520_v37 }
 0x326   :  { %12996 = vmatpush3.bf16.msra.mxu0 %v12995_v32  ;;  %v10794_v32 = vpop.f32.mrb[153].mxu1  ;;  %v13037_v18 = vpack.c.bf16 %v21530_v4, %v21529_v36  ;;  %v21543_v36 = vand.u32 4294901760, %v21501_v6 }
 0x327   :  { %13030 = vmatprep.subr.bf16.mxu0 %v13029_v62  ;;  %v10795_v49 = vadd.f32 %v10794_v32, %v10793_v54  ;;  %v21527_v62 = vand.u32 4294901760, %v21482_v12  ;;  %v10796_v43 = vpop.f32.mrb[154].mxu1  ;;  %v10755_v54 = vpop.f32.mrb[158].mxu0  ;;  %v21534_v32 = vand.u32 4294901760, %v21494_v38  ;;  %v21540_v38 = vand.u32 4294901760, %v21499_v41  ;;  %v21545_v41 = vld [vmem:[#allocation53_spill] sm:$0xff] }
 0x328   :  { %13024 = vmatpush3.bf16.msra.mxu1 %v21525_v55  ;;  %v10797_v34 = vpop.f32.mrb[155].mxu1  ;;  %v10756_v63 = vpop.f32.mrb[159].mxu0 }
 0x329   :  { %8651 = vmatmul.mubr.f32.vlgmr.msra.gmra.mrb[220].mxu0 %v21524_v59  ;;  %v13035_v48 = vpack.c.bf16 %v21528_v45, %v21527_v62  ;;  %v19224_v37 = vadd.f32 %v10795_v49, %v6038_v26  ;;  %13026 = vmatprep.subr.bf16.mxu1 %v18910_v13  ;;  %v10798_v12 = vadd.f32 %v10797_v34, %v10796_v43  ;;  %v21531_v26 = vld [vmem:[#allocation41_spill] sm:$0xff]  ;;  %v21536_v45 = vand.u32 4294901760, %v21524_v59 }
 0x32a   :  { %13032 = vmatpush3.bf16.msra.mxu0 %v13031_v42  ;;  %8657 = vmatprep.mubr.f32.mxu0 %v21526_v51  ;;  %v6068_v42 = vadd.f32 %v10754_v23, %v19158_v20  ;;  %v10757_v17 = vadd.f32 %v10756_v63, %v10755_v54  ;;  %v10799_v20 = vpop.f32.mrb[156].mxu1  ;;  %v13041_v49 = vpack.c.bf16 %v21535_v33, %v21534_v32  ;;  %v21541_v43 = vand.u32 4294901760, %v21526_v51  ;;  %v21546_v51 = vld [vmem:[#allocation27_spill] sm:$0xff]  ;;  %v21565_v32 = vld [vmem:[#allocation38_spill] sm:$0xff] }
 0x32b   :  { %13034 = vmatprep.subr.bf16.mxu0 %v13033_v24  ;;  %v21532_v24 = vand.u32 4294901760, %v21490_v44  ;;  %v19239_v39 = vadd.f32 %v10798_v12, %v6053_v7  ;;  %v10800_v62 = vpop.f32.mrb[157].mxu1  ;;  %v21538_v7 = vld [vmem:[#allocation47_spill] sm:$0xff]  ;;  %v21542_v59 = vand.u32 4294901760, %v21500_v50  ;;  %v21548_v50 = vand.u32 4294901760, %v21505_v47 }
 0x32c   :  { %13028 = vmatpush3.bf16.msra.mxu1 %v18929_v21  ;;  %v6083_v23 = vadd.f32 %v10757_v17, %v19168_v10  ;;  %v10801_v44 = vadd.f32 %v10800_v62, %v10799_v20  ;;  %v10802_v10 = vpop.f32.mrb[158].mxu1  ;;  %v21551_v34 = vand.u32 4294901760, %v18764_v56  ;;  %v21554_v47 = vand.u32 4294901760, %v21507_v1 }
 0x32d   :  { %8660 = vmatmul.mubr.f32.gmra.mrb[222].mxu0 %v19025_v61  ;;  %v13039_v57 = vpack.c.bf16 %v21533_v29, %v21532_v24  ;;  %13062 = vmatprep.subr.bf16.mxu1 %v21493_v5  ;;  %v21539_v5 = vand.u32 4294901760, %v21498_v22  ;;  %v10803_v4 = vpop.f32.mrb[159].mxu1  ;;  %v21556_v56 = vand.u32 4294901760, %v21509_v40  ;;  %v21559_v24 = vld [vmem:[#allocation7_spill] sm:$0xff]  ;;  %v21566_v33 = vand.u32 4294901760, %v21565_v32 }
 0x32e   :  { %13036 = vmatpush3.bf16.msra.mxu0 %v13035_v48  ;;  %8666 = vmatprep.mubr.f32.mxu0 %v21531_v26  ;;  %v19256_v48 = vadd.f32 %v10801_v44, %v6068_v42  ;;  %v10804_v22 = vadd.f32 %v10803_v4, %v10802_v10  ;;  %v21547_v42 = vand.u32 4294901760, %v21504_v0  ;;  %v21553_v0 = vand.u32 4294901760, %v21538_v7  ;;  %v21568_v44 = vld [vmem:[#allocation9_spill] sm:$0xff] }
 0x32f   :  { %13038 = vmatprep.subr.bf16.mxu0 %v13037_v18  ;;  %8795 = vmatmul.mubr.f32.vlgmr.msra.gmra.mrb[220].mxu1 %v21536_v45  ;;  %v13043_v16 = vpack.c.bf16 %v21540_v38, %v21539_v5  ;;  %v21544_v18 = vand.u32 4294901760, %v19025_v61  ;;  %v21549_v61 = vand.u32 4294901760, %v21531_v26  ;;  %v10837_v26 = vpop.f32.mrb[160].mxu0  ;;  %v21567_v62 = vand.u32 4294901760, %v19122_v3 }
 0x330   :  { %13064 = vmatpush3.bf16.msra.mxu1 %v21496_v9  ;;  %8802 = vmatprep.mubr.f32.mxu1 %v21541_v43  ;;  %v13045_v9 = vpack.c.bf16 %v21543_v36, %v21542_v59  ;;  %v13047_v6 = vpack.c.bf16 %v21548_v50, %v21547_v42  ;;  %v19274_v54 = vadd.f32 %v10804_v22, %v6083_v23  ;;  %v10838_v29 = vpop.f32.mrb[161].mxu0  ;;  %v21574_v42 = vld [vmem:[#allocation28_spill] sm:$0xff] }
 0x331   :  { %8669 = vmatmul.mubr.f32.gmra.mrb[224].mxu0 %v21537_v60  ;;  %13066 = vmatprep.subr.bf16.mxu1 %v21502_v31  ;;  %v21550_v31 = vand.u32 4294901760, %v21506_v58  ;;  %v21555_v58 = vand.u32 4294901760, %v18785_v11  ;;  %v21560_v11 = vand.u32 4294901760, %v21546_v51  ;;  %v10839_v1 = vadd.f32 %v10838_v29, %v10837_v26  ;;  %v21579_v26 = vld [vmem:[#allocation31_spill] sm:$0xff] }
 0x332   :  { %13040 = vmatpush3.bf16.msra.mxu0 %v13039_v57  ;;  %8675 = vmatprep.mubr.f32.mxu0 %v21538_v7  ;;  %v21563_v57 = vld [vmem:[#allocation46_spill] sm:$0xff] }
 0x333   :  { %13042 = vmatprep.subr.bf16.mxu0 %v13041_v49  ;;  %8806 = vmatmul.mubr.f32.gmra.mrb[222].mxu1 %v21544_v18  ;;  %v13049_v63 = vpack.c.bf16 %v21551_v34, %v21550_v31  ;;  %v13051_v12 = vpack.c.bf16 %v21555_v58, %v21554_v47  ;;  %v21564_v20 = vand.u32 4294901760, %v21563_v57  ;;  %v10840_v23 = vpop.f32.mrb[162].mxu0  ;;  %v21575_v34 = vld [vmem:[#allocation18_spill] sm:$0xff] }
 0x334   :  { %13068 = vmatpush3.bf16.msra.mxu1 %v21503_v2  ;;  %8813 = vmatprep.mubr.f32.mxu1 %v21549_v61  ;;  %v21552_v2 = vand.u32 4294901760, %v21537_v60  ;;  %v10841_v45 = vpop.f32.mrb[163].mxu0  ;;  %v21571_v60 = vld [vmem:[#allocation39_spill] sm:$0xff] }
 0x335   :  { %8678 = vmatmul.mubr.f32.gmra.mrb[226].mxu0 %v21545_v41  ;;  %13070 = vmatprep.subr.bf16.mxu1 %v18559_v27  ;;  %v21557_v27 = vand.u32 4294901760, %v18817_v30  ;;  %v21562_v30 = vand.u32 4294901760, %v18852_v15  ;;  %v13057_v49 = vpack.c.bf16 %v21566_v33, %v21564_v20  ;;  %v21569_v15 = vld [vmem:[#allocation52_spill] sm:$0xff]  ;;  %v21572_v7 = vand.u32 4294901760, %v21571_v60  ;;  %v10884_v38 = vpop.f32.mrb[160].mxu1 }
 0x336   :  { %13044 = vmatpush3.bf16.msra.mxu0 %v13043_v16  ;;  %8684 = vmatprep.mubr.f32.mxu0 %v21546_v51  ;;  %v10885_v16 = vpop.f32.mrb[161].mxu1  ;;  %v21573_v51 = vld [vmem:[#allocation40_spill] sm:$0xff] }
 0x337   :  { %13046 = vmatprep.subr.bf16.mxu0 %v13045_v9  ;;  %8817 = vmatmul.mubr.f32.gmra.mrb[224].mxu1 %v21552_v2  ;;  %v13053_v17 = vpack.c.bf16 %v21557_v27, %v21556_v56  ;;  %v10886_v43 = vadd.f32 %v10885_v16, %v10884_v38  ;;  %v21576_v2 = vld [vmem:[#allocation42_spill] sm:$0xff] }
 0x338   :  { %13072 = vmatpush3.bf16.msra.mxu1 %v18582_v52  ;;  %8824 = vmatprep.mubr.f32.mxu1 %v21553_v0  ;;  %v21558_v52 = vand.u32 4294901760, %v21545_v41 }
 0x339   :  { %8687 = vmatmul.mubr.f32.gmra.mrb[228].mxu0 %v19122_v3  ;;  %13074 = vmatprep.subr.bf16.mxu1 %v21508_v14  ;;  %v21561_v14 = vand.u32 4294901760, %v18845_v28  ;;  %v21570_v28 = vand.u32 4294901760, %v21569_v15  ;;  %v10843_v3 = vpop.f32.mrb[164].mxu0 }
 0x33a   :  { %13048 = vmatpush3.bf16.msra.mxu0 %v13047_v6  ;;  %9005 = vmatprep.mubr.f32.mxu0 %v21559_v24  ;;  %v10844_v10 = vpop.f32.mrb[165].mxu0  ;;  %v10887_v36 = vpop.f32.mrb[162].mxu1 }
 0x33b   :  { %13050 = vmatprep.subr.bf16.mxu0 %v13049_v63  ;;  %8828 = vmatmul.mubr.f32.gmra.mrb[226].mxu1 %v21558_v52  ;;  %v13055_v40 = vpack.c.bf16 %v21562_v30, %v21561_v14  ;;  %v13059_v5 = vpack.c.bf16 %v21572_v7, %v21570_v28  ;;  %v10845_v59 = vadd.f32 %v10844_v10, %v10843_v3  ;;  %v10846_v4 = vpop.f32.mrb[166].mxu0  ;;  %v10888_v18 = vpop.f32.mrb[163].mxu1 }
 0x33c   :  { %13076 = vmatpush3.bf16.msra.mxu1 %v18657_v8  ;;  %8835 = vmatprep.mubr.f32.mxu1 %v21560_v11  ;;  %v6481_v8 = vadd.f32 %v10839_v1, %v19210_v53  ;;  %v10847_v22 = vpop.f32.mrb[167].mxu0  ;;  %v10889_v41 = vadd.f32 %v10888_v18, %v10887_v36 }
 0x33d   :  { %13078 = vmatprep.subr.bf16.mxu1 %v18694_v19  ;;  %v10842_v19 = vadd.f32 %v10841_v45, %v10840_v23  ;;  %v6499_v9 = vadd.f32 %v10845_v59, %v19239_v39 }
 0x33e   :  { %13052 = vmatpush3.bf16.msra.mxu0 %v13051_v12  ;;  %v21578_v12 = vld [vmem:[#allocation37_spill] sm:$0xff] }
 0x33f   :  { %13054 = vmatprep.subr.bf16.mxu0 %v13053_v17  ;;  %8839 = vmatmul.mubr.f32.gmra.mrb[228].mxu1 %v21567_v62  ;;  %v6490_v53 = vadd.f32 %v10842_v19, %v19224_v37  ;;  %v10848_v37 = vadd.f32 %v10847_v22, %v10846_v4  ;;  %v10890_v50 = vpop.f32.mrb[164].mxu1  ;;  %v10849_v6 = vpop.f32.mrb[168].mxu0 }
 0x340   :  { %13080 = vmatpush3.bf16.msra.mxu1 %v21568_v44  ;;  %9137 = vmatprep.mubr.f32.mxu1 %v21559_v24  ;;  %v10891_v61 = vpop.f32.mrb[165].mxu1  ;;  %v10850_v39 = vpop.f32.mrb[169].mxu0  ;;  %v21581_v24 = vld [vmem:[#allocation49_spill] sm:$0xff] }
 0x341   :  { %13082 = vmatprep.subr.bf16.mxu1 %v21513_v35  ;;  %v6625_v35 = vadd.f32 %v10886_v43, %v6481_v8  ;;  %v10892_v31 = vadd.f32 %v10891_v61, %v10890_v50  ;;  %v10851_v63 = vadd.f32 %v10850_v39, %v10849_v6 }
 0x342   :  { %13056 = vmatpush3.bf16.msra.mxu0 %v13055_v40 }
 0x343   :  { %13058 = vmatprep.subr.bf16.mxu0 %v13057_v49  ;;  %v10893_v0 = vpop.f32.mrb[166].mxu1  ;;  %v6517_v47 = vadd.f32 %v10851_v63, %v19274_v54  ;;  %v21580_v54 = vld [vmem:[#allocation30_spill] sm:$0xff] }
 0x344   :  { %13084 = vmatpush3.bf16.msra.mxu1 %v21518_v25  ;;  %v6636_v25 = vadd.f32 %v10889_v41, %v6490_v53 }
 0x345   :  { %13086 = vmatprep.subr.bf16.mxu1 %v21519_v46  ;;  %v6508_v46 = vadd.f32 %v10848_v37, %v19256_v48  ;;  %v21577_v48 = vld [vmem:[#allocation10_spill] sm:$0xff] }
 0x346   :  { %13060 = vmatpush3.bf16.msra.mxu0 %v13059_v5 }
 0x348   :  { %13088 = vmatpush3.bf16.msra.mxu1 %v21525_v55  ;;  %v6647_v55 = vadd.f32 %v10892_v31, %v6499_v9 }
 0x349   :  { %9007 = vmatmul.mubr.f32.vlgmr.msra.gmra.mrb[230].mxu0 %v21573_v51  ;;  %13090 = vmatprep.subr.bf16.mxu1 %v18910_v13  ;;  %v10894_v13 = vpop.f32.mrb[167].mxu1 }
 0x34a   :  { %9012 = vmatprep.mubr.f32.mxu0 %v21574_v42  ;;  %v10895_v58 = vadd.f32 %v10894_v13, %v10893_v0  ;;  %v10896_v27 = vpop.f32.mrb[168].mxu1 }
 0x34c   :  { %13092 = vmatpush3.bf16.msra.mxu1 %v18929_v21  ;;  %v6658_v56 = vadd.f32 %v10895_v58, %v6508_v46  ;;  %v10897_v21 = vpop.f32.mrb[169].mxu1 }
 0x34d   :  { %9014 = vmatmul.mubr.f32.gmra.mrb[232].mxu0 %v21575_v34  ;;  %v10898_v17 = vadd.f32 %v10897_v21, %v10896_v27 }
 0x34e   :  { %9019 = vmatprep.mubr.f32.mxu0 %v21576_v2 }
 0x34f   :  { %9139 = vmatmul.mubr.f32.vlgmr.msra.gmra.mrb[230].mxu1 %v21573_v51  ;;  %v6669_v52 = vadd.f32 %v10898_v17, %v6517_v47 }
 0x350   :  { %9144 = vmatprep.mubr.f32.mxu1 %v21574_v42 }
 0x351   :  { %9021 = vmatmul.mubr.f32.gmra.mrb[234].mxu0 %v21577_v48  ;;  %v10931_v29 = vpop.f32.mrb[170].mxu0 }
 0x352   :  { %9026 = vmatprep.mubr.f32.mxu0 %v21578_v12  ;;  %v10932_v11 = vpop.f32.mrb[171].mxu0 }
 0x353   :  { %9146 = vmatmul.mubr.f32.gmra.mrb[232].mxu1 %v21575_v34  ;;  %v10933_v1 = vadd.f32 %v10932_v11, %v10931_v29 }
 0x354   :  { %9151 = vmatprep.mubr.f32.mxu1 %v21576_v2 }
 0x355   :  { %9028 = vmatmul.mubr.f32.gmra.mrb[236].mxu0 %v21579_v26  ;;  %v6837_v14 = vadd.f32 %v10933_v1, %v6625_v35  ;;  %v10934_v30 = vpop.f32.mrb[172].mxu0 }
 0x356   :  { %9033 = vmatprep.mubr.f32.mxu0 %v21580_v54  ;;  %v10935_v40 = vpop.f32.mrb[173].mxu0 }
 0x357   :  { %9153 = vmatmul.mubr.f32.gmra.mrb[234].mxu1 %v21577_v48  ;;  %v10936_v57 = vadd.f32 %v10935_v40, %v10934_v30 }
 0x358   :  { %9158 = vmatprep.mubr.f32.mxu1 %v21578_v12  ;;  %v10978_v20 = vpop.f32.mrb[170].mxu1 }
 0x359   :  { %9035 = vmatmul.mubr.f32.gmra.mrb[238].mxu0 %v21581_v24  ;;  %v6844_v32 = vadd.f32 %v10936_v57, %v6636_v25  ;;  %v10937_v33 = vpop.f32.mrb[174].mxu0  ;;  %v10979_v49 = vpop.f32.mrb[171].mxu1 }
 0x35a   :  { %v10938_v8 = vpop.f32.mrb[175].mxu0  ;;  %v10980_v23 = vadd.f32 %v10979_v49, %v10978_v20 }
 0x35b   :  { %9160 = vmatmul.mubr.f32.gmra.mrb[236].mxu1 %v21579_v26  ;;  %v10939_v62 = vadd.f32 %v10938_v8, %v10937_v33 }
 0x35c   :  { %9165 = vmatprep.mubr.f32.mxu1 %v21580_v54  ;;  %v6969_v45 = vadd.f32 %v10980_v23, %v6837_v14  ;;  %v10981_v44 = vpop.f32.mrb[172].mxu1 }
 0x35d   :  { %v6851_v19 = vadd.f32 %v10939_v62, %v6647_v55  ;;  %v10940_v15 = vpop.f32.mrb[176].mxu0  ;;  %v10982_v28 = vpop.f32.mrb[173].mxu1 }
 0x35e   :  { %v10941_v60 = vpop.f32.mrb[177].mxu0  ;;  %v10983_v7 = vadd.f32 %v10982_v28, %v10981_v44 }
 0x35f   :  { %9167 = vmatmul.mubr.f32.gmra.mrb[238].mxu1 %v21581_v24  ;;  %v10942_v5 = vadd.f32 %v10941_v60, %v10940_v15 }
 0x360   :  { %v6976_v38 = vadd.f32 %v10983_v7, %v6844_v32  ;;  %v10984_v53 = vpop.f32.mrb[174].mxu1 }
 0x361   :  { %v6858_v3 = vadd.f32 %v10942_v5, %v6658_v56  ;;  %v10943_v16 = vpop.f32.mrb[178].mxu0  ;;  %v10985_v10 = vpop.f32.mrb[175].mxu1 }
 0x362   :  { %v10944_v43 = vpop.f32.mrb[179].mxu0  ;;  %v10986_v59 = vadd.f32 %v10985_v10, %v10984_v53 }
 0x363   :  { %v10945_v35 = vadd.f32 %v10944_v43, %v10943_v16 }
 0x364   :  { %v6983_v36 = vadd.f32 %v10986_v59, %v6851_v19  ;;  %v10987_v9 = vpop.f32.mrb[176].mxu1 }
 0x365   :  { %v6865_v4 = vadd.f32 %v10945_v35, %v6669_v52  ;;  %v10988_v18 = vpop.f32.mrb[177].mxu1 }
 0x366   :  { %v10989_v22 = vadd.f32 %v10988_v18, %v10987_v9 }
 0x368   :  { %v6990_v41 = vadd.f32 %v10989_v22, %v6858_v3  ;;  %v10990_v51 = vpop.f32.mrb[178].mxu1 }
 0x369   :  { %v10991_v37 = vpop.f32.mrb[179].mxu1 }
 0x36a   :  { %v10992_v42 = vadd.f32 %v10991_v37, %v10990_v51 }
 0x36c   :  { %v6997_v25 = vadd.f32 %v10992_v42, %v6865_v4 }
 0x371   :  { %v11025_v50 = vpop.f32.mrb[180].mxu0 }
 0x372   :  { %v11026_v46 = vpop.f32.mrb[181].mxu0 }
 0x373   :  { %v11027_v6 = vadd.f32 %v11026_v46, %v11025_v50 }
 0x375   :  { %v7109_v61 = vadd.f32 %v11027_v6, %v6969_v45  ;;  %v11028_v39 = vpop.f32.mrb[182].mxu0 }
 0x376   :  { %v11029_v31 = vpop.f32.mrb[183].mxu0 }
 0x377   :  { %v11030_v34 = vadd.f32 %v11029_v31, %v11028_v39 }
 0x379   :  { %v11072_v63 = vpop.f32.mrb[180].mxu1  ;;  %v7124_v2 = vadd.f32 %v11030_v34, %v6976_v38 }
 0x37a   :  { %v11031_v55 = vpop.f32.mrb[184].mxu0  ;;  %v11073_v0 = vpop.f32.mrb[181].mxu1 }
 0x37b   :  { %v11032_v47 = vpop.f32.mrb[185].mxu0  ;;  %v11074_v13 = vadd.f32 %v11073_v0, %v11072_v63 }
 0x37c   :  { %v11033_v58 = vadd.f32 %v11032_v47, %v11031_v55 }
 0x37d   :  { %v7401_v48 = vadd.f32 %v11074_v13, %v7109_v61  ;;  %v11075_v12 = vpop.f32.mrb[182].mxu1 }
 0x37e   :  { %v7139_v56 = vadd.f32 %v11033_v58, %v6983_v36  ;;  %v11034_v27 = vpop.f32.mrb[186].mxu0  ;;  %v11076_v21 = vpop.f32.mrb[183].mxu1 }
 0x37f   :  { %v11035_v17 = vpop.f32.mrb[187].mxu0  ;;  %v11077_v26 = vadd.f32 %v11076_v21, %v11075_v12 }
 0x380   :  { %v11036_v54 = vadd.f32 %v11035_v17, %v11034_v27 }
 0x381   :  { %v7408_v52 = vadd.f32 %v11077_v26, %v7124_v2  ;;  %v11078_v24 = vpop.f32.mrb[184].mxu1 }
 0x382   :  { %v7154_v29 = vadd.f32 %v11036_v54, %v6990_v41  ;;  %v11037_v11 = vpop.f32.mrb[188].mxu0  ;;  %v11079_v1 = vpop.f32.mrb[185].mxu1 }
 0x383   :  { %v11038_v14 = vpop.f32.mrb[189].mxu0  ;;  %v11080_v30 = vadd.f32 %v11079_v1, %v11078_v24 }
 0x384   :  { %v11039_v40 = vadd.f32 %v11038_v14, %v11037_v11 }
 0x385   :  { %v7415_v57 = vadd.f32 %v11080_v30, %v7139_v56  ;;  %v11081_v20 = vpop.f32.mrb[186].mxu1 }
 0x386   :  { %v7169_v32 = vadd.f32 %v11039_v40, %v6997_v25  ;;  %v11082_v33 = vpop.f32.mrb[187].mxu1 }
 0x387   :  { %v11083_v49 = vadd.f32 %v11082_v33, %v11081_v20 }
 0x389   :  { %v7422_v8 = vadd.f32 %v11083_v49, %v7154_v29  ;;  %v11084_v23 = vpop.f32.mrb[188].mxu1 }
 0x38a   :  { %v11085_v62 = vpop.f32.mrb[189].mxu1 }
 0x38b   :  { %v11086_v45 = vadd.f32 %v11085_v62, %v11084_v23 }
 0x38d   :  { %v7429_v44 = vadd.f32 %v11086_v45, %v7169_v32 }
 0x399   :  { %v11119_v19 = vpop.f32.mrb[190].mxu0 }
 0x39a   :  { %v11120_v15 = vpop.f32.mrb[191].mxu0 }
 0x39b   :  { %v11121_v28 = vadd.f32 %v11120_v15, %v11119_v19 }
 0x39d   :  { %v7567_v60 = vadd.f32 %v11121_v28, %v7401_v48  ;;  %v11122_v7 = vpop.f32.mrb[192].mxu0 }
 0x39e   :  { %v11123_v5 = vpop.f32.mrb[193].mxu0 }
 0x39f   :  { %v11124_v38 = vadd.f32 %v11123_v5, %v11122_v7 }
 0x3a0   :  { %v11166_v53 = vpop.f32.mrb[190].mxu1 }
 0x3a1   :  { %v7576_v3 = vadd.f32 %v11124_v38, %v7408_v52  ;;  %v11125_v16 = vpop.f32.mrb[194].mxu0  ;;  %v11167_v10 = vpop.f32.mrb[191].mxu1 }
 0x3a2   :  { %v11126_v43 = vpop.f32.mrb[195].mxu0  ;;  %v11168_v59 = vadd.f32 %v11167_v10, %v11166_v53 }
 0x3a3   :  { %v11127_v35 = vadd.f32 %v11126_v43, %v11125_v16 }
 0x3a4   :  { %v7711_v36 = vadd.f32 %v11168_v59, %v7567_v60  ;;  %v11169_v9 = vpop.f32.mrb[192].mxu1 }
 0x3a5   :  { %v7585_v4 = vadd.f32 %v11127_v35, %v7415_v57  ;;  %v11128_v18 = vpop.f32.mrb[196].mxu0  ;;  %v11170_v22 = vpop.f32.mrb[193].mxu1 }
 0x3a6   :  { %v11129_v41 = vpop.f32.mrb[197].mxu0  ;;  %v11171_v51 = vadd.f32 %v11170_v22, %v11169_v9 }
 0x3a7   :  { %v11130_v37 = vadd.f32 %v11129_v41, %v11128_v18 }
 0x3a8   :  { %v7722_v42 = vadd.f32 %v11171_v51, %v7576_v3  ;;  %v11172_v25 = vpop.f32.mrb[194].mxu1 }
 0x3a9   :  { %v7594_v50 = vadd.f32 %v11130_v37, %v7422_v8  ;;  %v11131_v46 = vpop.f32.mrb[198].mxu0  ;;  %v11173_v6 = vpop.f32.mrb[195].mxu1 }
 0x3aa   :  { %v11132_v61 = vpop.f32.mrb[199].mxu0  ;;  %v11174_v39 = vadd.f32 %v11173_v6, %v11172_v25 }
 0x3ab   :  { %v11133_v31 = vadd.f32 %v11132_v61, %v11131_v46 }
 0x3ac   :  { %v7733_v34 = vadd.f32 %v11174_v39, %v7585_v4 }
 0x3ad   :  { %v11175_v63 = vpop.f32.mrb[196].mxu1  ;;  %v7603_v2 = vadd.f32 %v11133_v31, %v7429_v44 }
 0x3ae   :  { %v11176_v55 = vpop.f32.mrb[197].mxu1 }
 0x3af   :  { %v11177_v0 = vadd.f32 %v11176_v55, %v11175_v63 }
 0x3b1   :  { %v7744_v47 = vadd.f32 %v11177_v0, %v7594_v50 }
 0x3b2   :  { %v11178_v13 = vpop.f32.mrb[198].mxu1 }
 0x3b3   :  { %v11179_v58 = vpop.f32.mrb[199].mxu1 }
 0x3b4   :  { %v11180_v48 = vadd.f32 %v11179_v58, %v11178_v13 }
 0x3b6   :  { %v7755_v12 = vadd.f32 %v11180_v48, %v7603_v2 }
 0x3b9   :  { %v11213_v56 = vpop.f32.mrb[200].mxu0 }
 0x3ba   :  { %v11214_v27 = vpop.f32.mrb[201].mxu0 }
 0x3bb   :  { %v11215_v21 = vadd.f32 %v11214_v27, %v11213_v56 }
 0x3bd   :  { %v7923_v17 = vadd.f32 %v11215_v21, %v7711_v36 }
 0x3be   :  { %v11216_v26 = vpop.f32.mrb[202].mxu0 }
 0x3bf   :  { %v11217_v54 = vpop.f32.mrb[203].mxu0 }
 0x3c0   :  { %v11218_v52 = vadd.f32 %v11217_v54, %v11216_v26 }
 0x3c2   :  { %v11260_v24 = vpop.f32.mrb[200].mxu1  ;;  %v7930_v29 = vadd.f32 %v11218_v52, %v7722_v42  ;;  %v11219_v11 = vpop.f32.mrb[204].mxu0 }
 0x3c3   :  { %v11261_v1 = vpop.f32.mrb[201].mxu1  ;;  %v11220_v14 = vpop.f32.mrb[205].mxu0 }
 0x3c4   :  { %v11262_v30 = vadd.f32 %v11261_v1, %v11260_v24  ;;  %v11221_v40 = vadd.f32 %v11220_v14, %v11219_v11 }
 0x3c6   :  { %v8055_v57 = vadd.f32 %v11262_v30, %v7923_v17  ;;  %v11263_v20 = vpop.f32.mrb[202].mxu1  ;;  %v7937_v32 = vadd.f32 %v11221_v40, %v7733_v34  ;;  %v11222_v33 = vpop.f32.mrb[206].mxu0 }
 0x3c7   :  { %v11264_v49 = vpop.f32.mrb[203].mxu1  ;;  %v11223_v8 = vpop.f32.mrb[207].mxu0 }
 0x3c8   :  { %v11265_v23 = vadd.f32 %v11264_v49, %v11263_v20  ;;  %v11224_v62 = vadd.f32 %v11223_v8, %v11222_v33 }
 0x3ca   :  { %v8062_v45 = vadd.f32 %v11265_v23, %v7930_v29  ;;  %v11266_v44 = vpop.f32.mrb[204].mxu1  ;;  %v7944_v19 = vadd.f32 %v11224_v62, %v7744_v47  ;;  %v11225_v15 = vpop.f32.mrb[208].mxu0 }
 0x3cb   :  { %v11267_v28 = vpop.f32.mrb[205].mxu1  ;;  %v11226_v60 = vpop.f32.mrb[209].mxu0 }
 0x3cc   :  { %v11268_v7 = vadd.f32 %v11267_v28, %v11266_v44  ;;  %v11227_v5 = vadd.f32 %v11226_v60, %v11225_v15 }
 0x3ce   :  { %v8069_v38 = vadd.f32 %v11268_v7, %v7937_v32  ;;  %v11269_v53 = vpop.f32.mrb[206].mxu1  ;;  %v7951_v3 = vadd.f32 %v11227_v5, %v7755_v12 }
 0x3cf   :  { %v11270_v16 = vpop.f32.mrb[207].mxu1 }
 0x3d0   :  { %v11271_v10 = vadd.f32 %v11270_v16, %v11269_v53 }
 0x3d2   :  { %v8076_v43 = vadd.f32 %v11271_v10, %v7944_v19  ;;  %v11272_v59 = vpop.f32.mrb[208].mxu1 }
 0x3d3   :  { %v11273_v35 = vpop.f32.mrb[209].mxu1 }
 0x3d4   :  { %v11274_v36 = vadd.f32 %v11273_v35, %v11272_v59 }
 0x3d6   :  { %v8083_v9 = vadd.f32 %v11274_v36, %v7951_v3 }
 0x3db   :  { %v11307_v4 = vpop.f32.mrb[210].mxu0 }
 0x3dc   :  { %v11308_v18 = vpop.f32.mrb[211].mxu0 }
 0x3dd   :  { %v11309_v22 = vadd.f32 %v11308_v18, %v11307_v4 }
 0x3df   :  { %v8195_v41 = vadd.f32 %v11309_v22, %v8055_v57  ;;  %v11310_v51 = vpop.f32.mrb[212].mxu0 }
 0x3e0   :  { %v11311_v37 = vpop.f32.mrb[213].mxu0 }
 0x3e1   :  { %v11312_v42 = vadd.f32 %v11311_v37, %v11310_v51 }
 0x3e2   :  { %v11354_v25 = vpop.f32.mrb[210].mxu1 }
 0x3e3   :  { %v8210_v50 = vadd.f32 %v11312_v42, %v8062_v45  ;;  %v11313_v46 = vpop.f32.mrb[214].mxu0  ;;  %v11355_v6 = vpop.f32.mrb[211].mxu1 }
 0x3e4   :  { %v11314_v61 = vpop.f32.mrb[215].mxu0  ;;  %v11356_v39 = vadd.f32 %v11355_v6, %v11354_v25 }
 0x3e5   :  { %v11315_v31 = vadd.f32 %v11314_v61, %v11313_v46 }
 0x3e6   :  { %v8487_v34 = vadd.f32 %v11356_v39, %v8195_v41  ;;  %v11357_v63 = vpop.f32.mrb[212].mxu1 }
 0x3e7   :  { %v8225_v2 = vadd.f32 %v11315_v31, %v8069_v38  ;;  %v11316_v55 = vpop.f32.mrb[216].mxu0  ;;  %v11358_v0 = vpop.f32.mrb[213].mxu1 }
 0x3e8   :  { %v11317_v47 = vpop.f32.mrb[217].mxu0  ;;  %v11359_v13 = vadd.f32 %v11358_v0, %v11357_v63 }
 0x3e9   :  { %v11318_v58 = vadd.f32 %v11317_v47, %v11316_v55 }
 0x3ea   :  { %v8494_v48 = vadd.f32 %v11359_v13, %v8210_v50  ;;  %v11360_v12 = vpop.f32.mrb[214].mxu1 }
 0x3eb   :  { %v8240_v56 = vadd.f32 %v11318_v58, %v8076_v43  ;;  %v11319_v27 = vpop.f32.mrb[218].mxu0  ;;  %v11361_v21 = vpop.f32.mrb[215].mxu1 }
 0x3ec   :  { %v11320_v17 = vpop.f32.mrb[219].mxu0  ;;  %v11362_v26 = vadd.f32 %v11361_v21, %v11360_v12 }
 0x3ed   :  { %v11321_v54 = vadd.f32 %v11320_v17, %v11319_v27 }
 0x3ee   :  { %v8501_v52 = vadd.f32 %v11362_v26, %v8225_v2  ;;  %v11363_v24 = vpop.f32.mrb[216].mxu1 }
 0x3ef   :  { %v8255_v29 = vadd.f32 %v11321_v54, %v8083_v9  ;;  %v11364_v11 = vpop.f32.mrb[217].mxu1 }
 0x3f0   :  { %v11365_v1 = vadd.f32 %v11364_v11, %v11363_v24 }
 0x3f2   :  { %v8508_v14 = vadd.f32 %v11365_v1, %v8240_v56  ;;  %v11366_v30 = vpop.f32.mrb[218].mxu1 }
 0x3f3   :  { %v11367_v40 = vpop.f32.mrb[219].mxu1 }
 0x3f4   :  { %v11368_v57 = vadd.f32 %v11367_v40, %v11366_v30 }
 0x3f6   :  { %v8515_v20 = vadd.f32 %v11368_v57, %v8255_v29 }
 0x3fc   :  { %v11401_v32 = vpop.f32.mrb[220].mxu0 }
 0x3fd   :  { %v11402_v33 = vpop.f32.mrb[221].mxu0 }
 0x3fe   :  { %v11403_v49 = vadd.f32 %v11402_v33, %v11401_v32 }
 0x400   :  { %v8653_v8 = vadd.f32 %v11403_v49, %v8487_v34  ;;  %v11404_v23 = vpop.f32.mrb[222].mxu0 }
 0x401   :  { %v11405_v62 = vpop.f32.mrb[223].mxu0 }
 0x402   :  { %v11406_v45 = vadd.f32 %v11405_v62, %v11404_v23  ;;  %v11448_v44 = vpop.f32.mrb[220].mxu1 }
 0x403   :  { %v11449_v28 = vpop.f32.mrb[221].mxu1 }
 0x404   :  { %v8662_v19 = vadd.f32 %v11406_v45, %v8494_v48  ;;  %v11407_v15 = vpop.f32.mrb[224].mxu0  ;;  %v11450_v7 = vadd.f32 %v11449_v28, %v11448_v44 }
 0x405   :  { %v11408_v60 = vpop.f32.mrb[225].mxu0 }
 0x406   :  { %v11409_v5 = vadd.f32 %v11408_v60, %v11407_v15  ;;  %v8797_v38 = vadd.f32 %v11450_v7, %v8653_v8  ;;  %v11451_v53 = vpop.f32.mrb[222].mxu1 }
 0x407   :  { %v11452_v10 = vpop.f32.mrb[223].mxu1 }
 0x408   :  { %v8671_v3 = vadd.f32 %v11409_v5, %v8501_v52  ;;  %v11410_v16 = vpop.f32.mrb[226].mxu0  ;;  %v11453_v59 = vadd.f32 %v11452_v10, %v11451_v53 }
 0x409   :  { %v11411_v43 = vpop.f32.mrb[227].mxu0 }
 0x40a   :  { %v11412_v35 = vadd.f32 %v11411_v43, %v11410_v16  ;;  %v8808_v36 = vadd.f32 %v11453_v59, %v8662_v19  ;;  %v11454_v9 = vpop.f32.mrb[224].mxu1 }
 0x40b   :  { %v11455_v22 = vpop.f32.mrb[225].mxu1 }
 0x40c   :  { %v8680_v4 = vadd.f32 %v11412_v35, %v8508_v14  ;;  %v11413_v18 = vpop.f32.mrb[228].mxu0  ;;  %v11456_v51 = vadd.f32 %v11455_v22, %v11454_v9 }
 0x40d   :  { %v11414_v41 = vpop.f32.mrb[229].mxu0 }
 0x40e   :  { %v11415_v37 = vadd.f32 %v11414_v41, %v11413_v18  ;;  %v8819_v42 = vadd.f32 %v11456_v51, %v8671_v3  ;;  %v11457_v25 = vpop.f32.mrb[226].mxu1 }
 0x40f   :  { %v11458_v46 = vpop.f32.mrb[227].mxu1 }
 0x410   :  { %v8689_v50 = vadd.f32 %v11415_v37, %v8515_v20  ;;  %v11459_v6 = vadd.f32 %v11458_v46, %v11457_v25 }
 0x412   :  { %v8830_v61 = vadd.f32 %v11459_v6, %v8680_v4  ;;  %v11460_v39 = vpop.f32.mrb[228].mxu1 }
 0x413   :  { %v11461_v31 = vpop.f32.mrb[229].mxu1 }
 0x414   :  { %v11462_v34 = vadd.f32 %v11461_v31, %v11460_v39 }
 0x416   :  { %v8841_v63 = vadd.f32 %v11462_v34, %v8689_v50 }
 0x41c   :  { %v11495_v2 = vpop.f32.mrb[230].mxu0 }
 0x41d   :  { %v11496_v55 = vpop.f32.mrb[231].mxu0 }
 0x41e   :  { %v11497_v0 = vadd.f32 %v11496_v55, %v11495_v2 }
 0x420   :  { %v9009_v47 = vadd.f32 %v11497_v0, %v8797_v38  ;;  %v11498_v13 = vpop.f32.mrb[232].mxu0 }
 0x421   :  { %v11499_v58 = vpop.f32.mrb[233].mxu0 }
 0x422   :  { %v11500_v48 = vadd.f32 %v11499_v58, %v11498_v13  ;;  %v11542_v12 = vpop.f32.mrb[230].mxu1 }
 0x423   :  { %v11543_v21 = vpop.f32.mrb[231].mxu1 }
 0x424   :  { %v9016_v56 = vadd.f32 %v11500_v48, %v8808_v36  ;;  %v11501_v27 = vpop.f32.mrb[234].mxu0  ;;  %v11544_v26 = vadd.f32 %v11543_v21, %v11542_v12 }
 0x425   :  { %v11502_v17 = vpop.f32.mrb[235].mxu0 }
 0x426   :  { %v11503_v54 = vadd.f32 %v11502_v17, %v11501_v27  ;;  %v9141_v52 = vadd.f32 %v11544_v26, %v9009_v47  ;;  %v11545_v24 = vpop.f32.mrb[232].mxu1  ;;  %v9207_v47 = vld [vmem:[%s19380_s1] sm:$0xff]  ;;  %v9208_v27 = vld [vmem:[%s19380_s1 + $0x8] sm:$0xff] }
 0x427   :  { %v11546_v1 = vpop.f32.mrb[233].mxu1 }
 0x428   :  { %v9023_v29 = vadd.f32 %v11503_v54, %v8819_v42  ;;  %v11504_v11 = vpop.f32.mrb[236].mxu0  ;;  %13097 = vrsqrt.f32 %v9141_v52  ;;  %v11547_v30 = vadd.f32 %v11546_v1, %v11545_v24  ;;  %vm9174_vm0 = vcmp.eq.f32.partialorder %v9141_v52, inf }
 0x429   :  { %v11505_v14 = vpop.f32.mrb[237].mxu0  ;;  %v9177_v16 = vand.u32 2147483648, %v9141_v52  ;;  %vm9176_vm1 = vcmp.eq.f32.partialorder %v9141_v52, 0.0 }
 0x42a   :  { %v11506_v40 = vadd.f32 %v11505_v14, %v11504_v11  ;;  %v9148_v57 = vadd.f32 %v11547_v30, %v9016_v56  ;;  %v11548_v20 = vpop.f32.mrb[234].mxu1 }
 0x42b   :  { %v11549_v49 = vpop.f32.mrb[235].mxu1 }
 0x42c   :  { %v9030_v32 = vadd.f32 %v11506_v40, %v8830_v61  ;;  %v11507_v33 = vpop.f32.mrb[238].mxu0  ;;  %13099 = vrsqrt.f32 %v9148_v57  ;;  %v11550_v23 = vadd.f32 %v11549_v49, %v11548_v20  ;;  %vm9181_vm2 = vcmp.eq.f32.partialorder %v9148_v57, inf  ;;  %v9209_v40 = vld [vmem:[%s19380_s1 + $0x10] sm:$0xff] }
 0x42d   :  { %v11508_v8 = vpop.f32.mrb[239].mxu0  ;;  %v9184_v4 = vand.u32 2147483648, %v9148_v57  ;;  %vm9183_vm3 = vcmp.eq.f32.partialorder %v9148_v57, 0.0 }
 0x42e   :  { %v11509_v62 = vadd.f32 %v11508_v8, %v11507_v33  ;;  %v9155_v45 = vadd.f32 %v11550_v23, %v9023_v29  ;;  %v11551_v44 = vpop.f32.mrb[236].mxu1 }
 0x42f   :  { %v11552_v15 = vpop.f32.mrb[237].mxu1 }
 0x430   :  { %v9037_v19 = vadd.f32 %v11509_v62, %v8841_v63  ;;  %13101 = vrsqrt.f32 %v9155_v45  ;;  %v11553_v28 = vadd.f32 %v11552_v15, %v11551_v44  ;;  %vm9188_vm4 = vcmp.eq.f32.partialorder %v9155_v45, inf }
 0x431   :  { %v9191_v6 = vand.u32 2147483648, %v9155_v45  ;;  %vm9190_vm5 = vcmp.eq.f32.partialorder %v9155_v45, 0.0 }
 0x432   :  { %v13098_v60 = vpop.eup %13097  ;;  %v9162_v7 = vadd.f32 %v11553_v28, %v9030_v32  ;;  %v11554_v5 = vpop.f32.mrb[238].mxu1  ;;  %v9210_v28 = vld [vmem:[%s19380_s1 + $0x18] sm:$0xff] }
 0x433   :  { %v11555_v38 = vpop.f32.mrb[239].mxu1  ;;  %v9173_v53 = vmul.f32 %v13098_v60, %v9141_v52 }
 0x434   :  { %13103 = vrsqrt.f32 %v9162_v7  ;;  %v11556_v3 = vadd.f32 %v11555_v38, %v11554_v5  ;;  %vm9195_vm6 = vcmp.eq.f32.partialorder %v9162_v7, inf  ;;  %v9198_v12 = vand.u32 2147483648, %v9162_v7 }
 0x435   :  { %v9175_v10 = vsel %vm9174_vm0, %v9141_v52, %v9173_v53  ;;  %vm9197_vm7 = vcmp.eq.f32.partialorder %v9162_v7, 0.0 }
 0x436   :  { %v13100_v43 = vpop.eup %13099  ;;  %v9169_v59 = vadd.f32 %v11556_v3, %v9037_v19  ;;  %v9178_v35 = vsel %vm9176_vm1, %v9177_v16, %v9175_v10 }
 0x437   :  { %v9180_v36 = vmul.f32 %v13100_v43, %v9148_v57  ;;  %v9296_v9 = vadd.f32 -0.1, %v9178_v35  ;;  %v9212_v18 = vsub.f32 0.9, %v9178_v35  ;;  %v9211_v43 = vld [vmem:[%s19380_s1 + $0x20] sm:$0xff]  ;;  %s13132_s1 = smov [#allocation2]  }
 0x438   :  { %13105 = vrsqrt.f32 %v9169_v59  ;;  %vm9202_vm8 = vcmp.eq.f32.partialorder %v9169_v59, inf  ;;  %v9205_v30 = vand.u32 2147483648, %v9169_v59  ;;  %vm9204_vm9 = vcmp.eq.f32.partialorder %v9169_v59, 0.0  ;;  %s9276_s17 = sshll.u32 %s13132_s1, 4  ;;  %s9277_s17 = int_to_ptr.vmem [resolvable:$true] %s9276_s17 }
 0x439   :  { %v9182_v22 = vsel %vm9181_vm2, %v9148_v57, %v9180_v36  ;;  %v9227_v41 = vmax.f32 %v9296_v9, 0.0  ;;  %v9217_v61 = vmax.f32 %v9212_v18, 0.0  ;;  %s13107_s19 = scalar_lea.vmem %s9277_s17, 16  ;;  %s13111_s20 = scalar_lea.vmem %s9277_s17, 32 }
 0x43a   :  { %v13102_v51 = vpop.eup %13101  ;;  %v9185_v37 = vsel %vm9183_vm3, %v9184_v4, %v9182_v22  ;;  %v13131_v22 = vmov 0.0   ;;  %p13108_p0 = scmp.ne.s32.totalorder %s9277_s17, %s13107_s19  ;;  %p13112_p1 = scmp.lt.s32.totalorder %s9277_s17, %s9277_s17 }
 0x43b   :  { %v9187_v42 = vmul.f32 %v13102_v51, %v9155_v45  ;;  %v9213_v25 = vsub.f32 0.9, %v9185_v37  ;;  %v9297_v50 = vadd.f32 -0.1, %v9185_v37  ;;  %v9232_v46 = vmul.f32 0.5, %v9227_v41  ;;  %p13113_p2 = scmp.lt.s32.totalorder %s13111_s20, %s13107_s19 }
 0x43c   :  { %67 = vst.msk [vmem:[#allocation2] sm:$0x1] %vm66_vm10, %v13131_v22 }
 0x43d   :  { %v9189_v39 = vsel %vm9188_vm4, %v9155_v45, %v9187_v42  ;;  %v9228_v31 = vmax.f32 %v9297_v50, 0.0  ;;  %v9218_v2 = vmax.f32 %v9213_v25, 0.0  ;;  %v9237_v55 = vsub.f32 %v9217_v61, %v9232_v46  ;;  %p13114_p3 = por %p13113_p2, %p13112_p1 }
 0x43e   :  { %v13104_v34 = vpop.eup %13103  ;;  %v9192_v63 = vsel %vm9190_vm5, %v9191_v6, %v9189_v39 }
 0x43f   :  { %v9194_v0 = vmul.f32 %v13104_v34, %v9162_v7  ;;  %v9214_v13 = vsub.f32 0.9, %v9192_v63  ;;  %v9298_v58 = vadd.f32 -0.1, %v9192_v63  ;;  %v9233_v48 = vmul.f32 0.5, %v9228_v31  ;;  %p13115_p4 = pnand %p13114_p3, %p13108_p0 }
 0x440   :  { %v9242_v24 = vmul.f32 %v9237_v55, %v9207_v47 }
 0x441   :  { %v9196_v56 = vsel %vm9195_vm6, %v9162_v7, %v9194_v0  ;;  %v9229_v21 = vmax.f32 %v9298_v58, 0.0  ;;  %v9238_v17 = vsub.f32 %v9218_v2, %v9233_v48  ;;  %v9219_v52 = vmax.f32 %v9214_v13, 0.0 }
 0x442   :  { %v13106_v26 = vpop.eup %13105  ;;  %v9199_v54 = vsel %vm9197_vm7, %v9198_v12, %v9196_v56  ;;  %v9247_v23 = vadd.f32 %v9242_v24, %v9232_v46 }
 0x443   :  { %v9201_v29 = vmul.f32 %v13106_v26, %v9169_v59  ;;  %v9215_v11 = vsub.f32 0.9, %v9199_v54  ;;  %v9299_v1 = vadd.f32 -0.1, %v9199_v54  ;;  %v9234_v14 = vmul.f32 0.5, %v9229_v21 }
 0x444   :  { %v9243_v57 = vmul.f32 %v9238_v17, %v9208_v27  ;;  %v9252_v6 = vld [vmem:[#allocation2] sm:$0x1] }
 0x445   :  { %v9203_v20 = vsel %vm9202_vm8, %v9169_v59, %v9201_v29  ;;  %v9230_v32 = vmax.f32 %v9299_v1, 0.0  ;;  %v9239_v33 = vsub.f32 %v9219_v52, %v9234_v14  ;;  %v9220_v8 = vmax.f32 %v9215_v11, 0.0 }
 0x446   :  { %v9206_v49 = vsel %vm9204_vm9, %v9205_v30, %v9203_v20  ;;  %v9248_v62 = vadd.f32 %v9243_v57, %v9233_v48 }
 0x447   :  { %v9216_v45 = vsub.f32 0.9, %v9206_v49  ;;  %v9300_v44 = vadd.f32 -0.1, %v9206_v49  ;;  %v9235_v19 = vmul.f32 0.5, %v9230_v32  ;;  %v9244_v15 = vmul.f32 %v9239_v33, %v9209_v40 }
 0x448   :  { %v9253_v60 = vadd.f32 %v9248_v62, %v9247_v23 }
 0x449   :  { %v9231_v7 = vmax.f32 %v9300_v44, 0.0  ;;  %v9240_v5 = vsub.f32 %v9220_v8, %v9235_v19  ;;  %v9249_v38 = vadd.f32 %v9244_v15, %v9234_v14  ;;  %v9221_v53 = vmax.f32 %v9216_v45, 0.0 }
 0x44b   :  { %v9236_v3 = vmul.f32 0.5, %v9231_v7  ;;  %v9245_v16 = vmul.f32 %v9240_v5, %v9210_v28  ;;  %v9254_v10 = vadd.f32 %v9253_v60, %v9249_v38 }
 0x44d   :  { %v9241_v59 = vsub.f32 %v9221_v53, %v9236_v3  ;;  %v9250_v35 = vadd.f32 %v9245_v16, %v9235_v19 }
 0x44f   :  { %v9246_v36 = vmul.f32 %v9241_v59, %v9211_v43  ;;  %v9255_v9 = vadd.f32 %v9254_v10, %v9250_v35 }
 0x451   :  { %v9251_v4 = vadd.f32 %v9246_v36, %v9236_v3 }
 0x453   :  { %v9256_v18 = vadd.f32 %v9255_v9, %v9251_v4 }
 0x455   :  { %9257 = vadd.xlane.f32.xlu0 %v9256_v18 }
 0x4e2   :  { %v9258_v41 = vpop.xlane.xlu0 %9257 }
 0x4e3   :  { %v9259_v51 = vrot.slane %v9258_v41, 4 }
 0x4e5   :  { %v9260_v37 = vadd.f32 %v9259_v51, %v9258_v41 }
 0x4e7   :  { %v9261_v42 = vrot.slane %v9260_v37, 2 }
 0x4e9   :  { %v9262_v25 = vadd.f32 %v9261_v42, %v9260_v37 }
 0x4eb   :  { %v9263_v50 = vrot.slane %v9262_v25, 1 }
 0x4ed   :  { %v9264_v46 = vadd.f32 %v9263_v50, %v9262_v25 }
 0x4ef   :  { %13093 = vpush %v9264_v46 }
 0x520   :  { %s13094_s18 = spop %13093 }
 0x521   :  { %v9266_v61 = vstv %s13094_s18 }
 0x522   :  { %v9267_v39 = vadd.f32 %v9266_v61, %v9252_v6 }
 0x524   :  { %9269 = vst.msk [vmem:[#allocation2] sm:$0x1] %vm66_vm10, %v9267_v39 }
 0x525   :  { %13118 = shalt.err (!%p13115_p4)
}
 0x526   :  { %s13119_s22 = scalar_lea.hbm %s19382_s3, 16 }
 0x527   :  { %p13120_p5 = scmp.ne.s32.totalorder %s19382_s3, %s13119_s22  ;;  %p13123_p6 = scmp.lt.u32.totalorder %s13119_s22, %s19382_s3 }
 0x529   :  { %p13125_p7 = pnand %p13123_p6, %p13120_p5 }
 0x52b   :  { %13128 = shalt.err (!%p13125_p7)
}
 0x52c   :  { %9279 = dma.vmem_to_hbm [thread:$0]  %s9277_s17, 16, %s19382_s3, [#allocation3]  }
 0x52d   :  { %13129 = dma.done.wait [#allocation3], 16  }
 0x52e   :  { %13130 = vsyncadd [#allocation3], 4294967280 }
 0x52f   :  { %9283 = vsyncpa [#allocation3], 1 }

</bundles_post_ra>
